<compile_context>
chip_gen: v7x
topology: tpu7x:2x2x1
jax: 0.10.0
libtpu: 0.0.40
codegen_flags: <defaults>
</compile_context>

<pallas_src>
import functools

import jax
import jax.numpy as jnp
import numpy as np
from jax.experimental import pallas as pl
from jax.experimental.pallas import tpu as pltpu

FEATURES_SIZE = 1024  # resnet50 layer3 output channels

_VMEM = pl.BlockSpec(memory_space=pltpu.MemorySpace.VMEM)


def _round_up(x, m):
    return (x + m - 1) // m * m


# ----------------------------------------------------------------------------
# Pallas kernels
# ----------------------------------------------------------------------------
def _tap_matmul_kernel(taps_ref, w_ref, shift_ref, o_ref, acc_ref, *, apply_relu):
    # taps_ref: (1, tm, K) bf16   w_ref: (1, K, tn) bf16   shift_ref: (1, tn) f32
    # o_ref: (tm, tn) f32         acc_ref: (tm, tn) f32 scratch
    t = pl.program_id(2)

    @pl.when(t == 0)
    def _():
        acc_ref[...] = jnp.zeros_like(acc_ref)

    acc_ref[...] += jnp.dot(taps_ref[0], w_ref[0],
                            preferred_element_type=jnp.float32)

    @pl.when(t == pl.num_programs(2) - 1)
    def _():
        out = acc_ref[...] + shift_ref[...]
        if apply_relu:
            out = jnp.maximum(out, 0.0)
        o_ref[...] = out


def _tap_matmul_res_kernel(taps_ref, w_ref, shift_ref, res_ref, o_ref, acc_ref,
                           *, apply_relu):
    # Same as above but with a fused residual add before the activation.
    t = pl.program_id(2)

    @pl.when(t == 0)
    def _():
        acc_ref[...] = jnp.zeros_like(acc_ref)

    acc_ref[...] += jnp.dot(taps_ref[0], w_ref[0],
                            preferred_element_type=jnp.float32)

    @pl.when(t == pl.num_programs(2) - 1)
    def _():
        out = acc_ref[...] + shift_ref[...] + res_ref[...]
        if apply_relu:
            out = jnp.maximum(out, 0.0)
        o_ref[...] = out


def _maxpool9_kernel(p00_ref, p01_ref, p10_ref, p11_ref, o_ref):
    # Four (N, ~H/2, ~W/2, C) parity subsamples of the (-inf) padded input.
    # The 9 pooling taps are plain offset windows of these parities, so the
    # whole 3x3/s2 max-pool is computed with static in-VMEM slices (no 9x HBM
    # duplication, no strided reads).
    _, ho, wo, _ = o_ref.shape
    par = {(0, 0): p00_ref[...], (0, 1): p01_ref[...],
           (1, 0): p10_ref[...], (1, 1): p11_ref[...]}
    out = None
    for i in range(3):
        for j in range(3):
            v = par[(i % 2, j % 2)][:, i // 2:i // 2 + ho, j // 2:j // 2 + wo, :]
            out = v if out is None else jnp.maximum(out, v)
    o_ref[...] = out


def _global_avg_pool_kernel(x_ref, o_ref):
    # x: (N, H*W, C) -> (N, C)   (tiny at this depth: (2, 4, 1024))
    o_ref[...] = jnp.mean(x_ref[...], axis=1)


# ----------------------------------------------------------------------------
# Tiled / pipelined fused matmul wrapper
# ----------------------------------------------------------------------------
def tap_matmul_bn_act(taps, wk, shift, apply_relu, residual=None):
    """act( sum_t taps[t] @ wk[t] + shift [+ residual] ).

    taps: (T, M, K) activations (any float dtype; cast to bf16)
    wk:   (T, K, Cout) bf16 weights with BN scale already folded in
    shift:(1, Cout) f32 BN shift
    residual: optional (M, Cout) f32, added before the final ReLU.
    Returns (M, Cout) f32.
    """
    T, M, K = taps.shape
    cout = wk.shape[2]

    # Lane-dense output: pad Cout to >=128 and to a multiple of the N tile.
    if cout <= 128:
        tn, np_ = 128, 128
    else:
        tn = 256
        np_ = _round_up(cout, 256)
    # M tile: multiple of 8 (sublane), capped at 256 (good for the 256-wide MXU
    # on v6e/v7x; still a multiple of 128 tiles on v5e for the big layers).
    tm = min(256, _round_up(M, 8))
    mp = _round_up(M, tm)

    taps_p = jnp.pad(taps.astype(jnp.bfloat16), ((0, 0), (0, mp - M), (0, 0)))
    wk_p = jnp.pad(wk.astype(jnp.bfloat16), ((0, 0), (0, 0), (0, np_ - cout)))
    shift_p = jnp.pad(shift.astype(jnp.float32), ((0, 0), (0, np_ - cout)))

    grid = (mp // tm, np_ // tn, T)
    in_specs = [
        pl.BlockSpec((1, tm, K), lambda i, j, t: (t, i, 0)),
        pl.BlockSpec((1, K, tn), lambda i, j, t: (t, 0, j)),
        pl.BlockSpec((1, tn), lambda i, j, t: (0, j)),
    ]
    operands = [taps_p, wk_p, shift_p]

    if residual is not None:
        res_p = jnp.pad(residual.astype(jnp.float32),
                        ((0, mp - M), (0, np_ - cout)))
        in_specs.append(pl.BlockSpec((tm, tn), lambda i, j, t: (i, j)))
        operands.append(res_p)
        kernel = functools.partial(_tap_matmul_res_kernel, apply_relu=apply_relu)
    else:
        kernel = functools.partial(_tap_matmul_kernel, apply_relu=apply_relu)

    flops = 2 * mp * np_ * K * T
    bytes_accessed = (taps_p.size * 2 + wk_p.size * 2 + shift_p.size * 4
                      + mp * np_ * 4
                      + (mp * np_ * 4 if residual is not None else 0))

    out = pl.pallas_call(
        kernel,
        out_shape=jax.ShapeDtypeStruct((mp, np_), jnp.float32),
        grid_spec=pltpu.PrefetchScalarGridSpec(
            num_scalar_prefetch=0,
            grid=grid,
            in_specs=in_specs,
            out_specs=pl.BlockSpec((tm, tn), lambda i, j, t: (i, j)),
            scratch_shapes=[pltpu.VMEM((tm, tn), jnp.float32)],
        ),
        compiler_params=pltpu.CompilerParams(
            dimension_semantics=("parallel", "parallel", "arbitrary"),
            vmem_limit_bytes=32 * 1024 * 1024,  # ample headroom on v5e/v6e/v7x
        ),
        cost_estimate=pl.CostEstimate(
            flops=int(flops), transcendentals=0,
            bytes_accessed=int(bytes_accessed)),
    )(*operands)
    return out[:M, :cout]


# ----------------------------------------------------------------------------
# Conv / pool wrappers
# ----------------------------------------------------------------------------
def conv_bn_act(x, p, stride, padding, apply_relu, residual=None):
    # x: (N, H, W, Cin) f32; p['w']: (KH, KW, Cin, Cout) bf16 (scale-folded);
    # p['shift']: (1, Cout) f32. Optional residual: (N, Ho, Wo, Cout).
    n, h, w, cin = x.shape
    kh, kw, _, cout = p["w"].shape
    ho = (h + 2 * padding - kh) // stride + 1
    wo = (w + 2 * padding - kw) // stride + 1
    m = n * ho * wo

    if kh == 1 and kw == 1:
        # 1x1 conv: pure matmul, no im2col at all.
        xs = x if stride == 1 else x[:, ::stride, ::stride, :]
        taps = xs.reshape(1, m, cin)
        wk = p["w"].reshape(1, cin, cout)
    elif cin < 8:
        # Lane-sparse input (the 7x7 stem, cin=3): small K-packed col with K
        # padded to a multiple of 128 so the contraction axis is lane-dense.
        k_raw = kh * kw * cin
        kp = _round_up(k_raw, 128)
        xp = jnp.pad(x, ((0, 0), (padding, padding), (padding, padding), (0, 0)))
        patches = [xp[:, i:i + stride * ho:stride, j:j + stride * wo:stride, :]
                   for i in range(kh) for j in range(kw)]
        col = jnp.concatenate(patches, axis=-1).reshape(m, k_raw)
        col = jnp.pad(col, ((0, 0), (0, kp - k_raw)))
        wmat = jnp.pad(p["w"].reshape(k_raw, cout), ((0, kp - k_raw), (0, 0)))
        taps = col[None]
        wk = wmat[None]
    else:
        # KxK conv: keep the kh*kw taps separate; the kernel's K grid axis
        # iterates over them and accumulates in the VMEM scratch (no
        # (M, kh*kw*cin) im2col matrix is ever materialized).
        xp = jnp.pad(x, ((0, 0), (padding, padding), (padding, padding), (0, 0)))
        taps = jnp.stack(
            [xp[:, i:i + stride * ho:stride, j:j + stride * wo:stride, :]
             .reshape(m, cin)
             for i in range(kh) for j in range(kw)], axis=0)
        wk = p["w"].reshape(kh * kw, cin, cout)

    res2d = None if residual is None else residual.reshape(m, cout)
    out = tap_matmul_bn_act(taps, wk, p["shift"], apply_relu, res2d)
    return out.reshape(n, ho, wo, cout)


def maxpool_3x3_s2(x):
    # x: (N, H, W, C) -> (N, H//2, W//2, C); kernel 3, stride 2, pad 1.
    n, h, w, c = x.shape
    ho = (h + 2 - 3) // 2 + 1
    wo = (w + 2 - 3) // 2 + 1
    xp = jnp.pad(x, ((0, 0), (1, 1), (1, 1), (0, 0)),
                 constant_values=-jnp.inf)
    # Four parity subsamples (~1x the input total) replace the old 9x tap stack.
    p00 = xp[:, 0::2, 0::2, :]
    p01 = xp[:, 0::2, 1::2, :]
    p10 = xp[:, 1::2, 0::2, :]
    p11 = xp[:, 1::2, 1::2, :]
    return pl.pallas_call(
        _maxpool9_kernel,
        out_shape=jax.ShapeDtypeStruct((n, ho, wo, c), jnp.float32),
        in_specs=[_VMEM, _VMEM, _VMEM, _VMEM],
        out_specs=_VMEM,
    )(p00, p01, p10, p11)


def global_avg_pool(x):
    # x: (N, H, W, C) -> (N, C)   (AdaptiveAvgPool2d((1,1)) + flatten); tiny.
    n, h, w, c = x.shape
    x3 = x.reshape(n, h * w, c)
    return pl.pallas_call(
        _global_avg_pool_kernel,
        out_shape=jax.ShapeDtypeStruct((n, c), jnp.float32),
        in_specs=[_VMEM],
        out_specs=_VMEM,
    )(x3)


def bottleneck(x, bp, stride):
    identity = x
    if "down" in bp:
        identity = conv_bn_act(x, bp["down"], stride, 0, apply_relu=False)
    out = conv_bn_act(x, bp["conv1"], 1, 0, True)          # 1x1
    out = conv_bn_act(out, bp["conv2"], stride, 1, True)   # 3x3 (stride, v1.5)
    # 1x1 expand with the residual add + ReLU fused into the matmul epilogue.
    out = conv_bn_act(out, bp["conv3"], 1, 0, True, residual=identity)
    return out


# ----------------------------------------------------------------------------
# Deterministic synthetic parameters (ResNet-50 conv1..layer3 shapes)
# ----------------------------------------------------------------------------
class _ParamGen:
    def __init__(self, seed=0):
        self.key = jax.random.PRNGKey(seed)

    def next(self):
        self.key, sub = jax.random.split(self.key)
        return sub


def _make_conv_bn(pg, kh, kw, cin, cout):
    w = jax.random.normal(pg.next(), (kh, kw, cin, cout), jnp.float32) * np.sqrt(
        2.0 / (kh * kw * cin))
    gamma = 1.0 + 0.1 * jax.random.normal(pg.next(), (cout,), jnp.float32)
    beta = 0.1 * jax.random.normal(pg.next(), (cout,), jnp.float32)
    mean = 0.1 * jax.random.normal(pg.next(), (cout,), jnp.float32)
    var = 1.0 + 0.05 * jnp.abs(jax.random.normal(pg.next(), (cout,), jnp.float32))
    eps = 1e-5
    scale = gamma / jnp.sqrt(var + eps)
    shift = beta - mean * scale
    # Fold BN scale into the weights (trace-time) and store them bf16 so the
    # MXU runs at its native bf16 rate; the epilogue add/ReLU stays f32.
    w_folded = (w * scale).astype(jnp.bfloat16)
    return {"w": w_folded, "shift": shift.reshape(1, cout).astype(jnp.float32)}


def _make_bottleneck(pg, cin, planes, stride):
    p = {
        "conv1": _make_conv_bn(pg, 1, 1, cin, planes),
        "conv2": _make_conv_bn(pg, 3, 3, planes, planes),
        "conv3": _make_conv_bn(pg, 1, 1, planes, planes * 4),
    }
    if stride != 1 or cin != planes * 4:
        p["down"] = _make_conv_bn(pg, 1, 1, cin, planes * 4)
    return p


def _make_layer(pg, cin, planes, num_blocks, stride):
    blocks = [_make_bottleneck(pg, cin, planes, stride)]
    for _ in range(num_blocks - 1):
        blocks.append(_make_bottleneck(pg, planes * 4, planes, 1))
    return blocks


def make_params(seed=0):
    pg = _ParamGen(seed)
    return {
        "stem": _make_conv_bn(pg, 7, 7, 3, 64),
        "layer1": _make_layer(pg, 64, 64, 3, 1),    # -> 256 ch
        "layer2": _make_layer(pg, 256, 128, 4, 2),  # -> 512 ch
        "layer3": _make_layer(pg, 512, 256, 6, 2),  # -> 1024 ch
    }


# ----------------------------------------------------------------------------
# Forward pass (matches FeatureVectors.forward)
# ----------------------------------------------------------------------------
def feature_vectors_forward(x_nchw, params):
    # x_nchw is NCHW (PyTorch); converted to NHWC for the kernels.
    x = jnp.transpose(x_nchw, (0, 2, 3, 1)).astype(jnp.float32)
    x = conv_bn_act(x, params["stem"], 2, 3, True)   # conv1 + bn1 + relu
    x = maxpool_3x3_s2(x)                            # maxpool
    for layer_name, stride in (("layer1", 1), ("layer2", 2), ("layer3", 2)):
        for bi, bp in enumerate(params[layer_name]):
            x = bottleneck(x, bp, stride if bi == 0 else 1)
    feat = global_avg_pool(x)                        # AdaptiveAvgPool2d((1,1))
    return feat.reshape(-1, FEATURES_SIZE)           # .reshape(-1, features_size)


if __name__ == "__main__":
    params = make_params(seed=0)
    key = jax.random.PRNGKey(0)
    # small input consistent with an image batch: (batch=2, channels=3, 32x32)
    x = jax.random.normal(key, (2, 3, 32, 32), jnp.float32)

    fwd = jax.jit(feature_vectors_forward)
    out = fwd(x, params)
    out = jax.block_until_ready(out)

    assert out.shape == (2, FEATURES_SIZE), out.shape
    assert bool(jnp.all(jnp.isfinite(out)))
    print("KERNEL_OK")
</pallas_src>

<mosaic_0001>
module attributes {stable_mosaic.version = 11 : i64} {
  func.func @_tap_matmul_kernel(%arg0: i32, %arg1: i32, %arg2: i32, %arg3: memref<1x256x256xbf16, #tpu.memory_space<vmem>>, %arg4: memref<1x256x128xbf16, #tpu.memory_space<vmem>>, %arg5: memref<1x128xf32, #tpu.memory_space<vmem>>, %arg6: memref<256x128xf32, #tpu.memory_space<vmem>>, %arg7: memref<256x128xf32, #tpu.memory_space<vmem>>) attributes {dimension_semantics = [#tpu.dimension_semantics<parallel>, #tpu.dimension_semantics<parallel>, #tpu.dimension_semantics<arbitrary>], iteration_bounds = array<i64: 2, 1, 1>, scalar_prefetch = 0 : i64, scratch_operands = 1 : i64, tpu.core_type = #tpu.core_type<tc>, window_params = [{transform_indices = @transform_0, window_bounds = array<i64: 1, 256, 256>}, {transform_indices = @transform_1, window_bounds = array<i64: 1, 256, 128>}, {transform_indices = @transform_2, window_bounds = array<i64: 1, 128>}, {transform_indices = @transform_3, window_bounds = array<i64: 256, 128>}]} {
    %c0_i32 = arith.constant 0 : i32
    %0 = arith.cmpi eq, %arg2, %c0_i32 : i32
    %1 = arith.extui %0 : i1 to i32
    %c0_i32_0 = arith.constant 0 : i32
    %2 = arith.cmpi ne, %1, %c0_i32_0 : i32
    scf.if %2 {
      %cst_12 = arith.constant 0.000000e+00 : f32
      %14 = vector.broadcast %cst_12 : f32 to vector<256x128xf32>
      %c0_13 = arith.constant 0 : index
      %c0_14 = arith.constant 0 : index
      %15 = vector.load %arg7[%c0_13, %c0_14] : memref<256x128xf32, #tpu.memory_space<vmem>>, vector<256x128xf32>
      tpu.vector_store %arg7[%c0_13, %c0_14], %14 {strides = array<i32>} : memref<256x128xf32, #tpu.memory_space<vmem>>, vector<256x128xf32>,
    } else {
    }
    %c0 = arith.constant 0 : index
    %c0_1 = arith.constant 0 : index
    %3 = vector.load %arg7[%c0, %c0_1] : memref<256x128xf32, #tpu.memory_space<vmem>>, vector<256x128xf32>
    %c0_2 = arith.constant 0 : index
    %c0_3 = arith.constant 0 : index
    %c0_4 = arith.constant 0 : index
    %4 = vector.load %arg3[%c0_2, %c0_3, %c0_4] : memref<1x256x256xbf16, #tpu.memory_space<vmem>>, vector<1x256x256xbf16>
    %5 = vector.shape_cast %4 : vector<1x256x256xbf16> to vector<256x256xbf16>
    %c0_5 = arith.constant 0 : index
    %c0_6 = arith.constant 0 : index
    %c0_7 = arith.constant 0 : index
    %6 = vector.load %arg4[%c0_5, %c0_6, %c0_7] : memref<1x256x128xbf16, #tpu.memory_space<vmem>>, vector<1x256x128xbf16>
    %7 = vector.shape_cast %6 : vector<1x256x128xbf16> to vector<256x128xbf16>
    %cst = arith.constant dense<0.000000e+00> : vector<256x128xf32>
    %8 = tpu.matmul %5, %7, %cst {dimension_numbers = #tpu.dot_dimension_numbers<[1], [0], [0], [1], [0, 0, 1, 1], [], []>} : vector<256x256xbf16>, vector<256x128xbf16>, vector<256x128xf32> -> vector<256x128xf32>
    %9 = arith.addf %3, %8 : vector<256x128xf32>
    %c0_8 = arith.constant 0 : index
    %c0_9 = arith.constant 0 : index
    %10 = vector.load %arg7[%c0_8, %c0_9] : memref<256x128xf32, #tpu.memory_space<vmem>>, vector<256x128xf32>
    tpu.vector_store %arg7[%c0_8, %c0_9], %9 {strides = array<i32>} : memref<256x128xf32, #tpu.memory_space<vmem>>, vector<256x128xf32>,
    %c0_i32_10 = arith.constant 0 : i32
    %11 = arith.cmpi eq, %arg2, %c0_i32_10 : i32
    %12 = arith.extui %11 : i1 to i32
    %c0_i32_11 = arith.constant 0 : i32
    %13 = arith.cmpi ne, %12, %c0_i32_11 : i32
    scf.if %13 {
      %c0_12 = arith.constant 0 : index
      %c0_13 = arith.constant 0 : index
      %14 = vector.load %arg7[%c0_12, %c0_13] : memref<256x128xf32, #tpu.memory_space<vmem>>, vector<256x128xf32>
      %c0_14 = arith.constant 0 : index
      %c0_15 = arith.constant 0 : index
      %15 = vector.load %arg5[%c0_14, %c0_15] : memref<1x128xf32, #tpu.memory_space<vmem>>, vector<1x128xf32>
      %16 = vector.broadcast %15 : vector<1x128xf32> to vector<256x128xf32>
      %17 = arith.addf %14, %16 : vector<256x128xf32>
      %cst_16 = arith.constant 0.000000e+00 : f32
      %18 = vector.broadcast %cst_16 : f32 to vector<256x128xf32>
      %19 = arith.maximumf %17, %18 : vector<256x128xf32>
      %c0_17 = arith.constant 0 : index
      %c0_18 = arith.constant 0 : index
      %20 = vector.load %arg6[%c0_17, %c0_18] : memref<256x128xf32, #tpu.memory_space<vmem>>, vector<256x128xf32>
      tpu.vector_store %arg6[%c0_17, %c0_18], %19 {strides = array<i32>} : memref<256x128xf32, #tpu.memory_space<vmem>>, vector<256x128xf32>,
    } else {
    }
    return
  }
  func.func @transform_0(%arg0: i32, %arg1: i32, %arg2: i32) -> (i32, i32, i32) {
    %c0_i32 = arith.constant 0 : i32
    %c0_i32_0 = arith.constant 0 : i32
    return %arg2, %arg0, %c0_i32 : i32, i32, i32
  }
  func.func @transform_1(%arg0: i32, %arg1: i32, %arg2: i32) -> (i32, i32, i32) {
    %c0_i32 = arith.constant 0 : i32
    %c0_i32_0 = arith.constant 0 : i32
    return %arg2, %c0_i32, %arg1 : i32, i32, i32
  }
  func.func @transform_2(%arg0: i32, %arg1: i32, %arg2: i32) -> (i32, i32) {
    %c0_i32 = arith.constant 0 : i32
    %c0_i32_0 = arith.constant 0 : i32
    return %c0_i32, %arg1 : i32, i32
  }
  func.func @transform_3(%arg0: i32, %arg1: i32, %arg2: i32) -> (i32, i32) {
    %c0_i32 = arith.constant 0 : i32
    return %arg0, %arg1 : i32, i32
  }
}

module attributes {stable_mosaic.version = 11 : i64} {
  func.func @_maxpool9_kernel(%arg0: memref<2x9x9x64xf32, #tpu.memory_space<vmem>>, %arg1: memref<2x9x9x64xf32, #tpu.memory_space<vmem>>, %arg2: memref<2x9x9x64xf32, #tpu.memory_space<vmem>>, %arg3: memref<2x9x9x64xf32, #tpu.memory_space<vmem>>, %arg4: memref<2x8x8x64xf32, #tpu.memory_space<vmem>>) attributes {dimension_semantics = [], scalar_prefetch = 0 : i64, scratch_operands = 0 : i64, tpu.core_type = #tpu.core_type<tc>} {
    %c0 = arith.constant 0 : index
    %c0_0 = arith.constant 0 : index
    %c0_1 = arith.constant 0 : index
    %c0_2 = arith.constant 0 : index
    %0 = vector.load %arg0[%c0, %c0_0, %c0_1, %c0_2] : memref<2x9x9x64xf32, #tpu.memory_space<vmem>>, vector<2x9x9x64xf32>
    %c0_3 = arith.constant 0 : index
    %c0_4 = arith.constant 0 : index
    %c0_5 = arith.constant 0 : index
    %c0_6 = arith.constant 0 : index
    %1 = vector.load %arg1[%c0_3, %c0_4, %c0_5, %c0_6] : memref<2x9x9x64xf32, #tpu.memory_space<vmem>>, vector<2x9x9x64xf32>
    %c0_7 = arith.constant 0 : index
    %c0_8 = arith.constant 0 : index
    %c0_9 = arith.constant 0 : index
    %c0_10 = arith.constant 0 : index
    %2 = vector.load %arg2[%c0_7, %c0_8, %c0_9, %c0_10] : memref<2x9x9x64xf32, #tpu.memory_space<vmem>>, vector<2x9x9x64xf32>
    %c0_11 = arith.constant 0 : index
    %c0_12 = arith.constant 0 : index
    %c0_13 = arith.constant 0 : index
    %c0_14 = arith.constant 0 : index
    %3 = vector.load %arg3[%c0_11, %c0_12, %c0_13, %c0_14] : memref<2x9x9x64xf32, #tpu.memory_space<vmem>>, vector<2x9x9x64xf32>
    %4 = vector.extract_strided_slice %0 {offsets = [0, 0, 0, 0], sizes = [2, 8, 8, 64], strides = [1, 1, 1, 1]} : vector<2x9x9x64xf32> to vector<2x8x8x64xf32>
    %5 = vector.extract_strided_slice %1 {offsets = [0, 0, 0, 0], sizes = [2, 8, 8, 64], strides = [1, 1, 1, 1]} : vector<2x9x9x64xf32> to vector<2x8x8x64xf32>
    %6 = arith.maximumf %4, %5 : vector<2x8x8x64xf32>
    %7 = vector.extract_strided_slice %0 {offsets = [0, 0, 1, 0], sizes = [2, 8, 8, 64], strides = [1, 1, 1, 1]} : vector<2x9x9x64xf32> to vector<2x8x8x64xf32>
    %8 = arith.maximumf %6, %7 : vector<2x8x8x64xf32>
    %9 = vector.extract_strided_slice %2 {offsets = [0, 0, 0, 0], sizes = [2, 8, 8, 64], strides = [1, 1, 1, 1]} : vector<2x9x9x64xf32> to vector<2x8x8x64xf32>
    %10 = arith.maximumf %8, %9 : vector<2x8x8x64xf32>
    %11 = vector.extract_strided_slice %3 {offsets = [0, 0, 0, 0], sizes = [2, 8, 8, 64], strides = [1, 1, 1, 1]} : vector<2x9x9x64xf32> to vector<2x8x8x64xf32>
    %12 = arith.maximumf %10, %11 : vector<2x8x8x64xf32>
    %13 = vector.extract_strided_slice %2 {offsets = [0, 0, 1, 0], sizes = [2, 8, 8, 64], strides = [1, 1, 1, 1]} : vector<2x9x9x64xf32> to vector<2x8x8x64xf32>
    %14 = arith.maximumf %12, %13 : vector<2x8x8x64xf32>
    %15 = vector.extract_strided_slice %0 {offsets = [0, 1, 0, 0], sizes = [2, 8, 8, 64], strides = [1, 1, 1, 1]} : vector<2x9x9x64xf32> to vector<2x8x8x64xf32>
    %16 = arith.maximumf %14, %15 : vector<2x8x8x64xf32>
    %17 = vector.extract_strided_slice %1 {offsets = [0, 1, 0, 0], sizes = [2, 8, 8, 64], strides = [1, 1, 1, 1]} : vector<2x9x9x64xf32> to vector<2x8x8x64xf32>
    %18 = arith.maximumf %16, %17 : vector<2x8x8x64xf32>
    %19 = vector.extract_strided_slice %0 {offsets = [0, 1, 1, 0], sizes = [2, 8, 8, 64], strides = [1, 1, 1, 1]} : vector<2x9x9x64xf32> to vector<2x8x8x64xf32>
    %20 = arith.maximumf %18, %19 : vector<2x8x8x64xf32>
    %c0_15 = arith.constant 0 : index
    %c0_16 = arith.constant 0 : index
    %c0_17 = arith.constant 0 : index
    %c0_18 = arith.constant 0 : index
    %21 = vector.load %arg4[%c0_15, %c0_16, %c0_17, %c0_18] : memref<2x8x8x64xf32, #tpu.memory_space<vmem>>, vector<2x8x8x64xf32>
    tpu.vector_store %arg4[%c0_15, %c0_16, %c0_17, %c0_18], %20 {strides = array<i32>} : memref<2x8x8x64xf32, #tpu.memory_space<vmem>>, vector<2x8x8x64xf32>,
    return
  }
}

module attributes {stable_mosaic.version = 11 : i64} {
  func.func @_tap_matmul_kernel(%arg0: i32, %arg1: i32, %arg2: i32, %arg3: memref<1x128x64xbf16, #tpu.memory_space<vmem>>, %arg4: memref<1x64x128xbf16, #tpu.memory_space<vmem>>, %arg5: memref<1x128xf32, #tpu.memory_space<vmem>>, %arg6: memref<128x128xf32, #tpu.memory_space<vmem>>, %arg7: memref<128x128xf32, #tpu.memory_space<vmem>>) attributes {dimension_semantics = [#tpu.dimension_semantics<parallel>, #tpu.dimension_semantics<parallel>, #tpu.dimension_semantics<arbitrary>], iteration_bounds = array<i64: 1, 1, 1>, scalar_prefetch = 0 : i64, scratch_operands = 1 : i64, tpu.core_type = #tpu.core_type<tc>, window_params = [{transform_indices = @transform_0, window_bounds = array<i64: 1, 128, 64>}, {transform_indices = @transform_1, window_bounds = array<i64: 1, 64, 128>}, {transform_indices = @transform_2, window_bounds = array<i64: 1, 128>}, {transform_indices = @transform_3, window_bounds = array<i64: 128, 128>}]} {
    %c0_i32 = arith.constant 0 : i32
    %0 = arith.cmpi eq, %arg2, %c0_i32 : i32
    %1 = arith.extui %0 : i1 to i32
    %c0_i32_0 = arith.constant 0 : i32
    %2 = arith.cmpi ne, %1, %c0_i32_0 : i32
    scf.if %2 {
      %cst_12 = arith.constant 0.000000e+00 : f32
      %14 = vector.broadcast %cst_12 : f32 to vector<128x128xf32>
      %c0_13 = arith.constant 0 : index
      %c0_14 = arith.constant 0 : index
      %15 = vector.load %arg7[%c0_13, %c0_14] : memref<128x128xf32, #tpu.memory_space<vmem>>, vector<128x128xf32>
      tpu.vector_store %arg7[%c0_13, %c0_14], %14 {strides = array<i32>} : memref<128x128xf32, #tpu.memory_space<vmem>>, vector<128x128xf32>,
    } else {
    }
    %c0 = arith.constant 0 : index
    %c0_1 = arith.constant 0 : index
    %3 = vector.load %arg7[%c0, %c0_1] : memref<128x128xf32, #tpu.memory_space<vmem>>, vector<128x128xf32>
    %c0_2 = arith.constant 0 : index
    %c0_3 = arith.constant 0 : index
    %c0_4 = arith.constant 0 : index
    %4 = vector.load %arg3[%c0_2, %c0_3, %c0_4] : memref<1x128x64xbf16, #tpu.memory_space<vmem>>, vector<1x128x64xbf16>
    %5 = vector.shape_cast %4 : vector<1x128x64xbf16> to vector<128x64xbf16>
    %c0_5 = arith.constant 0 : index
    %c0_6 = arith.constant 0 : index
    %c0_7 = arith.constant 0 : index
    %6 = vector.load %arg4[%c0_5, %c0_6, %c0_7] : memref<1x64x128xbf16, #tpu.memory_space<vmem>>, vector<1x64x128xbf16>
    %7 = vector.shape_cast %6 : vector<1x64x128xbf16> to vector<64x128xbf16>
    %cst = arith.constant dense<0.000000e+00> : vector<128x128xf32>
    %8 = tpu.matmul %5, %7, %cst {dimension_numbers = #tpu.dot_dimension_numbers<[1], [0], [0], [1], [0, 0, 1, 1], [], []>} : vector<128x64xbf16>, vector<64x128xbf16>, vector<128x128xf32> -> vector<128x128xf32>
    %9 = arith.addf %3, %8 : vector<128x128xf32>
    %c0_8 = arith.constant 0 : index
    %c0_9 = arith.constant 0 : index
    %10 = vector.load %arg7[%c0_8, %c0_9] : memref<128x128xf32, #tpu.memory_space<vmem>>, vector<128x128xf32>
    tpu.vector_store %arg7[%c0_8, %c0_9], %9 {strides = array<i32>} : memref<128x128xf32, #tpu.memory_space<vmem>>, vector<128x128xf32>,
    %c0_i32_10 = arith.constant 0 : i32
    %11 = arith.cmpi eq, %arg2, %c0_i32_10 : i32
    %12 = arith.extui %11 : i1 to i32
    %c0_i32_11 = arith.constant 0 : i32
    %13 = arith.cmpi ne, %12, %c0_i32_11 : i32
    scf.if %13 {
      %c0_12 = arith.constant 0 : index
      %c0_13 = arith.constant 0 : index
      %14 = vector.load %arg7[%c0_12, %c0_13] : memref<128x128xf32, #tpu.memory_space<vmem>>, vector<128x128xf32>
      %c0_14 = arith.constant 0 : index
      %c0_15 = arith.constant 0 : index
      %15 = vector.load %arg5[%c0_14, %c0_15] : memref<1x128xf32, #tpu.memory_space<vmem>>, vector<1x128xf32>
      %16 = vector.broadcast %15 : vector<1x128xf32> to vector<128x128xf32>
      %17 = arith.addf %14, %16 : vector<128x128xf32>
      %cst_16 = arith.constant 0.000000e+00 : f32
      %18 = vector.broadcast %cst_16 : f32 to vector<128x128xf32>
      %19 = arith.maximumf %17, %18 : vector<128x128xf32>
      %c0_17 = arith.constant 0 : index
      %c0_18 = arith.constant 0 : index
      %20 = vector.load %arg6[%c0_17, %c0_18] : memref<128x128xf32, #tpu.memory_space<vmem>>, vector<128x128xf32>
      tpu.vector_store %arg6[%c0_17, %c0_18], %19 {strides = array<i32>} : memref<128x128xf32, #tpu.memory_space<vmem>>, vector<128x128xf32>,
    } else {
    }
    return
  }
  func.func @transform_0(%arg0: i32, %arg1: i32, %arg2: i32) -> (i32, i32, i32) {
    %c0_i32 = arith.constant 0 : i32
    %c0_i32_0 = arith.constant 0 : i32
    return %arg2, %arg0, %c0_i32 : i32, i32, i32
  }
  func.func @transform_1(%arg0: i32, %arg1: i32, %arg2: i32) -> (i32, i32, i32) {
    %c0_i32 = arith.constant 0 : i32
    %c0_i32_0 = arith.constant 0 : i32
    return %arg2, %c0_i32, %arg1 : i32, i32, i32
  }
  func.func @transform_2(%arg0: i32, %arg1: i32, %arg2: i32) -> (i32, i32) {
    %c0_i32 = arith.constant 0 : i32
    %c0_i32_0 = arith.constant 0 : i32
    return %c0_i32, %arg1 : i32, i32
  }
  func.func @transform_3(%arg0: i32, %arg1: i32, %arg2: i32) -> (i32, i32) {
    %c0_i32 = arith.constant 0 : i32
    return %arg0, %arg1 : i32, i32
  }
}

module attributes {stable_mosaic.version = 11 : i64} {
  func.func @_tap_matmul_kernel(%arg0: i32, %arg1: i32, %arg2: i32, %arg3: memref<1x128x64xbf16, #tpu.memory_space<vmem>>, %arg4: memref<1x64x256xbf16, #tpu.memory_space<vmem>>, %arg5: memref<1x256xf32, #tpu.memory_space<vmem>>, %arg6: memref<128x256xf32, #tpu.memory_space<vmem>>, %arg7: memref<128x256xf32, #tpu.memory_space<vmem>>) attributes {dimension_semantics = [#tpu.dimension_semantics<parallel>, #tpu.dimension_semantics<parallel>, #tpu.dimension_semantics<arbitrary>], iteration_bounds = array<i64: 1, 1, 1>, scalar_prefetch = 0 : i64, scratch_operands = 1 : i64, tpu.core_type = #tpu.core_type<tc>, window_params = [{transform_indices = @transform_0, window_bounds = array<i64: 1, 128, 64>}, {transform_indices = @transform_1, window_bounds = array<i64: 1, 64, 256>}, {transform_indices = @transform_2, window_bounds = array<i64: 1, 256>}, {transform_indices = @transform_3, window_bounds = array<i64: 128, 256>}]} {
    %c0_i32 = arith.constant 0 : i32
    %0 = arith.cmpi eq, %arg2, %c0_i32 : i32
    %1 = arith.extui %0 : i1 to i32
    %c0_i32_0 = arith.constant 0 : i32
    %2 = arith.cmpi ne, %1, %c0_i32_0 : i32
    scf.if %2 {
      %cst_12 = arith.constant 0.000000e+00 : f32
      %14 = vector.broadcast %cst_12 : f32 to vector<128x256xf32>
      %c0_13 = arith.constant 0 : index
      %c0_14 = arith.constant 0 : index
      %15 = vector.load %arg7[%c0_13, %c0_14] : memref<128x256xf32, #tpu.memory_space<vmem>>, vector<128x256xf32>
      tpu.vector_store %arg7[%c0_13, %c0_14], %14 {strides = array<i32>} : memref<128x256xf32, #tpu.memory_space<vmem>>, vector<128x256xf32>,
    } else {
    }
    %c0 = arith.constant 0 : index
    %c0_1 = arith.constant 0 : index
    %3 = vector.load %arg7[%c0, %c0_1] : memref<128x256xf32, #tpu.memory_space<vmem>>, vector<128x256xf32>
    %c0_2 = arith.constant 0 : index
    %c0_3 = arith.constant 0 : index
    %c0_4 = arith.constant 0 : index
    %4 = vector.load %arg3[%c0_2, %c0_3, %c0_4] : memref<1x128x64xbf16, #tpu.memory_space<vmem>>, vector<1x128x64xbf16>
    %5 = vector.shape_cast %4 : vector<1x128x64xbf16> to vector<128x64xbf16>
    %c0_5 = arith.constant 0 : index
    %c0_6 = arith.constant 0 : index
    %c0_7 = arith.constant 0 : index
    %6 = vector.load %arg4[%c0_5, %c0_6, %c0_7] : memref<1x64x256xbf16, #tpu.memory_space<vmem>>, vector<1x64x256xbf16>
    %7 = vector.shape_cast %6 : vector<1x64x256xbf16> to vector<64x256xbf16>
    %cst = arith.constant dense<0.000000e+00> : vector<128x256xf32>
    %8 = tpu.matmul %5, %7, %cst {dimension_numbers = #tpu.dot_dimension_numbers<[1], [0], [0], [1], [0, 0, 1, 1], [], []>} : vector<128x64xbf16>, vector<64x256xbf16>, vector<128x256xf32> -> vector<128x256xf32>
    %9 = arith.addf %3, %8 : vector<128x256xf32>
    %c0_8 = arith.constant 0 : index
    %c0_9 = arith.constant 0 : index
    %10 = vector.load %arg7[%c0_8, %c0_9] : memref<128x256xf32, #tpu.memory_space<vmem>>, vector<128x256xf32>
    tpu.vector_store %arg7[%c0_8, %c0_9], %9 {strides = array<i32>} : memref<128x256xf32, #tpu.memory_space<vmem>>, vector<128x256xf32>,
    %c0_i32_10 = arith.constant 0 : i32
    %11 = arith.cmpi eq, %arg2, %c0_i32_10 : i32
    %12 = arith.extui %11 : i1 to i32
    %c0_i32_11 = arith.constant 0 : i32
    %13 = arith.cmpi ne, %12, %c0_i32_11 : i32
    scf.if %13 {
      %c0_12 = arith.constant 0 : index
      %c0_13 = arith.constant 0 : index
      %14 = vector.load %arg7[%c0_12, %c0_13] : memref<128x256xf32, #tpu.memory_space<vmem>>, vector<128x256xf32>
      %c0_14 = arith.constant 0 : index
      %c0_15 = arith.constant 0 : index
      %15 = vector.load %arg5[%c0_14, %c0_15] : memref<1x256xf32, #tpu.memory_space<vmem>>, vector<1x256xf32>
      %16 = vector.broadcast %15 : vector<1x256xf32> to vector<128x256xf32>
      %17 = arith.addf %14, %16 : vector<128x256xf32>
      %c0_16 = arith.constant 0 : index
      %c0_17 = arith.constant 0 : index
      %18 = vector.load %arg6[%c0_16, %c0_17] : memref<128x256xf32, #tpu.memory_space<vmem>>, vector<128x256xf32>
      tpu.vector_store %arg6[%c0_16, %c0_17], %17 {strides = array<i32>} : memref<128x256xf32, #tpu.memory_space<vmem>>, vector<128x256xf32>,
    } else {
    }
    return
  }
  func.func @transform_0(%arg0: i32, %arg1: i32, %arg2: i32) -> (i32, i32, i32) {
    %c0_i32 = arith.constant 0 : i32
    %c0_i32_0 = arith.constant 0 : i32
    return %arg2, %arg0, %c0_i32 : i32, i32, i32
  }
  func.func @transform_1(%arg0: i32, %arg1: i32, %arg2: i32) -> (i32, i32, i32) {
    %c0_i32 = arith.constant 0 : i32
    %c0_i32_0 = arith.constant 0 : i32
    return %arg2, %c0_i32, %arg1 : i32, i32, i32
  }
  func.func @transform_2(%arg0: i32, %arg1: i32, %arg2: i32) -> (i32, i32) {
    %c0_i32 = arith.constant 0 : i32
    %c0_i32_0 = arith.constant 0 : i32
    return %c0_i32, %arg1 : i32, i32
  }
  func.func @transform_3(%arg0: i32, %arg1: i32, %arg2: i32) -> (i32, i32) {
    %c0_i32 = arith.constant 0 : i32
    return %arg0, %arg1 : i32, i32
  }
}

module attributes {stable_mosaic.version = 11 : i64} {
  func.func @_tap_matmul_res_kernel(%arg0: i32, %arg1: i32, %arg2: i32, %arg3: memref<1x128x64xbf16, #tpu.memory_space<vmem>>, %arg4: memref<1x64x256xbf16, #tpu.memory_space<vmem>>, %arg5: memref<1x256xf32, #tpu.memory_space<vmem>>, %arg6: memref<128x256xf32, #tpu.memory_space<vmem>>, %arg7: memref<128x256xf32, #tpu.memory_space<vmem>>, %arg8: memref<128x256xf32, #tpu.memory_space<vmem>>) attributes {dimension_semantics = [#tpu.dimension_semantics<parallel>, #tpu.dimension_semantics<parallel>, #tpu.dimension_semantics<arbitrary>], iteration_bounds = array<i64: 1, 1, 1>, scalar_prefetch = 0 : i64, scratch_operands = 1 : i64, tpu.core_type = #tpu.core_type<tc>, window_params = [{transform_indices = @transform_0, window_bounds = array<i64: 1, 128, 64>}, {transform_indices = @transform_1, window_bounds = array<i64: 1, 64, 256>}, {transform_indices = @transform_2, window_bounds = array<i64: 1, 256>}, {transform_indices = @transform_3, window_bounds = array<i64: 128, 256>}, {transform_indices = @transform_4, window_bounds = array<i64: 128, 256>}]} {
    %c0_i32 = arith.constant 0 : i32
    %0 = arith.cmpi eq, %arg2, %c0_i32 : i32
    %1 = arith.extui %0 : i1 to i32
    %c0_i32_0 = arith.constant 0 : i32
    %2 = arith.cmpi ne, %1, %c0_i32_0 : i32
    scf.if %2 {
      %cst_12 = arith.constant 0.000000e+00 : f32
      %14 = vector.broadcast %cst_12 : f32 to vector<128x256xf32>
      %c0_13 = arith.constant 0 : index
      %c0_14 = arith.constant 0 : index
      %15 = vector.load %arg8[%c0_13, %c0_14] : memref<128x256xf32, #tpu.memory_space<vmem>>, vector<128x256xf32>
      tpu.vector_store %arg8[%c0_13, %c0_14], %14 {strides = array<i32>} : memref<128x256xf32, #tpu.memory_space<vmem>>, vector<128x256xf32>,
    } else {
    }
    %c0 = arith.constant 0 : index
    %c0_1 = arith.constant 0 : index
    %3 = vector.load %arg8[%c0, %c0_1] : memref<128x256xf32, #tpu.memory_space<vmem>>, vector<128x256xf32>
    %c0_2 = arith.constant 0 : index
    %c0_3 = arith.constant 0 : index
    %c0_4 = arith.constant 0 : index
    %4 = vector.load %arg3[%c0_2, %c0_3, %c0_4] : memref<1x128x64xbf16, #tpu.memory_space<vmem>>, vector<1x128x64xbf16>
    %5 = vector.shape_cast %4 : vector<1x128x64xbf16> to vector<128x64xbf16>
    %c0_5 = arith.constant 0 : index
    %c0_6 = arith.constant 0 : index
    %c0_7 = arith.constant 0 : index
    %6 = vector.load %arg4[%c0_5, %c0_6, %c0_7] : memref<1x64x256xbf16, #tpu.memory_space<vmem>>, vector<1x64x256xbf16>
    %7 = vector.shape_cast %6 : vector<1x64x256xbf16> to vector<64x256xbf16>
    %cst = arith.constant dense<0.000000e+00> : vector<128x256xf32>
    %8 = tpu.matmul %5, %7, %cst {dimension_numbers = #tpu.dot_dimension_numbers<[1], [0], [0], [1], [0, 0, 1, 1], [], []>} : vector<128x64xbf16>, vector<64x256xbf16>, vector<128x256xf32> -> vector<128x256xf32>
    %9 = arith.addf %3, %8 : vector<128x256xf32>
    %c0_8 = arith.constant 0 : index
    %c0_9 = arith.constant 0 : index
    %10 = vector.load %arg8[%c0_8, %c0_9] : memref<128x256xf32, #tpu.memory_space<vmem>>, vector<128x256xf32>
    tpu.vector_store %arg8[%c0_8, %c0_9], %9 {strides = array<i32>} : memref<128x256xf32, #tpu.memory_space<vmem>>, vector<128x256xf32>,
    %c0_i32_10 = arith.constant 0 : i32
    %11 = arith.cmpi eq, %arg2, %c0_i32_10 : i32
    %12 = arith.extui %11 : i1 to i32
    %c0_i32_11 = arith.constant 0 : i32
    %13 = arith.cmpi ne, %12, %c0_i32_11 : i32
    scf.if %13 {
      %c0_12 = arith.constant 0 : index
      %c0_13 = arith.constant 0 : index
      %14 = vector.load %arg8[%c0_12, %c0_13] : memref<128x256xf32, #tpu.memory_space<vmem>>, vector<128x256xf32>
      %c0_14 = arith.constant 0 : index
      %c0_15 = arith.constant 0 : index
      %15 = vector.load %arg5[%c0_14, %c0_15] : memref<1x256xf32, #tpu.memory_space<vmem>>, vector<1x256xf32>
      %16 = vector.broadcast %15 : vector<1x256xf32> to vector<128x256xf32>
      %17 = arith.addf %14, %16 : vector<128x256xf32>
      %c0_16 = arith.constant 0 : index
      %c0_17 = arith.constant 0 : index
      %18 = vector.load %arg6[%c0_16, %c0_17] : memref<128x256xf32, #tpu.memory_space<vmem>>, vector<128x256xf32>
      %19 = arith.addf %17, %18 : vector<128x256xf32>
      %cst_18 = arith.constant 0.000000e+00 : f32
      %20 = vector.broadcast %cst_18 : f32 to vector<128x256xf32>
      %21 = arith.maximumf %19, %20 : vector<128x256xf32>
      %c0_19 = arith.constant 0 : index
      %c0_20 = arith.constant 0 : index
      %22 = vector.load %arg7[%c0_19, %c0_20] : memref<128x256xf32, #tpu.memory_space<vmem>>, vector<128x256xf32>
      tpu.vector_store %arg7[%c0_19, %c0_20], %21 {strides = array<i32>} : memref<128x256xf32, #tpu.memory_space<vmem>>, vector<128x256xf32>,
    } else {
    }
    return
  }
  func.func @transform_0(%arg0: i32, %arg1: i32, %arg2: i32) -> (i32, i32, i32) {
    %c0_i32 = arith.constant 0 : i32
    %c0_i32_0 = arith.constant 0 : i32
    return %arg2, %arg0, %c0_i32 : i32, i32, i32
  }
  func.func @transform_1(%arg0: i32, %arg1: i32, %arg2: i32) -> (i32, i32, i32) {
    %c0_i32 = arith.constant 0 : i32
    %c0_i32_0 = arith.constant 0 : i32
    return %arg2, %c0_i32, %arg1 : i32, i32, i32
  }
  func.func @transform_2(%arg0: i32, %arg1: i32, %arg2: i32) -> (i32, i32) {
    %c0_i32 = arith.constant 0 : i32
    %c0_i32_0 = arith.constant 0 : i32
    return %c0_i32, %arg1 : i32, i32
  }
  func.func @transform_3(%arg0: i32, %arg1: i32, %arg2: i32) -> (i32, i32) {
    %c0_i32 = arith.constant 0 : i32
    return %arg0, %arg1 : i32, i32
  }
  func.func @transform_4(%arg0: i32, %arg1: i32, %arg2: i32) -> (i32, i32) {
    %c0_i32 = arith.constant 0 : i32
    return %arg0, %arg1 : i32, i32
  }
}

module attributes {stable_mosaic.version = 11 : i64} {
  func.func @_tap_matmul_kernel(%arg0: i32, %arg1: i32, %arg2: i32, %arg3: memref<1x128x64xbf16, #tpu.memory_space<vmem>>, %arg4: memref<1x64x128xbf16, #tpu.memory_space<vmem>>, %arg5: memref<1x128xf32, #tpu.memory_space<vmem>>, %arg6: memref<128x128xf32, #tpu.memory_space<vmem>>, %arg7: memref<128x128xf32, #tpu.memory_space<vmem>>) attributes {dimension_semantics = [#tpu.dimension_semantics<parallel>, #tpu.dimension_semantics<parallel>, #tpu.dimension_semantics<arbitrary>], iteration_bounds = array<i64: 1, 1, 9>, scalar_prefetch = 0 : i64, scratch_operands = 1 : i64, tpu.core_type = #tpu.core_type<tc>, window_params = [{transform_indices = @transform_0, window_bounds = array<i64: 1, 128, 64>}, {transform_indices = @transform_1, window_bounds = array<i64: 1, 64, 128>}, {transform_indices = @transform_2, window_bounds = array<i64: 1, 128>}, {transform_indices = @transform_3, window_bounds = array<i64: 128, 128>}]} {
    %c0_i32 = arith.constant 0 : i32
    %0 = arith.cmpi eq, %arg2, %c0_i32 : i32
    %1 = arith.extui %0 : i1 to i32
    %c0_i32_0 = arith.constant 0 : i32
    %2 = arith.cmpi ne, %1, %c0_i32_0 : i32
    scf.if %2 {
      %cst_11 = arith.constant 0.000000e+00 : f32
      %14 = vector.broadcast %cst_11 : f32 to vector<128x128xf32>
      %c0_12 = arith.constant 0 : index
      %c0_13 = arith.constant 0 : index
      %15 = vector.load %arg7[%c0_12, %c0_13] : memref<128x128xf32, #tpu.memory_space<vmem>>, vector<128x128xf32>
      tpu.vector_store %arg7[%c0_12, %c0_13], %14 {strides = array<i32>} : memref<128x128xf32, #tpu.memory_space<vmem>>, vector<128x128xf32>,
    } else {
    }
    %c0 = arith.constant 0 : index
    %c0_1 = arith.constant 0 : index
    %3 = vector.load %arg7[%c0, %c0_1] : memref<128x128xf32, #tpu.memory_space<vmem>>, vector<128x128xf32>
    %c0_2 = arith.constant 0 : index
    %c0_3 = arith.constant 0 : index
    %c0_4 = arith.constant 0 : index
    %4 = vector.load %arg3[%c0_2, %c0_3, %c0_4] : memref<1x128x64xbf16, #tpu.memory_space<vmem>>, vector<1x128x64xbf16>
    %5 = vector.shape_cast %4 : vector<1x128x64xbf16> to vector<128x64xbf16>
    %c0_5 = arith.constant 0 : index
    %c0_6 = arith.constant 0 : index
    %c0_7 = arith.constant 0 : index
    %6 = vector.load %arg4[%c0_5, %c0_6, %c0_7] : memref<1x64x128xbf16, #tpu.memory_space<vmem>>, vector<1x64x128xbf16>
    %7 = vector.shape_cast %6 : vector<1x64x128xbf16> to vector<64x128xbf16>
    %cst = arith.constant dense<0.000000e+00> : vector<128x128xf32>
    %8 = tpu.matmul %5, %7, %cst {dimension_numbers = #tpu.dot_dimension_numbers<[1], [0], [0], [1], [0, 0, 1, 1], [], []>} : vector<128x64xbf16>, vector<64x128xbf16>, vector<128x128xf32> -> vector<128x128xf32>
    %9 = arith.addf %3, %8 : vector<128x128xf32>
    %c0_8 = arith.constant 0 : index
    %c0_9 = arith.constant 0 : index
    %10 = vector.load %arg7[%c0_8, %c0_9] : memref<128x128xf32, #tpu.memory_space<vmem>>, vector<128x128xf32>
    tpu.vector_store %arg7[%c0_8, %c0_9], %9 {strides = array<i32>} : memref<128x128xf32, #tpu.memory_space<vmem>>, vector<128x128xf32>,
    %c8_i32 = arith.constant 8 : i32
    %11 = arith.cmpi eq, %arg2, %c8_i32 : i32
    %12 = arith.extui %11 : i1 to i32
    %c0_i32_10 = arith.constant 0 : i32
    %13 = arith.cmpi ne, %12, %c0_i32_10 : i32
    scf.if %13 {
      %c0_11 = arith.constant 0 : index
      %c0_12 = arith.constant 0 : index
      %14 = vector.load %arg7[%c0_11, %c0_12] : memref<128x128xf32, #tpu.memory_space<vmem>>, vector<128x128xf32>
      %c0_13 = arith.constant 0 : index
      %c0_14 = arith.constant 0 : index
      %15 = vector.load %arg5[%c0_13, %c0_14] : memref<1x128xf32, #tpu.memory_space<vmem>>, vector<1x128xf32>
      %16 = vector.broadcast %15 : vector<1x128xf32> to vector<128x128xf32>
      %17 = arith.addf %14, %16 : vector<128x128xf32>
      %cst_15 = arith.constant 0.000000e+00 : f32
      %18 = vector.broadcast %cst_15 : f32 to vector<128x128xf32>
      %19 = arith.maximumf %17, %18 : vector<128x128xf32>
      %c0_16 = arith.constant 0 : index
      %c0_17 = arith.constant 0 : index
      %20 = vector.load %arg6[%c0_16, %c0_17] : memref<128x128xf32, #tpu.memory_space<vmem>>, vector<128x128xf32>
      tpu.vector_store %arg6[%c0_16, %c0_17], %19 {strides = array<i32>} : memref<128x128xf32, #tpu.memory_space<vmem>>, vector<128x128xf32>,
    } else {
    }
    return
  }
  func.func @transform_0(%arg0: i32, %arg1: i32, %arg2: i32) -> (i32, i32, i32) {
    %c0_i32 = arith.constant 0 : i32
    %c0_i32_0 = arith.constant 0 : i32
    return %arg2, %arg0, %c0_i32 : i32, i32, i32
  }
  func.func @transform_1(%arg0: i32, %arg1: i32, %arg2: i32) -> (i32, i32, i32) {
    %c0_i32 = arith.constant 0 : i32
    %c0_i32_0 = arith.constant 0 : i32
    return %arg2, %c0_i32, %arg1 : i32, i32, i32
  }
  func.func @transform_2(%arg0: i32, %arg1: i32, %arg2: i32) -> (i32, i32) {
    %c0_i32 = arith.constant 0 : i32
    %c0_i32_0 = arith.constant 0 : i32
    return %c0_i32, %arg1 : i32, i32
  }
  func.func @transform_3(%arg0: i32, %arg1: i32, %arg2: i32) -> (i32, i32) {
    %c0_i32 = arith.constant 0 : i32
    return %arg0, %arg1 : i32, i32
  }
}

module attributes {stable_mosaic.version = 11 : i64} {
  func.func @_tap_matmul_kernel(%arg0: i32, %arg1: i32, %arg2: i32, %arg3: memref<1x128x256xbf16, #tpu.memory_space<vmem>>, %arg4: memref<1x256x128xbf16, #tpu.memory_space<vmem>>, %arg5: memref<1x128xf32, #tpu.memory_space<vmem>>, %arg6: memref<128x128xf32, #tpu.memory_space<vmem>>, %arg7: memref<128x128xf32, #tpu.memory_space<vmem>>) attributes {dimension_semantics = [#tpu.dimension_semantics<parallel>, #tpu.dimension_semantics<parallel>, #tpu.dimension_semantics<arbitrary>], iteration_bounds = array<i64: 1, 1, 1>, scalar_prefetch = 0 : i64, scratch_operands = 1 : i64, tpu.core_type = #tpu.core_type<tc>, window_params = [{transform_indices = @transform_0, window_bounds = array<i64: 1, 128, 256>}, {transform_indices = @transform_1, window_bounds = array<i64: 1, 256, 128>}, {transform_indices = @transform_2, window_bounds = array<i64: 1, 128>}, {transform_indices = @transform_3, window_bounds = array<i64: 128, 128>}]} {
    %c0_i32 = arith.constant 0 : i32
    %0 = arith.cmpi eq, %arg2, %c0_i32 : i32
    %1 = arith.extui %0 : i1 to i32
    %c0_i32_0 = arith.constant 0 : i32
    %2 = arith.cmpi ne, %1, %c0_i32_0 : i32
    scf.if %2 {
      %cst_12 = arith.constant 0.000000e+00 : f32
      %14 = vector.broadcast %cst_12 : f32 to vector<128x128xf32>
      %c0_13 = arith.constant 0 : index
      %c0_14 = arith.constant 0 : index
      %15 = vector.load %arg7[%c0_13, %c0_14] : memref<128x128xf32, #tpu.memory_space<vmem>>, vector<128x128xf32>
      tpu.vector_store %arg7[%c0_13, %c0_14], %14 {strides = array<i32>} : memref<128x128xf32, #tpu.memory_space<vmem>>, vector<128x128xf32>,
    } else {
    }
    %c0 = arith.constant 0 : index
    %c0_1 = arith.constant 0 : index
    %3 = vector.load %arg7[%c0, %c0_1] : memref<128x128xf32, #tpu.memory_space<vmem>>, vector<128x128xf32>
    %c0_2 = arith.constant 0 : index
    %c0_3 = arith.constant 0 : index
    %c0_4 = arith.constant 0 : index
    %4 = vector.load %arg3[%c0_2, %c0_3, %c0_4] : memref<1x128x256xbf16, #tpu.memory_space<vmem>>, vector<1x128x256xbf16>
    %5 = vector.shape_cast %4 : vector<1x128x256xbf16> to vector<128x256xbf16>
    %c0_5 = arith.constant 0 : index
    %c0_6 = arith.constant 0 : index
    %c0_7 = arith.constant 0 : index
    %6 = vector.load %arg4[%c0_5, %c0_6, %c0_7] : memref<1x256x128xbf16, #tpu.memory_space<vmem>>, vector<1x256x128xbf16>
    %7 = vector.shape_cast %6 : vector<1x256x128xbf16> to vector<256x128xbf16>
    %cst = arith.constant dense<0.000000e+00> : vector<128x128xf32>
    %8 = tpu.matmul %5, %7, %cst {dimension_numbers = #tpu.dot_dimension_numbers<[1], [0], [0], [1], [0, 0, 1, 1], [], []>} : vector<128x256xbf16>, vector<256x128xbf16>, vector<128x128xf32> -> vector<128x128xf32>
    %9 = arith.addf %3, %8 : vector<128x128xf32>
    %c0_8 = arith.constant 0 : index
    %c0_9 = arith.constant 0 : index
    %10 = vector.load %arg7[%c0_8, %c0_9] : memref<128x128xf32, #tpu.memory_space<vmem>>, vector<128x128xf32>
    tpu.vector_store %arg7[%c0_8, %c0_9], %9 {strides = array<i32>} : memref<128x128xf32, #tpu.memory_space<vmem>>, vector<128x128xf32>,
    %c0_i32_10 = arith.constant 0 : i32
    %11 = arith.cmpi eq, %arg2, %c0_i32_10 : i32
    %12 = arith.extui %11 : i1 to i32
    %c0_i32_11 = arith.constant 0 : i32
    %13 = arith.cmpi ne, %12, %c0_i32_11 : i32
    scf.if %13 {
      %c0_12 = arith.constant 0 : index
      %c0_13 = arith.constant 0 : index
      %14 = vector.load %arg7[%c0_12, %c0_13] : memref<128x128xf32, #tpu.memory_space<vmem>>, vector<128x128xf32>
      %c0_14 = arith.constant 0 : index
      %c0_15 = arith.constant 0 : index
      %15 = vector.load %arg5[%c0_14, %c0_15] : memref<1x128xf32, #tpu.memory_space<vmem>>, vector<1x128xf32>
      %16 = vector.broadcast %15 : vector<1x128xf32> to vector<128x128xf32>
      %17 = arith.addf %14, %16 : vector<128x128xf32>
      %cst_16 = arith.constant 0.000000e+00 : f32
      %18 = vector.broadcast %cst_16 : f32 to vector<128x128xf32>
      %19 = arith.maximumf %17, %18 : vector<128x128xf32>
      %c0_17 = arith.constant 0 : index
      %c0_18 = arith.constant 0 : index
      %20 = vector.load %arg6[%c0_17, %c0_18] : memref<128x128xf32, #tpu.memory_space<vmem>>, vector<128x128xf32>
      tpu.vector_store %arg6[%c0_17, %c0_18], %19 {strides = array<i32>} : memref<128x128xf32, #tpu.memory_space<vmem>>, vector<128x128xf32>,
    } else {
    }
    return
  }
  func.func @transform_0(%arg0: i32, %arg1: i32, %arg2: i32) -> (i32, i32, i32) {
    %c0_i32 = arith.constant 0 : i32
    %c0_i32_0 = arith.constant 0 : i32
    return %arg2, %arg0, %c0_i32 : i32, i32, i32
  }
  func.func @transform_1(%arg0: i32, %arg1: i32, %arg2: i32) -> (i32, i32, i32) {
    %c0_i32 = arith.constant 0 : i32
    %c0_i32_0 = arith.constant 0 : i32
    return %arg2, %c0_i32, %arg1 : i32, i32, i32
  }
  func.func @transform_2(%arg0: i32, %arg1: i32, %arg2: i32) -> (i32, i32) {
    %c0_i32 = arith.constant 0 : i32
    %c0_i32_0 = arith.constant 0 : i32
    return %c0_i32, %arg1 : i32, i32
  }
  func.func @transform_3(%arg0: i32, %arg1: i32, %arg2: i32) -> (i32, i32) {
    %c0_i32 = arith.constant 0 : i32
    return %arg0, %arg1 : i32, i32
  }
}

module attributes {stable_mosaic.version = 11 : i64} {
  func.func @_tap_matmul_kernel(%arg0: i32, %arg1: i32, %arg2: i32, %arg3: memref<1x32x128xbf16, #tpu.memory_space<vmem>>, %arg4: memref<1x128x128xbf16, #tpu.memory_space<vmem>>, %arg5: memref<1x128xf32, #tpu.memory_space<vmem>>, %arg6: memref<32x128xf32, #tpu.memory_space<vmem>>, %arg7: memref<32x128xf32, #tpu.memory_space<vmem>>) attributes {dimension_semantics = [#tpu.dimension_semantics<parallel>, #tpu.dimension_semantics<parallel>, #tpu.dimension_semantics<arbitrary>], iteration_bounds = array<i64: 1, 1, 9>, scalar_prefetch = 0 : i64, scratch_operands = 1 : i64, tpu.core_type = #tpu.core_type<tc>, window_params = [{transform_indices = @transform_0, window_bounds = array<i64: 1, 32, 128>}, {transform_indices = @transform_1, window_bounds = array<i64: 1, 128, 128>}, {transform_indices = @transform_2, window_bounds = array<i64: 1, 128>}, {transform_indices = @transform_3, window_bounds = array<i64: 32, 128>}]} {
    %c0_i32 = arith.constant 0 : i32
    %0 = arith.cmpi eq, %arg2, %c0_i32 : i32
    %1 = arith.extui %0 : i1 to i32
    %c0_i32_0 = arith.constant 0 : i32
    %2 = arith.cmpi ne, %1, %c0_i32_0 : i32
    scf.if %2 {
      %cst_11 = arith.constant 0.000000e+00 : f32
      %14 = vector.broadcast %cst_11 : f32 to vector<32x128xf32>
      %c0_12 = arith.constant 0 : index
      %c0_13 = arith.constant 0 : index
      %15 = vector.load %arg7[%c0_12, %c0_13] : memref<32x128xf32, #tpu.memory_space<vmem>>, vector<32x128xf32>
      tpu.vector_store %arg7[%c0_12, %c0_13], %14 {strides = array<i32>} : memref<32x128xf32, #tpu.memory_space<vmem>>, vector<32x128xf32>,
    } else {
    }
    %c0 = arith.constant 0 : index
    %c0_1 = arith.constant 0 : index
    %3 = vector.load %arg7[%c0, %c0_1] : memref<32x128xf32, #tpu.memory_space<vmem>>, vector<32x128xf32>
    %c0_2 = arith.constant 0 : index
    %c0_3 = arith.constant 0 : index
    %c0_4 = arith.constant 0 : index
    %4 = vector.load %arg3[%c0_2, %c0_3, %c0_4] : memref<1x32x128xbf16, #tpu.memory_space<vmem>>, vector<1x32x128xbf16>
    %5 = vector.shape_cast %4 : vector<1x32x128xbf16> to vector<32x128xbf16>
    %c0_5 = arith.constant 0 : index
    %c0_6 = arith.constant 0 : index
    %c0_7 = arith.constant 0 : index
    %6 = vector.load %arg4[%c0_5, %c0_6, %c0_7] : memref<1x128x128xbf16, #tpu.memory_space<vmem>>, vector<1x128x128xbf16>
    %7 = vector.shape_cast %6 : vector<1x128x128xbf16> to vector<128x128xbf16>
    %cst = arith.constant dense<0.000000e+00> : vector<32x128xf32>
    %8 = tpu.matmul %5, %7, %cst {dimension_numbers = #tpu.dot_dimension_numbers<[1], [0], [0], [1], [0, 0, 1, 1], [], []>} : vector<32x128xbf16>, vector<128x128xbf16>, vector<32x128xf32> -> vector<32x128xf32>
    %9 = arith.addf %3, %8 : vector<32x128xf32>
    %c0_8 = arith.constant 0 : index
    %c0_9 = arith.constant 0 : index
    %10 = vector.load %arg7[%c0_8, %c0_9] : memref<32x128xf32, #tpu.memory_space<vmem>>, vector<32x128xf32>
    tpu.vector_store %arg7[%c0_8, %c0_9], %9 {strides = array<i32>} : memref<32x128xf32, #tpu.memory_space<vmem>>, vector<32x128xf32>,
    %c8_i32 = arith.constant 8 : i32
    %11 = arith.cmpi eq, %arg2, %c8_i32 : i32
    %12 = arith.extui %11 : i1 to i32
    %c0_i32_10 = arith.constant 0 : i32
    %13 = arith.cmpi ne, %12, %c0_i32_10 : i32
    scf.if %13 {
      %c0_11 = arith.constant 0 : index
      %c0_12 = arith.constant 0 : index
      %14 = vector.load %arg7[%c0_11, %c0_12] : memref<32x128xf32, #tpu.memory_space<vmem>>, vector<32x128xf32>
      %c0_13 = arith.constant 0 : index
      %c0_14 = arith.constant 0 : index
      %15 = vector.load %arg5[%c0_13, %c0_14] : memref<1x128xf32, #tpu.memory_space<vmem>>, vector<1x128xf32>
      %16 = vector.broadcast %15 : vector<1x128xf32> to vector<32x128xf32>
      %17 = arith.addf %14, %16 : vector<32x128xf32>
      %cst_15 = arith.constant 0.000000e+00 : f32
      %18 = vector.broadcast %cst_15 : f32 to vector<32x128xf32>
      %19 = arith.maximumf %17, %18 : vector<32x128xf32>
      %c0_16 = arith.constant 0 : index
      %c0_17 = arith.constant 0 : index
      %20 = vector.load %arg6[%c0_16, %c0_17] : memref<32x128xf32, #tpu.memory_space<vmem>>, vector<32x128xf32>
      tpu.vector_store %arg6[%c0_16, %c0_17], %19 {strides = array<i32>} : memref<32x128xf32, #tpu.memory_space<vmem>>, vector<32x128xf32>,
    } else {
    }
    return
  }
  func.func @transform_0(%arg0: i32, %arg1: i32, %arg2: i32) -> (i32, i32, i32) {
    %c0_i32 = arith.constant 0 : i32
    %c0_i32_0 = arith.constant 0 : i32
    return %arg2, %arg0, %c0_i32 : i32, i32, i32
  }
  func.func @transform_1(%arg0: i32, %arg1: i32, %arg2: i32) -> (i32, i32, i32) {
    %c0_i32 = arith.constant 0 : i32
    %c0_i32_0 = arith.constant 0 : i32
    return %arg2, %c0_i32, %arg1 : i32, i32, i32
  }
  func.func @transform_2(%arg0: i32, %arg1: i32, %arg2: i32) -> (i32, i32) {
    %c0_i32 = arith.constant 0 : i32
    %c0_i32_0 = arith.constant 0 : i32
    return %c0_i32, %arg1 : i32, i32
  }
  func.func @transform_3(%arg0: i32, %arg1: i32, %arg2: i32) -> (i32, i32) {
    %c0_i32 = arith.constant 0 : i32
    return %arg0, %arg1 : i32, i32
  }
}

module attributes {stable_mosaic.version = 11 : i64} {
  func.func @_tap_matmul_res_kernel(%arg0: i32, %arg1: i32, %arg2: i32, %arg3: memref<1x32x128xbf16, #tpu.memory_space<vmem>>, %arg4: memref<1x128x256xbf16, #tpu.memory_space<vmem>>, %arg5: memref<1x256xf32, #tpu.memory_space<vmem>>, %arg6: memref<32x256xf32, #tpu.memory_space<vmem>>, %arg7: memref<32x256xf32, #tpu.memory_space<vmem>>, %arg8: memref<32x256xf32, #tpu.memory_space<vmem>>) attributes {dimension_semantics = [#tpu.dimension_semantics<parallel>, #tpu.dimension_semantics<parallel>, #tpu.dimension_semantics<arbitrary>], iteration_bounds = array<i64: 1, 2, 1>, scalar_prefetch = 0 : i64, scratch_operands = 1 : i64, tpu.core_type = #tpu.core_type<tc>, window_params = [{transform_indices = @transform_0, window_bounds = array<i64: 1, 32, 128>}, {transform_indices = @transform_1, window_bounds = array<i64: 1, 128, 256>}, {transform_indices = @transform_2, window_bounds = array<i64: 1, 256>}, {transform_indices = @transform_3, window_bounds = array<i64: 32, 256>}, {transform_indices = @transform_4, window_bounds = array<i64: 32, 256>}]} {
    %c0_i32 = arith.constant 0 : i32
    %0 = arith.cmpi eq, %arg2, %c0_i32 : i32
    %1 = arith.extui %0 : i1 to i32
    %c0_i32_0 = arith.constant 0 : i32
    %2 = arith.cmpi ne, %1, %c0_i32_0 : i32
    scf.if %2 {
      %cst_12 = arith.constant 0.000000e+00 : f32
      %14 = vector.broadcast %cst_12 : f32 to vector<32x256xf32>
      %c0_13 = arith.constant 0 : index
      %c0_14 = arith.constant 0 : index
      %15 = vector.load %arg8[%c0_13, %c0_14] : memref<32x256xf32, #tpu.memory_space<vmem>>, vector<32x256xf32>
      tpu.vector_store %arg8[%c0_13, %c0_14], %14 {strides = array<i32>} : memref<32x256xf32, #tpu.memory_space<vmem>>, vector<32x256xf32>,
    } else {
    }
    %c0 = arith.constant 0 : index
    %c0_1 = arith.constant 0 : index
    %3 = vector.load %arg8[%c0, %c0_1] : memref<32x256xf32, #tpu.memory_space<vmem>>, vector<32x256xf32>
    %c0_2 = arith.constant 0 : index
    %c0_3 = arith.constant 0 : index
    %c0_4 = arith.constant 0 : index
    %4 = vector.load %arg3[%c0_2, %c0_3, %c0_4] : memref<1x32x128xbf16, #tpu.memory_space<vmem>>, vector<1x32x128xbf16>
    %5 = vector.shape_cast %4 : vector<1x32x128xbf16> to vector<32x128xbf16>
    %c0_5 = arith.constant 0 : index
    %c0_6 = arith.constant 0 : index
    %c0_7 = arith.constant 0 : index
    %6 = vector.load %arg4[%c0_5, %c0_6, %c0_7] : memref<1x128x256xbf16, #tpu.memory_space<vmem>>, vector<1x128x256xbf16>
    %7 = vector.shape_cast %6 : vector<1x128x256xbf16> to vector<128x256xbf16>
    %cst = arith.constant dense<0.000000e+00> : vector<32x256xf32>
    %8 = tpu.matmul %5, %7, %cst {dimension_numbers = #tpu.dot_dimension_numbers<[1], [0], [0], [1], [0, 0, 1, 1], [], []>} : vector<32x128xbf16>, vector<128x256xbf16>, vector<32x256xf32> -> vector<32x256xf32>
    %9 = arith.addf %3, %8 : vector<32x256xf32>
    %c0_8 = arith.constant 0 : index
    %c0_9 = arith.constant 0 : index
    %10 = vector.load %arg8[%c0_8, %c0_9] : memref<32x256xf32, #tpu.memory_space<vmem>>, vector<32x256xf32>
    tpu.vector_store %arg8[%c0_8, %c0_9], %9 {strides = array<i32>} : memref<32x256xf32, #tpu.memory_space<vmem>>, vector<32x256xf32>,
    %c0_i32_10 = arith.constant 0 : i32
    %11 = arith.cmpi eq, %arg2, %c0_i32_10 : i32
    %12 = arith.extui %11 : i1 to i32
    %c0_i32_11 = arith.constant 0 : i32
    %13 = arith.cmpi ne, %12, %c0_i32_11 : i32
    scf.if %13 {
      %c0_12 = arith.constant 0 : index
      %c0_13 = arith.constant 0 : index
      %14 = vector.load %arg8[%c0_12, %c0_13] : memref<32x256xf32, #tpu.memory_space<vmem>>, vector<32x256xf32>
      %c0_14 = arith.constant 0 : index
      %c0_15 = arith.constant 0 : index
      %15 = vector.load %arg5[%c0_14, %c0_15] : memref<1x256xf32, #tpu.memory_space<vmem>>, vector<1x256xf32>
      %16 = vector.broadcast %15 : vector<1x256xf32> to vector<32x256xf32>
      %17 = arith.addf %14, %16 : vector<32x256xf32>
      %c0_16 = arith.constant 0 : index
      %c0_17 = arith.constant 0 : index
      %18 = vector.load %arg6[%c0_16, %c0_17] : memref<32x256xf32, #tpu.memory_space<vmem>>, vector<32x256xf32>
      %19 = arith.addf %17, %18 : vector<32x256xf32>
      %cst_18 = arith.constant 0.000000e+00 : f32
      %20 = vector.broadcast %cst_18 : f32 to vector<32x256xf32>
      %21 = arith.maximumf %19, %20 : vector<32x256xf32>
      %c0_19 = arith.constant 0 : index
      %c0_20 = arith.constant 0 : index
      %22 = vector.load %arg7[%c0_19, %c0_20] : memref<32x256xf32, #tpu.memory_space<vmem>>, vector<32x256xf32>
      tpu.vector_store %arg7[%c0_19, %c0_20], %21 {strides = array<i32>} : memref<32x256xf32, #tpu.memory_space<vmem>>, vector<32x256xf32>,
    } else {
    }
    return
  }
  func.func @transform_0(%arg0: i32, %arg1: i32, %arg2: i32) -> (i32, i32, i32) {
    %c0_i32 = arith.constant 0 : i32
    %c0_i32_0 = arith.constant 0 : i32
    return %arg2, %arg0, %c0_i32 : i32, i32, i32
  }
  func.func @transform_1(%arg0: i32, %arg1: i32, %arg2: i32) -> (i32, i32, i32) {
    %c0_i32 = arith.constant 0 : i32
    %c0_i32_0 = arith.constant 0 : i32
    return %arg2, %c0_i32, %arg1 : i32, i32, i32
  }
  func.func @transform_2(%arg0: i32, %arg1: i32, %arg2: i32) -> (i32, i32) {
    %c0_i32 = arith.constant 0 : i32
    %c0_i32_0 = arith.constant 0 : i32
    return %c0_i32, %arg1 : i32, i32
  }
  func.func @transform_3(%arg0: i32, %arg1: i32, %arg2: i32) -> (i32, i32) {
    %c0_i32 = arith.constant 0 : i32
    return %arg0, %arg1 : i32, i32
  }
  func.func @transform_4(%arg0: i32, %arg1: i32, %arg2: i32) -> (i32, i32) {
    %c0_i32 = arith.constant 0 : i32
    return %arg0, %arg1 : i32, i32
  }
}

module attributes {stable_mosaic.version = 11 : i64} {
  func.func @_tap_matmul_kernel(%arg0: i32, %arg1: i32, %arg2: i32, %arg3: memref<1x32x256xbf16, #tpu.memory_space<vmem>>, %arg4: memref<1x256x256xbf16, #tpu.memory_space<vmem>>, %arg5: memref<1x256xf32, #tpu.memory_space<vmem>>, %arg6: memref<32x256xf32, #tpu.memory_space<vmem>>, %arg7: memref<32x256xf32, #tpu.memory_space<vmem>>) attributes {dimension_semantics = [#tpu.dimension_semantics<parallel>, #tpu.dimension_semantics<parallel>, #tpu.dimension_semantics<arbitrary>], iteration_bounds = array<i64: 1, 2, 1>, scalar_prefetch = 0 : i64, scratch_operands = 1 : i64, tpu.core_type = #tpu.core_type<tc>, window_params = [{transform_indices = @transform_0, window_bounds = array<i64: 1, 32, 256>}, {transform_indices = @transform_1, window_bounds = array<i64: 1, 256, 256>}, {transform_indices = @transform_2, window_bounds = array<i64: 1, 256>}, {transform_indices = @transform_3, window_bounds = array<i64: 32, 256>}]} {
    %c0_i32 = arith.constant 0 : i32
    %0 = arith.cmpi eq, %arg2, %c0_i32 : i32
    %1 = arith.extui %0 : i1 to i32
    %c0_i32_0 = arith.constant 0 : i32
    %2 = arith.cmpi ne, %1, %c0_i32_0 : i32
    scf.if %2 {
      %cst_12 = arith.constant 0.000000e+00 : f32
      %14 = vector.broadcast %cst_12 : f32 to vector<32x256xf32>
      %c0_13 = arith.constant 0 : index
      %c0_14 = arith.constant 0 : index
      %15 = vector.load %arg7[%c0_13, %c0_14] : memref<32x256xf32, #tpu.memory_space<vmem>>, vector<32x256xf32>
      tpu.vector_store %arg7[%c0_13, %c0_14], %14 {strides = array<i32>} : memref<32x256xf32, #tpu.memory_space<vmem>>, vector<32x256xf32>,
    } else {
    }
    %c0 = arith.constant 0 : index
    %c0_1 = arith.constant 0 : index
    %3 = vector.load %arg7[%c0, %c0_1] : memref<32x256xf32, #tpu.memory_space<vmem>>, vector<32x256xf32>
    %c0_2 = arith.constant 0 : index
    %c0_3 = arith.constant 0 : index
    %c0_4 = arith.constant 0 : index
    %4 = vector.load %arg3[%c0_2, %c0_3, %c0_4] : memref<1x32x256xbf16, #tpu.memory_space<vmem>>, vector<1x32x256xbf16>
    %5 = vector.shape_cast %4 : vector<1x32x256xbf16> to vector<32x256xbf16>
    %c0_5 = arith.constant 0 : index
    %c0_6 = arith.constant 0 : index
    %c0_7 = arith.constant 0 : index
    %6 = vector.load %arg4[%c0_5, %c0_6, %c0_7] : memref<1x256x256xbf16, #tpu.memory_space<vmem>>, vector<1x256x256xbf16>
    %7 = vector.shape_cast %6 : vector<1x256x256xbf16> to vector<256x256xbf16>
    %cst = arith.constant dense<0.000000e+00> : vector<32x256xf32>
    %8 = tpu.matmul %5, %7, %cst {dimension_numbers = #tpu.dot_dimension_numbers<[1], [0], [0], [1], [0, 0, 1, 1], [], []>} : vector<32x256xbf16>, vector<256x256xbf16>, vector<32x256xf32> -> vector<32x256xf32>
    %9 = arith.addf %3, %8 : vector<32x256xf32>
    %c0_8 = arith.constant 0 : index
    %c0_9 = arith.constant 0 : index
    %10 = vector.load %arg7[%c0_8, %c0_9] : memref<32x256xf32, #tpu.memory_space<vmem>>, vector<32x256xf32>
    tpu.vector_store %arg7[%c0_8, %c0_9], %9 {strides = array<i32>} : memref<32x256xf32, #tpu.memory_space<vmem>>, vector<32x256xf32>,
    %c0_i32_10 = arith.constant 0 : i32
    %11 = arith.cmpi eq, %arg2, %c0_i32_10 : i32
    %12 = arith.extui %11 : i1 to i32
    %c0_i32_11 = arith.constant 0 : i32
    %13 = arith.cmpi ne, %12, %c0_i32_11 : i32
    scf.if %13 {
      %c0_12 = arith.constant 0 : index
      %c0_13 = arith.constant 0 : index
      %14 = vector.load %arg7[%c0_12, %c0_13] : memref<32x256xf32, #tpu.memory_space<vmem>>, vector<32x256xf32>
      %c0_14 = arith.constant 0 : index
      %c0_15 = arith.constant 0 : index
      %15 = vector.load %arg5[%c0_14, %c0_15] : memref<1x256xf32, #tpu.memory_space<vmem>>, vector<1x256xf32>
      %16 = vector.broadcast %15 : vector<1x256xf32> to vector<32x256xf32>
      %17 = arith.addf %14, %16 : vector<32x256xf32>
      %c0_16 = arith.constant 0 : index
      %c0_17 = arith.constant 0 : index
      %18 = vector.load %arg6[%c0_16, %c0_17] : memref<32x256xf32, #tpu.memory_space<vmem>>, vector<32x256xf32>
      tpu.vector_store %arg6[%c0_16, %c0_17], %17 {strides = array<i32>} : memref<32x256xf32, #tpu.memory_space<vmem>>, vector<32x256xf32>,
    } else {
    }
    return
  }
  func.func @transform_0(%arg0: i32, %arg1: i32, %arg2: i32) -> (i32, i32, i32) {
    %c0_i32 = arith.constant 0 : i32
    %c0_i32_0 = arith.constant 0 : i32
    return %arg2, %arg0, %c0_i32 : i32, i32, i32
  }
  func.func @transform_1(%arg0: i32, %arg1: i32, %arg2: i32) -> (i32, i32, i32) {
    %c0_i32 = arith.constant 0 : i32
    %c0_i32_0 = arith.constant 0 : i32
    return %arg2, %c0_i32, %arg1 : i32, i32, i32
  }
  func.func @transform_2(%arg0: i32, %arg1: i32, %arg2: i32) -> (i32, i32) {
    %c0_i32 = arith.constant 0 : i32
    %c0_i32_0 = arith.constant 0 : i32
    return %c0_i32, %arg1 : i32, i32
  }
  func.func @transform_3(%arg0: i32, %arg1: i32, %arg2: i32) -> (i32, i32) {
    %c0_i32 = arith.constant 0 : i32
    return %arg0, %arg1 : i32, i32
  }
}

module attributes {stable_mosaic.version = 11 : i64} {
  func.func @_tap_matmul_kernel(%arg0: i32, %arg1: i32, %arg2: i32, %arg3: memref<1x32x512xbf16, #tpu.memory_space<vmem>>, %arg4: memref<1x512x128xbf16, #tpu.memory_space<vmem>>, %arg5: memref<1x128xf32, #tpu.memory_space<vmem>>, %arg6: memref<32x128xf32, #tpu.memory_space<vmem>>, %arg7: memref<32x128xf32, #tpu.memory_space<vmem>>) attributes {dimension_semantics = [#tpu.dimension_semantics<parallel>, #tpu.dimension_semantics<parallel>, #tpu.dimension_semantics<arbitrary>], iteration_bounds = array<i64: 1, 1, 1>, scalar_prefetch = 0 : i64, scratch_operands = 1 : i64, tpu.core_type = #tpu.core_type<tc>, window_params = [{transform_indices = @transform_0, window_bounds = array<i64: 1, 32, 512>}, {transform_indices = @transform_1, window_bounds = array<i64: 1, 512, 128>}, {transform_indices = @transform_2, window_bounds = array<i64: 1, 128>}, {transform_indices = @transform_3, window_bounds = array<i64: 32, 128>}]} {
    %c0_i32 = arith.constant 0 : i32
    %0 = arith.cmpi eq, %arg2, %c0_i32 : i32
    %1 = arith.extui %0 : i1 to i32
    %c0_i32_0 = arith.constant 0 : i32
    %2 = arith.cmpi ne, %1, %c0_i32_0 : i32
    scf.if %2 {
      %cst_12 = arith.constant 0.000000e+00 : f32
      %14 = vector.broadcast %cst_12 : f32 to vector<32x128xf32>
      %c0_13 = arith.constant 0 : index
      %c0_14 = arith.constant 0 : index
      %15 = vector.load %arg7[%c0_13, %c0_14] : memref<32x128xf32, #tpu.memory_space<vmem>>, vector<32x128xf32>
      tpu.vector_store %arg7[%c0_13, %c0_14], %14 {strides = array<i32>} : memref<32x128xf32, #tpu.memory_space<vmem>>, vector<32x128xf32>,
    } else {
    }
    %c0 = arith.constant 0 : index
    %c0_1 = arith.constant 0 : index
    %3 = vector.load %arg7[%c0, %c0_1] : memref<32x128xf32, #tpu.memory_space<vmem>>, vector<32x128xf32>
    %c0_2 = arith.constant 0 : index
    %c0_3 = arith.constant 0 : index
    %c0_4 = arith.constant 0 : index
    %4 = vector.load %arg3[%c0_2, %c0_3, %c0_4] : memref<1x32x512xbf16, #tpu.memory_space<vmem>>, vector<1x32x512xbf16>
    %5 = vector.shape_cast %4 : vector<1x32x512xbf16> to vector<32x512xbf16>
    %c0_5 = arith.constant 0 : index
    %c0_6 = arith.constant 0 : index
    %c0_7 = arith.constant 0 : index
    %6 = vector.load %arg4[%c0_5, %c0_6, %c0_7] : memref<1x512x128xbf16, #tpu.memory_space<vmem>>, vector<1x512x128xbf16>
    %7 = vector.shape_cast %6 : vector<1x512x128xbf16> to vector<512x128xbf16>
    %cst = arith.constant dense<0.000000e+00> : vector<32x128xf32>
    %8 = tpu.matmul %5, %7, %cst {dimension_numbers = #tpu.dot_dimension_numbers<[1], [0], [0], [1], [0, 0, 1, 1], [], []>} : vector<32x512xbf16>, vector<512x128xbf16>, vector<32x128xf32> -> vector<32x128xf32>
    %9 = arith.addf %3, %8 : vector<32x128xf32>
    %c0_8 = arith.constant 0 : index
    %c0_9 = arith.constant 0 : index
    %10 = vector.load %arg7[%c0_8, %c0_9] : memref<32x128xf32, #tpu.memory_space<vmem>>, vector<32x128xf32>
    tpu.vector_store %arg7[%c0_8, %c0_9], %9 {strides = array<i32>} : memref<32x128xf32, #tpu.memory_space<vmem>>, vector<32x128xf32>,
    %c0_i32_10 = arith.constant 0 : i32
    %11 = arith.cmpi eq, %arg2, %c0_i32_10 : i32
    %12 = arith.extui %11 : i1 to i32
    %c0_i32_11 = arith.constant 0 : i32
    %13 = arith.cmpi ne, %12, %c0_i32_11 : i32
    scf.if %13 {
      %c0_12 = arith.constant 0 : index
      %c0_13 = arith.constant 0 : index
      %14 = vector.load %arg7[%c0_12, %c0_13] : memref<32x128xf32, #tpu.memory_space<vmem>>, vector<32x128xf32>
      %c0_14 = arith.constant 0 : index
      %c0_15 = arith.constant 0 : index
      %15 = vector.load %arg5[%c0_14, %c0_15] : memref<1x128xf32, #tpu.memory_space<vmem>>, vector<1x128xf32>
      %16 = vector.broadcast %15 : vector<1x128xf32> to vector<32x128xf32>
      %17 = arith.addf %14, %16 : vector<32x128xf32>
      %cst_16 = arith.constant 0.000000e+00 : f32
      %18 = vector.broadcast %cst_16 : f32 to vector<32x128xf32>
      %19 = arith.maximumf %17, %18 : vector<32x128xf32>
      %c0_17 = arith.constant 0 : index
      %c0_18 = arith.constant 0 : index
      %20 = vector.load %arg6[%c0_17, %c0_18] : memref<32x128xf32, #tpu.memory_space<vmem>>, vector<32x128xf32>
      tpu.vector_store %arg6[%c0_17, %c0_18], %19 {strides = array<i32>} : memref<32x128xf32, #tpu.memory_space<vmem>>, vector<32x128xf32>,
    } else {
    }
    return
  }
  func.func @transform_0(%arg0: i32, %arg1: i32, %arg2: i32) -> (i32, i32, i32) {
    %c0_i32 = arith.constant 0 : i32
    %c0_i32_0 = arith.constant 0 : i32
    return %arg2, %arg0, %c0_i32 : i32, i32, i32
  }
  func.func @transform_1(%arg0: i32, %arg1: i32, %arg2: i32) -> (i32, i32, i32) {
    %c0_i32 = arith.constant 0 : i32
    %c0_i32_0 = arith.constant 0 : i32
    return %arg2, %c0_i32, %arg1 : i32, i32, i32
  }
  func.func @transform_2(%arg0: i32, %arg1: i32, %arg2: i32) -> (i32, i32) {
    %c0_i32 = arith.constant 0 : i32
    %c0_i32_0 = arith.constant 0 : i32
    return %c0_i32, %arg1 : i32, i32
  }
  func.func @transform_3(%arg0: i32, %arg1: i32, %arg2: i32) -> (i32, i32) {
    %c0_i32 = arith.constant 0 : i32
    return %arg0, %arg1 : i32, i32
  }
}

module attributes {stable_mosaic.version = 11 : i64} {
  func.func @_tap_matmul_kernel(%arg0: i32, %arg1: i32, %arg2: i32, %arg3: memref<1x32x512xbf16, #tpu.memory_space<vmem>>, %arg4: memref<1x512x256xbf16, #tpu.memory_space<vmem>>, %arg5: memref<1x256xf32, #tpu.memory_space<vmem>>, %arg6: memref<32x256xf32, #tpu.memory_space<vmem>>, %arg7: memref<32x256xf32, #tpu.memory_space<vmem>>) attributes {dimension_semantics = [#tpu.dimension_semantics<parallel>, #tpu.dimension_semantics<parallel>, #tpu.dimension_semantics<arbitrary>], iteration_bounds = array<i64: 1, 1, 1>, scalar_prefetch = 0 : i64, scratch_operands = 1 : i64, tpu.core_type = #tpu.core_type<tc>, window_params = [{transform_indices = @transform_0, window_bounds = array<i64: 1, 32, 512>}, {transform_indices = @transform_1, window_bounds = array<i64: 1, 512, 256>}, {transform_indices = @transform_2, window_bounds = array<i64: 1, 256>}, {transform_indices = @transform_3, window_bounds = array<i64: 32, 256>}]} {
    %c0_i32 = arith.constant 0 : i32
    %0 = arith.cmpi eq, %arg2, %c0_i32 : i32
    %1 = arith.extui %0 : i1 to i32
    %c0_i32_0 = arith.constant 0 : i32
    %2 = arith.cmpi ne, %1, %c0_i32_0 : i32
    scf.if %2 {
      %cst_12 = arith.constant 0.000000e+00 : f32
      %14 = vector.broadcast %cst_12 : f32 to vector<32x256xf32>
      %c0_13 = arith.constant 0 : index
      %c0_14 = arith.constant 0 : index
      %15 = vector.load %arg7[%c0_13, %c0_14] : memref<32x256xf32, #tpu.memory_space<vmem>>, vector<32x256xf32>
      tpu.vector_store %arg7[%c0_13, %c0_14], %14 {strides = array<i32>} : memref<32x256xf32, #tpu.memory_space<vmem>>, vector<32x256xf32>,
    } else {
    }
    %c0 = arith.constant 0 : index
    %c0_1 = arith.constant 0 : index
    %3 = vector.load %arg7[%c0, %c0_1] : memref<32x256xf32, #tpu.memory_space<vmem>>, vector<32x256xf32>
    %c0_2 = arith.constant 0 : index
    %c0_3 = arith.constant 0 : index
    %c0_4 = arith.constant 0 : index
    %4 = vector.load %arg3[%c0_2, %c0_3, %c0_4] : memref<1x32x512xbf16, #tpu.memory_space<vmem>>, vector<1x32x512xbf16>
    %5 = vector.shape_cast %4 : vector<1x32x512xbf16> to vector<32x512xbf16>
    %c0_5 = arith.constant 0 : index
    %c0_6 = arith.constant 0 : index
    %c0_7 = arith.constant 0 : index
    %6 = vector.load %arg4[%c0_5, %c0_6, %c0_7] : memref<1x512x256xbf16, #tpu.memory_space<vmem>>, vector<1x512x256xbf16>
    %7 = vector.shape_cast %6 : vector<1x512x256xbf16> to vector<512x256xbf16>
    %cst = arith.constant dense<0.000000e+00> : vector<32x256xf32>
    %8 = tpu.matmul %5, %7, %cst {dimension_numbers = #tpu.dot_dimension_numbers<[1], [0], [0], [1], [0, 0, 1, 1], [], []>} : vector<32x512xbf16>, vector<512x256xbf16>, vector<32x256xf32> -> vector<32x256xf32>
    %9 = arith.addf %3, %8 : vector<32x256xf32>
    %c0_8 = arith.constant 0 : index
    %c0_9 = arith.constant 0 : index
    %10 = vector.load %arg7[%c0_8, %c0_9] : memref<32x256xf32, #tpu.memory_space<vmem>>, vector<32x256xf32>
    tpu.vector_store %arg7[%c0_8, %c0_9], %9 {strides = array<i32>} : memref<32x256xf32, #tpu.memory_space<vmem>>, vector<32x256xf32>,
    %c0_i32_10 = arith.constant 0 : i32
    %11 = arith.cmpi eq, %arg2, %c0_i32_10 : i32
    %12 = arith.extui %11 : i1 to i32
    %c0_i32_11 = arith.constant 0 : i32
    %13 = arith.cmpi ne, %12, %c0_i32_11 : i32
    scf.if %13 {
      %c0_12 = arith.constant 0 : index
      %c0_13 = arith.constant 0 : index
      %14 = vector.load %arg7[%c0_12, %c0_13] : memref<32x256xf32, #tpu.memory_space<vmem>>, vector<32x256xf32>
      %c0_14 = arith.constant 0 : index
      %c0_15 = arith.constant 0 : index
      %15 = vector.load %arg5[%c0_14, %c0_15] : memref<1x256xf32, #tpu.memory_space<vmem>>, vector<1x256xf32>
      %16 = vector.broadcast %15 : vector<1x256xf32> to vector<32x256xf32>
      %17 = arith.addf %14, %16 : vector<32x256xf32>
      %cst_16 = arith.constant 0.000000e+00 : f32
      %18 = vector.broadcast %cst_16 : f32 to vector<32x256xf32>
      %19 = arith.maximumf %17, %18 : vector<32x256xf32>
      %c0_17 = arith.constant 0 : index
      %c0_18 = arith.constant 0 : index
      %20 = vector.load %arg6[%c0_17, %c0_18] : memref<32x256xf32, #tpu.memory_space<vmem>>, vector<32x256xf32>
      tpu.vector_store %arg6[%c0_17, %c0_18], %19 {strides = array<i32>} : memref<32x256xf32, #tpu.memory_space<vmem>>, vector<32x256xf32>,
    } else {
    }
    return
  }
  func.func @transform_0(%arg0: i32, %arg1: i32, %arg2: i32) -> (i32, i32, i32) {
    %c0_i32 = arith.constant 0 : i32
    %c0_i32_0 = arith.constant 0 : i32
    return %arg2, %arg0, %c0_i32 : i32, i32, i32
  }
  func.func @transform_1(%arg0: i32, %arg1: i32, %arg2: i32) -> (i32, i32, i32) {
    %c0_i32 = arith.constant 0 : i32
    %c0_i32_0 = arith.constant 0 : i32
    return %arg2, %c0_i32, %arg1 : i32, i32, i32
  }
  func.func @transform_2(%arg0: i32, %arg1: i32, %arg2: i32) -> (i32, i32) {
    %c0_i32 = arith.constant 0 : i32
    %c0_i32_0 = arith.constant 0 : i32
    return %c0_i32, %arg1 : i32, i32
  }
  func.func @transform_3(%arg0: i32, %arg1: i32, %arg2: i32) -> (i32, i32) {
    %c0_i32 = arith.constant 0 : i32
    return %arg0, %arg1 : i32, i32
  }
}

module attributes {stable_mosaic.version = 11 : i64} {
  func.func @_tap_matmul_kernel(%arg0: i32, %arg1: i32, %arg2: i32, %arg3: memref<1x8x256xbf16, #tpu.memory_space<vmem>>, %arg4: memref<1x256x256xbf16, #tpu.memory_space<vmem>>, %arg5: memref<1x256xf32, #tpu.memory_space<vmem>>, %arg6: memref<8x256xf32, #tpu.memory_space<vmem>>, %arg7: memref<8x256xf32, #tpu.memory_space<vmem>>) attributes {dimension_semantics = [#tpu.dimension_semantics<parallel>, #tpu.dimension_semantics<parallel>, #tpu.dimension_semantics<arbitrary>], iteration_bounds = array<i64: 1, 1, 9>, scalar_prefetch = 0 : i64, scratch_operands = 1 : i64, tpu.core_type = #tpu.core_type<tc>, window_params = [{transform_indices = @transform_0, window_bounds = array<i64: 1, 8, 256>}, {transform_indices = @transform_1, window_bounds = array<i64: 1, 256, 256>}, {transform_indices = @transform_2, window_bounds = array<i64: 1, 256>}, {transform_indices = @transform_3, window_bounds = array<i64: 8, 256>}]} {
    %c0_i32 = arith.constant 0 : i32
    %0 = arith.cmpi eq, %arg2, %c0_i32 : i32
    %1 = arith.extui %0 : i1 to i32
    %c0_i32_0 = arith.constant 0 : i32
    %2 = arith.cmpi ne, %1, %c0_i32_0 : i32
    scf.if %2 {
      %cst_11 = arith.constant 0.000000e+00 : f32
      %14 = vector.broadcast %cst_11 : f32 to vector<8x256xf32>
      %c0_12 = arith.constant 0 : index
      %c0_13 = arith.constant 0 : index
      %15 = vector.load %arg7[%c0_12, %c0_13] : memref<8x256xf32, #tpu.memory_space<vmem>>, vector<8x256xf32>
      tpu.vector_store %arg7[%c0_12, %c0_13], %14 {strides = array<i32>} : memref<8x256xf32, #tpu.memory_space<vmem>>, vector<8x256xf32>,
    } else {
    }
    %c0 = arith.constant 0 : index
    %c0_1 = arith.constant 0 : index
    %3 = vector.load %arg7[%c0, %c0_1] : memref<8x256xf32, #tpu.memory_space<vmem>>, vector<8x256xf32>
    %c0_2 = arith.constant 0 : index
    %c0_3 = arith.constant 0 : index
    %c0_4 = arith.constant 0 : index
    %4 = vector.load %arg3[%c0_2, %c0_3, %c0_4] : memref<1x8x256xbf16, #tpu.memory_space<vmem>>, vector<1x8x256xbf16>
    %5 = vector.shape_cast %4 : vector<1x8x256xbf16> to vector<8x256xbf16>
    %c0_5 = arith.constant 0 : index
    %c0_6 = arith.constant 0 : index
    %c0_7 = arith.constant 0 : index
    %6 = vector.load %arg4[%c0_5, %c0_6, %c0_7] : memref<1x256x256xbf16, #tpu.memory_space<vmem>>, vector<1x256x256xbf16>
    %7 = vector.shape_cast %6 : vector<1x256x256xbf16> to vector<256x256xbf16>
    %cst = arith.constant dense<0.000000e+00> : vector<8x256xf32>
    %8 = tpu.matmul %5, %7, %cst {dimension_numbers = #tpu.dot_dimension_numbers<[1], [0], [0], [1], [0, 0, 1, 1], [], []>} : vector<8x256xbf16>, vector<256x256xbf16>, vector<8x256xf32> -> vector<8x256xf32>
    %9 = arith.addf %3, %8 : vector<8x256xf32>
    %c0_8 = arith.constant 0 : index
    %c0_9 = arith.constant 0 : index
    %10 = vector.load %arg7[%c0_8, %c0_9] : memref<8x256xf32, #tpu.memory_space<vmem>>, vector<8x256xf32>
    tpu.vector_store %arg7[%c0_8, %c0_9], %9 {strides = array<i32>} : memref<8x256xf32, #tpu.memory_space<vmem>>, vector<8x256xf32>,
    %c8_i32 = arith.constant 8 : i32
    %11 = arith.cmpi eq, %arg2, %c8_i32 : i32
    %12 = arith.extui %11 : i1 to i32
    %c0_i32_10 = arith.constant 0 : i32
    %13 = arith.cmpi ne, %12, %c0_i32_10 : i32
    scf.if %13 {
      %c0_11 = arith.constant 0 : index
      %c0_12 = arith.constant 0 : index
      %14 = vector.load %arg7[%c0_11, %c0_12] : memref<8x256xf32, #tpu.memory_space<vmem>>, vector<8x256xf32>
      %c0_13 = arith.constant 0 : index
      %c0_14 = arith.constant 0 : index
      %15 = vector.load %arg5[%c0_13, %c0_14] : memref<1x256xf32, #tpu.memory_space<vmem>>, vector<1x256xf32>
      %16 = vector.broadcast %15 : vector<1x256xf32> to vector<8x256xf32>
      %17 = arith.addf %14, %16 : vector<8x256xf32>
      %cst_15 = arith.constant 0.000000e+00 : f32
      %18 = vector.broadcast %cst_15 : f32 to vector<8x256xf32>
      %19 = arith.maximumf %17, %18 : vector<8x256xf32>
      %c0_16 = arith.constant 0 : index
      %c0_17 = arith.constant 0 : index
      %20 = vector.load %arg6[%c0_16, %c0_17] : memref<8x256xf32, #tpu.memory_space<vmem>>, vector<8x256xf32>
      tpu.vector_store %arg6[%c0_16, %c0_17], %19 {strides = array<i32>} : memref<8x256xf32, #tpu.memory_space<vmem>>, vector<8x256xf32>,
    } else {
    }
    return
  }
  func.func @transform_0(%arg0: i32, %arg1: i32, %arg2: i32) -> (i32, i32, i32) {
    %c0_i32 = arith.constant 0 : i32
    %c0_i32_0 = arith.constant 0 : i32
    return %arg2, %arg0, %c0_i32 : i32, i32, i32
  }
  func.func @transform_1(%arg0: i32, %arg1: i32, %arg2: i32) -> (i32, i32, i32) {
    %c0_i32 = arith.constant 0 : i32
    %c0_i32_0 = arith.constant 0 : i32
    return %arg2, %c0_i32, %arg1 : i32, i32, i32
  }
  func.func @transform_2(%arg0: i32, %arg1: i32, %arg2: i32) -> (i32, i32) {
    %c0_i32 = arith.constant 0 : i32
    %c0_i32_0 = arith.constant 0 : i32
    return %c0_i32, %arg1 : i32, i32
  }
  func.func @transform_3(%arg0: i32, %arg1: i32, %arg2: i32) -> (i32, i32) {
    %c0_i32 = arith.constant 0 : i32
    return %arg0, %arg1 : i32, i32
  }
}

module attributes {stable_mosaic.version = 11 : i64} {
  func.func @_tap_matmul_res_kernel(%arg0: i32, %arg1: i32, %arg2: i32, %arg3: memref<1x8x256xbf16, #tpu.memory_space<vmem>>, %arg4: memref<1x256x256xbf16, #tpu.memory_space<vmem>>, %arg5: memref<1x256xf32, #tpu.memory_space<vmem>>, %arg6: memref<8x256xf32, #tpu.memory_space<vmem>>, %arg7: memref<8x256xf32, #tpu.memory_space<vmem>>, %arg8: memref<8x256xf32, #tpu.memory_space<vmem>>) attributes {dimension_semantics = [#tpu.dimension_semantics<parallel>, #tpu.dimension_semantics<parallel>, #tpu.dimension_semantics<arbitrary>], iteration_bounds = array<i64: 1, 4, 1>, scalar_prefetch = 0 : i64, scratch_operands = 1 : i64, tpu.core_type = #tpu.core_type<tc>, window_params = [{transform_indices = @transform_0, window_bounds = array<i64: 1, 8, 256>}, {transform_indices = @transform_1, window_bounds = array<i64: 1, 256, 256>}, {transform_indices = @transform_2, window_bounds = array<i64: 1, 256>}, {transform_indices = @transform_3, window_bounds = array<i64: 8, 256>}, {transform_indices = @transform_4, window_bounds = array<i64: 8, 256>}]} {
    %c0_i32 = arith.constant 0 : i32
    %0 = arith.cmpi eq, %arg2, %c0_i32 : i32
    %1 = arith.extui %0 : i1 to i32
    %c0_i32_0 = arith.constant 0 : i32
    %2 = arith.cmpi ne, %1, %c0_i32_0 : i32
    scf.if %2 {
      %cst_12 = arith.constant 0.000000e+00 : f32
      %14 = vector.broadcast %cst_12 : f32 to vector<8x256xf32>
      %c0_13 = arith.constant 0 : index
      %c0_14 = arith.constant 0 : index
      %15 = vector.load %arg8[%c0_13, %c0_14] : memref<8x256xf32, #tpu.memory_space<vmem>>, vector<8x256xf32>
      tpu.vector_store %arg8[%c0_13, %c0_14], %14 {strides = array<i32>} : memref<8x256xf32, #tpu.memory_space<vmem>>, vector<8x256xf32>,
    } else {
    }
    %c0 = arith.constant 0 : index
    %c0_1 = arith.constant 0 : index
    %3 = vector.load %arg8[%c0, %c0_1] : memref<8x256xf32, #tpu.memory_space<vmem>>, vector<8x256xf32>
    %c0_2 = arith.constant 0 : index
    %c0_3 = arith.constant 0 : index
    %c0_4 = arith.constant 0 : index
    %4 = vector.load %arg3[%c0_2, %c0_3, %c0_4] : memref<1x8x256xbf16, #tpu.memory_space<vmem>>, vector<1x8x256xbf16>
    %5 = vector.shape_cast %4 : vector<1x8x256xbf16> to vector<8x256xbf16>
    %c0_5 = arith.constant 0 : index
    %c0_6 = arith.constant 0 : index
    %c0_7 = arith.constant 0 : index
    %6 = vector.load %arg4[%c0_5, %c0_6, %c0_7] : memref<1x256x256xbf16, #tpu.memory_space<vmem>>, vector<1x256x256xbf16>
    %7 = vector.shape_cast %6 : vector<1x256x256xbf16> to vector<256x256xbf16>
    %cst = arith.constant dense<0.000000e+00> : vector<8x256xf32>
    %8 = tpu.matmul %5, %7, %cst {dimension_numbers = #tpu.dot_dimension_numbers<[1], [0], [0], [1], [0, 0, 1, 1], [], []>} : vector<8x256xbf16>, vector<256x256xbf16>, vector<8x256xf32> -> vector<8x256xf32>
    %9 = arith.addf %3, %8 : vector<8x256xf32>
    %c0_8 = arith.constant 0 : index
    %c0_9 = arith.constant 0 : index
    %10 = vector.load %arg8[%c0_8, %c0_9] : memref<8x256xf32, #tpu.memory_space<vmem>>, vector<8x256xf32>
    tpu.vector_store %arg8[%c0_8, %c0_9], %9 {strides = array<i32>} : memref<8x256xf32, #tpu.memory_space<vmem>>, vector<8x256xf32>,
    %c0_i32_10 = arith.constant 0 : i32
    %11 = arith.cmpi eq, %arg2, %c0_i32_10 : i32
    %12 = arith.extui %11 : i1 to i32
    %c0_i32_11 = arith.constant 0 : i32
    %13 = arith.cmpi ne, %12, %c0_i32_11 : i32
    scf.if %13 {
      %c0_12 = arith.constant 0 : index
      %c0_13 = arith.constant 0 : index
      %14 = vector.load %arg8[%c0_12, %c0_13] : memref<8x256xf32, #tpu.memory_space<vmem>>, vector<8x256xf32>
      %c0_14 = arith.constant 0 : index
      %c0_15 = arith.constant 0 : index
      %15 = vector.load %arg5[%c0_14, %c0_15] : memref<1x256xf32, #tpu.memory_space<vmem>>, vector<1x256xf32>
      %16 = vector.broadcast %15 : vector<1x256xf32> to vector<8x256xf32>
      %17 = arith.addf %14, %16 : vector<8x256xf32>
      %c0_16 = arith.constant 0 : index
      %c0_17 = arith.constant 0 : index
      %18 = vector.load %arg6[%c0_16, %c0_17] : memref<8x256xf32, #tpu.memory_space<vmem>>, vector<8x256xf32>
      %19 = arith.addf %17, %18 : vector<8x256xf32>
      %cst_18 = arith.constant 0.000000e+00 : f32
      %20 = vector.broadcast %cst_18 : f32 to vector<8x256xf32>
      %21 = arith.maximumf %19, %20 : vector<8x256xf32>
      %c0_19 = arith.constant 0 : index
      %c0_20 = arith.constant 0 : index
      %22 = vector.load %arg7[%c0_19, %c0_20] : memref<8x256xf32, #tpu.memory_space<vmem>>, vector<8x256xf32>
      tpu.vector_store %arg7[%c0_19, %c0_20], %21 {strides = array<i32>} : memref<8x256xf32, #tpu.memory_space<vmem>>, vector<8x256xf32>,
    } else {
    }
    return
  }
  func.func @transform_0(%arg0: i32, %arg1: i32, %arg2: i32) -> (i32, i32, i32) {
    %c0_i32 = arith.constant 0 : i32
    %c0_i32_0 = arith.constant 0 : i32
    return %arg2, %arg0, %c0_i32 : i32, i32, i32
  }
  func.func @transform_1(%arg0: i32, %arg1: i32, %arg2: i32) -> (i32, i32, i32) {
    %c0_i32 = arith.constant 0 : i32
    %c0_i32_0 = arith.constant 0 : i32
    return %arg2, %c0_i32, %arg1 : i32, i32, i32
  }
  func.func @transform_2(%arg0: i32, %arg1: i32, %arg2: i32) -> (i32, i32) {
    %c0_i32 = arith.constant 0 : i32
    %c0_i32_0 = arith.constant 0 : i32
    return %c0_i32, %arg1 : i32, i32
  }
  func.func @transform_3(%arg0: i32, %arg1: i32, %arg2: i32) -> (i32, i32) {
    %c0_i32 = arith.constant 0 : i32
    return %arg0, %arg1 : i32, i32
  }
  func.func @transform_4(%arg0: i32, %arg1: i32, %arg2: i32) -> (i32, i32) {
    %c0_i32 = arith.constant 0 : i32
    return %arg0, %arg1 : i32, i32
  }
}

module attributes {stable_mosaic.version = 11 : i64} {
  func.func @_tap_matmul_kernel(%arg0: i32, %arg1: i32, %arg2: i32, %arg3: memref<1x8x512xbf16, #tpu.memory_space<vmem>>, %arg4: memref<1x512x256xbf16, #tpu.memory_space<vmem>>, %arg5: memref<1x256xf32, #tpu.memory_space<vmem>>, %arg6: memref<8x256xf32, #tpu.memory_space<vmem>>, %arg7: memref<8x256xf32, #tpu.memory_space<vmem>>) attributes {dimension_semantics = [#tpu.dimension_semantics<parallel>, #tpu.dimension_semantics<parallel>, #tpu.dimension_semantics<arbitrary>], iteration_bounds = array<i64: 1, 4, 1>, scalar_prefetch = 0 : i64, scratch_operands = 1 : i64, tpu.core_type = #tpu.core_type<tc>, window_params = [{transform_indices = @transform_0, window_bounds = array<i64: 1, 8, 512>}, {transform_indices = @transform_1, window_bounds = array<i64: 1, 512, 256>}, {transform_indices = @transform_2, window_bounds = array<i64: 1, 256>}, {transform_indices = @transform_3, window_bounds = array<i64: 8, 256>}]} {
    %c0_i32 = arith.constant 0 : i32
    %0 = arith.cmpi eq, %arg2, %c0_i32 : i32
    %1 = arith.extui %0 : i1 to i32
    %c0_i32_0 = arith.constant 0 : i32
    %2 = arith.cmpi ne, %1, %c0_i32_0 : i32
    scf.if %2 {
      %cst_12 = arith.constant 0.000000e+00 : f32
      %14 = vector.broadcast %cst_12 : f32 to vector<8x256xf32>
      %c0_13 = arith.constant 0 : index
      %c0_14 = arith.constant 0 : index
      %15 = vector.load %arg7[%c0_13, %c0_14] : memref<8x256xf32, #tpu.memory_space<vmem>>, vector<8x256xf32>
      tpu.vector_store %arg7[%c0_13, %c0_14], %14 {strides = array<i32>} : memref<8x256xf32, #tpu.memory_space<vmem>>, vector<8x256xf32>,
    } else {
    }
    %c0 = arith.constant 0 : index
    %c0_1 = arith.constant 0 : index
    %3 = vector.load %arg7[%c0, %c0_1] : memref<8x256xf32, #tpu.memory_space<vmem>>, vector<8x256xf32>
    %c0_2 = arith.constant 0 : index
    %c0_3 = arith.constant 0 : index
    %c0_4 = arith.constant 0 : index
    %4 = vector.load %arg3[%c0_2, %c0_3, %c0_4] : memref<1x8x512xbf16, #tpu.memory_space<vmem>>, vector<1x8x512xbf16>
    %5 = vector.shape_cast %4 : vector<1x8x512xbf16> to vector<8x512xbf16>
    %c0_5 = arith.constant 0 : index
    %c0_6 = arith.constant 0 : index
    %c0_7 = arith.constant 0 : index
    %6 = vector.load %arg4[%c0_5, %c0_6, %c0_7] : memref<1x512x256xbf16, #tpu.memory_space<vmem>>, vector<1x512x256xbf16>
    %7 = vector.shape_cast %6 : vector<1x512x256xbf16> to vector<512x256xbf16>
    %cst = arith.constant dense<0.000000e+00> : vector<8x256xf32>
    %8 = tpu.matmul %5, %7, %cst {dimension_numbers = #tpu.dot_dimension_numbers<[1], [0], [0], [1], [0, 0, 1, 1], [], []>} : vector<8x512xbf16>, vector<512x256xbf16>, vector<8x256xf32> -> vector<8x256xf32>
    %9 = arith.addf %3, %8 : vector<8x256xf32>
    %c0_8 = arith.constant 0 : index
    %c0_9 = arith.constant 0 : index
    %10 = vector.load %arg7[%c0_8, %c0_9] : memref<8x256xf32, #tpu.memory_space<vmem>>, vector<8x256xf32>
    tpu.vector_store %arg7[%c0_8, %c0_9], %9 {strides = array<i32>} : memref<8x256xf32, #tpu.memory_space<vmem>>, vector<8x256xf32>,
    %c0_i32_10 = arith.constant 0 : i32
    %11 = arith.cmpi eq, %arg2, %c0_i32_10 : i32
    %12 = arith.extui %11 : i1 to i32
    %c0_i32_11 = arith.constant 0 : i32
    %13 = arith.cmpi ne, %12, %c0_i32_11 : i32
    scf.if %13 {
      %c0_12 = arith.constant 0 : index
      %c0_13 = arith.constant 0 : index
      %14 = vector.load %arg7[%c0_12, %c0_13] : memref<8x256xf32, #tpu.memory_space<vmem>>, vector<8x256xf32>
      %c0_14 = arith.constant 0 : index
      %c0_15 = arith.constant 0 : index
      %15 = vector.load %arg5[%c0_14, %c0_15] : memref<1x256xf32, #tpu.memory_space<vmem>>, vector<1x256xf32>
      %16 = vector.broadcast %15 : vector<1x256xf32> to vector<8x256xf32>
      %17 = arith.addf %14, %16 : vector<8x256xf32>
      %c0_16 = arith.constant 0 : index
      %c0_17 = arith.constant 0 : index
      %18 = vector.load %arg6[%c0_16, %c0_17] : memref<8x256xf32, #tpu.memory_space<vmem>>, vector<8x256xf32>
      tpu.vector_store %arg6[%c0_16, %c0_17], %17 {strides = array<i32>} : memref<8x256xf32, #tpu.memory_space<vmem>>, vector<8x256xf32>,
    } else {
    }
    return
  }
  func.func @transform_0(%arg0: i32, %arg1: i32, %arg2: i32) -> (i32, i32, i32) {
    %c0_i32 = arith.constant 0 : i32
    %c0_i32_0 = arith.constant 0 : i32
    return %arg2, %arg0, %c0_i32 : i32, i32, i32
  }
  func.func @transform_1(%arg0: i32, %arg1: i32, %arg2: i32) -> (i32, i32, i32) {
    %c0_i32 = arith.constant 0 : i32
    %c0_i32_0 = arith.constant 0 : i32
    return %arg2, %c0_i32, %arg1 : i32, i32, i32
  }
  func.func @transform_2(%arg0: i32, %arg1: i32, %arg2: i32) -> (i32, i32) {
    %c0_i32 = arith.constant 0 : i32
    %c0_i32_0 = arith.constant 0 : i32
    return %c0_i32, %arg1 : i32, i32
  }
  func.func @transform_3(%arg0: i32, %arg1: i32, %arg2: i32) -> (i32, i32) {
    %c0_i32 = arith.constant 0 : i32
    return %arg0, %arg1 : i32, i32
  }
}

module attributes {stable_mosaic.version = 11 : i64} {
  func.func @_tap_matmul_kernel(%arg0: i32, %arg1: i32, %arg2: i32, %arg3: memref<1x8x1024xbf16, #tpu.memory_space<vmem>>, %arg4: memref<1x1024x256xbf16, #tpu.memory_space<vmem>>, %arg5: memref<1x256xf32, #tpu.memory_space<vmem>>, %arg6: memref<8x256xf32, #tpu.memory_space<vmem>>, %arg7: memref<8x256xf32, #tpu.memory_space<vmem>>) attributes {dimension_semantics = [#tpu.dimension_semantics<parallel>, #tpu.dimension_semantics<parallel>, #tpu.dimension_semantics<arbitrary>], iteration_bounds = array<i64: 1, 1, 1>, scalar_prefetch = 0 : i64, scratch_operands = 1 : i64, tpu.core_type = #tpu.core_type<tc>, window_params = [{transform_indices = @transform_0, window_bounds = array<i64: 1, 8, 1024>}, {transform_indices = @transform_1, window_bounds = array<i64: 1, 1024, 256>}, {transform_indices = @transform_2, window_bounds = array<i64: 1, 256>}, {transform_indices = @transform_3, window_bounds = array<i64: 8, 256>}]} {
    %c0_i32 = arith.constant 0 : i32
    %0 = arith.cmpi eq, %arg2, %c0_i32 : i32
    %1 = arith.extui %0 : i1 to i32
    %c0_i32_0 = arith.constant 0 : i32
    %2 = arith.cmpi ne, %1, %c0_i32_0 : i32
    scf.if %2 {
      %cst_12 = arith.constant 0.000000e+00 : f32
      %14 = vector.broadcast %cst_12 : f32 to vector<8x256xf32>
      %c0_13 = arith.constant 0 : index
      %c0_14 = arith.constant 0 : index
      %15 = vector.load %arg7[%c0_13, %c0_14] : memref<8x256xf32, #tpu.memory_space<vmem>>, vector<8x256xf32>
      tpu.vector_store %arg7[%c0_13, %c0_14], %14 {strides = array<i32>} : memref<8x256xf32, #tpu.memory_space<vmem>>, vector<8x256xf32>,
    } else {
    }
    %c0 = arith.constant 0 : index
    %c0_1 = arith.constant 0 : index
    %3 = vector.load %arg7[%c0, %c0_1] : memref<8x256xf32, #tpu.memory_space<vmem>>, vector<8x256xf32>
    %c0_2 = arith.constant 0 : index
    %c0_3 = arith.constant 0 : index
    %c0_4 = arith.constant 0 : index
    %4 = vector.load %arg3[%c0_2, %c0_3, %c0_4] : memref<1x8x1024xbf16, #tpu.memory_space<vmem>>, vector<1x8x1024xbf16>
    %5 = vector.shape_cast %4 : vector<1x8x1024xbf16> to vector<8x1024xbf16>
    %c0_5 = arith.constant 0 : index
    %c0_6 = arith.constant 0 : index
    %c0_7 = arith.constant 0 : index
    %6 = vector.load %arg4[%c0_5, %c0_6, %c0_7] : memref<1x1024x256xbf16, #tpu.memory_space<vmem>>, vector<1x1024x256xbf16>
    %7 = vector.shape_cast %6 : vector<1x1024x256xbf16> to vector<1024x256xbf16>
    %cst = arith.constant dense<0.000000e+00> : vector<8x256xf32>
    %8 = tpu.matmul %5, %7, %cst {dimension_numbers = #tpu.dot_dimension_numbers<[1], [0], [0], [1], [0, 0, 1, 1], [], []>} : vector<8x1024xbf16>, vector<1024x256xbf16>, vector<8x256xf32> -> vector<8x256xf32>
    %9 = arith.addf %3, %8 : vector<8x256xf32>
    %c0_8 = arith.constant 0 : index
    %c0_9 = arith.constant 0 : index
    %10 = vector.load %arg7[%c0_8, %c0_9] : memref<8x256xf32, #tpu.memory_space<vmem>>, vector<8x256xf32>
    tpu.vector_store %arg7[%c0_8, %c0_9], %9 {strides = array<i32>} : memref<8x256xf32, #tpu.memory_space<vmem>>, vector<8x256xf32>,
    %c0_i32_10 = arith.constant 0 : i32
    %11 = arith.cmpi eq, %arg2, %c0_i32_10 : i32
    %12 = arith.extui %11 : i1 to i32
    %c0_i32_11 = arith.constant 0 : i32
    %13 = arith.cmpi ne, %12, %c0_i32_11 : i32
    scf.if %13 {
      %c0_12 = arith.constant 0 : index
      %c0_13 = arith.constant 0 : index
      %14 = vector.load %arg7[%c0_12, %c0_13] : memref<8x256xf32, #tpu.memory_space<vmem>>, vector<8x256xf32>
      %c0_14 = arith.constant 0 : index
      %c0_15 = arith.constant 0 : index
      %15 = vector.load %arg5[%c0_14, %c0_15] : memref<1x256xf32, #tpu.memory_space<vmem>>, vector<1x256xf32>
      %16 = vector.broadcast %15 : vector<1x256xf32> to vector<8x256xf32>
      %17 = arith.addf %14, %16 : vector<8x256xf32>
      %cst_16 = arith.constant 0.000000e+00 : f32
      %18 = vector.broadcast %cst_16 : f32 to vector<8x256xf32>
      %19 = arith.maximumf %17, %18 : vector<8x256xf32>
      %c0_17 = arith.constant 0 : index
      %c0_18 = arith.constant 0 : index
      %20 = vector.load %arg6[%c0_17, %c0_18] : memref<8x256xf32, #tpu.memory_space<vmem>>, vector<8x256xf32>
      tpu.vector_store %arg6[%c0_17, %c0_18], %19 {strides = array<i32>} : memref<8x256xf32, #tpu.memory_space<vmem>>, vector<8x256xf32>,
    } else {
    }
    return
  }
  func.func @transform_0(%arg0: i32, %arg1: i32, %arg2: i32) -> (i32, i32, i32) {
    %c0_i32 = arith.constant 0 : i32
    %c0_i32_0 = arith.constant 0 : i32
    return %arg2, %arg0, %c0_i32 : i32, i32, i32
  }
  func.func @transform_1(%arg0: i32, %arg1: i32, %arg2: i32) -> (i32, i32, i32) {
    %c0_i32 = arith.constant 0 : i32
    %c0_i32_0 = arith.constant 0 : i32
    return %arg2, %c0_i32, %arg1 : i32, i32, i32
  }
  func.func @transform_2(%arg0: i32, %arg1: i32, %arg2: i32) -> (i32, i32) {
    %c0_i32 = arith.constant 0 : i32
    %c0_i32_0 = arith.constant 0 : i32
    return %c0_i32, %arg1 : i32, i32
  }
  func.func @transform_3(%arg0: i32, %arg1: i32, %arg2: i32) -> (i32, i32) {
    %c0_i32 = arith.constant 0 : i32
    return %arg0, %arg1 : i32, i32
  }
}

module attributes {stable_mosaic.version = 11 : i64} {
  func.func @_global_avg_pool_kernel(%arg0: memref<2x4x1024xf32, #tpu.memory_space<vmem>>, %arg1: memref<2x1024xf32, #tpu.memory_space<vmem>>) attributes {dimension_semantics = [], scalar_prefetch = 0 : i64, scratch_operands = 0 : i64, tpu.core_type = #tpu.core_type<tc>} {
    %c0 = arith.constant 0 : index
    %c0_0 = arith.constant 0 : index
    %c0_1 = arith.constant 0 : index
    %0 = vector.load %arg0[%c0, %c0_0, %c0_1] : memref<2x4x1024xf32, #tpu.memory_space<vmem>>, vector<2x4x1024xf32>
    %cst = arith.constant dense<0.000000e+00> : vector<2x1024xf32>
    %1 = vector.multi_reduction <add>, %0, %cst [1] : vector<2x4x1024xf32> to vector<2x1024xf32>
    %cst_2 = arith.constant 4.000000e+00 : f32
    %2 = vector.broadcast %cst_2 : f32 to vector<2x1024xf32>
    %3 = arith.divf %1, %2 : vector<2x1024xf32>
    %c0_3 = arith.constant 0 : index
    %c0_4 = arith.constant 0 : index
    %4 = vector.load %arg1[%c0_3, %c0_4] : memref<2x1024xf32, #tpu.memory_space<vmem>>, vector<2x1024xf32>
    tpu.vector_store %arg1[%c0_3, %c0_4], %3 {strides = array<i32>} : memref<2x1024xf32, #tpu.memory_space<vmem>>, vector<2x1024xf32>,
    return
  }
}

</mosaic_0001>

<bundles_post_ra>
// kernel: feature_vectors_forward.45
= control target key start
LH: loop header
LB: loop body
LE: loop exit
PB: predicated region body
PF: predicated region fallthrough
CT: control target
= control target key end

     0   :  { %s1459_s12 = smov 0   ;;  %s1461_s13 = smov 0   ;;  %s1652_s0 = inlined_call_operand.vmem [shape: bf16[1,512,256], index: 0, kind: input, shape index: {}]   ;;  %s1653_s1 = inlined_call_operand.vmem [shape: bf16[1,256,128], index: 1, kind: input, shape index: {}]   ;;  %s1654_s2 = inlined_call_operand.vmem [shape: f32[1,128], index: 2, kind: input, shape index: {}]   ;;  %s1655_s3 = inlined_call_operand.vmem [shape: f32[512,128], index: 3, kind: output, shape index: {}]  }
   0x1   :  { %s1463_s14 = smov 0  }
   0x2 LB: > { %s32_s15 = sadd.s32 1, %s1433_s13  ;;  %p1141_p0 = scmp.ge.s32.totalorder %s1437_s14, 1  ;;  %s1437_s14 = sphi %s1463_s14, %s13_s14   ;;  %s1433_s13 = sphi %s1461_s13, %s1657_s13   ;;  %s1429_s12 = sphi %s1459_s12, %s1656_s12  }
   0x3   : > { %p34_p1 = scmp.ge.s32.totalorder %s32_s15, 2  ;;  %p189_p2 = scmp.lt.s32.totalorder %s1437_s14, 3 }
   0x5   : > { %s1659_s15 = smov (%p34_p1, %s32_s15), 0  ;;  %p190_p3 = pnand %p1141_p0, %p189_p2 }
   0x6   : > { %v1351_v0 = vld [vmem:[%s1653_s1 + $0x40] sm:$0xff] (!%p190_p3)   ;;  %s1142_s18 = sshll.u32 (!%p190_p3), %s1429_s12, 5  ;;  %v1353_v2 = vld [vmem:[%s1653_s1 + $0x48] sm:$0xff] (!%p190_p3)   ;;  %v1355_v4 = vld [vmem:[%s1653_s1 + $0x50] sm:$0xff] (!%p190_p3)  }
   0x7   : > { %193 = sbr.rel (%p190_p3) target bundleno = 317 (0x13d), region = 32  ;;  %v1352_v1 = vld [vmem:[%s1653_s1] sm:$0xff] (!%p190_p3)   ;;  %1199 = vmatprep.subr.bf16.mxu0 (!%p190_p3), %v1351_v0  ;;  %1311 = vmatprep.subr.bf16.mxu1 (!%p190_p3), %v1351_v0  ;;  %v1354_v3 = vld [vmem:[%s1653_s1 + $0x8] sm:$0xff] (!%p190_p3)   ;;  %p235_p4 = scmp.lt.s32.totalorder (!%p190_p3), %s1142_s18, 63  ;;  %v1356_v5 = vld [vmem:[%s1653_s1 + $0x10] sm:$0xff] (!%p190_p3)  }
   0x8   : > { %1200 = vmatpush3.bf16.msra.mxu0 (!%p190_p3), %v1352_v1  ;;  %1319 = vmatpush3.bf16.msra.mxu1 (!%p190_p3), %v1352_v1  ;;  %v1357_v6 = vld [vmem:[%s1653_s1 + $0x58] sm:$0xff] (!%p190_p3)   ;;  %v1359_v8 = vld [vmem:[%s1653_s1 + $0x60] sm:$0xff] (!%p190_p3)   ;;  %v1361_v10 = vld [vmem:[%s1653_s1 + $0x68] sm:$0xff] (!%p190_p3)  }
   0x9   : > { %1201 = vmatprep.subr.bf16.mxu0 (!%p190_p3), %v1353_v2  ;;  %1312 = vmatprep.subr.bf16.mxu1 (!%p190_p3), %v1353_v2  ;;  %v1358_v7 = vld [vmem:[%s1653_s1 + $0x18] sm:$0xff] (!%p190_p3)   ;;  %v1360_v9 = vld [vmem:[%s1653_s1 + $0x20] sm:$0xff] (!%p190_p3)   ;;  %v1362_v13 = vld [vmem:[%s1653_s1 + $0x28] sm:$0xff] (!%p190_p3)  }
   0xa   : > { %v1363_v14 = vld [vmem:[%s1653_s1 + $0x70] sm:$0xff] (!%p190_p3)   ;;  %v1365_v16 = vld [vmem:[%s1653_s1 + $0x78] sm:$0xff] (!%p190_p3)   ;;  %v1570_v51 = vld [vmem:[%s1654_s2] ss:$0 sm:$0xff] (!%p190_p3) }
   0xb   : > { %v1364_v15 = vld [vmem:[%s1653_s1 + $0x30] sm:$0xff] (!%p190_p3)   ;;  %v1366_v17 = vld [vmem:[%s1653_s1 + $0x38] sm:$0xff] (!%p190_p3)  }
   0xc   : > { %1202 = vmatpush3.bf16.msra.mxu0 (!%p190_p3), %v1354_v3  ;;  %1320 = vmatpush3.bf16.msra.mxu1 (!%p190_p3), %v1354_v3 }
   0xd   : > { %1203 = vmatprep.subr.bf16.mxu0 (!%p190_p3), %v1355_v4  ;;  %1313 = vmatprep.subr.bf16.mxu1 (!%p190_p3), %v1355_v4 }
   0xe   : > { %s1661_s18 = smov (!%p235_p4, %s1142_s18), 63 }
   0xf   : > { %s1198_s6 = sshll.u32 %s1661_s18, 3 }
  0x10   : > { %1204 = vmatpush3.bf16.msra.mxu0 %v1356_v5  ;;  %1321 = vmatpush3.bf16.msra.mxu1 %v1356_v5  ;;  %s1512_s11 = scalar_lea.vmem %s1652_s0, %s1198_s6  ;;  %s1579_s8 = scalar_lea.vmem %s1655_s3, %s1198_s6 }
  0x11   : > { %1205 = vmatprep.subr.bf16.mxu0 %v1357_v6  ;;  %1314 = vmatprep.subr.bf16.mxu1 %v1357_v6  ;;  %v1369_v11 = vld [vmem:[%s1512_s11 + $0x4] ss:$8 sps:$4 sm:$0xff]   ;;  %v1367_v18 = vld [vmem:[%s1512_s11] ss:$8 sps:$4 sm:$0xff]   ;;  %v1373_v20 = vld [vmem:[%s1512_s11 + $0x14] ss:$8 sps:$4 sm:$0xff]  }
  0x12   : > { %v1372_v12 = vld [vmem:[%s1512_s11 + $0x84] ss:$8 sps:$4 sm:$0xff]   ;;  %684 = vmatprep.mubr.bf16.mxu0 %v1369_v11  ;;  %v1370_v19 = vld [vmem:[%s1512_s11 + $0x80] ss:$8 sps:$4 sm:$0xff]   ;;  %v1375_v21 = vld [vmem:[%s1512_s11 + $0x94] ss:$8 sps:$4 sm:$0xff]  }
  0x13   : > { %748 = vmatprep.mubr.bf16.mxu1 %v1372_v12  ;;  %v1377_v22 = vld [vmem:[%s1512_s11 + $0x10] ss:$8 sps:$4 sm:$0xff]   ;;  %v1379_v24 = vld [vmem:[%s1512_s11 + $0x24] ss:$8 sps:$4 sm:$0xff]   ;;  %v1383_v26 = vld [vmem:[%s1512_s11 + $0x20] ss:$8 sps:$4 sm:$0xff]  }
  0x14   : > { %1206 = vmatpush3.bf16.msra.mxu0 %v1358_v7  ;;  %1322 = vmatpush3.bf16.msra.mxu1 %v1358_v7  ;;  %v1378_v23 = vld [vmem:[%s1512_s11 + $0x90] ss:$8 sps:$4 sm:$0xff]   ;;  %v1381_v25 = vld [vmem:[%s1512_s11 + $0xa4] ss:$8 sps:$4 sm:$0xff]   ;;  %v1384_v27 = vld [vmem:[%s1512_s11 + $0xa0] ss:$8 sps:$4 sm:$0xff]  }
  0x15   : > { %1207 = vmatprep.subr.bf16.mxu0 %v1359_v8  ;;  %1315 = vmatprep.subr.bf16.mxu1 %v1359_v8  ;;  %v1385_v28 = vld [vmem:[%s1512_s11 + $0x34] ss:$8 sps:$4 sm:$0xff]   ;;  %v1389_v30 = vld [vmem:[%s1512_s11 + $0x30] ss:$8 sps:$4 sm:$0xff]   ;;  %v1391_v32 = vld [vmem:[%s1512_s11 + $0x44] ss:$8 sps:$4 sm:$0xff]  }
  0x16   : > { %v1387_v29 = vld [vmem:[%s1512_s11 + $0xb4] ss:$8 sps:$4 sm:$0xff]   ;;  %v1390_v31 = vld [vmem:[%s1512_s11 + $0xb0] ss:$8 sps:$4 sm:$0xff]   ;;  %v1393_v33 = vld [vmem:[%s1512_s11 + $0xc4] ss:$8 sps:$4 sm:$0xff]  }
  0x17   : > { %v1395_v34 = vld [vmem:[%s1512_s11 + $0x40] ss:$8 sps:$4 sm:$0xff]   ;;  %v1397_v36 = vld [vmem:[%s1512_s11 + $0x54] ss:$8 sps:$4 sm:$0xff]   ;;  %v1401_v38 = vld [vmem:[%s1512_s11 + $0x50] ss:$8 sps:$4 sm:$0xff]  }
  0x18   : > { %1208 = vmatpush3.bf16.msra.mxu0 %v1360_v9  ;;  %1323 = vmatpush3.bf16.msra.mxu1 %v1360_v9  ;;  %v1396_v35 = vld [vmem:[%s1512_s11 + $0xc0] ss:$8 sps:$4 sm:$0xff]   ;;  %v1399_v37 = vld [vmem:[%s1512_s11 + $0xd4] ss:$8 sps:$4 sm:$0xff]   ;;  %v1402_v39 = vld [vmem:[%s1512_s11 + $0xd0] ss:$8 sps:$4 sm:$0xff]  }
  0x19   : > { %1209 = vmatprep.subr.bf16.mxu0 %v1361_v10  ;;  %1316 = vmatprep.subr.bf16.mxu1 %v1361_v10  ;;  %v1403_v40 = vld [vmem:[%s1512_s11 + $0x64] ss:$8 sps:$4 sm:$0xff]   ;;  %v1407_v42 = vld [vmem:[%s1512_s11 + $0x60] ss:$8 sps:$4 sm:$0xff]   ;;  %v1409_v44 = vld [vmem:[%s1512_s11 + $0x74] ss:$8 sps:$4 sm:$0xff]  }
  0x1a   : > { %v1405_v41 = vld [vmem:[%s1512_s11 + $0xe4] ss:$8 sps:$4 sm:$0xff]   ;;  %v1408_v43 = vld [vmem:[%s1512_s11 + $0xe0] ss:$8 sps:$4 sm:$0xff]   ;;  %v1411_v45 = vld [vmem:[%s1512_s11 + $0xf4] ss:$8 sps:$4 sm:$0xff]  }
  0x1b   : > { %v1413_v46 = vld [vmem:[%s1512_s11 + $0x70] ss:$8 sps:$4 sm:$0xff]  }
  0x1c   : > { %1210 = vmatpush3.bf16.msra.mxu0 %v1362_v13  ;;  %1324 = vmatpush3.bf16.msra.mxu1 %v1362_v13  ;;  %v1414_v47 = vld [vmem:[%s1512_s11 + $0xf0] ss:$8 sps:$4 sm:$0xff]  }
  0x1d   : > { %1211 = vmatprep.subr.bf16.mxu0 %v1363_v14  ;;  %1317 = vmatprep.subr.bf16.mxu1 %v1363_v14 }
  0x20   : > { %1212 = vmatpush3.bf16.msra.mxu0 %v1364_v15  ;;  %1325 = vmatpush3.bf16.msra.mxu1 %v1364_v15 }
  0x21   : > { %1213 = vmatprep.subr.bf16.mxu0 %v1365_v16  ;;  %1318 = vmatprep.subr.bf16.mxu1 %v1365_v16 }
  0x24   : > { %1214 = vmatpush3.bf16.msra.mxu0 %v1366_v17  ;;  %1326 = vmatpush3.bf16.msra.mxu1 %v1366_v17 }
  0x27   : > { %685 = vmatmul.mubr.bf16.vlgmr.msra.gmra.mrb[0].mxu0 %v1367_v18  ;;  %749 = vmatmul.mubr.bf16.vlgmr.msra.gmra.mrb[0].mxu1 %v1370_v19 }
  0x28   : > { %692 = vmatprep.mubr.bf16.mxu0 %v1373_v20  ;;  %756 = vmatprep.mubr.bf16.mxu1 %v1375_v21 }
  0x2f   : > { %693 = vmatmul.mubr.bf16.gmra.mrb[4].mxu0 %v1377_v22  ;;  %757 = vmatmul.mubr.bf16.gmra.mrb[4].mxu1 %v1378_v23 }
  0x30   : > { %700 = vmatprep.mubr.bf16.mxu0 %v1379_v24  ;;  %764 = vmatprep.mubr.bf16.mxu1 %v1381_v25 }
  0x37   : > { %701 = vmatmul.mubr.bf16.gmra.mrb[8].mxu0 %v1383_v26  ;;  %765 = vmatmul.mubr.bf16.gmra.mrb[8].mxu1 %v1384_v27 }
  0x38   : > { %708 = vmatprep.mubr.bf16.mxu0 %v1385_v28  ;;  %772 = vmatprep.mubr.bf16.mxu1 %v1387_v29 }
  0x3f   : > { %709 = vmatmul.mubr.bf16.gmra.mrb[12].mxu0 %v1389_v30  ;;  %773 = vmatmul.mubr.bf16.gmra.mrb[12].mxu1 %v1390_v31 }
  0x40   : > { %716 = vmatprep.mubr.bf16.mxu0 %v1391_v32  ;;  %780 = vmatprep.mubr.bf16.mxu1 %v1393_v33 }
  0x47   : > { %717 = vmatmul.mubr.bf16.gmra.mrb[16].mxu0 %v1395_v34  ;;  %781 = vmatmul.mubr.bf16.gmra.mrb[16].mxu1 %v1396_v35 }
  0x48   : > { %724 = vmatprep.mubr.bf16.mxu0 %v1397_v36  ;;  %788 = vmatprep.mubr.bf16.mxu1 %v1399_v37 }
  0x4f   : > { %725 = vmatmul.mubr.bf16.gmra.mrb[20].mxu0 %v1401_v38  ;;  %789 = vmatmul.mubr.bf16.gmra.mrb[20].mxu1 %v1402_v39 }
  0x50   : > { %732 = vmatprep.mubr.bf16.mxu0 %v1403_v40  ;;  %796 = vmatprep.mubr.bf16.mxu1 %v1405_v41 }
  0x57   : > { %733 = vmatmul.mubr.bf16.gmra.mrb[24].mxu0 %v1407_v42  ;;  %797 = vmatmul.mubr.bf16.gmra.mrb[24].mxu1 %v1408_v43 }
  0x58   : > { %740 = vmatprep.mubr.bf16.mxu0 %v1409_v44  ;;  %804 = vmatprep.mubr.bf16.mxu1 %v1411_v45 }
  0x5f   : > { %741 = vmatmul.mubr.bf16.gmra.mrb[28].mxu0 %v1413_v46  ;;  %805 = vmatmul.mubr.bf16.gmra.mrb[28].mxu1 %v1414_v47 }
  0xfa   : > { %v1215_v48 = vpop.f32.mrb[0].mxu0  ;;  %v1263_v49 = vpop.f32.mrb[0].mxu1 }
  0xfb   : > { %v1216_v50 = vpop.f32.mrb[1].mxu0  ;;  %v1264_v52 = vpop.f32.mrb[1].mxu1 }
  0xfc   : > { %v1217_v53 = vadd.f32 %v1216_v50, %v1215_v48  ;;  %v1265_v54 = vadd.f32 %v1264_v52, %v1263_v49  ;;  %v1218_v55 = vpop.f32.mrb[2].mxu0  ;;  %v1266_v56 = vpop.f32.mrb[2].mxu1 }
  0xfd   : > { %v1219_v57 = vpop.f32.mrb[3].mxu0  ;;  %v1267_v58 = vpop.f32.mrb[3].mxu1 }
  0xfe   : > { %v919_v59 = vadd.f32 %v1217_v53, %v1570_v51  ;;  %v935_v60 = vadd.f32 %v1265_v54, %v1570_v51  ;;  %v1220_v61 = vadd.f32 %v1219_v57, %v1218_v55  ;;  %v1268_v62 = vadd.f32 %v1267_v58, %v1266_v56 }
 0x100   : > { %v951_v63 = vmax.f32 %v919_v59, 0.0  ;;  %v967_v0 = vmax.f32 %v935_v60, 0.0  ;;  %v920_v1 = vadd.f32 %v1220_v61, %v1570_v51  ;;  %v936_v2 = vadd.f32 %v1268_v62, %v1570_v51 }
 0x102   : > { %983 = vst [vmem:[%s1579_s8] sm:$0xff] %v951_v63  ;;  %999 = vst [vmem:[%s1579_s8 + $0x80] sm:$0xff] %v967_v0  ;;  %v952_v3 = vmax.f32 %v920_v1, 0.0  ;;  %v968_v4 = vmax.f32 %v936_v2, 0.0  ;;  %v1221_v5 = vpop.f32.mrb[4].mxu0  ;;  %v1269_v6 = vpop.f32.mrb[4].mxu1 }
 0x103   : > { %v1222_v7 = vpop.f32.mrb[5].mxu0  ;;  %v1270_v8 = vpop.f32.mrb[5].mxu1 }
 0x104   : > { %984 = vst [vmem:[%s1579_s8 + $0x8] sm:$0xff] %v952_v3  ;;  %1000 = vst [vmem:[%s1579_s8 + $0x88] sm:$0xff] %v968_v4  ;;  %v1223_v9 = vadd.f32 %v1222_v7, %v1221_v5  ;;  %v1271_v10 = vadd.f32 %v1270_v8, %v1269_v6  ;;  %v1224_v11 = vpop.f32.mrb[6].mxu0  ;;  %v1272_v12 = vpop.f32.mrb[6].mxu1 }
 0x105   : > { %v1225_v13 = vpop.f32.mrb[7].mxu0  ;;  %v1273_v14 = vpop.f32.mrb[7].mxu1 }
 0x106   : > { %v921_v15 = vadd.f32 %v1223_v9, %v1570_v51  ;;  %v937_v16 = vadd.f32 %v1271_v10, %v1570_v51  ;;  %v1226_v17 = vadd.f32 %v1225_v13, %v1224_v11  ;;  %v1274_v18 = vadd.f32 %v1273_v14, %v1272_v12 }
 0x108   : > { %v953_v19 = vmax.f32 %v921_v15, 0.0  ;;  %v969_v20 = vmax.f32 %v937_v16, 0.0  ;;  %v922_v21 = vadd.f32 %v1226_v17, %v1570_v51  ;;  %v938_v22 = vadd.f32 %v1274_v18, %v1570_v51 }
 0x10a   : > { %985 = vst [vmem:[%s1579_s8 + $0x10] sm:$0xff] %v953_v19  ;;  %1001 = vst [vmem:[%s1579_s8 + $0x90] sm:$0xff] %v969_v20  ;;  %v954_v23 = vmax.f32 %v922_v21, 0.0  ;;  %v970_v24 = vmax.f32 %v938_v22, 0.0  ;;  %v1227_v25 = vpop.f32.mrb[8].mxu0  ;;  %v1275_v26 = vpop.f32.mrb[8].mxu1 }
 0x10b   : > { %v1228_v27 = vpop.f32.mrb[9].mxu0  ;;  %v1276_v28 = vpop.f32.mrb[9].mxu1 }
 0x10c   : > { %986 = vst [vmem:[%s1579_s8 + $0x18] sm:$0xff] %v954_v23  ;;  %1002 = vst [vmem:[%s1579_s8 + $0x98] sm:$0xff] %v970_v24  ;;  %v1229_v29 = vadd.f32 %v1228_v27, %v1227_v25  ;;  %v1277_v30 = vadd.f32 %v1276_v28, %v1275_v26  ;;  %v1230_v31 = vpop.f32.mrb[10].mxu0  ;;  %v1278_v32 = vpop.f32.mrb[10].mxu1 }
 0x10d   : > { %v1231_v33 = vpop.f32.mrb[11].mxu0  ;;  %v1279_v34 = vpop.f32.mrb[11].mxu1 }
 0x10e   : > { %v923_v35 = vadd.f32 %v1229_v29, %v1570_v51  ;;  %v939_v36 = vadd.f32 %v1277_v30, %v1570_v51  ;;  %v1232_v37 = vadd.f32 %v1231_v33, %v1230_v31  ;;  %v1280_v38 = vadd.f32 %v1279_v34, %v1278_v32 }
 0x110   : > { %v955_v39 = vmax.f32 %v923_v35, 0.0  ;;  %v971_v40 = vmax.f32 %v939_v36, 0.0  ;;  %v924_v41 = vadd.f32 %v1232_v37, %v1570_v51  ;;  %v940_v42 = vadd.f32 %v1280_v38, %v1570_v51 }
 0x112   : > { %987 = vst [vmem:[%s1579_s8 + $0x20] sm:$0xff] %v955_v39  ;;  %1003 = vst [vmem:[%s1579_s8 + $0xa0] sm:$0xff] %v971_v40  ;;  %v956_v43 = vmax.f32 %v924_v41, 0.0  ;;  %v972_v44 = vmax.f32 %v940_v42, 0.0  ;;  %v1233_v45 = vpop.f32.mrb[12].mxu0  ;;  %v1281_v46 = vpop.f32.mrb[12].mxu1 }
 0x113   : > { %v1234_v47 = vpop.f32.mrb[13].mxu0  ;;  %v1282_v48 = vpop.f32.mrb[13].mxu1 }
 0x114   : > { %988 = vst [vmem:[%s1579_s8 + $0x28] sm:$0xff] %v956_v43  ;;  %1004 = vst [vmem:[%s1579_s8 + $0xa8] sm:$0xff] %v972_v44  ;;  %v1235_v49 = vadd.f32 %v1234_v47, %v1233_v45  ;;  %v1283_v50 = vadd.f32 %v1282_v48, %v1281_v46  ;;  %v1236_v52 = vpop.f32.mrb[14].mxu0  ;;  %v1284_v53 = vpop.f32.mrb[14].mxu1 }
 0x115   : > { %v1237_v54 = vpop.f32.mrb[15].mxu0  ;;  %v1285_v55 = vpop.f32.mrb[15].mxu1 }
 0x116   : > { %v925_v56 = vadd.f32 %v1235_v49, %v1570_v51  ;;  %v941_v57 = vadd.f32 %v1283_v50, %v1570_v51  ;;  %v1238_v58 = vadd.f32 %v1237_v54, %v1236_v52  ;;  %v1286_v59 = vadd.f32 %v1285_v55, %v1284_v53 }
 0x118   : > { %v957_v60 = vmax.f32 %v925_v56, 0.0  ;;  %v973_v61 = vmax.f32 %v941_v57, 0.0  ;;  %v926_v62 = vadd.f32 %v1238_v58, %v1570_v51  ;;  %v942_v63 = vadd.f32 %v1286_v59, %v1570_v51 }
 0x11a   : > { %989 = vst [vmem:[%s1579_s8 + $0x30] sm:$0xff] %v957_v60  ;;  %1005 = vst [vmem:[%s1579_s8 + $0xb0] sm:$0xff] %v973_v61  ;;  %v958_v0 = vmax.f32 %v926_v62, 0.0  ;;  %v974_v1 = vmax.f32 %v942_v63, 0.0  ;;  %v1239_v2 = vpop.f32.mrb[16].mxu0  ;;  %v1287_v3 = vpop.f32.mrb[16].mxu1 }
 0x11b   : > { %v1240_v4 = vpop.f32.mrb[17].mxu0  ;;  %v1288_v5 = vpop.f32.mrb[17].mxu1 }
 0x11c   : > { %990 = vst [vmem:[%s1579_s8 + $0x38] sm:$0xff] %v958_v0  ;;  %1006 = vst [vmem:[%s1579_s8 + $0xb8] sm:$0xff] %v974_v1  ;;  %v1241_v6 = vadd.f32 %v1240_v4, %v1239_v2  ;;  %v1289_v7 = vadd.f32 %v1288_v5, %v1287_v3  ;;  %v1242_v8 = vpop.f32.mrb[18].mxu0  ;;  %v1290_v9 = vpop.f32.mrb[18].mxu1 }
 0x11d   : > { %v1243_v10 = vpop.f32.mrb[19].mxu0  ;;  %v1291_v11 = vpop.f32.mrb[19].mxu1 }
 0x11e   : > { %v927_v12 = vadd.f32 %v1241_v6, %v1570_v51  ;;  %v943_v13 = vadd.f32 %v1289_v7, %v1570_v51  ;;  %v1244_v14 = vadd.f32 %v1243_v10, %v1242_v8  ;;  %v1292_v15 = vadd.f32 %v1291_v11, %v1290_v9 }
 0x120   : > { %v959_v16 = vmax.f32 %v927_v12, 0.0  ;;  %v975_v17 = vmax.f32 %v943_v13, 0.0  ;;  %v928_v18 = vadd.f32 %v1244_v14, %v1570_v51  ;;  %v944_v19 = vadd.f32 %v1292_v15, %v1570_v51 }
 0x122   : > { %991 = vst [vmem:[%s1579_s8 + $0x40] sm:$0xff] %v959_v16  ;;  %1007 = vst [vmem:[%s1579_s8 + $0xc0] sm:$0xff] %v975_v17  ;;  %v960_v20 = vmax.f32 %v928_v18, 0.0  ;;  %v976_v21 = vmax.f32 %v944_v19, 0.0  ;;  %v1245_v22 = vpop.f32.mrb[20].mxu0  ;;  %v1293_v23 = vpop.f32.mrb[20].mxu1 }
 0x123   : > { %v1246_v24 = vpop.f32.mrb[21].mxu0  ;;  %v1294_v25 = vpop.f32.mrb[21].mxu1 }
 0x124   : > { %992 = vst [vmem:[%s1579_s8 + $0x48] sm:$0xff] %v960_v20  ;;  %1008 = vst [vmem:[%s1579_s8 + $0xc8] sm:$0xff] %v976_v21  ;;  %v1247_v26 = vadd.f32 %v1246_v24, %v1245_v22  ;;  %v1295_v27 = vadd.f32 %v1294_v25, %v1293_v23  ;;  %v1248_v28 = vpop.f32.mrb[22].mxu0  ;;  %v1296_v29 = vpop.f32.mrb[22].mxu1 }
 0x125   : > { %v1249_v30 = vpop.f32.mrb[23].mxu0  ;;  %v1297_v31 = vpop.f32.mrb[23].mxu1 }
 0x126   : > { %v929_v32 = vadd.f32 %v1247_v26, %v1570_v51  ;;  %v945_v33 = vadd.f32 %v1295_v27, %v1570_v51  ;;  %v1250_v34 = vadd.f32 %v1249_v30, %v1248_v28  ;;  %v1298_v35 = vadd.f32 %v1297_v31, %v1296_v29 }
 0x128   : > { %v961_v36 = vmax.f32 %v929_v32, 0.0  ;;  %v977_v37 = vmax.f32 %v945_v33, 0.0  ;;  %v930_v38 = vadd.f32 %v1250_v34, %v1570_v51  ;;  %v946_v39 = vadd.f32 %v1298_v35, %v1570_v51 }
 0x12a   : > { %993 = vst [vmem:[%s1579_s8 + $0x50] sm:$0xff] %v961_v36  ;;  %1009 = vst [vmem:[%s1579_s8 + $0xd0] sm:$0xff] %v977_v37  ;;  %v962_v40 = vmax.f32 %v930_v38, 0.0  ;;  %v978_v41 = vmax.f32 %v946_v39, 0.0  ;;  %v1251_v42 = vpop.f32.mrb[24].mxu0  ;;  %v1299_v43 = vpop.f32.mrb[24].mxu1 }
 0x12b   : > { %v1252_v44 = vpop.f32.mrb[25].mxu0  ;;  %v1300_v45 = vpop.f32.mrb[25].mxu1 }
 0x12c   : > { %994 = vst [vmem:[%s1579_s8 + $0x58] sm:$0xff] %v962_v40  ;;  %1010 = vst [vmem:[%s1579_s8 + $0xd8] sm:$0xff] %v978_v41  ;;  %v1253_v46 = vadd.f32 %v1252_v44, %v1251_v42  ;;  %v1301_v47 = vadd.f32 %v1300_v45, %v1299_v43  ;;  %v1254_v48 = vpop.f32.mrb[26].mxu0  ;;  %v1302_v49 = vpop.f32.mrb[26].mxu1 }
 0x12d   : > { %v1255_v50 = vpop.f32.mrb[27].mxu0  ;;  %v1303_v52 = vpop.f32.mrb[27].mxu1 }
 0x12e   : > { %v931_v53 = vadd.f32 %v1253_v46, %v1570_v51  ;;  %v947_v54 = vadd.f32 %v1301_v47, %v1570_v51  ;;  %v1256_v55 = vadd.f32 %v1255_v50, %v1254_v48  ;;  %v1304_v56 = vadd.f32 %v1303_v52, %v1302_v49 }
 0x130   : > { %v963_v57 = vmax.f32 %v931_v53, 0.0  ;;  %v979_v58 = vmax.f32 %v947_v54, 0.0  ;;  %v932_v59 = vadd.f32 %v1256_v55, %v1570_v51  ;;  %v948_v60 = vadd.f32 %v1304_v56, %v1570_v51 }
 0x132   : > { %995 = vst [vmem:[%s1579_s8 + $0x60] sm:$0xff] %v963_v57  ;;  %1011 = vst [vmem:[%s1579_s8 + $0xe0] sm:$0xff] %v979_v58  ;;  %v964_v61 = vmax.f32 %v932_v59, 0.0  ;;  %v980_v62 = vmax.f32 %v948_v60, 0.0  ;;  %v1257_v63 = vpop.f32.mrb[28].mxu0  ;;  %v1305_v0 = vpop.f32.mrb[28].mxu1 }
 0x133   : > { %v1258_v1 = vpop.f32.mrb[29].mxu0  ;;  %v1306_v2 = vpop.f32.mrb[29].mxu1 }
 0x134   : > { %996 = vst [vmem:[%s1579_s8 + $0x68] sm:$0xff] %v964_v61  ;;  %1012 = vst [vmem:[%s1579_s8 + $0xe8] sm:$0xff] %v980_v62  ;;  %v1259_v3 = vadd.f32 %v1258_v1, %v1257_v63  ;;  %v1307_v4 = vadd.f32 %v1306_v2, %v1305_v0  ;;  %v1260_v5 = vpop.f32.mrb[30].mxu0  ;;  %v1308_v6 = vpop.f32.mrb[30].mxu1 }
 0x135   : > { %v1261_v7 = vpop.f32.mrb[31].mxu0  ;;  %v1309_v8 = vpop.f32.mrb[31].mxu1 }
 0x136   : > { %v933_v9 = vadd.f32 %v1259_v3, %v1570_v51  ;;  %v949_v10 = vadd.f32 %v1307_v4, %v1570_v51  ;;  %v1262_v11 = vadd.f32 %v1261_v7, %v1260_v5  ;;  %v1310_v12 = vadd.f32 %v1309_v8, %v1308_v6 }
 0x138   : > { %v965_v13 = vmax.f32 %v933_v9, 0.0  ;;  %v981_v14 = vmax.f32 %v949_v10, 0.0  ;;  %v934_v15 = vadd.f32 %v1262_v11, %v1570_v51  ;;  %v950_v16 = vadd.f32 %v1310_v12, %v1570_v51 }
 0x13a   : > { %997 = vst [vmem:[%s1579_s8 + $0x70] sm:$0xff] %v965_v13  ;;  %1013 = vst [vmem:[%s1579_s8 + $0xf0] sm:$0xff] %v981_v14  ;;  %v966_v17 = vmax.f32 %v934_v15, 0.0  ;;  %v982_v18 = vmax.f32 %v950_v16, 0.0 }
 0x13c   : > { %998 = vst [vmem:[%s1579_s8 + $0x78] sm:$0xff] %v966_v17  ;;  %1014 = vst [vmem:[%s1579_s8 + $0xf8] sm:$0xff] %v982_v18 }
 0x13d PF: > { %s13_s14 = sadd.s32 1, %s1437_s14   ;;  %s1656_s12 = smov %s1433_s13 }
 0x13e   : > { %p10_p5 = scmp.ge.s32.totalorder %s13_s14, 4   ;;  %s1657_s13 = smov %s1659_s15 }
 0x140   :  { %12 = sbr.rel (!%p10_p5) target bundleno = 2 (0x2), region = 76 }

// kernel: feature_vectors_forward.46
= control target key start
LH: loop header
LB: loop body
LE: loop exit
PB: predicated region body
PF: predicated region fallthrough
CT: control target
= control target key end

     0   :  { %vm167_vm0 = vcmask 1046528   ;;  %vm452_vm1 = vcmask 523264   ;;  %s1011_s0 = inlined_call_operand.vmem [shape: f32[2,9,9,64], index: 0, kind: input, shape index: {}]   ;;  %s1012_s1 = inlined_call_operand.vmem [shape: f32[2,9,9,64], index: 1, kind: input, shape index: {}]   ;;  %s1013_s2 = inlined_call_operand.vmem [shape: f32[2,9,9,64], index: 2, kind: input, shape index: {}]   ;;  %s1014_s3 = inlined_call_operand.vmem [shape: f32[2,9,9,64], index: 3, kind: input, shape index: {}]   ;;  %s1015_s4 = inlined_call_operand.vmem [shape: f32[2,8,8,64], index: 4, kind: output, shape index: {}]  }
   0x1   :  { %v17_v0 = vld [vmem:[%s1011_s0] sm:$0xff]  ;;  %v18_v1 = vld [vmem:[%s1011_s0 + $0x8] sm:$0x1]  ;;  %v507_v2 = vld [vmem:[%s1011_s0 + $0x10] sm:$0xff] }
   0x2   :  { %v20_v3 = vld [vmem:[%s1011_s0 + $0x18] sm:$0x1]  ;;  %v53_v4 = vld [vmem:[%s1012_s1] sm:$0xff]  ;;  %v518_v5 = vld [vmem:[%s1012_s1 + $0x10] sm:$0xff]  ;;  %v168_v6 = vrot.slane %v17_v0, 1  ;;  %v169_v7 = vrot.slane %v18_v1, 1 }
   0x3   :  { %v71_v8 = vld [vmem:[%s1013_s2] sm:$0xff]  ;;  %v72_v9 = vld [vmem:[%s1013_s2 + $0x8] sm:$0x1]  ;;  %v73_v10 = vld [vmem:[%s1013_s2 + $0x10] sm:$0xff]  ;;  %v119_v11 = vmax.f32 %v17_v0, %v53_v4  ;;  %v120_v12 = vmax.f32 %v507_v2, %v518_v5  ;;  %v171_v13 = vrot.slane %v507_v2, 1  ;;  %v172_v14 = vrot.slane %v20_v3, 1 }
   0x4   :  { %v103_v15 = vld [vmem:[%s1014_s3] sm:$0xff]  ;;  %v170_v16 = vsel %vm167_vm0, %v168_v6, %v169_v7  ;;  %v312_v17 = vrot.slane %v71_v8, 1  ;;  %v313_v18 = vrot.slane %v72_v9, 1  ;;  %v315_v19 = vrot.slane %v73_v10, 1  ;;  %v22_v23 = vld [vmem:[%s1011_s0 + $0x28] sm:$0x1] }
   0x5   :  { %v21_v20 = vld [vmem:[%s1011_s0 + $0x20] sm:$0xff]  ;;  %v540_v21 = vsel %vm167_vm0, %v171_v13, %v172_v14  ;;  %v232_v22 = vmax.f32 %v119_v11, %v170_v16  ;;  %v74_v25 = vld [vmem:[%s1013_s2 + $0x18] sm:$0x1]  ;;  %v104_v27 = vld [vmem:[%s1014_s3 + $0x10] sm:$0xff]  ;;  %v175_v31 = vrot.slane %v22_v23, 1 }
   0x6   :  { %v548_v24 = vld [vmem:[%s1012_s1 + $0x20] sm:$0xff]  ;;  %v174_v26 = vrot.slane %v21_v20, 1  ;;  %v233_v28 = vmax.f32 %v120_v12, %v540_v21  ;;  %v23_v32 = vld [vmem:[%s1011_s0 + $0x30] sm:$0xff]  ;;  %v314_v34 = vsel %vm167_vm0, %v312_v17, %v313_v18  ;;  %v316_v35 = vrot.slane %v74_v25, 1  ;;  %v24_v37 = vld [vmem:[%s1011_s0 + $0x38] sm:$0x1] }
   0x7   :  { %v75_v29 = vld [vmem:[%s1013_s2 + $0x20] sm:$0xff]  ;;  %v121_v30 = vmax.f32 %v21_v20, %v548_v24  ;;  %v248_v33 = vmax.f32 %v232_v22, %v71_v8  ;;  %v571_v38 = vld [vmem:[%s1012_s1 + $0x30] sm:$0xff]  ;;  %v76_v42 = vld [vmem:[%s1013_s2 + $0x28] sm:$0x1]  ;;  %v177_v44 = vrot.slane %v23_v32, 1  ;;  %v178_v49 = vrot.slane %v24_v37, 1 }
   0x8   :  { %v318_v36 = vrot.slane %v75_v29, 1  ;;  %v77_v39 = vld [vmem:[%s1013_s2 + $0x30] sm:$0xff]  ;;  %v249_v40 = vmax.f32 %v233_v28, %v73_v10  ;;  %v176_v41 = vsel %vm167_vm0, %v174_v26, %v175_v31  ;;  %v122_v43 = vmax.f32 %v23_v32, %v571_v38  ;;  %v584_v45 = vld [vmem:[%s1011_s0 + $0x40] sm:$0xff]  ;;  %v26_v50 = vld [vmem:[%s1011_s0 + $0x48] sm:$0x1] }
   0x9   :  { %v264_v46 = vmax.f32 %v248_v33, %v103_v15  ;;  %v234_v47 = vmax.f32 %v121_v30, %v176_v41  ;;  %v317_v48 = vsel %vm167_vm0, %v315_v19, %v316_v35  ;;  %v593_v51 = vld [vmem:[%s1012_s1 + $0x40] sm:$0xff]  ;;  %v319_v54 = vrot.slane %v76_v42, 1  ;;  %v78_v56 = vld [vmem:[%s1013_s2 + $0x38] sm:$0x1]  ;;  %v611_v63 = vld [vmem:[%s1011_s0 + $0x50] sm:$0xff] }
   0xa   :  { %v265_v52 = vmax.f32 %v249_v40, %v104_v27  ;;  %v105_v53 = vld [vmem:[%s1014_s3 + $0x20] sm:$0xff]  ;;  %v321_v55 = vrot.slane %v77_v39, 1  ;;  %v123_v58 = vmax.f32 %v584_v45, %v593_v51  ;;  %v179_v61 = vsel %vm167_vm0, %v177_v44, %v178_v49  ;;  %v616_v0 = vld [vmem:[%s1012_s1 + $0x50] sm:$0xff]  ;;  %v28_v12 = vld [vmem:[%s1011_s0 + $0x58] sm:$0x1] }
   0xb   :  { %v79_v57 = vld [vmem:[%s1013_s2 + $0x40] sm:$0xff]  ;;  %v376_v59 = vmax.f32 %v264_v46, %v314_v34  ;;  %v250_v60 = vmax.f32 %v234_v47, %v75_v29  ;;  %v180_v62 = vrot.slane %v584_v45, 1  ;;  %v235_v3 = vmax.f32 %v122_v43, %v179_v61  ;;  %v106_v9 = vld [vmem:[%s1014_s3 + $0x30] sm:$0xff]  ;;  %v80_v16 = vld [vmem:[%s1013_s2 + $0x48] sm:$0x1] }
   0xc   :  { %v377_v1 = vmax.f32 %v265_v52, %v317_v48  ;;  %v320_v4 = vsel %vm167_vm0, %v318_v36, %v319_v54  ;;  %v181_v6 = vrot.slane %v26_v50, 1  ;;  %v322_v10 = vrot.slane %v78_v56, 1  ;;  %v107_v26 = vld [vmem:[%s1014_s3 + $0x40] sm:$0xff]  ;;  %v82_v37 = vld [vmem:[%s1013_s2 + $0x58] sm:$0x1]  ;;  %v670_v44 = vld [vmem:[%s1011_s0 + $0x70] sm:$0xff] }
   0xd   :  { %v392_v7 = vmax.f32 %v376_v59, %v507_v2  ;;  %v266_v8 = vmax.f32 %v250_v60, %v105_v53  ;;  %v324_v11 = vrot.slane %v79_v57, 1  ;;  %v251_v14 = vmax.f32 %v235_v3, %v77_v39  ;;  %v29_v33 = vld [vmem:[%s1011_s0 + $0x60] sm:$0xff]  ;;  %v675_v46 = vld [vmem:[%s1012_s1 + $0x70] sm:$0xff]  ;;  %v32_v56 = vld [vmem:[%s1011_s0 + $0x78] sm:$0x1] }
   0xe   :  { %v393_v13 = vmax.f32 %v377_v1, %v21_v20  ;;  %v182_v15 = vsel %vm167_vm0, %v180_v62, %v181_v6  ;;  %v124_v2 = vmax.f32 %v611_v63, %v616_v0  ;;  %v323_v22 = vsel %vm167_vm0, %v321_v55, %v322_v10  ;;  %v81_v20 = vld [vmem:[%s1013_s2 + $0x50] sm:$0xff]  ;;  %v652_v34 = vld [vmem:[%s1012_s1 + $0x60] sm:$0xff] }
   0xf   :  { %v408_v17 = vmax.f32 %v392_v7, %v518_v5  ;;  %v378_v18 = vmax.f32 %v266_v8, %v320_v4  ;;  %v236_v19 = vmax.f32 %v123_v58, %v182_v15  ;;  %v267_v25 = vmax.f32 %v251_v14, %v106_v9  ;;  %v108_v47 = vld [vmem:[%s1014_s3 + $0x50] sm:$0xff]  ;;  %v711_v6 = vld [vmem:[%s1011_s0 + $0x80] sm:$0xff]  ;;  %v86_v7 = vld [vmem:[%s1013_s2 + $0x78] sm:$0x1] }
  0x10   :  { %v409_v23 = vmax.f32 %v393_v13, %v548_v24  ;;  %v183_v27 = vrot.slane %v611_v63, 1  ;;  %v184_v28 = vrot.slane %v28_v12, 1  ;;  %v325_v31 = vrot.slane %v80_v16, 1  ;;  %v30_v24 = vld [vmem:[%s1011_s0 + $0x68] sm:$0x1]  ;;  %v85_v60 = vld [vmem:[%s1013_s2 + $0x70] sm:$0xff] }
  0x11   :  { %v436_v5 = vmax.f32 %v408_v17, %v540_v21  ;;  %v394_v29 = vmax.f32 %v378_v18, %v23_v32  ;;  %v252_v30 = vmax.f32 %v236_v19, %v79_v57  ;;  %v379_v36 = vmax.f32 %v267_v25, %v323_v22  ;;  %v35_v12 = vld [vmem:[%s1011_s0 + $0x90] sm:$0xff]  ;;  %v735_v18 = vld [vmem:[%s1012_s1 + $0xa0] sm:$0xff] }
  0x12   :  { %v437_v35 = vmax.f32 %v409_v23, %v176_v41  ;;  %v185_v21 = vsel %vm167_vm0, %v183_v27, %v184_v28  ;;  %v327_v32 = vrot.slane %v81_v20, 1  ;;  %v326_v43 = vsel %vm167_vm0, %v324_v11, %v325_v31  ;;  %v83_v41 = vld [vmem:[%s1013_s2 + $0x60] sm:$0xff]  ;;  %v34_v11 = vld [vmem:[%s1011_s0 + $0x88] sm:$0x1]  ;;  %v62_v17 = vld [vmem:[%s1012_s1 + $0x90] sm:$0xff] }
  0x13   :  { %453 = vst.msk [vmem:[%s1015_s4] sm:$0xff] %vm452_vm1, %v436_v5  ;;  %v410_v39 = vmax.f32 %v394_v29, %v571_v38  ;;  %v268_v40 = vmax.f32 %v252_v30, %v107_v26  ;;  %v237_v42 = vmax.f32 %v124_v2, %v185_v21  ;;  %v395_v38 = vmax.f32 %v379_v36, %v584_v45  ;;  %v84_v45 = vld [vmem:[%s1013_s2 + $0x68] sm:$0x1]  ;;  %v36_v28 = vld [vmem:[%s1011_s0 + $0x98] sm:$0x1]  ;;  %v110_v29 = vld [vmem:[%s1014_s3 + $0x70] sm:$0xff] }
  0x14   :  { %454 = vst.msk [vmem:[%s1015_s4 + $0x8] sm:$0xff] %vm452_vm1, %v437_v35  ;;  %v125_v48 = vmax.f32 %v29_v33, %v652_v34  ;;  %v186_v49 = vrot.slane %v29_v33, 1  ;;  %v187_v50 = vrot.slane %v30_v24, 1  ;;  %v328_v55 = vrot.slane %v82_v37, 1  ;;  %v38_v5 = vld [vmem:[%s1011_s0 + $0xa8] sm:$0x1] }
  0x15   :  { %v438_v52 = vmax.f32 %v410_v39, %v179_v61  ;;  %v253_v53 = vmax.f32 %v237_v42, %v81_v20  ;;  %v380_v54 = vmax.f32 %v268_v40, %v326_v43  ;;  %v411_v57 = vmax.f32 %v395_v38, %v593_v51  ;;  %v109_v51 = vld [vmem:[%s1014_s3 + $0x60] sm:$0xff]  ;;  %v88_v37 = vld [vmem:[%s1013_s2 + $0x98] sm:$0x1] }
  0x16   :  { %v188_v58 = vsel %vm167_vm0, %v186_v49, %v187_v50  ;;  %v330_v59 = vrot.slane %v83_v41, 1  ;;  %v126_v61 = vmax.f32 %v670_v44, %v675_v46  ;;  %v329_v4 = vsel %vm167_vm0, %v327_v32, %v328_v55  ;;  %v89_v39 = vld [vmem:[%s1013_s2 + $0xa0] sm:$0xff]  ;;  %v39_v50 = vld [vmem:[%s1011_s0 + $0xb0] sm:$0xff] }
  0x17   :  { %455 = vst.msk [vmem:[%s1015_s4 + $0x10] sm:$0xff] %vm452_vm1, %v438_v52  ;;  %v269_v62 = vmax.f32 %v253_v53, %v108_v47  ;;  %v396_v1 = vmax.f32 %v380_v54, %v611_v63  ;;  %v238_v3 = vmax.f32 %v125_v48, %v188_v58  ;;  %v439_v8 = vmax.f32 %v411_v57, %v182_v15  ;;  %v727_v15 = vld [vmem:[%s1011_s0 + $0xa0] sm:$0xff]  ;;  %v40_v52 = vld [vmem:[%s1011_s0 + $0xb8] sm:$0x1]  ;;  %v782_v53 = vld [vmem:[%s1012_s1 + $0xb0] sm:$0xff] }
  0x18   :  { %v189_v9 = vrot.slane %v670_v44, 1  ;;  %v190_v63 = vrot.slane %v32_v56, 1  ;;  %v331_v10 = vrot.slane %v84_v45, 1  ;;  %v333_v2 = vrot.slane %v85_v60, 1  ;;  %v90_v45 = vld [vmem:[%s1013_s2 + $0xa8] sm:$0x1] }
  0x19   :  { %v412_v13 = vmax.f32 %v396_v1, %v616_v0  ;;  %v254_v14 = vmax.f32 %v238_v3, %v83_v41  ;;  %v381_v16 = vmax.f32 %v269_v62, %v329_v4  ;;  %456 = vst.msk [vmem:[%s1015_s4 + $0x18] sm:$0xff] %vm452_vm1, %v439_v8  ;;  %v334_v22 = vrot.slane %v86_v7, 1  ;;  %v803_v62 = vld [vmem:[%s1011_s0 + $0xc0] sm:$0xff] }
  0x1a   :  { %v191_v0 = vsel %vm167_vm0, %v189_v9, %v190_v63  ;;  %v332_v19 = vsel %vm167_vm0, %v330_v59, %v331_v10  ;;  %v428_v20 = vrot.slane %v711_v6, 1  ;;  %v429_v31 = vrot.slane %v34_v11, 1  ;;  %v808_v1 = vld [vmem:[%s1012_s1 + $0xc0] sm:$0xff] }
  0x1b   :  { %v440_v23 = vmax.f32 %v412_v13, %v185_v21  ;;  %v270_v25 = vmax.f32 %v254_v14, %v109_v51  ;;  %v397_v26 = vmax.f32 %v381_v16, %v29_v33  ;;  %v239_v27 = vmax.f32 %v126_v61, %v191_v0  ;;  %v87_v33 = vld [vmem:[%s1013_s2 + $0x90] sm:$0xff]  ;;  %v112_v3 = vld [vmem:[%s1014_s3 + $0xa0] sm:$0xff]  ;;  %v42_v13 = vld [vmem:[%s1011_s0 + $0xc8] sm:$0x1] }
  0x1c   :  { %v335_v30 = vsel %vm167_vm0, %v333_v2, %v334_v22  ;;  %v127_v24 = vmax.f32 %v35_v12, %v62_v17  ;;  %v128_v35 = vmax.f32 %v727_v15, %v735_v18  ;;  %v192_v40 = vrot.slane %v35_v12, 1  ;;  %v91_v61 = vld [vmem:[%s1013_s2 + $0xb0] sm:$0xff]  ;;  %v92_v14 = vld [vmem:[%s1013_s2 + $0xb8] sm:$0x1] }
  0x1d   :  { %457 = vst.msk [vmem:[%s1015_s4 + $0x20] sm:$0xff] %vm452_vm1, %v440_v23  ;;  %v413_v36 = vmax.f32 %v397_v26, %v652_v34  ;;  %v255_v21 = vmax.f32 %v239_v27, %v85_v60  ;;  %v382_v32 = vmax.f32 %v270_v25, %v332_v19  ;;  %v430_v42 = vsel %vm167_vm0, %v428_v20, %v429_v31  ;;  %v111_v51 = vld [vmem:[%s1014_s3 + $0x90] sm:$0xff]  ;;  %v93_v23 = vld [vmem:[%s1013_s2 + $0xc0] sm:$0xff] }
  0x1e   :  { %v193_v43 = vrot.slane %v36_v28, 1  ;;  %v195_v41 = vrot.slane %v727_v15, 1  ;;  %v196_v38 = vrot.slane %v38_v5, 1  ;;  %v336_v49 = vrot.slane %v87_v33, 1  ;;  %v841_v25 = vld [vmem:[%s1011_s0 + $0xd0] sm:$0xff] }
  0x1f   :  { %v441_v47 = vmax.f32 %v413_v36, %v188_v58  ;;  %v271_v48 = vmax.f32 %v255_v21, %v110_v29  ;;  %v398_v34 = vmax.f32 %v382_v32, %v670_v44  ;;  %v337_v44 = vrot.slane %v88_v37, 1  ;;  %v846_v26 = vld [vmem:[%s1012_s1 + $0xd0] sm:$0xff]  ;;  %v44_v36 = vld [vmem:[%s1011_s0 + $0xd8] sm:$0x1]  ;;  %v94_v21 = vld [vmem:[%s1013_s2 + $0xc8] sm:$0x1] }
  0x20   :  { %v194_v54 = vsel %vm167_vm0, %v192_v40, %v193_v43  ;;  %v786_v55 = vsel %vm167_vm0, %v195_v41, %v196_v38  ;;  %v339_v56 = vrot.slane %v89_v39, 1  ;;  %v129_v7 = vmax.f32 %v39_v50, %v782_v53  ;;  %v113_v27 = vld [vmem:[%s1014_s3 + $0xb0] sm:$0xff] }
  0x21   :  { %458 = vst.msk [vmem:[%s1015_s4 + $0x28] sm:$0xff] %vm452_vm1, %v441_v47  ;;  %v414_v57 = vmax.f32 %v398_v34, %v675_v46  ;;  %v383_v58 = vmax.f32 %v271_v48, %v335_v30  ;;  %v240_v59 = vmax.f32 %v127_v24, %v194_v54  ;;  %v241_v60 = vmax.f32 %v128_v35, %v786_v55  ;;  %v61_v46 = vld [vmem:[%s1012_s1 + $0x80] sm:$0xff]  ;;  %v95_v32 = vld [vmem:[%s1013_s2 + $0xd0] sm:$0xff] }
  0x22   :  { %v338_v4 = vsel %vm167_vm0, %v336_v49, %v337_v44  ;;  %v198_v8 = vrot.slane %v39_v50, 1  ;;  %v199_v9 = vrot.slane %v40_v52, 1  ;;  %v340_v2 = vrot.slane %v90_v45, 1  ;;  %v874_v48 = vld [vmem:[%s1011_s0 + $0xe0] sm:$0xff] }
  0x23   :  { %v442_v63 = vmax.f32 %v414_v57, %v191_v0  ;;  %v399_v10 = vmax.f32 %v383_v58, %v711_v6  ;;  %v256_v11 = vmax.f32 %v240_v59, %v87_v33  ;;  %v257_v12 = vmax.f32 %v241_v60, %v89_v39  ;;  %v879_v34 = vld [vmem:[%s1012_s1 + $0xe0] sm:$0xff]  ;;  %v46_v58 = vld [vmem:[%s1011_s0 + $0xe8] sm:$0x1]  ;;  %v96_v59 = vld [vmem:[%s1013_s2 + $0xd8] sm:$0x1] }
  0x24   :  { %v200_v16 = vsel %vm167_vm0, %v198_v8, %v199_v9  ;;  %v342_v17 = vrot.slane %v91_v61, 1  ;;  %v130_v19 = vmax.f32 %v803_v62, %v808_v1  ;;  %v341_v28 = vsel %vm167_vm0, %v339_v56, %v340_v2  ;;  %v114_v49 = vld [vmem:[%s1014_s3 + $0xc0] sm:$0xff]  ;;  %v99_v2 = vld [vmem:[%s1013_s2 + $0xf0] sm:$0xff] }
  0x25   :  { %459 = vst.msk [vmem:[%s1015_s4 + $0x30] sm:$0xff] %vm452_vm1, %v442_v63  ;;  %v415_v6 = vmax.f32 %v399_v10, %v61_v46  ;;  %v272_v0 = vmax.f32 %v256_v11, %v111_v51  ;;  %v273_v22 = vmax.f32 %v257_v12, %v112_v3  ;;  %v242_v20 = vmax.f32 %v129_v7, %v200_v16  ;;  %v97_v60 = vld [vmem:[%s1013_s2 + $0xe0] sm:$0xff]  ;;  %v904_v51 = vld [vmem:[%s1011_s0 + $0xf0] sm:$0xff]  ;;  %v48_v63 = vld [vmem:[%s1011_s0 + $0xf8] sm:$0x1] }
  0x26   :  { %v201_v5 = vrot.slane %v803_v62, 1  ;;  %v202_v29 = vrot.slane %v42_v13, 1  ;;  %v343_v30 = vrot.slane %v92_v14, 1  ;;  %v345_v40 = vrot.slane %v93_v23, 1  ;;  %v909_v3 = vld [vmem:[%s1012_s1 + $0xf0] sm:$0xff] }
  0x27   :  { %v443_v31 = vmax.f32 %v415_v6, %v430_v42  ;;  %v384_v33 = vmax.f32 %v272_v0, %v338_v4  ;;  %v258_v24 = vmax.f32 %v242_v20, %v91_v61  ;;  %v385_v35 = vmax.f32 %v273_v22, %v341_v28  ;;  %v115_v10 = vld [vmem:[%s1014_s3 + $0xd0] sm:$0xff]  ;;  %v49_v6 = vld [vmem:[%s1011_s0 + $0x100] sm:$0xff] }
  0x28   :  { %v203_v37 = vsel %vm167_vm0, %v201_v5, %v202_v29  ;;  %v344_v39 = vsel %vm167_vm0, %v342_v17, %v343_v30  ;;  %v131_v42 = vmax.f32 %v841_v25, %v846_v26  ;;  %v204_v52 = vrot.slane %v841_v25, 1  ;;  %v69_v0 = vld [vmem:[%s1012_s1 + $0x100] sm:$0xff]  ;;  %v50_v30 = vld [vmem:[%s1011_s0 + $0x108] sm:$0x1] }
  0x29   :  { %460 = vst.msk [vmem:[%s1015_s4 + $0x38] sm:$0xff] %vm452_vm1, %v443_v31  ;;  %v400_v43 = vmax.f32 %v384_v33, %v727_v15  ;;  %v274_v41 = vmax.f32 %v258_v24, %v113_v27  ;;  %v401_v38 = vmax.f32 %v385_v35, %v39_v50  ;;  %v243_v47 = vmax.f32 %v130_v19, %v203_v37  ;;  %v100_v31 = vld [vmem:[%s1013_s2 + $0xf8] sm:$0x1]  ;;  %v116_v24 = vld [vmem:[%s1014_s3 + $0xe0] sm:$0xff] }
  0x2a   :  { %v205_v15 = vrot.slane %v44_v36, 1  ;;  %v346_v54 = vrot.slane %v94_v21, 1  ;;  %v348_v50 = vrot.slane %v95_v32, 1  ;;  %v207_v46 = vrot.slane %v874_v48, 1 }
  0x2b   :  { %v416_v44 = vmax.f32 %v400_v43, %v735_v18  ;;  %v417_v56 = vmax.f32 %v401_v38, %v782_v53  ;;  %v259_v45 = vmax.f32 %v243_v47, %v93_v23  ;;  %v386_v57 = vmax.f32 %v274_v41, %v344_v39  ;;  %v117_v41 = vld [vmem:[%s1014_s3 + $0xf0] sm:$0xff] }
  0x2c   :  { %v206_v61 = vsel %vm167_vm0, %v204_v52, %v205_v15  ;;  %v347_v18 = vsel %vm167_vm0, %v345_v40, %v346_v54  ;;  %v132_v53 = vmax.f32 %v874_v48, %v879_v34  ;;  %v208_v12 = vrot.slane %v46_v58, 1 }
  0x2d   :  { %v444_v4 = vmax.f32 %v416_v44, %v786_v55  ;;  %v445_v7 = vmax.f32 %v417_v56, %v200_v16  ;;  %v275_v8 = vmax.f32 %v259_v45, %v114_v49  ;;  %v402_v9 = vmax.f32 %v386_v57, %v803_v62  ;;  %v98_v55 = vld [vmem:[%s1013_s2 + $0xe8] sm:$0x1] }
  0x2e   :  { %v244_v11 = vmax.f32 %v131_v42, %v206_v61  ;;  %v349_v13 = vrot.slane %v96_v59, 1  ;;  %v351_v14 = vrot.slane %v97_v60, 1  ;;  %v133_v17 = vmax.f32 %v904_v51, %v909_v3  ;;  %v102_v42 = vld [vmem:[%s1013_s2 + $0x108] sm:$0x1] }
  0x2f   :  { %461 = vst.msk [vmem:[%s1015_s4 + $0x40] sm:$0xff] %vm452_vm1, %v444_v4  ;;  %462 = vst.msk [vmem:[%s1015_s4 + $0x48] sm:$0xff] %vm452_vm1, %v445_v7  ;;  %v418_v62 = vmax.f32 %v402_v9, %v808_v1  ;;  %v387_v16 = vmax.f32 %v275_v8, %v347_v18  ;;  %v210_v19 = vrot.slane %v904_v51, 1  ;;  %v209_v1 = vsel %vm167_vm0, %v207_v46, %v208_v12  ;;  %v51_v46 = vld [vmem:[%s1011_s0 + $0x110] sm:$0xff]  ;;  %v52_v4 = vld [vmem:[%s1011_s0 + $0x118] sm:$0x1] }
  0x30   :  { %v260_v22 = vmax.f32 %v244_v11, %v95_v32  ;;  %v350_v20 = vsel %vm167_vm0, %v348_v50, %v349_v13  ;;  %v211_v23 = vrot.slane %v48_v63, 1  ;;  %v245_v5 = vmax.f32 %v132_v53, %v209_v1 }
  0x31   :  { %v446_v27 = vmax.f32 %v418_v62, %v203_v37  ;;  %v403_v28 = vmax.f32 %v387_v16, %v841_v25  ;;  %v352_v29 = vrot.slane %v98_v55, 1  ;;  %v354_v36 = vrot.slane %v99_v2, 1  ;;  %v101_v25 = vld [vmem:[%s1013_s2 + $0x100] sm:$0xff] }
  0x32   :  { %v276_v33 = vmax.f32 %v260_v22, %v115_v10  ;;  %v212_v35 = vsel %vm167_vm0, %v210_v19, %v211_v23  ;;  %v134_v21 = vmax.f32 %v49_v6, %v69_v0  ;;  %v261_v37 = vmax.f32 %v245_v5, %v97_v60 }
  0x33   :  { %463 = vst.msk [vmem:[%s1015_s4 + $0x50] sm:$0xff] %vm452_vm1, %v446_v27  ;;  %v419_v32 = vmax.f32 %v403_v28, %v846_v26  ;;  %v246_v39 = vmax.f32 %v133_v17, %v212_v35  ;;  %v353_v40 = vsel %vm167_vm0, %v351_v14, %v352_v29  ;;  %v213_v38 = vrot.slane %v49_v6, 1  ;;  %v70_v14 = vld [vmem:[%s1012_s1 + $0x110] sm:$0xff] }
  0x34   :  { %v388_v43 = vmax.f32 %v276_v33, %v350_v20  ;;  %v214_v47 = vrot.slane %v50_v30, 1  ;;  %v355_v49 = vrot.slane %v100_v31, 1  ;;  %v277_v15 = vmax.f32 %v261_v37, %v116_v24 }
  0x35   :  { %v447_v52 = vmax.f32 %v419_v32, %v206_v61  ;;  %v262_v54 = vmax.f32 %v246_v39, %v99_v2  ;;  %v357_v26 = vrot.slane %v101_v25, 1  ;;  %v358_v45 = vrot.slane %v102_v42, 1  ;;  %v118_v61 = vld [vmem:[%s1014_s3 + $0x100] sm:$0xff] }
  0x36   :  { %v404_v50 = vmax.f32 %v388_v43, %v874_v48  ;;  %v215_v44 = vsel %vm167_vm0, %v213_v38, %v214_v47  ;;  %v356_v56 = vsel %vm167_vm0, %v354_v36, %v355_v49  ;;  %v389_v58 = vmax.f32 %v277_v15, %v353_v40 }
  0x37   :  { %464 = vst.msk [vmem:[%s1015_s4 + $0x58] sm:$0xff] %vm452_vm1, %v447_v52  ;;  %v278_v57 = vmax.f32 %v262_v54, %v117_v41  ;;  %v247_v59 = vmax.f32 %v134_v21, %v215_v44  ;;  %v359_v8 = vsel %vm167_vm0, %v357_v26, %v358_v45  ;;  %v432_v10 = vrot.slane %v52_v4, 1 }
  0x38   :  { %v420_v60 = vmax.f32 %v404_v50, %v879_v34  ;;  %v405_v48 = vmax.f32 %v389_v58, %v904_v51  ;;  %v431_v51 = vrot.slane %v51_v46, 1 }
  0x39   :  { %v263_v18 = vmax.f32 %v247_v59, %v101_v25  ;;  %v390_v53 = vmax.f32 %v278_v57, %v356_v56 }
  0x3a   :  { %v448_v7 = vmax.f32 %v420_v60, %v209_v1  ;;  %v421_v34 = vmax.f32 %v405_v48, %v909_v3  ;;  %v433_v62 = vsel %vm167_vm0, %v431_v51, %v432_v10 }
  0x3b   :  { %v279_v9 = vmax.f32 %v263_v18, %v118_v61  ;;  %v406_v63 = vmax.f32 %v390_v53, %v49_v6 }
  0x3c   :  { %465 = vst.msk [vmem:[%s1015_s4 + $0x60] sm:$0xff] %vm452_vm1, %v448_v7  ;;  %v449_v11 = vmax.f32 %v421_v34, %v212_v35 }
  0x3d   :  { %v422_v12 = vmax.f32 %v406_v63, %v69_v0  ;;  %v391_v13 = vmax.f32 %v279_v9, %v359_v8 }
  0x3e   :  { %466 = vst.msk [vmem:[%s1015_s4 + $0x68] sm:$0xff] %vm452_vm1, %v449_v11 }
  0x3f   :  { %v450_v3 = vmax.f32 %v422_v12, %v215_v44  ;;  %v407_v55 = vmax.f32 %v391_v13, %v51_v46 }
  0x41   :  { %467 = vst.msk [vmem:[%s1015_s4 + $0x70] sm:$0xff] %vm452_vm1, %v450_v3  ;;  %v423_v16 = vmax.f32 %v407_v55, %v70_v14 }
  0x43   :  { %v451_v2 = vmax.f32 %v423_v16, %v433_v62 }
  0x45   :  { %468 = vst.msk [vmem:[%s1015_s4 + $0x78] sm:$0xff] %vm452_vm1, %v451_v2 }

// kernel: feature_vectors_forward.48
= control target key start
LH: loop header
LB: loop body
LE: loop exit
PB: predicated region body
PF: predicated region fallthrough
CT: control target
= control target key end

     0   :  { %vm139_vm0 = vcmask 523264   ;;  %s563_s1 = inlined_call_operand.vmem [shape: bf16[1,64,128], index: 1, kind: input, shape index: {}]   ;;  %s564_s0 = inlined_call_operand.vmem [shape: bf16[1,128,64], index: 0, kind: input, shape index: {}]   ;;  %s565_s2 = inlined_call_operand.vmem [shape: f32[1,128], index: 2, kind: input, shape index: {}]   ;;  %s566_s3 = inlined_call_operand.vmem [shape: f32[128,128], index: 3, kind: output, shape index: {}]  }
   0x1   :  { %v436_v0 = vld [vmem:[%s563_s1] sm:$0xff]   ;;  %v437_v1 = vld [vmem:[%s563_s1 + $0x8] sm:$0xff]   ;;  %v438_v2 = vld [vmem:[%s563_s1 + $0x10] sm:$0xff]  }
   0x2   :  { %404 = vmatprep.subr.bf16.mxu0 %v436_v0  ;;  %428 = vmatprep.subr.bf16.mxu1 %v436_v0  ;;  %v440_v3 = vld [vmem:[%s564_s0] sm:$0xff]   ;;  %v439_v5 = vld [vmem:[%s563_s1 + $0x18] sm:$0xff]   ;;  %v442_v6 = vld [vmem:[%s564_s0 + $0x8] sm:$0xff]  }
   0x3   :  { %405 = vmatpush3.bf16.msra.mxu0 %v436_v0  ;;  %432 = vmatpush3.bf16.msra.mxu1 %v436_v0  ;;  %v441_v4 = vld [vmem:[%s564_s0 + $0x20] sm:$0xff]   ;;  %v443_v7 = vld [vmem:[%s564_s0 + $0x28] sm:$0xff]   ;;  %v444_v8 = vld [vmem:[%s564_s0 + $0x10] sm:$0xff]  }
   0x4   :  { %406 = vmatprep.subr.bf16.mxu0 %v437_v1  ;;  %429 = vmatprep.subr.bf16.mxu1 %v437_v1  ;;  %v445_v9 = vld [vmem:[%s564_s0 + $0x30] sm:$0xff]   ;;  %v446_v10 = vld [vmem:[%s564_s0 + $0x18] sm:$0xff]   ;;  %v391_v12 = vld [vmem:[%s565_s2] ss:$0 sm:$0xff] }
   0x5   :  { %412 = vmatprep.mubr.msk.bf16.mxu0 %vm139_vm0, %v440_v3  ;;  %420 = vmatprep.mubr.msk.bf16.mxu1 %vm139_vm0, %v441_v4  ;;  %v447_v11 = vld [vmem:[%s564_s0 + $0x38] sm:$0xff]  }
   0x7   :  { %407 = vmatpush3.bf16.msra.mxu0 %v437_v1  ;;  %433 = vmatpush3.bf16.msra.mxu1 %v437_v1 }
   0x8   :  { %408 = vmatprep.subr.bf16.mxu0 %v438_v2  ;;  %430 = vmatprep.subr.bf16.mxu1 %v438_v2 }
   0xb   :  { %409 = vmatpush3.bf16.msra.mxu0 %v438_v2  ;;  %434 = vmatpush3.bf16.msra.mxu1 %v438_v2 }
   0xc   :  { %410 = vmatprep.subr.bf16.mxu0 %v439_v5  ;;  %431 = vmatprep.subr.bf16.mxu1 %v439_v5 }
   0xf   :  { %411 = vmatpush3.bf16.msra.mxu0 %v439_v5  ;;  %435 = vmatpush3.bf16.msra.mxu1 %v439_v5 }
  0x12   :  { %413 = vmatmul.mubr.msk.bf16.vlgmr.msra.gmra.mrb[0].mxu0 %vm139_vm0, %v442_v6  ;;  %421 = vmatmul.mubr.msk.bf16.vlgmr.msra.gmra.mrb[0].mxu1 %vm139_vm0, %v443_v7 }
  0x13   :  { %416 = vmatprep.mubr.msk.bf16.mxu0 %vm139_vm0, %v444_v8  ;;  %424 = vmatprep.mubr.msk.bf16.mxu1 %vm139_vm0, %v445_v9 }
  0x1a   :  { %417 = vmatmul.mubr.msk.bf16.gmra.mrb[4].mxu0 %vm139_vm0, %v446_v10  ;;  %425 = vmatmul.mubr.msk.bf16.gmra.mrb[4].mxu1 %vm139_vm0, %v447_v11 }
  0xe5   :  { %v414_v13 = vpop.f32.mrb[0].mxu0  ;;  %v422_v14 = vpop.f32.mrb[0].mxu1 }
  0xe6   :  { %v321_v15 = vadd.f32 %v414_v13, %v391_v12  ;;  %v329_v16 = vadd.f32 %v422_v14, %v391_v12  ;;  %v198_v17 = vpop.f32.mrb[1].mxu0  ;;  %v230_v18 = vpop.f32.mrb[1].mxu1 }
  0xe7   :  { %v319_v19 = vadd.f32 %v391_v12, %v198_v17  ;;  %v327_v20 = vadd.f32 %v391_v12, %v230_v18  ;;  %v415_v21 = vpop.f32.mrb[2].mxu0  ;;  %v423_v22 = vpop.f32.mrb[2].mxu1 }
  0xe8   :  { %v337_v23 = vmax.f32 %v321_v15, 0.0  ;;  %v345_v24 = vmax.f32 %v329_v16, 0.0  ;;  %v322_v25 = vadd.f32 %v415_v21, %v391_v12  ;;  %v330_v26 = vadd.f32 %v423_v22, %v391_v12  ;;  %v201_v27 = vpop.f32.mrb[3].mxu0  ;;  %v233_v28 = vpop.f32.mrb[3].mxu1 }
  0xe9   :  { %v335_v29 = vmax.f32 %v319_v19, 0.0  ;;  %v343_v30 = vmax.f32 %v327_v20, 0.0  ;;  %v320_v31 = vadd.f32 %v391_v12, %v201_v27  ;;  %v328_v32 = vadd.f32 %v391_v12, %v233_v28 }
  0xea   :  { %353 = vst [vmem:[%s566_s3 + $0x10] sm:$0xff] %v337_v23  ;;  %361 = vst [vmem:[%s566_s3 + $0x50] sm:$0xff] %v345_v24  ;;  %v338_v33 = vmax.f32 %v322_v25, 0.0  ;;  %v346_v34 = vmax.f32 %v330_v26, 0.0 }
  0xeb   :  { %351 = vst [vmem:[%s566_s3] sm:$0xff] %v335_v29  ;;  %359 = vst [vmem:[%s566_s3 + $0x40] sm:$0xff] %v343_v30  ;;  %v336_v35 = vmax.f32 %v320_v31, 0.0  ;;  %v344_v36 = vmax.f32 %v328_v32, 0.0 }
  0xec   :  { %354 = vst [vmem:[%s566_s3 + $0x18] sm:$0xff] %v338_v33  ;;  %362 = vst [vmem:[%s566_s3 + $0x58] sm:$0xff] %v346_v34 }
  0xed   :  { %352 = vst [vmem:[%s566_s3 + $0x8] sm:$0xff] %v336_v35  ;;  %360 = vst [vmem:[%s566_s3 + $0x48] sm:$0xff] %v344_v36  ;;  %v418_v37 = vpop.f32.mrb[4].mxu0  ;;  %v426_v38 = vpop.f32.mrb[4].mxu1 }
  0xee   :  { %v325_v39 = vadd.f32 %v418_v37, %v391_v12  ;;  %v333_v40 = vadd.f32 %v426_v38, %v391_v12  ;;  %v214_v41 = vpop.f32.mrb[5].mxu0  ;;  %v246_v42 = vpop.f32.mrb[5].mxu1 }
  0xef   :  { %v323_v43 = vadd.f32 %v391_v12, %v214_v41  ;;  %v331_v44 = vadd.f32 %v391_v12, %v246_v42  ;;  %v419_v45 = vpop.f32.mrb[6].mxu0  ;;  %v427_v46 = vpop.f32.mrb[6].mxu1 }
  0xf0   :  { %v341_v47 = vmax.f32 %v325_v39, 0.0  ;;  %v349_v48 = vmax.f32 %v333_v40, 0.0  ;;  %v326_v49 = vadd.f32 %v419_v45, %v391_v12  ;;  %v334_v50 = vadd.f32 %v427_v46, %v391_v12  ;;  %v217_v51 = vpop.f32.mrb[7].mxu0  ;;  %v249_v52 = vpop.f32.mrb[7].mxu1 }
  0xf1   :  { %v339_v53 = vmax.f32 %v323_v43, 0.0  ;;  %v347_v54 = vmax.f32 %v331_v44, 0.0  ;;  %v324_v55 = vadd.f32 %v391_v12, %v217_v51  ;;  %v332_v56 = vadd.f32 %v391_v12, %v249_v52 }
  0xf2   :  { %357 = vst [vmem:[%s566_s3 + $0x30] sm:$0xff] %v341_v47  ;;  %365 = vst [vmem:[%s566_s3 + $0x70] sm:$0xff] %v349_v48  ;;  %v342_v57 = vmax.f32 %v326_v49, 0.0  ;;  %v350_v58 = vmax.f32 %v334_v50, 0.0 }
  0xf3   :  { %355 = vst [vmem:[%s566_s3 + $0x20] sm:$0xff] %v339_v53  ;;  %363 = vst [vmem:[%s566_s3 + $0x60] sm:$0xff] %v347_v54  ;;  %v340_v59 = vmax.f32 %v324_v55, 0.0  ;;  %v348_v60 = vmax.f32 %v332_v56, 0.0 }
  0xf4   :  { %358 = vst [vmem:[%s566_s3 + $0x38] sm:$0xff] %v342_v57  ;;  %366 = vst [vmem:[%s566_s3 + $0x78] sm:$0xff] %v350_v58 }
  0xf5   :  { %356 = vst [vmem:[%s566_s3 + $0x28] sm:$0xff] %v340_v59  ;;  %364 = vst [vmem:[%s566_s3 + $0x68] sm:$0xff] %v348_v60 }

// kernel: feature_vectors_forward.47
= control target key start
LH: loop header
LB: loop body
LE: loop exit
PB: predicated region body
PF: predicated region fallthrough
CT: control target
= control target key end

     0   :  { %v557_v1 = vmov 0   ;;  %vm187_vm0 = vcmask 523264   ;;  %v426_v17 = vlaneseq  ;;  %s769_s1 = inlined_call_operand.vmem [shape: bf16[1,64,256], index: 1, kind: input, shape index: {}]   ;;  %s770_s0 = inlined_call_operand.vmem [shape: bf16[1,128,64], index: 0, kind: input, shape index: {}]   ;;  %s771_s2 = inlined_call_operand.vmem [shape: f32[1,256], index: 2, kind: input, shape index: {}]   ;;  %s772_s3 = inlined_call_operand.vmem [shape: f32[128,256], index: 3, kind: output, shape index: {}]  }
   0x1   :  { %v537_v0 = vld [vmem:[%s769_s1 + $0x4] ss:$8 sps:$4 sm:$0xff]   ;;  %244 = vmatprep.mubr.bf16.mxu0 %v557_v1  ;;  %284 = vmatprep.mubr.bf16.mxu1 %v557_v1  ;;  %v539_v2 = vld [vmem:[%s769_s1] ss:$8 sps:$4 sm:$0xff]   ;;  %v540_v3 = vld [vmem:[%s769_s1 + $0x14] ss:$8 sps:$4 sm:$0xff]  }
   0x2   :  { %212 = vmatprep.subr.bf16.mxu0 %v537_v0  ;;  %528 = vmatprep.subr.bf16.mxu1 %v537_v0  ;;  %v542_v4 = vld [vmem:[%s769_s1 + $0x10] ss:$8 sps:$4 sm:$0xff]   ;;  %v543_v5 = vld [vmem:[%s769_s1 + $0x24] ss:$8 sps:$4 sm:$0xff]   ;;  %v545_v6 = vld [vmem:[%s769_s1 + $0x20] ss:$8 sps:$4 sm:$0xff]  }
   0x3   :  { %213 = vmatpush1.bf16.msra.mxu0 %v539_v2  ;;  %532 = vmatpush1.bf16.msra.mxu1 %v539_v2  ;;  %v546_v7 = vld [vmem:[%s769_s1 + $0x34] ss:$8 sps:$4 sm:$0xff]   ;;  %v548_v8 = vld [vmem:[%s769_s1 + $0x30] ss:$8 sps:$4 sm:$0xff]   ;;  %v549_v9 = vld [vmem:[%s770_s0] sm:$0xff]   ;;  %v427_v18 = vshrl.u32 %v426_v17, 7 }
   0x4   :  { %214 = vmatprep.subr.bf16.mxu0 %v540_v3  ;;  %529 = vmatprep.subr.bf16.mxu1 %v540_v3  ;;  %v550_v10 = vld [vmem:[%s770_s0 + $0x20] sm:$0xff]   ;;  %v551_v11 = vld [vmem:[%s770_s0 + $0x8] sm:$0xff]   ;;  %v553_v13 = vld [vmem:[%s770_s0 + $0x10] sm:$0xff]  }
   0x5   :  { %v552_v12 = vld [vmem:[%s770_s0 + $0x28] sm:$0xff]   ;;  %v554_v14 = vld [vmem:[%s770_s0 + $0x30] sm:$0xff]   ;;  %v555_v15 = vld [vmem:[%s770_s0 + $0x18] sm:$0xff]   ;;  %v428_v19 = vsub.s32 0, %v427_v18  ;;  %v432_v21 = vsub.s32 1, %v427_v18 }
   0x6   :  { %v556_v16 = vld [vmem:[%s770_s0 + $0x38] sm:$0xff]   ;;  %v424_v20 = vld [vmem:[%s771_s2] sm:$0x3] }
   0x7   :  { %215 = vmatpush1.bf16.msra.mxu0 %v542_v4  ;;  %533 = vmatpush1.bf16.msra.mxu1 %v542_v4  ;;  %v637_v22 = vrot.slane %v424_v20, %v428_v19  ;;  %v639_v23 = vrot.slane %v424_v20, %v432_v21 }
   0x8   :  { %216 = vmatprep.subr.bf16.mxu0 %v543_v5  ;;  %530 = vmatprep.subr.bf16.mxu1 %v543_v5 }
   0xb   :  { %217 = vmatpush1.bf16.msra.mxu0 %v545_v6  ;;  %534 = vmatpush1.bf16.msra.mxu1 %v545_v6 }
   0xc   :  { %218 = vmatprep.subr.bf16.mxu0 %v546_v7  ;;  %531 = vmatprep.subr.bf16.mxu1 %v546_v7 }
   0xf   :  { %219 = vmatpush1.bf16.msra.mxu0 %v548_v8  ;;  %535 = vmatpush1.bf16.msra.mxu1 %v548_v8 }
  0x12   :  { %520 = vmatmul.mubr.msk.bf16.vlgmr.msra.gmra.mrb[0].mxu0 %vm187_vm0, %v549_v9  ;;  %524 = vmatmul.mubr.msk.bf16.vlgmr.msra.gmra.mrb[0].mxu1 %vm187_vm0, %v550_v10 }
  0x13   :  { %254 = vmatprep.mubr.bf16.mxu0 %v557_v1  ;;  %294 = vmatprep.mubr.bf16.mxu1 %v557_v1 }
  0x1a   :  { %521 = vmatmul.mubr.msk.bf16.gmra.mrb[4].mxu0 %vm187_vm0, %v551_v11  ;;  %525 = vmatmul.mubr.msk.bf16.gmra.mrb[4].mxu1 %vm187_vm0, %v552_v12 }
  0x1b   :  { %264 = vmatprep.mubr.bf16.mxu0 %v557_v1  ;;  %304 = vmatprep.mubr.bf16.mxu1 %v557_v1 }
  0x22   :  { %522 = vmatmul.mubr.msk.bf16.gmra.mrb[8].mxu0 %vm187_vm0, %v553_v13  ;;  %526 = vmatmul.mubr.msk.bf16.gmra.mrb[8].mxu1 %vm187_vm0, %v554_v14 }
  0x23   :  { %274 = vmatprep.mubr.bf16.mxu0 %v557_v1  ;;  %314 = vmatprep.mubr.bf16.mxu1 %v557_v1 }
  0x2a   :  { %523 = vmatmul.mubr.msk.bf16.gmra.mrb[12].mxu0 %vm187_vm0, %v555_v15  ;;  %527 = vmatmul.mubr.msk.bf16.gmra.mrb[12].mxu1 %vm187_vm0, %v556_v16 }
  0xe5   :  { %v246_v24 = vpop.f32.mrb[0].mxu0  ;;  %v286_v25 = vpop.f32.mrb[0].mxu1 }
  0xe6   :  { %v436_v26 = vadd.f32 %v637_v22, %v246_v24  ;;  %v452_v27 = vadd.f32 %v637_v22, %v286_v25  ;;  %v248_v28 = vpop.f32.mrb[1].mxu0  ;;  %v288_v29 = vpop.f32.mrb[1].mxu1 }
  0xe7   :  { %v437_v30 = vadd.f32 %v639_v23, %v248_v28  ;;  %v453_v31 = vadd.f32 %v639_v23, %v288_v29  ;;  %v250_v32 = vpop.f32.mrb[2].mxu0  ;;  %v290_v33 = vpop.f32.mrb[2].mxu1 }
  0xe8   :  { %468 = vst [vmem:[%s772_s3] sm:$0xff] %v436_v26  ;;  %484 = vst [vmem:[%s772_s3 + $0x80] sm:$0xff] %v452_v27  ;;  %v438_v34 = vadd.f32 %v637_v22, %v250_v32  ;;  %v454_v35 = vadd.f32 %v637_v22, %v290_v33  ;;  %v252_v36 = vpop.f32.mrb[3].mxu0  ;;  %v292_v37 = vpop.f32.mrb[3].mxu1 }
  0xe9   :  { %469 = vst [vmem:[%s772_s3 + $0x8] sm:$0xff] %v437_v30  ;;  %485 = vst [vmem:[%s772_s3 + $0x88] sm:$0xff] %v453_v31  ;;  %v439_v38 = vadd.f32 %v639_v23, %v252_v36  ;;  %v455_v39 = vadd.f32 %v639_v23, %v292_v37 }
  0xea   :  { %470 = vst [vmem:[%s772_s3 + $0x10] sm:$0xff] %v438_v34  ;;  %486 = vst [vmem:[%s772_s3 + $0x90] sm:$0xff] %v454_v35 }
  0xeb   :  { %471 = vst [vmem:[%s772_s3 + $0x18] sm:$0xff] %v439_v38  ;;  %487 = vst [vmem:[%s772_s3 + $0x98] sm:$0xff] %v455_v39 }
  0xed   :  { %v256_v40 = vpop.f32.mrb[4].mxu0  ;;  %v296_v41 = vpop.f32.mrb[4].mxu1 }
  0xee   :  { %v440_v42 = vadd.f32 %v637_v22, %v256_v40  ;;  %v456_v43 = vadd.f32 %v637_v22, %v296_v41  ;;  %v258_v44 = vpop.f32.mrb[5].mxu0  ;;  %v298_v45 = vpop.f32.mrb[5].mxu1 }
  0xef   :  { %v441_v46 = vadd.f32 %v639_v23, %v258_v44  ;;  %v457_v47 = vadd.f32 %v639_v23, %v298_v45  ;;  %v260_v48 = vpop.f32.mrb[6].mxu0  ;;  %v300_v49 = vpop.f32.mrb[6].mxu1 }
  0xf0   :  { %472 = vst [vmem:[%s772_s3 + $0x20] sm:$0xff] %v440_v42  ;;  %488 = vst [vmem:[%s772_s3 + $0xa0] sm:$0xff] %v456_v43  ;;  %v442_v50 = vadd.f32 %v637_v22, %v260_v48  ;;  %v458_v51 = vadd.f32 %v637_v22, %v300_v49  ;;  %v262_v52 = vpop.f32.mrb[7].mxu0  ;;  %v302_v53 = vpop.f32.mrb[7].mxu1 }
  0xf1   :  { %473 = vst [vmem:[%s772_s3 + $0x28] sm:$0xff] %v441_v46  ;;  %489 = vst [vmem:[%s772_s3 + $0xa8] sm:$0xff] %v457_v47  ;;  %v443_v54 = vadd.f32 %v639_v23, %v262_v52  ;;  %v459_v55 = vadd.f32 %v639_v23, %v302_v53 }
  0xf2   :  { %474 = vst [vmem:[%s772_s3 + $0x30] sm:$0xff] %v442_v50  ;;  %490 = vst [vmem:[%s772_s3 + $0xb0] sm:$0xff] %v458_v51 }
  0xf3   :  { %475 = vst [vmem:[%s772_s3 + $0x38] sm:$0xff] %v443_v54  ;;  %491 = vst [vmem:[%s772_s3 + $0xb8] sm:$0xff] %v459_v55 }
  0xf5   :  { %v266_v56 = vpop.f32.mrb[8].mxu0  ;;  %v306_v57 = vpop.f32.mrb[8].mxu1 }
  0xf6   :  { %v444_v58 = vadd.f32 %v637_v22, %v266_v56  ;;  %v460_v59 = vadd.f32 %v637_v22, %v306_v57  ;;  %v268_v60 = vpop.f32.mrb[9].mxu0  ;;  %v308_v61 = vpop.f32.mrb[9].mxu1 }
  0xf7   :  { %v445_v62 = vadd.f32 %v639_v23, %v268_v60  ;;  %v461_v63 = vadd.f32 %v639_v23, %v308_v61  ;;  %v270_v0 = vpop.f32.mrb[10].mxu0  ;;  %v310_v1 = vpop.f32.mrb[10].mxu1 }
  0xf8   :  { %476 = vst [vmem:[%s772_s3 + $0x40] sm:$0xff] %v444_v58  ;;  %492 = vst [vmem:[%s772_s3 + $0xc0] sm:$0xff] %v460_v59  ;;  %v446_v2 = vadd.f32 %v637_v22, %v270_v0  ;;  %v462_v3 = vadd.f32 %v637_v22, %v310_v1  ;;  %v272_v4 = vpop.f32.mrb[11].mxu0  ;;  %v312_v5 = vpop.f32.mrb[11].mxu1 }
  0xf9   :  { %477 = vst [vmem:[%s772_s3 + $0x48] sm:$0xff] %v445_v62  ;;  %493 = vst [vmem:[%s772_s3 + $0xc8] sm:$0xff] %v461_v63  ;;  %v447_v6 = vadd.f32 %v639_v23, %v272_v4  ;;  %v463_v7 = vadd.f32 %v639_v23, %v312_v5 }
  0xfa   :  { %478 = vst [vmem:[%s772_s3 + $0x50] sm:$0xff] %v446_v2  ;;  %494 = vst [vmem:[%s772_s3 + $0xd0] sm:$0xff] %v462_v3 }
  0xfb   :  { %479 = vst [vmem:[%s772_s3 + $0x58] sm:$0xff] %v447_v6  ;;  %495 = vst [vmem:[%s772_s3 + $0xd8] sm:$0xff] %v463_v7 }
  0xfd   :  { %v276_v8 = vpop.f32.mrb[12].mxu0  ;;  %v316_v9 = vpop.f32.mrb[12].mxu1 }
  0xfe   :  { %v448_v10 = vadd.f32 %v637_v22, %v276_v8  ;;  %v464_v11 = vadd.f32 %v637_v22, %v316_v9  ;;  %v278_v12 = vpop.f32.mrb[13].mxu0  ;;  %v318_v13 = vpop.f32.mrb[13].mxu1 }
  0xff   :  { %v449_v14 = vadd.f32 %v639_v23, %v278_v12  ;;  %v465_v15 = vadd.f32 %v639_v23, %v318_v13  ;;  %v280_v16 = vpop.f32.mrb[14].mxu0  ;;  %v320_v17 = vpop.f32.mrb[14].mxu1 }
 0x100   :  { %480 = vst [vmem:[%s772_s3 + $0x60] sm:$0xff] %v448_v10  ;;  %496 = vst [vmem:[%s772_s3 + $0xe0] sm:$0xff] %v464_v11  ;;  %v450_v18 = vadd.f32 %v637_v22, %v280_v16  ;;  %v466_v19 = vadd.f32 %v637_v22, %v320_v17  ;;  %v282_v20 = vpop.f32.mrb[15].mxu0  ;;  %v322_v21 = vpop.f32.mrb[15].mxu1 }
 0x101   :  { %481 = vst [vmem:[%s772_s3 + $0x68] sm:$0xff] %v449_v14  ;;  %497 = vst [vmem:[%s772_s3 + $0xe8] sm:$0xff] %v465_v15  ;;  %v451_v24 = vadd.f32 %v639_v23, %v282_v20  ;;  %v467_v25 = vadd.f32 %v639_v23, %v322_v21 }
 0x102   :  { %482 = vst [vmem:[%s772_s3 + $0x70] sm:$0xff] %v450_v18  ;;  %498 = vst [vmem:[%s772_s3 + $0xf0] sm:$0xff] %v466_v19 }
 0x103   :  { %483 = vst [vmem:[%s772_s3 + $0x78] sm:$0xff] %v451_v24  ;;  %499 = vst [vmem:[%s772_s3 + $0xf8] sm:$0xff] %v467_v25 }

// kernel: feature_vectors_forward.49
= control target key start
LH: loop header
LB: loop body
LE: loop exit
PB: predicated region body
PF: predicated region fallthrough
CT: control target
= control target key end

     0   :  { %s889_s12 = smov 0   ;;  %s891_s13 = smov 0   ;;  %s1003_s0 = inlined_call_operand.vmem [shape: bf16[9,128,64], index: 0, kind: input, shape index: {}]   ;;  %s1004_s1 = inlined_call_operand.vmem [shape: bf16[9,64,128], index: 1, kind: input, shape index: {}]   ;;  %s1005_s2 = inlined_call_operand.vmem [shape: f32[1,128], index: 2, kind: input, shape index: {}]   ;;  %s1006_s3 = inlined_call_operand.vmem [shape: f32[128,128], index: 3, kind: output, shape index: {}]  }
   0x1   :  { %s893_s14 = smov 0  }
   0x2 LB: > { %s25_s15 = sadd.s32 1, %s862_s13  ;;  %p729_p0 = scmp.ge.s32.totalorder %s866_s14, 1  ;;  %s866_s14 = sphi %s893_s14, %s13_s14   ;;  %s862_s13 = sphi %s891_s13, %s1008_s13   ;;  %s858_s12 = sphi %s889_s12, %s1007_s12  }
   0x3   : > { %p26_p1 = scmp.ge.s32.totalorder %s25_s15, 9  ;;  %p188_p2 = scmp.lt.s32.totalorder %s866_s14, 10 }
   0x5   : > { %s1010_s15 = smov (%p26_p1, %s25_s15), 0  ;;  %p189_p3 = pnand %p729_p0, %p188_p2 }
   0x6   : > { %p231_p4 = scmp.lt.s32.totalorder (!%p189_p3), %s858_s12, 8  ;;  %p734_p5 = scmp.ne.s32.totalorder (!%p189_p3), %s858_s12, 0 }
   0x7   : > { %192 = sbr.rel (%p189_p3) target bundleno = 280 (0x118), region = 32 }
   0xe   : > { %s232_s16 = scalar_select %p231_p4, %s858_s12, 8 }
   0xf   : > { %264 = sbr.rel (%p734_p5) target bundleno = 24 (0x18), region = 36  ;;  %v868_v0 = vmov (!%p734_p5), 0.0  }
  0x10   : > { %s761_s17 = sshll.u32 %s232_s16, 6  ;;  %s762_s18 = sshll.u32 %s232_s16, 5  ;;  %265 = vst [vmem:[#allocation2] sm:$0xff] (!%p734_p5), %v868_v0  ;;  %266 = vst [vmem:[#allocation2 + $0x8] sm:$0xff] (!%p734_p5), %v868_v0 }
  0x11   : > { %s914_s21 = scalar_lea.vmem %s1003_s0, %s761_s17  ;;  %s919_s24 = scalar_lea.vmem %s1004_s1, %s762_s18  ;;  %267 = vst [vmem:[#allocation2 + $0x10] sm:$0xff] (!%p734_p5), %v868_v0  ;;  %268 = vst [vmem:[#allocation2 + $0x18] sm:$0xff] (!%p734_p5), %v868_v0 }
  0x12   : > { %269 = vst [vmem:[#allocation2 + $0x20] sm:$0xff] (!%p734_p5), %v868_v0  ;;  %270 = vst [vmem:[#allocation2 + $0x28] sm:$0xff] (!%p734_p5), %v868_v0 }
  0x13   : > { %271 = vst [vmem:[#allocation2 + $0x30] sm:$0xff] (!%p734_p5), %v868_v0  ;;  %272 = vst [vmem:[#allocation2 + $0x38] sm:$0xff] (!%p734_p5), %v868_v0 }
  0x14   : > { %273 = vst [vmem:[#allocation2 + $0x40] sm:$0xff] (!%p734_p5), %v868_v0  ;;  %274 = vst [vmem:[#allocation2 + $0x48] sm:$0xff] (!%p734_p5), %v868_v0 }
  0x15   : > { %275 = vst [vmem:[#allocation2 + $0x50] sm:$0xff] (!%p734_p5), %v868_v0  ;;  %276 = vst [vmem:[#allocation2 + $0x58] sm:$0xff] (!%p734_p5), %v868_v0 }
  0x16   : > { %277 = vst [vmem:[#allocation2 + $0x60] sm:$0xff] %v868_v0  ;;  %278 = vst [vmem:[#allocation2 + $0x68] sm:$0xff] %v868_v0 }
  0x17   : > { %279 = vst [vmem:[#allocation2 + $0x70] sm:$0xff] %v868_v0  ;;  %280 = vst [vmem:[#allocation2 + $0x78] sm:$0xff] %v868_v0 }
  0x18 PF: > { %v832_v1 = vld [vmem:[%s919_s24] sm:$0xff]   ;;  %v833_v2 = vld [vmem:[%s919_s24 + $0x8] sm:$0xff]   ;;  %v834_v3 = vld [vmem:[%s919_s24 + $0x10] sm:$0xff]   ;;  %vm385_vm0 = vcmask 523264   ;;  %p755_p6 = scmp.ne.s32.totalorder %s858_s12, 8 }
  0x19   : > { %775 = vmatprep.subr.bf16.mxu0 %v832_v1  ;;  %799 = vmatprep.subr.bf16.mxu1 %v832_v1  ;;  %v836_v4 = vld [vmem:[%s914_s21] sm:$0xff]   ;;  %v835_v6 = vld [vmem:[%s919_s24 + $0x18] sm:$0xff]   ;;  %v838_v7 = vld [vmem:[%s914_s21 + $0x8] sm:$0xff]  }
  0x1a   : > { %776 = vmatpush3.bf16.msra.mxu0 %v832_v1  ;;  %803 = vmatpush3.bf16.msra.mxu1 %v832_v1  ;;  %v837_v5 = vld [vmem:[%s914_s21 + $0x20] sm:$0xff]   ;;  %v839_v8 = vld [vmem:[%s914_s21 + $0x28] sm:$0xff]   ;;  %v840_v9 = vld [vmem:[%s914_s21 + $0x10] sm:$0xff]  }
  0x1b   : > { %777 = vmatprep.subr.bf16.mxu0 %v833_v2  ;;  %800 = vmatprep.subr.bf16.mxu1 %v833_v2  ;;  %v841_v10 = vld [vmem:[%s914_s21 + $0x30] sm:$0xff]   ;;  %v842_v11 = vld [vmem:[%s914_s21 + $0x18] sm:$0xff]   ;;  %v281_v15 = vld [vmem:[#allocation2] sm:$0xff] }
  0x1c   : > { %783 = vmatprep.mubr.msk.bf16.mxu0 %vm385_vm0, %v836_v4  ;;  %791 = vmatprep.mubr.msk.bf16.mxu1 %vm385_vm0, %v837_v5  ;;  %v843_v12 = vld [vmem:[%s914_s21 + $0x38] sm:$0xff]   ;;  %v283_v13 = vld [vmem:[#allocation2 + $0x10] sm:$0xff]  ;;  %v282_v25 = vld [vmem:[#allocation2 + $0x8] sm:$0xff] }
  0x1d   : > { %v289_v16 = vld [vmem:[#allocation2 + $0x40] sm:$0xff]  ;;  %v284_v19 = vld [vmem:[#allocation2 + $0x18] sm:$0xff]  ;;  %v290_v26 = vld [vmem:[#allocation2 + $0x48] sm:$0xff] }
  0x1e   : > { %778 = vmatpush3.bf16.msra.mxu0 %v833_v2  ;;  %804 = vmatpush3.bf16.msra.mxu1 %v833_v2  ;;  %v291_v14 = vld [vmem:[#allocation2 + $0x50] sm:$0xff]  ;;  %v292_v20 = vld [vmem:[#allocation2 + $0x58] sm:$0xff]  ;;  %v285_v39 = vld [vmem:[#allocation2 + $0x20] sm:$0xff] }
  0x1f   : > { %779 = vmatprep.subr.bf16.mxu0 %v834_v3  ;;  %801 = vmatprep.subr.bf16.mxu1 %v834_v3  ;;  %v287_v37 = vld [vmem:[#allocation2 + $0x30] sm:$0xff]  ;;  %v293_v40 = vld [vmem:[#allocation2 + $0x60] sm:$0xff]  ;;  %v288_v43 = vld [vmem:[#allocation2 + $0x38] sm:$0xff] }
  0x20   : > { %v295_v38 = vld [vmem:[#allocation2 + $0x70] sm:$0xff]  ;;  %v296_v44 = vld [vmem:[#allocation2 + $0x78] sm:$0xff]  ;;  %v286_v49 = vld [vmem:[#allocation2 + $0x28] sm:$0xff] }
  0x21   : > { %v294_v50 = vld [vmem:[#allocation2 + $0x68] sm:$0xff]  ;;  %v756_v62 = vld [vmem:[%s1005_s2] ss:$0 sm:$0xff] (!%p755_p6) }
  0x22   : > { %780 = vmatpush3.bf16.msra.mxu0 %v834_v3  ;;  %805 = vmatpush3.bf16.msra.mxu1 %v834_v3 }
  0x23   : > { %781 = vmatprep.subr.bf16.mxu0 %v835_v6  ;;  %802 = vmatprep.subr.bf16.mxu1 %v835_v6 }
  0x26   : > { %782 = vmatpush3.bf16.msra.mxu0 %v835_v6  ;;  %806 = vmatpush3.bf16.msra.mxu1 %v835_v6 }
  0x29   : > { %784 = vmatmul.mubr.msk.bf16.vlgmr.msra.gmra.mrb[0].mxu0 %vm385_vm0, %v838_v7  ;;  %792 = vmatmul.mubr.msk.bf16.vlgmr.msra.gmra.mrb[0].mxu1 %vm385_vm0, %v839_v8 }
  0x2a   : > { %787 = vmatprep.mubr.msk.bf16.mxu0 %vm385_vm0, %v840_v9  ;;  %795 = vmatprep.mubr.msk.bf16.mxu1 %vm385_vm0, %v841_v10 }
  0x31   : > { %788 = vmatmul.mubr.msk.bf16.gmra.mrb[4].mxu0 %vm385_vm0, %v842_v11  ;;  %796 = vmatmul.mubr.msk.bf16.gmra.mrb[4].mxu1 %vm385_vm0, %v843_v12 }
  0xfc   : > { %v785_v17 = vpop.f32.mrb[0].mxu0  ;;  %v793_v18 = vpop.f32.mrb[0].mxu1 }
  0xfd   : > { %v509_v21 = vadd.f32 %v785_v17, %v283_v13  ;;  %v517_v22 = vadd.f32 %v793_v18, %v291_v14  ;;  %v444_v23 = vpop.f32.mrb[1].mxu0  ;;  %v476_v24 = vpop.f32.mrb[1].mxu1 }
  0xfe   : > { %v507_v27 = vadd.f32 %v444_v23, %v281_v15  ;;  %v515_v28 = vadd.f32 %v476_v24, %v289_v16  ;;  %v786_v29 = vpop.f32.mrb[2].mxu0  ;;  %v794_v30 = vpop.f32.mrb[2].mxu1 }
  0xff   : > { %525 = vst [vmem:[#allocation2 + $0x10] sm:$0xff] %v509_v21  ;;  %533 = vst [vmem:[#allocation2 + $0x50] sm:$0xff] %v517_v22  ;;  %v510_v31 = vadd.f32 %v786_v29, %v284_v19  ;;  %v518_v32 = vadd.f32 %v794_v30, %v292_v20  ;;  %v447_v33 = vpop.f32.mrb[3].mxu0  ;;  %v479_v34 = vpop.f32.mrb[3].mxu1 }
 0x100   : > { %523 = vst [vmem:[#allocation2] sm:$0xff] %v507_v27  ;;  %531 = vst [vmem:[#allocation2 + $0x40] sm:$0xff] %v515_v28  ;;  %v508_v35 = vadd.f32 %v447_v33, %v282_v25  ;;  %v516_v36 = vadd.f32 %v479_v34, %v290_v26 }
 0x101   : > { %526 = vst [vmem:[#allocation2 + $0x18] sm:$0xff] %v510_v31  ;;  %534 = vst [vmem:[#allocation2 + $0x58] sm:$0xff] %v518_v32 }
 0x102   : > { %524 = vst [vmem:[#allocation2 + $0x8] sm:$0xff] %v508_v35  ;;  %532 = vst [vmem:[#allocation2 + $0x48] sm:$0xff] %v516_v36 }
 0x104   : > { %v789_v41 = vpop.f32.mrb[4].mxu0  ;;  %v797_v42 = vpop.f32.mrb[4].mxu1  ;;  %542 = sbr.rel (%p755_p6) target bundleno = 280 (0x118), region = 40 }
 0x105   : > { %v513_v45 = vadd.f32 %v789_v41, %v287_v37  ;;  %v521_v46 = vadd.f32 %v797_v42, %v295_v38  ;;  %v460_v47 = vpop.f32.mrb[5].mxu0  ;;  %v492_v48 = vpop.f32.mrb[5].mxu1 }
 0x106   : > { %v511_v51 = vadd.f32 %v460_v47, %v285_v39  ;;  %v519_v52 = vadd.f32 %v492_v48, %v293_v40  ;;  %v790_v53 = vpop.f32.mrb[6].mxu0  ;;  %v798_v54 = vpop.f32.mrb[6].mxu1  ;;  %v545_v2 = vld [vmem:[#allocation2 + $0x10] sm:$0xff] (!%p755_p6) }
 0x107   : > { %529 = vst [vmem:[#allocation2 + $0x30] sm:$0xff] %v513_v45  ;;  %537 = vst [vmem:[#allocation2 + $0x70] sm:$0xff] %v521_v46  ;;  %v514_v55 = vadd.f32 %v790_v53, %v288_v43  ;;  %v522_v56 = vadd.f32 %v798_v54, %v296_v44  ;;  %v463_v57 = vpop.f32.mrb[7].mxu0  ;;  %v495_v58 = vpop.f32.mrb[7].mxu1  ;;  %v543_v61 = vld [vmem:[#allocation2] sm:$0xff] (!%p755_p6)  ;;  %v568_v5 = vadd.f32 (!%p755_p6), %v756_v62, %v545_v2  ;;  %v553_v17 = vld [vmem:[#allocation2 + $0x50] sm:$0xff] (!%p755_p6) }
 0x108   : > { %527 = vst [vmem:[#allocation2 + $0x20] sm:$0xff] %v511_v51  ;;  %535 = vst [vmem:[#allocation2 + $0x60] sm:$0xff] %v519_v52  ;;  %v512_v59 = vadd.f32 %v463_v57, %v286_v49  ;;  %v520_v60 = vadd.f32 %v495_v58, %v294_v50  ;;  %v566_v0 = vadd.f32 (!%p755_p6), %v756_v62, %v543_v61  ;;  %v546_v3 = vld [vmem:[#allocation2 + $0x18] sm:$0xff] (!%p755_p6)  ;;  %v551_v15 = vld [vmem:[#allocation2 + $0x40] sm:$0xff] (!%p755_p6) }
 0x109   : > { %530 = vst [vmem:[#allocation2 + $0x38] sm:$0xff] %v514_v55  ;;  %538 = vst [vmem:[#allocation2 + $0x78] sm:$0xff] %v522_v56  ;;  %v544_v63 = vld [vmem:[#allocation2 + $0x8] sm:$0xff] (!%p755_p6)  ;;  %v569_v6 = vadd.f32 (!%p755_p6), %v756_v62, %v546_v3  ;;  %v584_v18 = vmax.f32 (!%p755_p6), %v568_v5, 0.0  ;;  %v554_v22 = vld [vmem:[#allocation2 + $0x58] sm:$0xff] (!%p755_p6)  ;;  %v574_v27 = vadd.f32 (!%p755_p6), %v756_v62, %v551_v15  ;;  %v576_v32 = vadd.f32 (!%p755_p6), %v756_v62, %v553_v17 }
 0x10a   : > { %528 = vst [vmem:[#allocation2 + $0x28] sm:$0xff] %v512_v59  ;;  %536 = vst [vmem:[#allocation2 + $0x68] sm:$0xff] %v520_v60  ;;  %v567_v1 = vadd.f32 (!%p755_p6), %v756_v62, %v544_v63  ;;  %v582_v11 = vmax.f32 (!%p755_p6), %v566_v0, 0.0  ;;  %v552_v16 = vld [vmem:[#allocation2 + $0x48] sm:$0xff] (!%p755_p6)  ;;  %v577_v33 = vadd.f32 (!%p755_p6), %v756_v62, %v554_v22 }
 0x10b   : > { %v585_v19 = vmax.f32 %v569_v6, 0.0  ;;  %v575_v28 = vadd.f32 %v756_v62, %v552_v16  ;;  %600 = vst [vmem:[%s1006_s3 + $0x10] sm:$0xff] %v584_v18  ;;  %v590_v35 = vmax.f32 %v574_v27, 0.0  ;;  %v592_v39 = vmax.f32 %v576_v32, 0.0 }
 0x10c   : > { %v583_v12 = vmax.f32 %v567_v1, 0.0  ;;  %598 = vst [vmem:[%s1006_s3] sm:$0xff] %v582_v11  ;;  %v593_v40 = vmax.f32 %v577_v33, 0.0 }
 0x10d   : > { %601 = vst [vmem:[%s1006_s3 + $0x18] sm:$0xff] %v585_v19  ;;  %v591_v36 = vmax.f32 %v575_v28, 0.0  ;;  %606 = vst [vmem:[%s1006_s3 + $0x40] sm:$0xff] %v590_v35 }
 0x10e   : > { %v549_v9 = vld [vmem:[#allocation2 + $0x30] sm:$0xff]  ;;  %599 = vst [vmem:[%s1006_s3 + $0x8] sm:$0xff] %v583_v12  ;;  %608 = vst [vmem:[%s1006_s3 + $0x50] sm:$0xff] %v592_v39 }
 0x10f   : > { %v547_v4 = vld [vmem:[#allocation2 + $0x20] sm:$0xff]  ;;  %v572_v14 = vadd.f32 %v756_v62, %v549_v9  ;;  %v557_v29 = vld [vmem:[#allocation2 + $0x70] sm:$0xff]  ;;  %607 = vst [vmem:[%s1006_s3 + $0x48] sm:$0xff] %v591_v36  ;;  %609 = vst [vmem:[%s1006_s3 + $0x58] sm:$0xff] %v593_v40 }
 0x110   : > { %v570_v7 = vadd.f32 %v756_v62, %v547_v4  ;;  %v550_v10 = vld [vmem:[#allocation2 + $0x38] sm:$0xff]  ;;  %v555_v23 = vld [vmem:[#allocation2 + $0x60] sm:$0xff]  ;;  %v580_v38 = vadd.f32 %v756_v62, %v557_v29 }
 0x111   : > { %v548_v8 = vld [vmem:[#allocation2 + $0x28] sm:$0xff]  ;;  %v573_v21 = vadd.f32 %v756_v62, %v550_v10  ;;  %v588_v26 = vmax.f32 %v572_v14, 0.0  ;;  %v558_v30 = vld [vmem:[#allocation2 + $0x78] sm:$0xff]  ;;  %v578_v34 = vadd.f32 %v756_v62, %v555_v23 }
 0x112   : > { %v571_v13 = vadd.f32 %v756_v62, %v548_v8  ;;  %v586_v20 = vmax.f32 %v570_v7, 0.0  ;;  %v556_v24 = vld [vmem:[#allocation2 + $0x68] sm:$0xff]  ;;  %v581_v42 = vadd.f32 %v756_v62, %v558_v30  ;;  %v596_v44 = vmax.f32 %v580_v38, 0.0 }
 0x113   : > { %v589_v31 = vmax.f32 %v573_v21, 0.0  ;;  %604 = vst [vmem:[%s1006_s3 + $0x30] sm:$0xff] %v588_v26  ;;  %v579_v37 = vadd.f32 %v756_v62, %v556_v24  ;;  %v594_v41 = vmax.f32 %v578_v34, 0.0 }
 0x114   : > { %v587_v25 = vmax.f32 %v571_v13, 0.0  ;;  %602 = vst [vmem:[%s1006_s3 + $0x20] sm:$0xff] %v586_v20  ;;  %v597_v45 = vmax.f32 %v581_v42, 0.0  ;;  %612 = vst [vmem:[%s1006_s3 + $0x70] sm:$0xff] %v596_v44 }
 0x115   : > { %605 = vst [vmem:[%s1006_s3 + $0x38] sm:$0xff] %v589_v31  ;;  %v595_v43 = vmax.f32 %v579_v37, 0.0  ;;  %610 = vst [vmem:[%s1006_s3 + $0x60] sm:$0xff] %v594_v41 }
 0x116   : > { %603 = vst [vmem:[%s1006_s3 + $0x28] sm:$0xff] %v587_v25  ;;  %613 = vst [vmem:[%s1006_s3 + $0x78] sm:$0xff] %v597_v45 }
 0x117   : > { %611 = vst [vmem:[%s1006_s3 + $0x68] sm:$0xff] %v595_v43 }
 0x118 PF: > { %s13_s14 = sadd.s32 1, %s866_s14   ;;  %s1007_s12 = smov %s862_s13 }
 0x119   : > { %p10_p7 = scmp.ge.s32.totalorder %s13_s14, 11   ;;  %s1008_s13 = smov %s1010_s15 }
 0x11b   :  { %12 = sbr.rel (!%p10_p7) target bundleno = 2 (0x2), region = 76 }

// kernel: feature_vectors_forward.50
= control target key start
LH: loop header
LB: loop body
LE: loop exit
PB: predicated region body
PF: predicated region fallthrough
CT: control target
= control target key end

     0   :  { %v656_v1 = vmov 0   ;;  %vm190_vm0 = vcmask 523264   ;;  %v429_v17 = vlaneseq  ;;  %s969_s1 = inlined_call_operand.vmem [shape: bf16[1,64,256], index: 1, kind: input, shape index: {}]   ;;  %s970_s0 = inlined_call_operand.vmem [shape: bf16[1,128,64], index: 0, kind: input, shape index: {}]   ;;  %s971_s2 = inlined_call_operand.vmem [shape: f32[1,256], index: 2, kind: input, shape index: {}]   ;;  %s972_s3 = inlined_call_operand.vmem [shape: f32[128,256], index: 3, kind: input, shape index: {}]   ;;  %s973_s4 = inlined_call_operand.vmem [shape: f32[128,256], index: 4, kind: output, shape index: {}]  }
   0x1   :  { %v636_v0 = vld [vmem:[%s969_s1 + $0x4] ss:$8 sps:$4 sm:$0xff]   ;;  %247 = vmatprep.mubr.bf16.mxu0 %v656_v1  ;;  %287 = vmatprep.mubr.bf16.mxu1 %v656_v1  ;;  %v638_v2 = vld [vmem:[%s969_s1] ss:$8 sps:$4 sm:$0xff]   ;;  %v639_v3 = vld [vmem:[%s969_s1 + $0x14] ss:$8 sps:$4 sm:$0xff]  }
   0x2   :  { %215 = vmatprep.subr.bf16.mxu0 %v636_v0  ;;  %627 = vmatprep.subr.bf16.mxu1 %v636_v0  ;;  %v641_v4 = vld [vmem:[%s969_s1 + $0x10] ss:$8 sps:$4 sm:$0xff]   ;;  %v642_v5 = vld [vmem:[%s969_s1 + $0x24] ss:$8 sps:$4 sm:$0xff]   ;;  %v644_v6 = vld [vmem:[%s969_s1 + $0x20] ss:$8 sps:$4 sm:$0xff]  }
   0x3   :  { %216 = vmatpush1.bf16.msra.mxu0 %v638_v2  ;;  %631 = vmatpush1.bf16.msra.mxu1 %v638_v2  ;;  %v645_v7 = vld [vmem:[%s969_s1 + $0x34] ss:$8 sps:$4 sm:$0xff]   ;;  %v647_v8 = vld [vmem:[%s969_s1 + $0x30] ss:$8 sps:$4 sm:$0xff]   ;;  %v648_v9 = vld [vmem:[%s970_s0] sm:$0xff]   ;;  %v430_v18 = vshrl.u32 %v429_v17, 7 }
   0x4   :  { %217 = vmatprep.subr.bf16.mxu0 %v639_v3  ;;  %628 = vmatprep.subr.bf16.mxu1 %v639_v3  ;;  %v649_v10 = vld [vmem:[%s970_s0 + $0x20] sm:$0xff]   ;;  %v650_v11 = vld [vmem:[%s970_s0 + $0x8] sm:$0xff]   ;;  %v652_v13 = vld [vmem:[%s970_s0 + $0x10] sm:$0xff]  }
   0x5   :  { %v651_v12 = vld [vmem:[%s970_s0 + $0x28] sm:$0xff]   ;;  %v653_v14 = vld [vmem:[%s970_s0 + $0x30] sm:$0xff]   ;;  %v654_v15 = vld [vmem:[%s970_s0 + $0x18] sm:$0xff]   ;;  %v431_v19 = vsub.s32 0, %v430_v18  ;;  %v435_v21 = vsub.s32 1, %v430_v18 }
   0x6   :  { %v655_v16 = vld [vmem:[%s970_s0 + $0x38] sm:$0xff]   ;;  %v427_v20 = vld [vmem:[%s971_s2] sm:$0x3]  ;;  %v472_v31 = vld [vmem:[%s972_s3 + $0x8] sm:$0xff] }
   0x7   :  { %218 = vmatpush1.bf16.msra.mxu0 %v641_v4  ;;  %632 = vmatpush1.bf16.msra.mxu1 %v641_v4  ;;  %v741_v22 = vrot.slane %v427_v20, %v431_v19  ;;  %v743_v23 = vrot.slane %v427_v20, %v435_v21  ;;  %v471_v25 = vld [vmem:[%s972_s3] sm:$0xff]  ;;  %v488_v33 = vld [vmem:[%s972_s3 + $0x88] sm:$0xff]  ;;  %v473_v37 = vld [vmem:[%s972_s3 + $0x10] sm:$0xff] }
   0x8   :  { %219 = vmatprep.subr.bf16.mxu0 %v642_v5  ;;  %629 = vmatprep.subr.bf16.mxu1 %v642_v5  ;;  %v487_v27 = vld [vmem:[%s972_s3 + $0x80] sm:$0xff]  ;;  %v489_v39 = vld [vmem:[%s972_s3 + $0x90] sm:$0xff]  ;;  %v474_v45 = vld [vmem:[%s972_s3 + $0x18] sm:$0xff] }
   0x9   :  { %v490_v47 = vld [vmem:[%s972_s3 + $0x98] sm:$0xff]  ;;  %v491_v3 = vld [vmem:[%s972_s3 + $0xa0] sm:$0xff] }
   0xa   :  { %v478_v21 = vld [vmem:[%s972_s3 + $0x38] sm:$0xff] }
   0xb   :  { %220 = vmatpush1.bf16.msra.mxu0 %v644_v6  ;;  %633 = vmatpush1.bf16.msra.mxu1 %v644_v6 }
   0xc   :  { %221 = vmatprep.subr.bf16.mxu0 %v645_v7  ;;  %630 = vmatprep.subr.bf16.mxu1 %v645_v7  ;;  %v476_v7 = vld [vmem:[%s972_s3 + $0x28] sm:$0xff] }
   0xf   :  { %222 = vmatpush1.bf16.msra.mxu0 %v647_v8  ;;  %634 = vmatpush1.bf16.msra.mxu1 %v647_v8 }
  0x12   :  { %619 = vmatmul.mubr.msk.bf16.vlgmr.msra.gmra.mrb[0].mxu0 %vm190_vm0, %v648_v9  ;;  %623 = vmatmul.mubr.msk.bf16.vlgmr.msra.gmra.mrb[0].mxu1 %vm190_vm0, %v649_v10  ;;  %v492_v9 = vld [vmem:[%s972_s3 + $0xa8] sm:$0xff] }
  0x13   :  { %257 = vmatprep.mubr.bf16.mxu0 %v656_v1  ;;  %297 = vmatprep.mubr.bf16.mxu1 %v656_v1 }
  0x1a   :  { %620 = vmatmul.mubr.msk.bf16.gmra.mrb[4].mxu0 %vm190_vm0, %v650_v11  ;;  %624 = vmatmul.mubr.msk.bf16.gmra.mrb[4].mxu1 %vm190_vm0, %v651_v12 }
  0x1b   :  { %267 = vmatprep.mubr.bf16.mxu0 %v656_v1  ;;  %307 = vmatprep.mubr.bf16.mxu1 %v656_v1 }
  0x22   :  { %621 = vmatmul.mubr.msk.bf16.gmra.mrb[8].mxu0 %vm190_vm0, %v652_v13  ;;  %625 = vmatmul.mubr.msk.bf16.gmra.mrb[8].mxu1 %vm190_vm0, %v653_v14  ;;  %v477_v13 = vld [vmem:[%s972_s3 + $0x30] sm:$0xff] }
  0x23   :  { %277 = vmatprep.mubr.bf16.mxu0 %v656_v1  ;;  %317 = vmatprep.mubr.bf16.mxu1 %v656_v1  ;;  %v475_v1 = vld [vmem:[%s972_s3 + $0x20] sm:$0xff] }
  0x2a   :  { %622 = vmatmul.mubr.msk.bf16.gmra.mrb[12].mxu0 %vm190_vm0, %v654_v15  ;;  %626 = vmatmul.mubr.msk.bf16.gmra.mrb[12].mxu1 %vm190_vm0, %v655_v16  ;;  %v493_v15 = vld [vmem:[%s972_s3 + $0xb0] sm:$0xff] }
  0xe5   :  { %v249_v24 = vpop.f32.mrb[0].mxu0  ;;  %v289_v26 = vpop.f32.mrb[0].mxu1 }
  0xe6   :  { %v439_v28 = vadd.f32 %v741_v22, %v249_v24  ;;  %v455_v29 = vadd.f32 %v741_v22, %v289_v26  ;;  %v251_v30 = vpop.f32.mrb[1].mxu0  ;;  %v291_v32 = vpop.f32.mrb[1].mxu1 }
  0xe7   :  { %v440_v34 = vadd.f32 %v743_v23, %v251_v30  ;;  %v456_v35 = vadd.f32 %v743_v23, %v291_v32  ;;  %v253_v36 = vpop.f32.mrb[2].mxu0  ;;  %v293_v38 = vpop.f32.mrb[2].mxu1 }
  0xe8   :  { %v503_v40 = vadd.f32 %v471_v25, %v439_v28  ;;  %v519_v41 = vadd.f32 %v487_v27, %v455_v29  ;;  %v441_v42 = vadd.f32 %v741_v22, %v253_v36  ;;  %v457_v43 = vadd.f32 %v741_v22, %v293_v38  ;;  %v255_v44 = vpop.f32.mrb[3].mxu0  ;;  %v295_v46 = vpop.f32.mrb[3].mxu1  ;;  %v494_v25 = vld [vmem:[%s972_s3 + $0xb8] sm:$0xff] }
  0xe9   :  { %v504_v48 = vadd.f32 %v472_v31, %v440_v34  ;;  %v520_v49 = vadd.f32 %v488_v33, %v456_v35  ;;  %v442_v50 = vadd.f32 %v743_v23, %v255_v44  ;;  %v458_v51 = vadd.f32 %v743_v23, %v295_v46 }
  0xea   :  { %v535_v52 = vmax.f32 %v503_v40, 0.0  ;;  %v551_v53 = vmax.f32 %v519_v41, 0.0  ;;  %v505_v54 = vadd.f32 %v473_v37, %v441_v42  ;;  %v521_v55 = vadd.f32 %v489_v39, %v457_v43  ;;  %v479_v43 = vld [vmem:[%s972_s3 + $0x40] sm:$0xff] }
  0xeb   :  { %v536_v56 = vmax.f32 %v504_v48, 0.0  ;;  %v552_v57 = vmax.f32 %v520_v49, 0.0  ;;  %v506_v58 = vadd.f32 %v474_v45, %v442_v50  ;;  %v522_v59 = vadd.f32 %v490_v47, %v458_v51  ;;  %v495_v45 = vld [vmem:[%s972_s3 + $0xc0] sm:$0xff]  ;;  %v480_v49 = vld [vmem:[%s972_s3 + $0x48] sm:$0xff] }
  0xec   :  { %567 = vst [vmem:[%s973_s4] sm:$0xff] %v535_v52  ;;  %583 = vst [vmem:[%s973_s4 + $0x80] sm:$0xff] %v551_v53  ;;  %v537_v60 = vmax.f32 %v505_v54, 0.0  ;;  %v553_v61 = vmax.f32 %v521_v55, 0.0  ;;  %v496_v51 = vld [vmem:[%s972_s3 + $0xc8] sm:$0xff]  ;;  %v481_v55 = vld [vmem:[%s972_s3 + $0x50] sm:$0xff] }
  0xed   :  { %568 = vst [vmem:[%s973_s4 + $0x8] sm:$0xff] %v536_v56  ;;  %584 = vst [vmem:[%s973_s4 + $0x88] sm:$0xff] %v552_v57  ;;  %v538_v62 = vmax.f32 %v506_v58, 0.0  ;;  %v554_v63 = vmax.f32 %v522_v59, 0.0  ;;  %v259_v0 = vpop.f32.mrb[4].mxu0  ;;  %v299_v2 = vpop.f32.mrb[4].mxu1 }
  0xee   :  { %569 = vst [vmem:[%s973_s4 + $0x10] sm:$0xff] %v537_v60  ;;  %585 = vst [vmem:[%s973_s4 + $0x90] sm:$0xff] %v553_v61  ;;  %v443_v4 = vadd.f32 %v741_v22, %v259_v0  ;;  %v459_v5 = vadd.f32 %v741_v22, %v299_v2  ;;  %v261_v6 = vpop.f32.mrb[5].mxu0  ;;  %v301_v8 = vpop.f32.mrb[5].mxu1  ;;  %v497_v57 = vld [vmem:[%s972_s3 + $0xd0] sm:$0xff] }
  0xef   :  { %570 = vst [vmem:[%s973_s4 + $0x18] sm:$0xff] %v538_v62  ;;  %586 = vst [vmem:[%s973_s4 + $0x98] sm:$0xff] %v554_v63  ;;  %v444_v10 = vadd.f32 %v743_v23, %v261_v6  ;;  %v460_v11 = vadd.f32 %v743_v23, %v301_v8  ;;  %v263_v12 = vpop.f32.mrb[6].mxu0  ;;  %v303_v14 = vpop.f32.mrb[6].mxu1  ;;  %v482_v63 = vld [vmem:[%s972_s3 + $0x58] sm:$0xff] }
  0xf0   :  { %v507_v16 = vadd.f32 %v475_v1, %v443_v4  ;;  %v523_v17 = vadd.f32 %v491_v3, %v459_v5  ;;  %v445_v18 = vadd.f32 %v741_v22, %v263_v12  ;;  %v461_v19 = vadd.f32 %v741_v22, %v303_v14  ;;  %v265_v20 = vpop.f32.mrb[7].mxu0  ;;  %v305_v24 = vpop.f32.mrb[7].mxu1  ;;  %v498_v1 = vld [vmem:[%s972_s3 + $0xd8] sm:$0xff] }
  0xf1   :  { %v508_v26 = vadd.f32 %v476_v7, %v444_v10  ;;  %v524_v27 = vadd.f32 %v492_v9, %v460_v11  ;;  %v446_v28 = vadd.f32 %v743_v23, %v265_v20  ;;  %v462_v29 = vadd.f32 %v743_v23, %v305_v24 }
  0xf2   :  { %v539_v30 = vmax.f32 %v507_v16, 0.0  ;;  %v555_v31 = vmax.f32 %v523_v17, 0.0  ;;  %v509_v32 = vadd.f32 %v477_v13, %v445_v18  ;;  %v525_v33 = vadd.f32 %v493_v15, %v461_v19  ;;  %v483_v19 = vld [vmem:[%s972_s3 + $0x60] sm:$0xff] }
  0xf3   :  { %v540_v34 = vmax.f32 %v508_v26, 0.0  ;;  %v556_v35 = vmax.f32 %v524_v27, 0.0  ;;  %v510_v36 = vadd.f32 %v478_v21, %v446_v28  ;;  %v526_v37 = vadd.f32 %v494_v25, %v462_v29  ;;  %v499_v21 = vld [vmem:[%s972_s3 + $0xe0] sm:$0xff]  ;;  %v484_v27 = vld [vmem:[%s972_s3 + $0x68] sm:$0xff] }
  0xf4   :  { %571 = vst [vmem:[%s973_s4 + $0x20] sm:$0xff] %v539_v30  ;;  %587 = vst [vmem:[%s973_s4 + $0xa0] sm:$0xff] %v555_v31  ;;  %v541_v38 = vmax.f32 %v509_v32, 0.0  ;;  %v557_v39 = vmax.f32 %v525_v33, 0.0  ;;  %v500_v29 = vld [vmem:[%s972_s3 + $0xe8] sm:$0xff]  ;;  %v485_v33 = vld [vmem:[%s972_s3 + $0x70] sm:$0xff] }
  0xf5   :  { %572 = vst [vmem:[%s973_s4 + $0x28] sm:$0xff] %v540_v34  ;;  %588 = vst [vmem:[%s973_s4 + $0xa8] sm:$0xff] %v556_v35  ;;  %v542_v40 = vmax.f32 %v510_v36, 0.0  ;;  %v558_v41 = vmax.f32 %v526_v37, 0.0  ;;  %v269_v42 = vpop.f32.mrb[8].mxu0  ;;  %v309_v44 = vpop.f32.mrb[8].mxu1 }
  0xf6   :  { %573 = vst [vmem:[%s973_s4 + $0x30] sm:$0xff] %v541_v38  ;;  %589 = vst [vmem:[%s973_s4 + $0xb0] sm:$0xff] %v557_v39  ;;  %v447_v46 = vadd.f32 %v741_v22, %v269_v42  ;;  %v463_v47 = vadd.f32 %v741_v22, %v309_v44  ;;  %v271_v48 = vpop.f32.mrb[9].mxu0  ;;  %v311_v50 = vpop.f32.mrb[9].mxu1  ;;  %v501_v35 = vld [vmem:[%s972_s3 + $0xf0] sm:$0xff] }
  0xf7   :  { %574 = vst [vmem:[%s973_s4 + $0x38] sm:$0xff] %v542_v40  ;;  %590 = vst [vmem:[%s973_s4 + $0xb8] sm:$0xff] %v558_v41  ;;  %v448_v52 = vadd.f32 %v743_v23, %v271_v48  ;;  %v464_v53 = vadd.f32 %v743_v23, %v311_v50  ;;  %v273_v54 = vpop.f32.mrb[10].mxu0  ;;  %v313_v56 = vpop.f32.mrb[10].mxu1  ;;  %v486_v41 = vld [vmem:[%s972_s3 + $0x78] sm:$0xff] }
  0xf8   :  { %v511_v58 = vadd.f32 %v479_v43, %v447_v46  ;;  %v527_v59 = vadd.f32 %v495_v45, %v463_v47  ;;  %v449_v60 = vadd.f32 %v741_v22, %v273_v54  ;;  %v465_v61 = vadd.f32 %v741_v22, %v313_v56  ;;  %v275_v62 = vpop.f32.mrb[11].mxu0  ;;  %v315_v0 = vpop.f32.mrb[11].mxu1  ;;  %v502_v43 = vld [vmem:[%s972_s3 + $0xf8] sm:$0xff] }
  0xf9   :  { %v512_v2 = vadd.f32 %v480_v49, %v448_v52  ;;  %v528_v3 = vadd.f32 %v496_v51, %v464_v53  ;;  %v450_v4 = vadd.f32 %v743_v23, %v275_v62  ;;  %v466_v5 = vadd.f32 %v743_v23, %v315_v0 }
  0xfa   :  { %v543_v6 = vmax.f32 %v511_v58, 0.0  ;;  %v559_v7 = vmax.f32 %v527_v59, 0.0  ;;  %v513_v8 = vadd.f32 %v481_v55, %v449_v60  ;;  %v529_v9 = vadd.f32 %v497_v57, %v465_v61 }
  0xfb   :  { %v544_v10 = vmax.f32 %v512_v2, 0.0  ;;  %v560_v11 = vmax.f32 %v528_v3, 0.0  ;;  %v514_v12 = vadd.f32 %v482_v63, %v450_v4  ;;  %v530_v13 = vadd.f32 %v498_v1, %v466_v5 }
  0xfc   :  { %575 = vst [vmem:[%s973_s4 + $0x40] sm:$0xff] %v543_v6  ;;  %591 = vst [vmem:[%s973_s4 + $0xc0] sm:$0xff] %v559_v7  ;;  %v545_v14 = vmax.f32 %v513_v8, 0.0  ;;  %v561_v15 = vmax.f32 %v529_v9, 0.0 }
  0xfd   :  { %576 = vst [vmem:[%s973_s4 + $0x48] sm:$0xff] %v544_v10  ;;  %592 = vst [vmem:[%s973_s4 + $0xc8] sm:$0xff] %v560_v11  ;;  %v546_v16 = vmax.f32 %v514_v12, 0.0  ;;  %v562_v17 = vmax.f32 %v530_v13, 0.0  ;;  %v279_v18 = vpop.f32.mrb[12].mxu0  ;;  %v319_v20 = vpop.f32.mrb[12].mxu1 }
  0xfe   :  { %577 = vst [vmem:[%s973_s4 + $0x50] sm:$0xff] %v545_v14  ;;  %593 = vst [vmem:[%s973_s4 + $0xd0] sm:$0xff] %v561_v15  ;;  %v451_v24 = vadd.f32 %v741_v22, %v279_v18  ;;  %v467_v25 = vadd.f32 %v741_v22, %v319_v20  ;;  %v281_v26 = vpop.f32.mrb[13].mxu0  ;;  %v321_v28 = vpop.f32.mrb[13].mxu1 }
  0xff   :  { %578 = vst [vmem:[%s973_s4 + $0x58] sm:$0xff] %v546_v16  ;;  %594 = vst [vmem:[%s973_s4 + $0xd8] sm:$0xff] %v562_v17  ;;  %v452_v30 = vadd.f32 %v743_v23, %v281_v26  ;;  %v468_v31 = vadd.f32 %v743_v23, %v321_v28  ;;  %v283_v32 = vpop.f32.mrb[14].mxu0  ;;  %v323_v34 = vpop.f32.mrb[14].mxu1 }
 0x100   :  { %v515_v36 = vadd.f32 %v483_v19, %v451_v24  ;;  %v531_v37 = vadd.f32 %v499_v21, %v467_v25  ;;  %v453_v38 = vadd.f32 %v741_v22, %v283_v32  ;;  %v469_v39 = vadd.f32 %v741_v22, %v323_v34  ;;  %v285_v40 = vpop.f32.mrb[15].mxu0  ;;  %v325_v42 = vpop.f32.mrb[15].mxu1 }
 0x101   :  { %v516_v44 = vadd.f32 %v484_v27, %v452_v30  ;;  %v532_v45 = vadd.f32 %v500_v29, %v468_v31  ;;  %v454_v46 = vadd.f32 %v743_v23, %v285_v40  ;;  %v470_v47 = vadd.f32 %v743_v23, %v325_v42 }
 0x102   :  { %v547_v48 = vmax.f32 %v515_v36, 0.0  ;;  %v563_v49 = vmax.f32 %v531_v37, 0.0  ;;  %v517_v50 = vadd.f32 %v485_v33, %v453_v38  ;;  %v533_v22 = vadd.f32 %v501_v35, %v469_v39 }
 0x103   :  { %v548_v51 = vmax.f32 %v516_v44, 0.0  ;;  %v564_v52 = vmax.f32 %v532_v45, 0.0  ;;  %v518_v53 = vadd.f32 %v486_v41, %v454_v46  ;;  %v534_v54 = vadd.f32 %v502_v43, %v470_v47 }
 0x104   :  { %579 = vst [vmem:[%s973_s4 + $0x60] sm:$0xff] %v547_v48  ;;  %595 = vst [vmem:[%s973_s4 + $0xe0] sm:$0xff] %v563_v49  ;;  %v549_v55 = vmax.f32 %v517_v50, 0.0  ;;  %v565_v56 = vmax.f32 %v533_v22, 0.0 }
 0x105   :  { %580 = vst [vmem:[%s973_s4 + $0x68] sm:$0xff] %v548_v51  ;;  %596 = vst [vmem:[%s973_s4 + $0xe8] sm:$0xff] %v564_v52  ;;  %v550_v23 = vmax.f32 %v518_v53, 0.0  ;;  %v566_v57 = vmax.f32 %v534_v54, 0.0 }
 0x106   :  { %581 = vst [vmem:[%s973_s4 + $0x70] sm:$0xff] %v549_v55  ;;  %597 = vst [vmem:[%s973_s4 + $0xf0] sm:$0xff] %v565_v56 }
 0x107   :  { %582 = vst [vmem:[%s973_s4 + $0x78] sm:$0xff] %v550_v23  ;;  %598 = vst [vmem:[%s973_s4 + $0xf8] sm:$0xff] %v566_v57 }

// kernel: feature_vectors_forward.51
= control target key start
LH: loop header
LB: loop body
LE: loop exit
PB: predicated region body
PF: predicated region fallthrough
CT: control target
= control target key end

     0   :  { %s820_s1 = inlined_call_operand.vmem [shape: bf16[1,256,128], index: 1, kind: input, shape index: {}]   ;;  %s821_s0 = inlined_call_operand.vmem [shape: bf16[1,128,256], index: 0, kind: input, shape index: {}]   ;;  %s822_s2 = inlined_call_operand.vmem [shape: f32[1,128], index: 2, kind: input, shape index: {}]   ;;  %s823_s3 = inlined_call_operand.vmem [shape: f32[128,128], index: 3, kind: output, shape index: {}]  }
   0x1   :  { %v595_v0 = vld [vmem:[%s820_s1 + $0x40] sm:$0xff]   ;;  %v597_v2 = vld [vmem:[%s820_s1 + $0x48] sm:$0xff]   ;;  %v599_v4 = vld [vmem:[%s820_s1 + $0x50] sm:$0xff]  }
   0x2   :  { %v596_v1 = vld [vmem:[%s820_s1] sm:$0xff]   ;;  %515 = vmatprep.subr.bf16.mxu0 %v595_v0  ;;  %579 = vmatprep.subr.bf16.mxu1 %v595_v0  ;;  %v598_v3 = vld [vmem:[%s820_s1 + $0x8] sm:$0xff]   ;;  %v600_v5 = vld [vmem:[%s820_s1 + $0x10] sm:$0xff]  }
   0x3   :  { %516 = vmatpush3.bf16.msra.mxu0 %v596_v1  ;;  %587 = vmatpush3.bf16.msra.mxu1 %v596_v1  ;;  %v601_v6 = vld [vmem:[%s820_s1 + $0x58] sm:$0xff]   ;;  %v603_v8 = vld [vmem:[%s820_s1 + $0x60] sm:$0xff]   ;;  %v605_v10 = vld [vmem:[%s820_s1 + $0x68] sm:$0xff]  }
   0x4   :  { %517 = vmatprep.subr.bf16.mxu0 %v597_v2  ;;  %580 = vmatprep.subr.bf16.mxu1 %v597_v2  ;;  %v602_v7 = vld [vmem:[%s820_s1 + $0x18] sm:$0xff]   ;;  %v604_v9 = vld [vmem:[%s820_s1 + $0x20] sm:$0xff]   ;;  %v606_v13 = vld [vmem:[%s820_s1 + $0x28] sm:$0xff]  }
   0x5   :  { %v613_v11 = vld [vmem:[%s821_s0 + $0x4] ss:$8 sps:$4 sm:$0xff]   ;;  %v607_v14 = vld [vmem:[%s820_s1 + $0x70] sm:$0xff]   ;;  %v609_v16 = vld [vmem:[%s820_s1 + $0x78] sm:$0xff]  }
   0x6   :  { %v616_v12 = vld [vmem:[%s821_s0 + $0x44] ss:$8 sps:$4 sm:$0xff]   ;;  %307 = vmatprep.mubr.bf16.mxu0 %v613_v11  ;;  %v608_v15 = vld [vmem:[%s820_s1 + $0x30] sm:$0xff]   ;;  %v610_v17 = vld [vmem:[%s820_s1 + $0x38] sm:$0xff]  }
   0x7   :  { %518 = vmatpush3.bf16.msra.mxu0 %v598_v3  ;;  %588 = vmatpush3.bf16.msra.mxu1 %v598_v3  ;;  %v611_v18 = vld [vmem:[%s821_s0] ss:$8 sps:$4 sm:$0xff]   ;;  %v617_v20 = vld [vmem:[%s821_s0 + $0x14] ss:$8 sps:$4 sm:$0xff]   ;;  %v621_v22 = vld [vmem:[%s821_s0 + $0x10] ss:$8 sps:$4 sm:$0xff]  }
   0x8   :  { %519 = vmatprep.subr.bf16.mxu0 %v599_v4  ;;  %581 = vmatprep.subr.bf16.mxu1 %v599_v4  ;;  %v614_v19 = vld [vmem:[%s821_s0 + $0x40] ss:$8 sps:$4 sm:$0xff]   ;;  %v619_v21 = vld [vmem:[%s821_s0 + $0x54] ss:$8 sps:$4 sm:$0xff]   ;;  %v622_v23 = vld [vmem:[%s821_s0 + $0x50] ss:$8 sps:$4 sm:$0xff]  }
   0x9   :  { %339 = vmatprep.mubr.bf16.mxu1 %v616_v12  ;;  %v623_v24 = vld [vmem:[%s821_s0 + $0x24] ss:$8 sps:$4 sm:$0xff]   ;;  %v627_v26 = vld [vmem:[%s821_s0 + $0x20] ss:$8 sps:$4 sm:$0xff]   ;;  %v629_v28 = vld [vmem:[%s821_s0 + $0x34] ss:$8 sps:$4 sm:$0xff]  }
   0xa   :  { %v625_v25 = vld [vmem:[%s821_s0 + $0x64] ss:$8 sps:$4 sm:$0xff]   ;;  %v628_v27 = vld [vmem:[%s821_s0 + $0x60] ss:$8 sps:$4 sm:$0xff]   ;;  %v631_v29 = vld [vmem:[%s821_s0 + $0x74] ss:$8 sps:$4 sm:$0xff]  }
   0xb   :  { %520 = vmatpush3.bf16.msra.mxu0 %v600_v5  ;;  %589 = vmatpush3.bf16.msra.mxu1 %v600_v5  ;;  %v633_v30 = vld [vmem:[%s821_s0 + $0x30] ss:$8 sps:$4 sm:$0xff]   ;;  %v754_v35 = vld [vmem:[%s822_s2] ss:$0 sm:$0xff] }
   0xc   :  { %521 = vmatprep.subr.bf16.mxu0 %v601_v6  ;;  %582 = vmatprep.subr.bf16.mxu1 %v601_v6  ;;  %v634_v31 = vld [vmem:[%s821_s0 + $0x70] ss:$8 sps:$4 sm:$0xff]  }
   0xf   :  { %522 = vmatpush3.bf16.msra.mxu0 %v602_v7  ;;  %590 = vmatpush3.bf16.msra.mxu1 %v602_v7 }
  0x10   :  { %523 = vmatprep.subr.bf16.mxu0 %v603_v8  ;;  %583 = vmatprep.subr.bf16.mxu1 %v603_v8 }
  0x13   :  { %524 = vmatpush3.bf16.msra.mxu0 %v604_v9  ;;  %591 = vmatpush3.bf16.msra.mxu1 %v604_v9 }
  0x14   :  { %525 = vmatprep.subr.bf16.mxu0 %v605_v10  ;;  %584 = vmatprep.subr.bf16.mxu1 %v605_v10 }
  0x17   :  { %526 = vmatpush3.bf16.msra.mxu0 %v606_v13  ;;  %592 = vmatpush3.bf16.msra.mxu1 %v606_v13 }
  0x18   :  { %527 = vmatprep.subr.bf16.mxu0 %v607_v14  ;;  %585 = vmatprep.subr.bf16.mxu1 %v607_v14 }
  0x1b   :  { %528 = vmatpush3.bf16.msra.mxu0 %v608_v15  ;;  %593 = vmatpush3.bf16.msra.mxu1 %v608_v15 }
  0x1c   :  { %529 = vmatprep.subr.bf16.mxu0 %v609_v16  ;;  %586 = vmatprep.subr.bf16.mxu1 %v609_v16 }
  0x1f   :  { %530 = vmatpush3.bf16.msra.mxu0 %v610_v17  ;;  %594 = vmatpush3.bf16.msra.mxu1 %v610_v17 }
  0x22   :  { %308 = vmatmul.mubr.bf16.vlgmr.msra.gmra.mrb[0].mxu0 %v611_v18  ;;  %340 = vmatmul.mubr.bf16.vlgmr.msra.gmra.mrb[0].mxu1 %v614_v19 }
  0x23   :  { %315 = vmatprep.mubr.bf16.mxu0 %v617_v20  ;;  %347 = vmatprep.mubr.bf16.mxu1 %v619_v21 }
  0x2a   :  { %316 = vmatmul.mubr.bf16.gmra.mrb[4].mxu0 %v621_v22  ;;  %348 = vmatmul.mubr.bf16.gmra.mrb[4].mxu1 %v622_v23 }
  0x2b   :  { %323 = vmatprep.mubr.bf16.mxu0 %v623_v24  ;;  %355 = vmatprep.mubr.bf16.mxu1 %v625_v25 }
  0x32   :  { %324 = vmatmul.mubr.bf16.gmra.mrb[8].mxu0 %v627_v26  ;;  %356 = vmatmul.mubr.bf16.gmra.mrb[8].mxu1 %v628_v27 }
  0x33   :  { %331 = vmatprep.mubr.bf16.mxu0 %v629_v28  ;;  %363 = vmatprep.mubr.bf16.mxu1 %v631_v29 }
  0x3a   :  { %332 = vmatmul.mubr.bf16.gmra.mrb[12].mxu0 %v633_v30  ;;  %364 = vmatmul.mubr.bf16.gmra.mrb[12].mxu1 %v634_v31 }
  0xf5   :  { %v531_v32 = vpop.f32.mrb[0].mxu0  ;;  %v555_v33 = vpop.f32.mrb[0].mxu1 }
  0xf6   :  { %v532_v34 = vpop.f32.mrb[1].mxu0  ;;  %v556_v36 = vpop.f32.mrb[1].mxu1 }
  0xf7   :  { %v533_v37 = vadd.f32 %v532_v34, %v531_v32  ;;  %v557_v38 = vadd.f32 %v556_v36, %v555_v33  ;;  %v534_v39 = vpop.f32.mrb[2].mxu0  ;;  %v558_v40 = vpop.f32.mrb[2].mxu1 }
  0xf8   :  { %v535_v41 = vpop.f32.mrb[3].mxu0  ;;  %v559_v42 = vpop.f32.mrb[3].mxu1 }
  0xf9   :  { %v430_v43 = vadd.f32 %v533_v37, %v754_v35  ;;  %v438_v44 = vadd.f32 %v557_v38, %v754_v35  ;;  %v536_v45 = vadd.f32 %v535_v41, %v534_v39  ;;  %v560_v46 = vadd.f32 %v559_v42, %v558_v40 }
  0xfb   :  { %v446_v47 = vmax.f32 %v430_v43, 0.0  ;;  %v454_v48 = vmax.f32 %v438_v44, 0.0  ;;  %v431_v49 = vadd.f32 %v536_v45, %v754_v35  ;;  %v439_v50 = vadd.f32 %v560_v46, %v754_v35 }
  0xfd   :  { %462 = vst [vmem:[%s823_s3] sm:$0xff] %v446_v47  ;;  %470 = vst [vmem:[%s823_s3 + $0x40] sm:$0xff] %v454_v48  ;;  %v447_v51 = vmax.f32 %v431_v49, 0.0  ;;  %v455_v52 = vmax.f32 %v439_v50, 0.0  ;;  %v537_v53 = vpop.f32.mrb[4].mxu0  ;;  %v561_v54 = vpop.f32.mrb[4].mxu1 }
  0xfe   :  { %v538_v55 = vpop.f32.mrb[5].mxu0  ;;  %v562_v56 = vpop.f32.mrb[5].mxu1 }
  0xff   :  { %463 = vst [vmem:[%s823_s3 + $0x8] sm:$0xff] %v447_v51  ;;  %471 = vst [vmem:[%s823_s3 + $0x48] sm:$0xff] %v455_v52  ;;  %v539_v57 = vadd.f32 %v538_v55, %v537_v53  ;;  %v563_v58 = vadd.f32 %v562_v56, %v561_v54  ;;  %v540_v59 = vpop.f32.mrb[6].mxu0  ;;  %v564_v60 = vpop.f32.mrb[6].mxu1 }
 0x100   :  { %v541_v61 = vpop.f32.mrb[7].mxu0  ;;  %v565_v62 = vpop.f32.mrb[7].mxu1 }
 0x101   :  { %v432_v63 = vadd.f32 %v539_v57, %v754_v35  ;;  %v440_v0 = vadd.f32 %v563_v58, %v754_v35  ;;  %v542_v1 = vadd.f32 %v541_v61, %v540_v59  ;;  %v566_v2 = vadd.f32 %v565_v62, %v564_v60 }
 0x103   :  { %v448_v3 = vmax.f32 %v432_v63, 0.0  ;;  %v456_v4 = vmax.f32 %v440_v0, 0.0  ;;  %v433_v5 = vadd.f32 %v542_v1, %v754_v35  ;;  %v441_v6 = vadd.f32 %v566_v2, %v754_v35 }
 0x105   :  { %464 = vst [vmem:[%s823_s3 + $0x10] sm:$0xff] %v448_v3  ;;  %472 = vst [vmem:[%s823_s3 + $0x50] sm:$0xff] %v456_v4  ;;  %v449_v7 = vmax.f32 %v433_v5, 0.0  ;;  %v457_v8 = vmax.f32 %v441_v6, 0.0  ;;  %v543_v9 = vpop.f32.mrb[8].mxu0  ;;  %v567_v10 = vpop.f32.mrb[8].mxu1 }
 0x106   :  { %v544_v11 = vpop.f32.mrb[9].mxu0  ;;  %v568_v12 = vpop.f32.mrb[9].mxu1 }
 0x107   :  { %465 = vst [vmem:[%s823_s3 + $0x18] sm:$0xff] %v449_v7  ;;  %473 = vst [vmem:[%s823_s3 + $0x58] sm:$0xff] %v457_v8  ;;  %v545_v13 = vadd.f32 %v544_v11, %v543_v9  ;;  %v569_v14 = vadd.f32 %v568_v12, %v567_v10  ;;  %v546_v15 = vpop.f32.mrb[10].mxu0  ;;  %v570_v16 = vpop.f32.mrb[10].mxu1 }
 0x108   :  { %v547_v17 = vpop.f32.mrb[11].mxu0  ;;  %v571_v18 = vpop.f32.mrb[11].mxu1 }
 0x109   :  { %v434_v19 = vadd.f32 %v545_v13, %v754_v35  ;;  %v442_v20 = vadd.f32 %v569_v14, %v754_v35  ;;  %v548_v21 = vadd.f32 %v547_v17, %v546_v15  ;;  %v572_v22 = vadd.f32 %v571_v18, %v570_v16 }
 0x10b   :  { %v450_v23 = vmax.f32 %v434_v19, 0.0  ;;  %v458_v24 = vmax.f32 %v442_v20, 0.0  ;;  %v435_v25 = vadd.f32 %v548_v21, %v754_v35  ;;  %v443_v26 = vadd.f32 %v572_v22, %v754_v35 }
 0x10d   :  { %466 = vst [vmem:[%s823_s3 + $0x20] sm:$0xff] %v450_v23  ;;  %474 = vst [vmem:[%s823_s3 + $0x60] sm:$0xff] %v458_v24  ;;  %v451_v27 = vmax.f32 %v435_v25, 0.0  ;;  %v459_v28 = vmax.f32 %v443_v26, 0.0  ;;  %v549_v29 = vpop.f32.mrb[12].mxu0  ;;  %v573_v30 = vpop.f32.mrb[12].mxu1 }
 0x10e   :  { %v550_v31 = vpop.f32.mrb[13].mxu0  ;;  %v574_v32 = vpop.f32.mrb[13].mxu1 }
 0x10f   :  { %467 = vst [vmem:[%s823_s3 + $0x28] sm:$0xff] %v451_v27  ;;  %475 = vst [vmem:[%s823_s3 + $0x68] sm:$0xff] %v459_v28  ;;  %v551_v33 = vadd.f32 %v550_v31, %v549_v29  ;;  %v575_v34 = vadd.f32 %v574_v32, %v573_v30  ;;  %v552_v36 = vpop.f32.mrb[14].mxu0  ;;  %v576_v37 = vpop.f32.mrb[14].mxu1 }
 0x110   :  { %v553_v38 = vpop.f32.mrb[15].mxu0  ;;  %v577_v39 = vpop.f32.mrb[15].mxu1 }
 0x111   :  { %v436_v40 = vadd.f32 %v551_v33, %v754_v35  ;;  %v444_v41 = vadd.f32 %v575_v34, %v754_v35  ;;  %v554_v42 = vadd.f32 %v553_v38, %v552_v36  ;;  %v578_v43 = vadd.f32 %v577_v39, %v576_v37 }
 0x113   :  { %v452_v44 = vmax.f32 %v436_v40, 0.0  ;;  %v460_v45 = vmax.f32 %v444_v41, 0.0  ;;  %v437_v46 = vadd.f32 %v554_v42, %v754_v35  ;;  %v445_v47 = vadd.f32 %v578_v43, %v754_v35 }
 0x115   :  { %468 = vst [vmem:[%s823_s3 + $0x30] sm:$0xff] %v452_v44  ;;  %476 = vst [vmem:[%s823_s3 + $0x70] sm:$0xff] %v460_v45  ;;  %v453_v48 = vmax.f32 %v437_v46, 0.0  ;;  %v461_v49 = vmax.f32 %v445_v47, 0.0 }
 0x117   :  { %469 = vst [vmem:[%s823_s3 + $0x38] sm:$0xff] %v453_v48  ;;  %477 = vst [vmem:[%s823_s3 + $0x78] sm:$0xff] %v461_v49 }

// kernel: feature_vectors_forward.59
= control target key start
LH: loop header
LB: loop body
LE: loop exit
PB: predicated region body
PF: predicated region fallthrough
CT: control target
= control target key end

     0   :  { %s686_s12 = smov 0   ;;  %s688_s13 = smov 0   ;;  %s754_s0 = inlined_call_operand.vmem [shape: bf16[9,32,128], index: 0, kind: input, shape index: {}]   ;;  %s755_s1 = inlined_call_operand.vmem [shape: bf16[9,128,128], index: 1, kind: input, shape index: {}]   ;;  %s756_s2 = inlined_call_operand.vmem [shape: f32[1,128], index: 2, kind: input, shape index: {}]   ;;  %s757_s3 = inlined_call_operand.vmem [shape: f32[32,128], index: 3, kind: output, shape index: {}]  }
   0x1   :  { %s690_s14 = smov 0  }
   0x2 LB: > { %s25_s15 = sadd.s32 1, %s659_s13  ;;  %p552_p0 = scmp.ge.s32.totalorder %s663_s14, 1  ;;  %s663_s14 = sphi %s690_s14, %s13_s14   ;;  %s659_s13 = sphi %s688_s13, %s759_s13   ;;  %s655_s12 = sphi %s686_s12, %s758_s12  }
   0x3   : > { %p26_p1 = scmp.ge.s32.totalorder %s25_s15, 9  ;;  %p188_p2 = scmp.lt.s32.totalorder %s663_s14, 10 }
   0x5   : > { %s761_s15 = smov (%p26_p1, %s25_s15), 0  ;;  %p189_p3 = pnand %p552_p0, %p188_p2 }
   0x6   : > { %p231_p4 = scmp.lt.s32.totalorder (!%p189_p3), %s655_s12, 8  ;;  %p557_p5 = scmp.ne.s32.totalorder (!%p189_p3), %s655_s12, 0 }
   0x7   : > { %192 = sbr.rel (%p189_p3) target bundleno = 285 (0x11d), region = 32 }
   0xe   : > { %s232_s16 = scalar_select %p231_p4, %s655_s12, 8 }
   0xf   : > { %264 = sbr.rel (%p557_p5) target bundleno = 22 (0x16), region = 36  ;;  %v665_v0 = vmov (!%p557_p5), 0.0  }
  0x10   : > { %s574_s17 = sshll.u32 %s232_s16, 4  ;;  %s575_s18 = sshll.u32 %s232_s16, 6  ;;  %265 = vst [vmem:[#allocation2] sm:$0xff] (!%p557_p5), %v665_v0  ;;  %266 = vst [vmem:[#allocation2 + $0x8] sm:$0xff] (!%p557_p5), %v665_v0 }
  0x11   : > { %s711_s21 = scalar_lea.vmem %s754_s0, %s574_s17  ;;  %s716_s24 = scalar_lea.vmem %s755_s1, %s575_s18  ;;  %267 = vst [vmem:[#allocation2 + $0x10] sm:$0xff] (!%p557_p5), %v665_v0  ;;  %268 = vst [vmem:[#allocation2 + $0x18] sm:$0xff] (!%p557_p5), %v665_v0 }
  0x16 PF: > { %v631_v1 = vld [vmem:[%s716_s24] sm:$0xff]   ;;  %v632_v2 = vld [vmem:[%s716_s24 + $0x8] sm:$0xff]   ;;  %v633_v3 = vld [vmem:[%s716_s24 + $0x10] sm:$0xff]   ;;  %p568_p6 = scmp.ne.s32.totalorder %s655_s12, 8 }
  0x17   : > { %586 = vmatprep.subr.bf16.mxu0 %v631_v1  ;;  %v634_v4 = vld [vmem:[%s716_s24 + $0x18] sm:$0xff]   ;;  %v639_v5 = vld [vmem:[%s711_s21] sm:$0xff]   ;;  %v636_v7 = vld [vmem:[%s716_s24 + $0x28] sm:$0xff]  }
  0x18   : > { %587 = vmatpush3.bf16.msra.mxu0 %v631_v1  ;;  %602 = vmatprep.mubr.bf16.mxu0 %v639_v5  ;;  %v635_v6 = vld [vmem:[%s716_s24 + $0x20] sm:$0xff]   ;;  %v637_v8 = vld [vmem:[%s716_s24 + $0x30] sm:$0xff]   ;;  %v638_v9 = vld [vmem:[%s716_s24 + $0x38] sm:$0xff]  }
  0x19   : > { %588 = vmatprep.subr.bf16.mxu0 %v632_v2  ;;  %v640_v10 = vld [vmem:[%s711_s21 + $0x8] sm:$0xff]   ;;  %v271_v11 = vld [vmem:[#allocation2 + $0x10] sm:$0xff]  ;;  %v269_v12 = vld [vmem:[#allocation2] sm:$0xff] }
  0x1a   : > { %v272_v14 = vld [vmem:[#allocation2 + $0x18] sm:$0xff]  ;;  %v270_v17 = vld [vmem:[#allocation2 + $0x8] sm:$0xff]  ;;  %v569_v24 = vld [vmem:[%s756_s2] ss:$0 sm:$0xff] (!%p568_p6) }
  0x1c   : > { %589 = vmatpush3.bf16.msra.mxu0 %v632_v2 }
  0x1d   : > { %590 = vmatprep.subr.bf16.mxu0 %v633_v3 }
  0x20   : > { %591 = vmatpush3.bf16.msra.mxu0 %v633_v3 }
  0x21   : > { %592 = vmatprep.subr.bf16.mxu0 %v634_v4 }
  0x24   : > { %593 = vmatpush3.bf16.msra.mxu0 %v634_v4 }
  0x25   : > { %594 = vmatprep.subr.bf16.mxu0 %v635_v6 }
  0x28   : > { %595 = vmatpush3.bf16.msra.mxu0 %v635_v6 }
  0x29   : > { %596 = vmatprep.subr.bf16.mxu0 %v636_v7 }
  0x2c   : > { %597 = vmatpush3.bf16.msra.mxu0 %v636_v7 }
  0x2d   : > { %598 = vmatprep.subr.bf16.mxu0 %v637_v8 }
  0x30   : > { %599 = vmatpush3.bf16.msra.mxu0 %v637_v8 }
  0x31   : > { %600 = vmatprep.subr.bf16.mxu0 %v638_v9 }
  0x34   : > { %601 = vmatpush3.bf16.msra.mxu0 %v638_v9 }
  0x37   : > { %603 = vmatmul.mubr.bf16.vlgmr.msra.gmra.mrb[0].mxu0 %v640_v10 }
 0x10a   : > { %v604_v13 = vpop.f32.mrb[0].mxu0  ;;  %413 = sbr.rel (%p568_p6) target bundleno = 285 (0x11d), region = 40 }
 0x10b   : > { %v404_v15 = vadd.f32 %v604_v13, %v271_v11  ;;  %v387_v16 = vpop.f32.mrb[1].mxu0 }
 0x10c   : > { %v402_v18 = vadd.f32 %v387_v16, %v269_v12  ;;  %v605_v19 = vpop.f32.mrb[2].mxu0 }
 0x10d   : > { %408 = vst [vmem:[#allocation2 + $0x10] sm:$0xff] %v404_v15  ;;  %v405_v20 = vadd.f32 %v605_v19, %v272_v14  ;;  %v390_v21 = vpop.f32.mrb[3].mxu0 }
 0x10e   : > { %406 = vst [vmem:[#allocation2] sm:$0xff] %v402_v18  ;;  %v403_v22 = vadd.f32 %v390_v21, %v270_v17 }
 0x10f   : > { %409 = vst [vmem:[#allocation2 + $0x18] sm:$0xff] %v405_v20 }
 0x110   : > { %407 = vst [vmem:[#allocation2 + $0x8] sm:$0xff] %v403_v22 }
 0x114   : > { %v416_v28 = vld [vmem:[#allocation2 + $0x10] sm:$0xff] }
 0x115   : > { %v414_v23 = vld [vmem:[#allocation2] sm:$0xff]  ;;  %v427_v30 = vadd.f32 %v569_v24, %v416_v28 }
 0x116   : > { %v425_v26 = vadd.f32 %v569_v24, %v414_v23  ;;  %v417_v29 = vld [vmem:[#allocation2 + $0x18] sm:$0xff] }
 0x117   : > { %v415_v25 = vld [vmem:[#allocation2 + $0x8] sm:$0xff]  ;;  %v428_v31 = vadd.f32 %v569_v24, %v417_v29  ;;  %v431_v34 = vmax.f32 %v427_v30, 0.0 }
 0x118   : > { %v426_v27 = vadd.f32 %v569_v24, %v415_v25  ;;  %v429_v32 = vmax.f32 %v425_v26, 0.0 }
 0x119   : > { %v432_v35 = vmax.f32 %v428_v31, 0.0  ;;  %435 = vst [vmem:[%s757_s3 + $0x10] sm:$0xff] %v431_v34 }
 0x11a   : > { %v430_v33 = vmax.f32 %v426_v27, 0.0  ;;  %433 = vst [vmem:[%s757_s3] sm:$0xff] %v429_v32 }
 0x11b   : > { %436 = vst [vmem:[%s757_s3 + $0x18] sm:$0xff] %v432_v35 }
 0x11c   : > { %434 = vst [vmem:[%s757_s3 + $0x8] sm:$0xff] %v430_v33 }
 0x11d PF: > { %s13_s14 = sadd.s32 1, %s663_s14   ;;  %s758_s12 = smov %s659_s13 }
 0x11e   : > { %p10_p7 = scmp.ge.s32.totalorder %s13_s14, 11   ;;  %s759_s13 = smov %s761_s15 }
 0x120   :  { %12 = sbr.rel (!%p10_p7) target bundleno = 2 (0x2), region = 76 }

// kernel: feature_vectors_forward.60
= control target key start
LH: loop header
LB: loop body
LE: loop exit
PB: predicated region body
PF: predicated region fallthrough
CT: control target
= control target key end

     0   :  { %s1056_s15 = smov 0   ;;  %s1058_s16 = smov 0   ;;  %s1195_s0 = inlined_call_operand.vmem [shape: bf16[1,32,128], index: 0, kind: input, shape index: {}]   ;;  %s1196_s1 = inlined_call_operand.vmem [shape: bf16[1,128,512], index: 1, kind: input, shape index: {}]   ;;  %s1197_s2 = inlined_call_operand.vmem [shape: f32[1,512], index: 2, kind: input, shape index: {}]   ;;  %s1198_s3 = inlined_call_operand.vmem [shape: f32[32,512], index: 3, kind: input, shape index: {}]   ;;  %s1199_s4 = inlined_call_operand.vmem [shape: f32[32,512], index: 4, kind: output, shape index: {}]  }
   0x1   :  { %s1060_s17 = smov 0   ;;  %s1062_s18 = smov 0  }
   0x2   :  { %s1064_s19 = smov 0  }
   0x3 LB: > { %s29_s20 = sadd.s32 1, %s1024_s18  ;;  %s865_s21 = sadd.s32 4294967295, %s1028_s19   ;;  %s1028_s19 = sphi %s1064_s19, %s14_s19   ;;  %s1024_s18 = sphi %s1062_s18, %s1205_s18   ;;  %s1020_s17 = sphi %s1060_s17, %s1204_s17   ;;  %s1016_s16 = sphi %s1058_s16, %s1203_s16   ;;  %s1012_s15 = sphi %s1056_s15, %s1202_s15  }
   0x4   : > { %p31_p0 = scmp.ge.s32.totalorder %s29_s20, 2  ;;  %p77_p1 = scmp.ne.s32.totalorder %s1016_s16, %s1012_s15 }
   0x5   : > { %p78_p2 = scmp.eq.s32.totalorder %s1028_s19, 0  ;;  %p163_p4 = scmp.eq.s32.totalorder %s865_s21, 1 }
   0x6   : > { %s1207_s20 = smov (%p31_p0, %s29_s20), 0  ;;  %s70_s24 = sadd.s32 1, %s1016_s16 }
   0x7   : > { %p1088_p3 = por %p78_p2, %p77_p1  ;;  %s66_s23 = ssub.s32 %s1024_s18, %s1207_s20 }
   0x8   : > { %p68_p5 = scmp.eq.s32.totalorder %s66_s23, 0  ;;  %p1095_p6 = por %p163_p4, %p77_p1 }
   0x9   : > { %p869_p7 = scmp.ge.s32.totalorder %s1028_s19, 2 }
   0xa   : > { %s1100_s26 = scalar_select %p68_p5, %s1016_s16, %s70_s24  }
   0xb   : > { %198 = sbr.rel (%p869_p7) target bundleno = 38 (0x26), region = 20 }
  0x12   : > { %201 = sbr.rel (!%p1088_p3) target bundleno = 30 (0x1e), region = 24  ;;  %s203_s27 = sand.u32 (%p1088_p3), 1, %s1016_s16  }
  0x13   : > { %s904_s28 = sshll.u32 (%p1088_p3), %s1024_s18, 3  ;;  %s870_s29 = sshll.u32 (%p1088_p3), %s203_s27, 7 }
  0x14   : > { %s1110_s6 = scalar_lea.vmem (%p1088_p3), %s1196_s1, %s904_s28  ;;  %s205_s7 = scalar_lea.vmem (%p1088_p3), [#allocation3], %s870_s29 }
  0x15   : > { %v268_v0 = vld [vmem:[%s1110_s6] sm:$0xff] (%p1088_p3)  ;;  %v270_v1 = vld [vmem:[%s1110_s6 + $0x10] sm:$0xff] (%p1088_p3) }
  0x16   : > { %v272_v2 = vld [vmem:[%s1110_s6 + $0x20] sm:$0xff] (%p1088_p3)  ;;  %269 = vst [vmem:[%s205_s7] sm:$0xff] (%p1088_p3), %v268_v0  ;;  %271 = vst [vmem:[%s205_s7 + $0x8] sm:$0xff] (%p1088_p3), %v270_v1  ;;  %v274_v3 = vld [vmem:[%s1110_s6 + $0x30] sm:$0xff] (%p1088_p3) }
  0x17   : > { %273 = vst [vmem:[%s205_s7 + $0x10] sm:$0xff] (%p1088_p3), %v272_v2  ;;  %v276_v4 = vld [vmem:[%s1110_s6 + $0x40] sm:$0xff] (%p1088_p3)  ;;  %v278_v5 = vld [vmem:[%s1110_s6 + $0x50] sm:$0xff] (%p1088_p3)  ;;  %275 = vst [vmem:[%s205_s7 + $0x18] sm:$0xff] (%p1088_p3), %v274_v3 }
  0x18   : > { %277 = vst [vmem:[%s205_s7 + $0x20] sm:$0xff] (%p1088_p3), %v276_v4  ;;  %279 = vst [vmem:[%s205_s7 + $0x28] sm:$0xff] (%p1088_p3), %v278_v5  ;;  %v280_v6 = vld [vmem:[%s1110_s6 + $0x60] sm:$0xff] (%p1088_p3)  ;;  %v282_v7 = vld [vmem:[%s1110_s6 + $0x70] sm:$0xff] (%p1088_p3) }
  0x19   : > { %v284_v8 = vld [vmem:[%s1110_s6 + $0x80] sm:$0xff]  ;;  %281 = vst [vmem:[%s205_s7 + $0x30] sm:$0xff] %v280_v6  ;;  %283 = vst [vmem:[%s205_s7 + $0x38] sm:$0xff] %v282_v7  ;;  %v286_v9 = vld [vmem:[%s1110_s6 + $0x90] sm:$0xff] }
  0x1a   : > { %285 = vst [vmem:[%s205_s7 + $0x40] sm:$0xff] %v284_v8  ;;  %v288_v10 = vld [vmem:[%s1110_s6 + $0xa0] sm:$0xff]  ;;  %v290_v11 = vld [vmem:[%s1110_s6 + $0xb0] sm:$0xff]  ;;  %287 = vst [vmem:[%s205_s7 + $0x48] sm:$0xff] %v286_v9 }
  0x1b   : > { %289 = vst [vmem:[%s205_s7 + $0x50] sm:$0xff] %v288_v10  ;;  %291 = vst [vmem:[%s205_s7 + $0x58] sm:$0xff] %v290_v11  ;;  %v292_v12 = vld [vmem:[%s1110_s6 + $0xc0] sm:$0xff]  ;;  %v294_v13 = vld [vmem:[%s1110_s6 + $0xd0] sm:$0xff] }
  0x1c   : > { %v296_v14 = vld [vmem:[%s1110_s6 + $0xe0] sm:$0xff]  ;;  %293 = vst [vmem:[%s205_s7 + $0x60] sm:$0xff] %v292_v12  ;;  %295 = vst [vmem:[%s205_s7 + $0x68] sm:$0xff] %v294_v13  ;;  %v298_v15 = vld [vmem:[%s1110_s6 + $0xf0] sm:$0xff] }
  0x1d   : > { %297 = vst [vmem:[%s205_s7 + $0x70] sm:$0xff] %v296_v14  ;;  %299 = vst [vmem:[%s205_s7 + $0x78] sm:$0xff] %v298_v15 }
  0x1e PF: > { %313 = sbr.rel (!%p1088_p3) target bundleno = 38 (0x26), region = 66  ;;  %s315_s8 = sand.u32 (%p1088_p3), 1, %s1016_s16  }
  0x1f   : > { %s905_s9 = sshll.u32 (%p1088_p3), %s1024_s18, 4  ;;  %s873_s10 = sshll.u32 (%p1088_p3), %s315_s8, 6 }
  0x20   : > { %s323_s13 = scalar_lea.vmem (%p1088_p3), %s1198_s3, %s905_s9  ;;  %s317_s14 = scalar_lea.vmem (%p1088_p3), [#allocation4], %s873_s10 }
  0x21   : > { %v336_v16 = vld [vmem:[%s323_s13] sm:$0xff] (%p1088_p3)  ;;  %v338_v17 = vld [vmem:[%s323_s13 + $0x8] sm:$0xff] (%p1088_p3) }
  0x22   : > { %v340_v18 = vld [vmem:[%s323_s13 + $0x20] sm:$0xff] (%p1088_p3)  ;;  %337 = vst [vmem:[%s317_s14] sm:$0xff] (%p1088_p3), %v336_v16  ;;  %339 = vst [vmem:[%s317_s14 + $0x8] sm:$0xff] (%p1088_p3), %v338_v17  ;;  %v342_v19 = vld [vmem:[%s323_s13 + $0x28] sm:$0xff] (%p1088_p3) }
  0x23   : > { %341 = vst [vmem:[%s317_s14 + $0x10] sm:$0xff] (%p1088_p3), %v340_v18  ;;  %v344_v20 = vld [vmem:[%s323_s13 + $0x40] sm:$0xff] (%p1088_p3)  ;;  %v346_v21 = vld [vmem:[%s323_s13 + $0x48] sm:$0xff] (%p1088_p3)  ;;  %343 = vst [vmem:[%s317_s14 + $0x18] sm:$0xff] (%p1088_p3), %v342_v19 }
  0x24   : > { %345 = vst [vmem:[%s317_s14 + $0x20] sm:$0xff] (%p1088_p3), %v344_v20  ;;  %347 = vst [vmem:[%s317_s14 + $0x28] sm:$0xff] (%p1088_p3), %v346_v21  ;;  %v348_v22 = vld [vmem:[%s323_s13 + $0x60] sm:$0xff] (%p1088_p3)  ;;  %v350_v23 = vld [vmem:[%s323_s13 + $0x68] sm:$0xff] (%p1088_p3) }
  0x25   : > { %349 = vst [vmem:[%s317_s14 + $0x30] sm:$0xff] %v348_v22  ;;  %351 = vst [vmem:[%s317_s14 + $0x38] sm:$0xff] %v350_v23 }
  0x26 PF: > { %p876_p8 = scmp.ge.s32.totalorder %s1028_s19, 1  ;;  %p356_p9 = scmp.lt.s32.totalorder %s1028_s19, 3 }
  0x28   : > { %p357_p10 = pnand %p876_p8, %p356_p9 }
  0x29   : > { %s363_s21 = sand.u32 (!%p357_p10), 1, %s1012_s15   ;;  %v1030_v24 = vmov (!%p357_p10), 0   ;;  %v988_v41 = vld [vmem:[%s1195_s0] sm:$0xff] (!%p357_p10)   ;;  %v989_v42 = vld [vmem:[%s1195_s0 + $0x8] sm:$0xff] (!%p357_p10)   ;;  %s880_s30 = sshll.u32 (!%p357_p10), %s1020_s17, 1  ;;  %v646_v43 = vlaneseq (!%p357_p10) }
  0x2a   : > { %360 = sbr.rel (%p357_p10) target bundleno = 308 (0x134), region = 89  ;;  %s877_s22 = sshll.u32 (!%p357_p10), %s363_s21, 7  ;;  %596 = vmatprep.mubr.bf16.mxu0 (!%p357_p10), %v1030_v24  ;;  %606 = vmatprep.mubr.bf16.mxu1 (!%p357_p10), %v1030_v24 }
  0x2b   : > { %s1140_s23 = scalar_lea.vmem (!%p357_p10), [#allocation3], %s877_s22  ;;  %p423_p11 = scmp.lt.s32.totalorder (!%p357_p10), %s880_s30, 3  ;;  %v647_v44 = vshrl.u32 (!%p357_p10), %v646_v43, 7 }
  0x2c   : > { %v964_v25 = vld [vmem:[%s1140_s23 + $0x4] ss:$8 sps:$4 sm:$0xff] (!%p357_p10)   ;;  %v966_v26 = vld [vmem:[%s1140_s23] ss:$8 sps:$4 sm:$0xff] (!%p357_p10)   ;;  %v967_v27 = vld [vmem:[%s1140_s23 + $0x14] ss:$8 sps:$4 sm:$0xff] (!%p357_p10)  }
  0x2d   : > { %564 = vmatprep.subr.bf16.mxu0 (!%p357_p10), %v964_v25  ;;  %907 = vmatprep.subr.bf16.mxu1 (!%p357_p10), %v964_v25  ;;  %v969_v28 = vld [vmem:[%s1140_s23 + $0x10] ss:$8 sps:$4 sm:$0xff] (!%p357_p10)   ;;  %v970_v29 = vld [vmem:[%s1140_s23 + $0x24] ss:$8 sps:$4 sm:$0xff] (!%p357_p10)   ;;  %v972_v30 = vld [vmem:[%s1140_s23 + $0x20] ss:$8 sps:$4 sm:$0xff] (!%p357_p10)  }
  0x2e   : > { %565 = vmatpush1.bf16.msra.mxu0 (!%p357_p10), %v966_v26  ;;  %915 = vmatpush1.bf16.msra.mxu1 (!%p357_p10), %v966_v26  ;;  %v973_v31 = vld [vmem:[%s1140_s23 + $0x34] ss:$8 sps:$4 sm:$0xff] (!%p357_p10)   ;;  %v975_v32 = vld [vmem:[%s1140_s23 + $0x30] ss:$8 sps:$4 sm:$0xff] (!%p357_p10)   ;;  %v976_v33 = vld [vmem:[%s1140_s23 + $0x44] ss:$8 sps:$4 sm:$0xff] (!%p357_p10)  }
  0x2f   : > { %566 = vmatprep.subr.bf16.mxu0 (!%p357_p10), %v967_v27  ;;  %908 = vmatprep.subr.bf16.mxu1 (!%p357_p10), %v967_v27  ;;  %v978_v34 = vld [vmem:[%s1140_s23 + $0x40] ss:$8 sps:$4 sm:$0xff] (!%p357_p10)   ;;  %v979_v35 = vld [vmem:[%s1140_s23 + $0x54] ss:$8 sps:$4 sm:$0xff] (!%p357_p10)   ;;  %v981_v36 = vld [vmem:[%s1140_s23 + $0x50] ss:$8 sps:$4 sm:$0xff] (!%p357_p10)  }
  0x30   : > { %v982_v37 = vld [vmem:[%s1140_s23 + $0x64] ss:$8 sps:$4 sm:$0xff] (!%p357_p10)   ;;  %v984_v38 = vld [vmem:[%s1140_s23 + $0x60] ss:$8 sps:$4 sm:$0xff] (!%p357_p10)   ;;  %v985_v39 = vld [vmem:[%s1140_s23 + $0x74] ss:$8 sps:$4 sm:$0xff] (!%p357_p10)  }
  0x31   : > { %v987_v40 = vld [vmem:[%s1140_s23 + $0x70] ss:$8 sps:$4 sm:$0xff]   ;;  %s1209_s30 = smov (!%p423_p11, %s880_s30), 3  ;;  %v648_v45 = vsub.s32 0, %v647_v44  ;;  %s1170_s8 = sshll.u32 %s363_s21, 6  ;;  %v652_v47 = vsub.s32 1, %v647_v44 }
  0x32   : > { %567 = vmatpush1.bf16.msra.mxu0 %v969_v28  ;;  %916 = vmatpush1.bf16.msra.mxu1 %v969_v28  ;;  %s425_s7 = scalar_lea.vmem %s1197_s2, %s1209_s30  ;;  %s372_s9 = scalar_lea.vmem [#allocation4], %s1170_s8 }
  0x33   : > { %568 = vmatprep.subr.bf16.mxu0 %v970_v29  ;;  %909 = vmatprep.subr.bf16.mxu1 %v970_v29  ;;  %v644_v46 = vld [vmem:[%s425_s7] sm:$0x3]  ;;  %v665_v57 = vld [vmem:[%s372_s9 + $0x8] sm:$0xff]  ;;  %v666_v63 = vld [vmem:[%s372_s9 + $0x10] sm:$0xff]  ;;  %s410_s15 = scalar_lea.vmem [#allocation5], %s1170_s8  ;;  %s906_s10 = sshll.u32 (%p1095_p6), %s1020_s17, 4 }
  0x34   : > { %v649_v48 = vrot.slane %v644_v46, %v648_v45  ;;  %v653_v49 = vrot.slane %v644_v46, %v652_v47  ;;  %v664_v51 = vld [vmem:[%s372_s9] sm:$0xff]  ;;  %v669_v59 = vld [vmem:[%s372_s9 + $0x28] sm:$0xff]  ;;  %v670_v1 = vld [vmem:[%s372_s9 + $0x30] sm:$0xff]  ;;  %s708_s13 = scalar_lea.vmem (%p1095_p6), %s1199_s4, %s906_s10 }
  0x35   : > { %v668_v53 = vld [vmem:[%s372_s9 + $0x20] sm:$0xff]  ;;  %v667_v7 = vld [vmem:[%s372_s9 + $0x18] sm:$0xff] }
  0x36   : > { %569 = vmatpush1.bf16.msra.mxu0 %v972_v30  ;;  %917 = vmatpush1.bf16.msra.mxu1 %v972_v30  ;;  %v671_v9 = vld [vmem:[%s372_s9 + $0x38] sm:$0xff] }
  0x37   : > { %570 = vmatprep.subr.bf16.mxu0 %v973_v31  ;;  %910 = vmatprep.subr.bf16.mxu1 %v973_v31 }
  0x3a   : > { %571 = vmatpush1.bf16.msra.mxu0 %v975_v32  ;;  %918 = vmatpush1.bf16.msra.mxu1 %v975_v32 }
  0x3b   : > { %572 = vmatprep.subr.bf16.mxu0 %v976_v33  ;;  %911 = vmatprep.subr.bf16.mxu1 %v976_v33 }
  0x3e   : > { %573 = vmatpush1.bf16.msra.mxu0 %v978_v34  ;;  %919 = vmatpush1.bf16.msra.mxu1 %v978_v34 }
  0x3f   : > { %574 = vmatprep.subr.bf16.mxu0 %v979_v35  ;;  %912 = vmatprep.subr.bf16.mxu1 %v979_v35 }
  0x42   : > { %575 = vmatpush1.bf16.msra.mxu0 %v981_v36  ;;  %920 = vmatpush1.bf16.msra.mxu1 %v981_v36 }
  0x43   : > { %576 = vmatprep.subr.bf16.mxu0 %v982_v37  ;;  %913 = vmatprep.subr.bf16.mxu1 %v982_v37 }
  0x46   : > { %577 = vmatpush1.bf16.msra.mxu0 %v984_v38  ;;  %921 = vmatpush1.bf16.msra.mxu1 %v984_v38 }
  0x47   : > { %578 = vmatprep.subr.bf16.mxu0 %v985_v39  ;;  %914 = vmatprep.subr.bf16.mxu1 %v985_v39 }
  0x4a   : > { %579 = vmatpush1.bf16.msra.mxu0 %v987_v40  ;;  %922 = vmatpush1.bf16.msra.mxu1 %v987_v40 }
  0x4d   : > { %597 = vmatmul.mubr.bf16.vlgmr.msra.gmra.mrb[0].mxu0 %v988_v41  ;;  %607 = vmatmul.mubr.bf16.vlgmr.msra.gmra.mrb[0].mxu1 %v989_v42 }
 0x120   : > { %v598_v50 = vpop.f32.mrb[0].mxu0  ;;  %v608_v52 = vpop.f32.mrb[0].mxu1 }
 0x121   : > { %v656_v54 = vadd.f32 %v649_v48, %v598_v50  ;;  %v660_v55 = vadd.f32 %v649_v48, %v608_v52  ;;  %v600_v56 = vpop.f32.mrb[1].mxu0  ;;  %v610_v58 = vpop.f32.mrb[1].mxu1 }
 0x122   : > { %v657_v60 = vadd.f32 %v653_v49, %v600_v56  ;;  %v661_v61 = vadd.f32 %v653_v49, %v610_v58  ;;  %v602_v62 = vpop.f32.mrb[2].mxu0  ;;  %v612_v0 = vpop.f32.mrb[2].mxu1 }
 0x123   : > { %v672_v2 = vadd.f32 %v664_v51, %v656_v54  ;;  %v676_v3 = vadd.f32 %v668_v53, %v660_v55  ;;  %v658_v4 = vadd.f32 %v649_v48, %v602_v62  ;;  %v662_v5 = vadd.f32 %v649_v48, %v612_v0  ;;  %v604_v6 = vpop.f32.mrb[3].mxu0  ;;  %v614_v8 = vpop.f32.mrb[3].mxu1 }
 0x124   : > { %v673_v10 = vadd.f32 %v665_v57, %v657_v60  ;;  %v677_v11 = vadd.f32 %v669_v59, %v661_v61  ;;  %v659_v12 = vadd.f32 %v653_v49, %v604_v6  ;;  %v663_v13 = vadd.f32 %v653_v49, %v614_v8  ;;  %702 = sbr.rel (!%p1095_p6) target bundleno = 308 (0x134), region = 109 }
 0x125   : > { %v680_v14 = vmax.f32 %v672_v2, 0.0  ;;  %v684_v15 = vmax.f32 %v676_v3, 0.0  ;;  %v674_v16 = vadd.f32 %v666_v63, %v658_v4  ;;  %v678_v17 = vadd.f32 %v670_v1, %v662_v5 }
 0x126   : > { %v681_v18 = vmax.f32 %v673_v10, 0.0  ;;  %v685_v19 = vmax.f32 %v677_v11, 0.0  ;;  %v675_v20 = vadd.f32 %v667_v7, %v659_v12  ;;  %v679_v21 = vadd.f32 %v671_v9, %v663_v13 }
 0x127   : > { %688 = vst [vmem:[%s410_s15] sm:$0xff] %v680_v14  ;;  %692 = vst [vmem:[%s410_s15 + $0x20] sm:$0xff] %v684_v15  ;;  %v682_v22 = vmax.f32 %v674_v16, 0.0  ;;  %v686_v23 = vmax.f32 %v678_v17, 0.0 }
 0x128   : > { %689 = vst [vmem:[%s410_s15 + $0x8] sm:$0xff] %v681_v18  ;;  %693 = vst [vmem:[%s410_s15 + $0x28] sm:$0xff] %v685_v19  ;;  %v683_v24 = vmax.f32 %v675_v20, 0.0  ;;  %v687_v25 = vmax.f32 %v679_v21, 0.0 }
 0x129   : > { %690 = vst [vmem:[%s410_s15 + $0x10] sm:$0xff] %v682_v22  ;;  %694 = vst [vmem:[%s410_s15 + $0x30] sm:$0xff] %v686_v23 }
 0x12a   : > { %691 = vst [vmem:[%s410_s15 + $0x18] sm:$0xff] %v683_v24  ;;  %695 = vst [vmem:[%s410_s15 + $0x38] sm:$0xff] %v687_v25 }
 0x12e   : > { %v721_v26 = vld [vmem:[%s410_s15] sm:$0xff] }
 0x12f   : > { %v723_v27 = vld [vmem:[%s410_s15 + $0x8] sm:$0xff]  ;;  %v729_v30 = vld [vmem:[%s410_s15 + $0x20] sm:$0xff]  ;;  %722 = vst [vmem:[%s708_s13] sm:$0xff] %v721_v26 }
 0x130   : > { %v725_v28 = vld [vmem:[%s410_s15 + $0x10] sm:$0xff]  ;;  %v731_v31 = vld [vmem:[%s410_s15 + $0x28] sm:$0xff]  ;;  %724 = vst [vmem:[%s708_s13 + $0x8] sm:$0xff] %v723_v27  ;;  %730 = vst [vmem:[%s708_s13 + $0x40] sm:$0xff] %v729_v30 }
 0x131   : > { %v727_v29 = vld [vmem:[%s410_s15 + $0x18] sm:$0xff]  ;;  %726 = vst [vmem:[%s708_s13 + $0x20] sm:$0xff] %v725_v28  ;;  %732 = vst [vmem:[%s708_s13 + $0x48] sm:$0xff] %v731_v31  ;;  %v733_v32 = vld [vmem:[%s410_s15 + $0x30] sm:$0xff] }
 0x132   : > { %728 = vst [vmem:[%s708_s13 + $0x28] sm:$0xff] %v727_v29  ;;  %v735_v33 = vld [vmem:[%s410_s15 + $0x38] sm:$0xff]  ;;  %734 = vst [vmem:[%s708_s13 + $0x60] sm:$0xff] %v733_v32 }
 0x133   : > { %736 = vst [vmem:[%s708_s13 + $0x68] sm:$0xff] %v735_v33 }
 0x134 PF: > { %s14_s19 = sadd.s32 1, %s1028_s19   ;;  %s1202_s15 = smov %s1016_s16 }
 0x135   : > { %p11_p12 = scmp.ge.s32.totalorder %s14_s19, 4   ;;  %s1203_s16 = smov %s1100_s26 }
 0x136   : > { %s1204_s17 = smov %s1024_s18  ;;  %s1205_s18 = smov %s1207_s20 }
 0x137   :  { %13 = sbr.rel (!%p11_p12) target bundleno = 3 (0x3), region = 177 }

// kernel: feature_vectors_forward.57
= control target key start
LH: loop header
LB: loop body
LE: loop exit
PB: predicated region body
PF: predicated region fallthrough
CT: control target
= control target key end

     0   :  { %s1146_s12 = smov 0   ;;  %s1148_s13 = smov 0   ;;  %s1358_s0 = inlined_call_operand.vmem [shape: bf16[1,32,256], index: 0, kind: input, shape index: {}]   ;;  %s1359_s1 = inlined_call_operand.vmem [shape: bf16[1,256,512], index: 1, kind: input, shape index: {}]   ;;  %s1360_s2 = inlined_call_operand.vmem [shape: f32[1,512], index: 2, kind: input, shape index: {}]   ;;  %s1361_s3 = inlined_call_operand.vmem [shape: f32[32,512], index: 3, kind: output, shape index: {}]  }
   0x1   :  { %s1150_s14 = smov 0   ;;  %s1152_s15 = smov 0  }
   0x2   :  { %s1154_s16 = smov 0  }
   0x3 LB: > { %s28_s17 = sadd.s32 1, %s1120_s15  ;;  %s905_s18 = sadd.s32 4294967295, %s1124_s16   ;;  %s1124_s16 = sphi %s1154_s16, %s13_s16   ;;  %s1120_s15 = sphi %s1152_s15, %s1366_s15   ;;  %s1116_s14 = sphi %s1150_s14, %s1365_s14   ;;  %s1112_s13 = sphi %s1148_s13, %s1364_s13   ;;  %s1108_s12 = sphi %s1146_s12, %s1363_s12  }
   0x4   : > { %p30_p0 = scmp.ge.s32.totalorder %s28_s17, 2  ;;  %p76_p1 = scmp.ne.s32.totalorder %s1112_s13, %s1108_s12 }
   0x5   : > { %p77_p2 = scmp.eq.s32.totalorder %s1124_s16, 0  ;;  %p134_p4 = scmp.eq.s32.totalorder %s905_s18, 1 }
   0x6   : > { %s1368_s17 = smov (%p30_p0, %s28_s17), 0  ;;  %s69_s20 = sadd.s32 1, %s1112_s13 }
   0x7   : > { %p78_p3 = por %p77_p2, %p76_p1  ;;  %s65_s19 = ssub.s32 %s1120_s15, %s1368_s17 }
   0x8   : > { %p67_p5 = scmp.eq.s32.totalorder %s65_s19, 0  ;;  %p1181_p6 = por %p134_p4, %p76_p1 }
   0x9   : > { %p909_p7 = scmp.ge.s32.totalorder %s1124_s16, 2 }
   0xa   : > { %s1186_s22 = scalar_select %p67_p5, %s1112_s13, %s69_s20  }
   0xb   : > { %170 = sbr.rel (%p909_p7) target bundleno = 38 (0x26), region = 20 }
  0x12   : > { %173 = sbr.rel (!%p78_p3) target bundleno = 38 (0x26), region = 24  ;;  %s175_s23 = sand.u32 (%p78_p3), 1, %s1112_s13  }
  0x13   : > { %s958_s24 = sshll.u32 (%p78_p3), %s1120_s15, 3  ;;  %s910_s25 = sshll.u32 (%p78_p3), %s175_s23, 8 }
  0x14   : > { %s1194_s28 = scalar_lea.vmem (%p78_p3), %s1359_s1, %s958_s24  ;;  %s1199_s29 = scalar_lea.vmem (%p78_p3), [#allocation3], %s910_s25 }
  0x15   : > { %v272_v0 = vld [vmem:[%s1194_s28] sm:$0xff] (%p78_p3)  ;;  %v274_v1 = vld [vmem:[%s1194_s28 + $0x10] sm:$0xff] (%p78_p3) }
  0x16   : > { %v276_v2 = vld [vmem:[%s1194_s28 + $0x20] sm:$0xff] (%p78_p3)  ;;  %273 = vst [vmem:[%s1199_s29] sm:$0xff] (%p78_p3), %v272_v0  ;;  %275 = vst [vmem:[%s1199_s29 + $0x8] sm:$0xff] (%p78_p3), %v274_v1  ;;  %v278_v3 = vld [vmem:[%s1194_s28 + $0x30] sm:$0xff] (%p78_p3) }
  0x17   : > { %277 = vst [vmem:[%s1199_s29 + $0x10] sm:$0xff] (%p78_p3), %v276_v2  ;;  %v280_v4 = vld [vmem:[%s1194_s28 + $0x40] sm:$0xff] (%p78_p3)  ;;  %v282_v5 = vld [vmem:[%s1194_s28 + $0x50] sm:$0xff] (%p78_p3)  ;;  %279 = vst [vmem:[%s1199_s29 + $0x18] sm:$0xff] (%p78_p3), %v278_v3 }
  0x18   : > { %281 = vst [vmem:[%s1199_s29 + $0x20] sm:$0xff] (%p78_p3), %v280_v4  ;;  %283 = vst [vmem:[%s1199_s29 + $0x28] sm:$0xff] (%p78_p3), %v282_v5  ;;  %v284_v6 = vld [vmem:[%s1194_s28 + $0x60] sm:$0xff] (%p78_p3)  ;;  %v286_v7 = vld [vmem:[%s1194_s28 + $0x70] sm:$0xff] (%p78_p3) }
  0x19   : > { %v288_v8 = vld [vmem:[%s1194_s28 + $0x80] sm:$0xff]  ;;  %285 = vst [vmem:[%s1199_s29 + $0x30] sm:$0xff] %v284_v6  ;;  %287 = vst [vmem:[%s1199_s29 + $0x38] sm:$0xff] %v286_v7  ;;  %v290_v9 = vld [vmem:[%s1194_s28 + $0x90] sm:$0xff] }
  0x1a   : > { %289 = vst [vmem:[%s1199_s29 + $0x40] sm:$0xff] %v288_v8  ;;  %v292_v10 = vld [vmem:[%s1194_s28 + $0xa0] sm:$0xff]  ;;  %v294_v11 = vld [vmem:[%s1194_s28 + $0xb0] sm:$0xff]  ;;  %291 = vst [vmem:[%s1199_s29 + $0x48] sm:$0xff] %v290_v9 }
  0x1b   : > { %293 = vst [vmem:[%s1199_s29 + $0x50] sm:$0xff] %v292_v10  ;;  %295 = vst [vmem:[%s1199_s29 + $0x58] sm:$0xff] %v294_v11  ;;  %v296_v12 = vld [vmem:[%s1194_s28 + $0xc0] sm:$0xff]  ;;  %v298_v13 = vld [vmem:[%s1194_s28 + $0xd0] sm:$0xff] }
  0x1c   : > { %v300_v14 = vld [vmem:[%s1194_s28 + $0xe0] sm:$0xff]  ;;  %297 = vst [vmem:[%s1199_s29 + $0x60] sm:$0xff] %v296_v12  ;;  %299 = vst [vmem:[%s1199_s29 + $0x68] sm:$0xff] %v298_v13  ;;  %v302_v15 = vld [vmem:[%s1194_s28 + $0xf0] sm:$0xff] }
  0x1d   : > { %301 = vst [vmem:[%s1199_s29 + $0x70] sm:$0xff] %v300_v14  ;;  %v304_v16 = vld [vmem:[%s1194_s28 + $0x100] sm:$0xff]  ;;  %v306_v17 = vld [vmem:[%s1194_s28 + $0x110] sm:$0xff]  ;;  %303 = vst [vmem:[%s1199_s29 + $0x78] sm:$0xff] %v302_v15 }
  0x1e   : > { %305 = vst [vmem:[%s1199_s29 + $0x80] sm:$0xff] %v304_v16  ;;  %307 = vst [vmem:[%s1199_s29 + $0x88] sm:$0xff] %v306_v17  ;;  %v308_v18 = vld [vmem:[%s1194_s28 + $0x120] sm:$0xff]  ;;  %v310_v19 = vld [vmem:[%s1194_s28 + $0x130] sm:$0xff] }
  0x1f   : > { %v312_v20 = vld [vmem:[%s1194_s28 + $0x140] sm:$0xff]  ;;  %309 = vst [vmem:[%s1199_s29 + $0x90] sm:$0xff] %v308_v18  ;;  %311 = vst [vmem:[%s1199_s29 + $0x98] sm:$0xff] %v310_v19  ;;  %v314_v21 = vld [vmem:[%s1194_s28 + $0x150] sm:$0xff] }
  0x20   : > { %313 = vst [vmem:[%s1199_s29 + $0xa0] sm:$0xff] %v312_v20  ;;  %v316_v22 = vld [vmem:[%s1194_s28 + $0x160] sm:$0xff]  ;;  %v318_v23 = vld [vmem:[%s1194_s28 + $0x170] sm:$0xff]  ;;  %315 = vst [vmem:[%s1199_s29 + $0xa8] sm:$0xff] %v314_v21 }
  0x21   : > { %317 = vst [vmem:[%s1199_s29 + $0xb0] sm:$0xff] %v316_v22  ;;  %319 = vst [vmem:[%s1199_s29 + $0xb8] sm:$0xff] %v318_v23  ;;  %v320_v24 = vld [vmem:[%s1194_s28 + $0x180] sm:$0xff]  ;;  %v322_v25 = vld [vmem:[%s1194_s28 + $0x190] sm:$0xff] }
  0x22   : > { %v324_v26 = vld [vmem:[%s1194_s28 + $0x1a0] sm:$0xff]  ;;  %321 = vst [vmem:[%s1199_s29 + $0xc0] sm:$0xff] %v320_v24  ;;  %323 = vst [vmem:[%s1199_s29 + $0xc8] sm:$0xff] %v322_v25  ;;  %v326_v27 = vld [vmem:[%s1194_s28 + $0x1b0] sm:$0xff] }
  0x23   : > { %325 = vst [vmem:[%s1199_s29 + $0xd0] sm:$0xff] %v324_v26  ;;  %v328_v28 = vld [vmem:[%s1194_s28 + $0x1c0] sm:$0xff]  ;;  %v330_v29 = vld [vmem:[%s1194_s28 + $0x1d0] sm:$0xff]  ;;  %327 = vst [vmem:[%s1199_s29 + $0xd8] sm:$0xff] %v326_v27 }
  0x24   : > { %329 = vst [vmem:[%s1199_s29 + $0xe0] sm:$0xff] %v328_v28  ;;  %331 = vst [vmem:[%s1199_s29 + $0xe8] sm:$0xff] %v330_v29  ;;  %v332_v30 = vld [vmem:[%s1194_s28 + $0x1e0] sm:$0xff]  ;;  %v334_v31 = vld [vmem:[%s1194_s28 + $0x1f0] sm:$0xff] }
  0x25   : > { %333 = vst [vmem:[%s1199_s29 + $0xf0] sm:$0xff] %v332_v30  ;;  %335 = vst [vmem:[%s1199_s29 + $0xf8] sm:$0xff] %v334_v31 }
  0x26 PF: > { %p913_p8 = scmp.ge.s32.totalorder %s1124_s16, 1  ;;  %p348_p9 = scmp.lt.s32.totalorder %s1124_s16, 3 }
  0x28   : > { %p349_p10 = pnand %p913_p8, %p348_p9 }
  0x29   : > { %s355_s30 = sand.u32 (!%p349_p10), 1, %s1108_s12   ;;  %v1082_v32 = vld [vmem:[%s1358_s0 + $0x4] ss:$8 sps:$4 sm:$0xff] (!%p349_p10)   ;;  %v1085_v33 = vld [vmem:[%s1358_s0 + $0x14] ss:$8 sps:$4 sm:$0xff] (!%p349_p10)   ;;  %s916_s20 = sshll.u32 (!%p349_p10), %s1116_s14, 1  ;;  %v728_v4 = vlaneseq (!%p349_p10) }
  0x2a   : > { %352 = sbr.rel (%p349_p10) target bundleno = 336 (0x150), region = 66  ;;  %s914_s4 = sshll.u32 (!%p349_p10), %s355_s30, 8  ;;  %678 = vmatprep.mubr.bf16.mxu0 (!%p349_p10), %v1082_v32  ;;  %688 = vmatprep.mubr.bf16.mxu1 (!%p349_p10), %v1085_v33  ;;  %v1080_v2 = vld [vmem:[%s1358_s0] ss:$8 sps:$4 sm:$0xff] (!%p349_p10)   ;;  %v1083_v3 = vld [vmem:[%s1358_s0 + $0x10] ss:$8 sps:$4 sm:$0xff] (!%p349_p10)  }
  0x2b   : > { %s1273_s9 = scalar_lea.vmem (!%p349_p10), [#allocation3], %s914_s4  ;;  %p404_p11 = scmp.lt.s32.totalorder (!%p349_p10), %s916_s20, 3  ;;  %v729_v5 = vshrl.u32 (!%p349_p10), %v728_v4, 7 }
  0x2c   : > { %v1032_v34 = vld [vmem:[%s1273_s9 + $0x4] ss:$8 sps:$4 sm:$0xff] (!%p349_p10)   ;;  %v1034_v35 = vld [vmem:[%s1273_s9] ss:$8 sps:$4 sm:$0xff] (!%p349_p10)   ;;  %v1035_v36 = vld [vmem:[%s1273_s9 + $0x14] ss:$8 sps:$4 sm:$0xff] (!%p349_p10)  }
  0x2d   : > { %646 = vmatprep.subr.bf16.mxu0 (!%p349_p10), %v1032_v34  ;;  %960 = vmatprep.subr.bf16.mxu1 (!%p349_p10), %v1032_v34  ;;  %v1037_v37 = vld [vmem:[%s1273_s9 + $0x10] ss:$8 sps:$4 sm:$0xff] (!%p349_p10)   ;;  %v1038_v38 = vld [vmem:[%s1273_s9 + $0x24] ss:$8 sps:$4 sm:$0xff] (!%p349_p10)   ;;  %v1040_v39 = vld [vmem:[%s1273_s9 + $0x20] ss:$8 sps:$4 sm:$0xff] (!%p349_p10)  }
  0x2e   : > { %647 = vmatpush1.bf16.msra.mxu0 (!%p349_p10), %v1034_v35  ;;  %976 = vmatpush1.bf16.msra.mxu1 (!%p349_p10), %v1034_v35  ;;  %v1041_v40 = vld [vmem:[%s1273_s9 + $0x34] ss:$8 sps:$4 sm:$0xff] (!%p349_p10)   ;;  %v1043_v41 = vld [vmem:[%s1273_s9 + $0x30] ss:$8 sps:$4 sm:$0xff] (!%p349_p10)   ;;  %v1044_v42 = vld [vmem:[%s1273_s9 + $0x44] ss:$8 sps:$4 sm:$0xff] (!%p349_p10)  }
  0x2f   : > { %648 = vmatprep.subr.bf16.mxu0 (!%p349_p10), %v1035_v36  ;;  %961 = vmatprep.subr.bf16.mxu1 (!%p349_p10), %v1035_v36  ;;  %v1046_v43 = vld [vmem:[%s1273_s9 + $0x40] ss:$8 sps:$4 sm:$0xff] (!%p349_p10)   ;;  %v1047_v44 = vld [vmem:[%s1273_s9 + $0x54] ss:$8 sps:$4 sm:$0xff] (!%p349_p10)   ;;  %v1049_v45 = vld [vmem:[%s1273_s9 + $0x50] ss:$8 sps:$4 sm:$0xff] (!%p349_p10)  }
  0x30   : > { %v1050_v46 = vld [vmem:[%s1273_s9 + $0x64] ss:$8 sps:$4 sm:$0xff] (!%p349_p10)   ;;  %v1052_v47 = vld [vmem:[%s1273_s9 + $0x60] ss:$8 sps:$4 sm:$0xff] (!%p349_p10)   ;;  %v1053_v48 = vld [vmem:[%s1273_s9 + $0x74] ss:$8 sps:$4 sm:$0xff] (!%p349_p10)  }
  0x31   : > { %v1055_v49 = vld [vmem:[%s1273_s9 + $0x70] ss:$8 sps:$4 sm:$0xff]   ;;  %v1056_v50 = vld [vmem:[%s1273_s9 + $0x84] ss:$8 sps:$4 sm:$0xff]   ;;  %v1058_v51 = vld [vmem:[%s1273_s9 + $0x80] ss:$8 sps:$4 sm:$0xff]  }
  0x32   : > { %649 = vmatpush1.bf16.msra.mxu0 %v1037_v37  ;;  %977 = vmatpush1.bf16.msra.mxu1 %v1037_v37  ;;  %v1059_v52 = vld [vmem:[%s1273_s9 + $0x94] ss:$8 sps:$4 sm:$0xff]   ;;  %v1061_v53 = vld [vmem:[%s1273_s9 + $0x90] ss:$8 sps:$4 sm:$0xff]   ;;  %v1062_v54 = vld [vmem:[%s1273_s9 + $0xa4] ss:$8 sps:$4 sm:$0xff]  }
  0x33   : > { %650 = vmatprep.subr.bf16.mxu0 %v1038_v38  ;;  %962 = vmatprep.subr.bf16.mxu1 %v1038_v38  ;;  %v1064_v55 = vld [vmem:[%s1273_s9 + $0xa0] ss:$8 sps:$4 sm:$0xff]   ;;  %v1065_v56 = vld [vmem:[%s1273_s9 + $0xb4] ss:$8 sps:$4 sm:$0xff]   ;;  %v1067_v57 = vld [vmem:[%s1273_s9 + $0xb0] ss:$8 sps:$4 sm:$0xff]  }
  0x34   : > { %v1068_v58 = vld [vmem:[%s1273_s9 + $0xc4] ss:$8 sps:$4 sm:$0xff]   ;;  %v1070_v59 = vld [vmem:[%s1273_s9 + $0xc0] ss:$8 sps:$4 sm:$0xff]   ;;  %v1071_v60 = vld [vmem:[%s1273_s9 + $0xd4] ss:$8 sps:$4 sm:$0xff]  }
  0x35   : > { %v1073_v61 = vld [vmem:[%s1273_s9 + $0xd0] ss:$8 sps:$4 sm:$0xff]   ;;  %v1074_v62 = vld [vmem:[%s1273_s9 + $0xe4] ss:$8 sps:$4 sm:$0xff]   ;;  %v1076_v63 = vld [vmem:[%s1273_s9 + $0xe0] ss:$8 sps:$4 sm:$0xff]  }
  0x36   : > { %651 = vmatpush1.bf16.msra.mxu0 %v1040_v39  ;;  %978 = vmatpush1.bf16.msra.mxu1 %v1040_v39  ;;  %v1077_v0 = vld [vmem:[%s1273_s9 + $0xf4] ss:$8 sps:$4 sm:$0xff]   ;;  %v1079_v1 = vld [vmem:[%s1273_s9 + $0xf0] ss:$8 sps:$4 sm:$0xff]   ;;  %s1370_s20 = smov (!%p404_p11, %s916_s20), 3  ;;  %v730_v6 = vsub.s32 0, %v729_v5 }
  0x37   : > { %652 = vmatprep.subr.bf16.mxu0 %v1041_v40  ;;  %963 = vmatprep.subr.bf16.mxu1 %v1041_v40  ;;  %s406_s25 = scalar_lea.vmem %s1360_s2, %s1370_s20  ;;  %v734_v8 = vsub.s32 1, %v729_v5  ;;  %s915_s26 = sshll.u32 %s355_s30, 6 }
  0x38   : > { %v726_v7 = vld [vmem:[%s406_s25] sm:$0x3]  ;;  %s1319_s27 = scalar_lea.vmem [#allocation4], %s915_s26  ;;  %s959_s12 = sshll.u32 (%p1181_p6), %s1116_s14, 4 }
  0x39   : > { %v731_v9 = vrot.slane %v726_v7, %v730_v6  ;;  %v735_v10 = vrot.slane %v726_v7, %v734_v8  ;;  %s766_s30 = scalar_lea.vmem (%p1181_p6), %s1361_s3, %s959_s12 }
  0x3a   : > { %653 = vmatpush1.bf16.msra.mxu0 %v1043_v41  ;;  %979 = vmatpush1.bf16.msra.mxu1 %v1043_v41 }
  0x3b   : > { %654 = vmatprep.subr.bf16.mxu0 %v1044_v42  ;;  %964 = vmatprep.subr.bf16.mxu1 %v1044_v42 }
  0x3e   : > { %655 = vmatpush1.bf16.msra.mxu0 %v1046_v43  ;;  %980 = vmatpush1.bf16.msra.mxu1 %v1046_v43 }
  0x3f   : > { %656 = vmatprep.subr.bf16.mxu0 %v1047_v44  ;;  %965 = vmatprep.subr.bf16.mxu1 %v1047_v44 }
  0x42   : > { %657 = vmatpush1.bf16.msra.mxu0 %v1049_v45  ;;  %981 = vmatpush1.bf16.msra.mxu1 %v1049_v45 }
  0x43   : > { %658 = vmatprep.subr.bf16.mxu0 %v1050_v46  ;;  %966 = vmatprep.subr.bf16.mxu1 %v1050_v46 }
  0x46   : > { %659 = vmatpush1.bf16.msra.mxu0 %v1052_v47  ;;  %982 = vmatpush1.bf16.msra.mxu1 %v1052_v47 }
  0x47   : > { %660 = vmatprep.subr.bf16.mxu0 %v1053_v48  ;;  %967 = vmatprep.subr.bf16.mxu1 %v1053_v48 }
  0x4a   : > { %661 = vmatpush1.bf16.msra.mxu0 %v1055_v49  ;;  %983 = vmatpush1.bf16.msra.mxu1 %v1055_v49 }
  0x4b   : > { %662 = vmatprep.subr.bf16.mxu0 %v1056_v50  ;;  %968 = vmatprep.subr.bf16.mxu1 %v1056_v50 }
  0x4e   : > { %663 = vmatpush1.bf16.msra.mxu0 %v1058_v51  ;;  %984 = vmatpush1.bf16.msra.mxu1 %v1058_v51 }
  0x4f   : > { %664 = vmatprep.subr.bf16.mxu0 %v1059_v52  ;;  %969 = vmatprep.subr.bf16.mxu1 %v1059_v52 }
  0x52   : > { %665 = vmatpush1.bf16.msra.mxu0 %v1061_v53  ;;  %985 = vmatpush1.bf16.msra.mxu1 %v1061_v53 }
  0x53   : > { %666 = vmatprep.subr.bf16.mxu0 %v1062_v54  ;;  %970 = vmatprep.subr.bf16.mxu1 %v1062_v54 }
  0x56   : > { %667 = vmatpush1.bf16.msra.mxu0 %v1064_v55  ;;  %986 = vmatpush1.bf16.msra.mxu1 %v1064_v55 }
  0x57   : > { %668 = vmatprep.subr.bf16.mxu0 %v1065_v56  ;;  %971 = vmatprep.subr.bf16.mxu1 %v1065_v56 }
  0x5a   : > { %669 = vmatpush1.bf16.msra.mxu0 %v1067_v57  ;;  %987 = vmatpush1.bf16.msra.mxu1 %v1067_v57 }
  0x5b   : > { %670 = vmatprep.subr.bf16.mxu0 %v1068_v58  ;;  %972 = vmatprep.subr.bf16.mxu1 %v1068_v58 }
  0x5e   : > { %671 = vmatpush1.bf16.msra.mxu0 %v1070_v59  ;;  %988 = vmatpush1.bf16.msra.mxu1 %v1070_v59 }
  0x5f   : > { %672 = vmatprep.subr.bf16.mxu0 %v1071_v60  ;;  %973 = vmatprep.subr.bf16.mxu1 %v1071_v60 }
  0x62   : > { %673 = vmatpush1.bf16.msra.mxu0 %v1073_v61  ;;  %989 = vmatpush1.bf16.msra.mxu1 %v1073_v61 }
  0x63   : > { %674 = vmatprep.subr.bf16.mxu0 %v1074_v62  ;;  %974 = vmatprep.subr.bf16.mxu1 %v1074_v62 }
  0x66   : > { %675 = vmatpush1.bf16.msra.mxu0 %v1076_v63  ;;  %990 = vmatpush1.bf16.msra.mxu1 %v1076_v63 }
  0x67   : > { %676 = vmatprep.subr.bf16.mxu0 %v1077_v0  ;;  %975 = vmatprep.subr.bf16.mxu1 %v1077_v0 }
  0x6a   : > { %677 = vmatpush1.bf16.msra.mxu0 %v1079_v1  ;;  %991 = vmatpush1.bf16.msra.mxu1 %v1079_v1 }
  0x6d   : > { %679 = vmatmul.mubr.bf16.vlgmr.msra.gmra.mrb[0].mxu0 %v1080_v2  ;;  %689 = vmatmul.mubr.bf16.vlgmr.msra.gmra.mrb[0].mxu1 %v1083_v3 }
 0x140   : > { %v680_v11 = vpop.f32.mrb[0].mxu0  ;;  %v690_v12 = vpop.f32.mrb[0].mxu1  ;;  %760 = sbr.rel (!%p1181_p6) target bundleno = 336 (0x150), region = 82 }
 0x141   : > { %v738_v13 = vadd.f32 %v731_v9, %v680_v11  ;;  %v742_v14 = vadd.f32 %v731_v9, %v690_v12  ;;  %v682_v15 = vpop.f32.mrb[1].mxu0  ;;  %v692_v16 = vpop.f32.mrb[1].mxu1 }
 0x142   : > { %v739_v17 = vadd.f32 %v735_v10, %v682_v15  ;;  %v743_v18 = vadd.f32 %v735_v10, %v692_v16  ;;  %v684_v19 = vpop.f32.mrb[2].mxu0  ;;  %v694_v20 = vpop.f32.mrb[2].mxu1 }
 0x143   : > { %746 = vst [vmem:[%s1319_s27] sm:$0xff] %v738_v13  ;;  %750 = vst [vmem:[%s1319_s27 + $0x20] sm:$0xff] %v742_v14  ;;  %v740_v21 = vadd.f32 %v731_v9, %v684_v19  ;;  %v744_v22 = vadd.f32 %v731_v9, %v694_v20  ;;  %v686_v23 = vpop.f32.mrb[3].mxu0  ;;  %v696_v24 = vpop.f32.mrb[3].mxu1 }
 0x144   : > { %747 = vst [vmem:[%s1319_s27 + $0x8] sm:$0xff] %v739_v17  ;;  %751 = vst [vmem:[%s1319_s27 + $0x28] sm:$0xff] %v743_v18  ;;  %v741_v25 = vadd.f32 %v735_v10, %v686_v23  ;;  %v745_v26 = vadd.f32 %v735_v10, %v696_v24 }
 0x145   : > { %748 = vst [vmem:[%s1319_s27 + $0x10] sm:$0xff] %v740_v21  ;;  %752 = vst [vmem:[%s1319_s27 + $0x30] sm:$0xff] %v744_v22 }
 0x146   : > { %749 = vst [vmem:[%s1319_s27 + $0x18] sm:$0xff] %v741_v25  ;;  %753 = vst [vmem:[%s1319_s27 + $0x38] sm:$0xff] %v745_v26 }
 0x14a   : > { %v779_v27 = vld [vmem:[%s1319_s27] sm:$0xff] }
 0x14b   : > { %v781_v28 = vld [vmem:[%s1319_s27 + $0x8] sm:$0xff]  ;;  %v787_v31 = vld [vmem:[%s1319_s27 + $0x20] sm:$0xff]  ;;  %780 = vst [vmem:[%s766_s30] sm:$0xff] %v779_v27 }
 0x14c   : > { %v783_v29 = vld [vmem:[%s1319_s27 + $0x10] sm:$0xff]  ;;  %v789_v32 = vld [vmem:[%s1319_s27 + $0x28] sm:$0xff]  ;;  %782 = vst [vmem:[%s766_s30 + $0x8] sm:$0xff] %v781_v28  ;;  %788 = vst [vmem:[%s766_s30 + $0x40] sm:$0xff] %v787_v31 }
 0x14d   : > { %v785_v30 = vld [vmem:[%s1319_s27 + $0x18] sm:$0xff]  ;;  %784 = vst [vmem:[%s766_s30 + $0x20] sm:$0xff] %v783_v29  ;;  %790 = vst [vmem:[%s766_s30 + $0x48] sm:$0xff] %v789_v32  ;;  %v791_v33 = vld [vmem:[%s1319_s27 + $0x30] sm:$0xff] }
 0x14e   : > { %786 = vst [vmem:[%s766_s30 + $0x28] sm:$0xff] %v785_v30  ;;  %v793_v34 = vld [vmem:[%s1319_s27 + $0x38] sm:$0xff]  ;;  %792 = vst [vmem:[%s766_s30 + $0x60] sm:$0xff] %v791_v33 }
 0x14f   : > { %794 = vst [vmem:[%s766_s30 + $0x68] sm:$0xff] %v793_v34 }
 0x150 PF: > { %s13_s16 = sadd.s32 1, %s1124_s16   ;;  %s1363_s12 = smov %s1112_s13 }
 0x151   : > { %p10_p12 = scmp.ge.s32.totalorder %s13_s16, 4   ;;  %s1364_s13 = smov %s1186_s22 }
 0x152   : > { %s1365_s14 = smov %s1120_s15  ;;  %s1366_s15 = smov %s1368_s17 }
 0x153   :  { %12 = sbr.rel (!%p10_p12) target bundleno = 3 (0x3), region = 142 }

// kernel: feature_vectors_forward.61
= control target key start
LH: loop header
LB: loop body
LE: loop exit
PB: predicated region body
PF: predicated region fallthrough
CT: control target
= control target key end

     0   :  { %s763_s1 = inlined_call_operand.vmem [shape: bf16[1,512,128], index: 1, kind: input, shape index: {}]   ;;  %s764_s0 = inlined_call_operand.vmem [shape: bf16[1,32,512], index: 0, kind: input, shape index: {}]   ;;  %s765_s2 = inlined_call_operand.vmem [shape: f32[1,128], index: 2, kind: input, shape index: {}]   ;;  %s766_s3 = inlined_call_operand.vmem [shape: f32[32,128], index: 3, kind: output, shape index: {}]  }
   0x1   :  { %v564_v0 = vld [vmem:[%s763_s1 + $0x40] sm:$0xff]   ;;  %v568_v4 = vld [vmem:[%s763_s1 + $0x48] sm:$0xff]   ;;  %v572_v8 = vld [vmem:[%s763_s1 + $0x50] sm:$0xff]  }
   0x2   :  { %v565_v1 = vld [vmem:[%s763_s1 + $0xc0] sm:$0xff]   ;;  %508 = vmatprep.subr.bf16.mxu0 %v564_v0  ;;  %v569_v5 = vld [vmem:[%s763_s1 + $0xc8] sm:$0xff]   ;;  %v573_v9 = vld [vmem:[%s763_s1 + $0xd0] sm:$0xff]  }
   0x3   :  { %v566_v2 = vld [vmem:[%s763_s1] sm:$0xff]   ;;  %536 = vmatprep.subr.bf16.mxu1 %v565_v1  ;;  %v570_v6 = vld [vmem:[%s763_s1 + $0x8] sm:$0xff]   ;;  %v574_v10 = vld [vmem:[%s763_s1 + $0x10] sm:$0xff]  }
   0x4   :  { %v567_v3 = vld [vmem:[%s763_s1 + $0x80] sm:$0xff]   ;;  %509 = vmatpush3.bf16.msra.mxu0 %v566_v2  ;;  %v571_v7 = vld [vmem:[%s763_s1 + $0x88] sm:$0xff]   ;;  %v575_v11 = vld [vmem:[%s763_s1 + $0x90] sm:$0xff]  }
   0x5   :  { %537 = vmatpush3.bf16.msra.mxu1 %v567_v3  ;;  %510 = vmatprep.subr.bf16.mxu0 %v568_v4  ;;  %v576_v12 = vld [vmem:[%s763_s1 + $0x58] sm:$0xff]   ;;  %v580_v16 = vld [vmem:[%s763_s1 + $0x60] sm:$0xff]   ;;  %v584_v20 = vld [vmem:[%s763_s1 + $0x68] sm:$0xff]  }
   0x6   :  { %538 = vmatprep.subr.bf16.mxu1 %v569_v5  ;;  %v577_v13 = vld [vmem:[%s763_s1 + $0xd8] sm:$0xff]   ;;  %v581_v17 = vld [vmem:[%s763_s1 + $0xe0] sm:$0xff]   ;;  %v585_v21 = vld [vmem:[%s763_s1 + $0xe8] sm:$0xff]  }
   0x7   :  { %v578_v14 = vld [vmem:[%s763_s1 + $0x18] sm:$0xff]   ;;  %v582_v18 = vld [vmem:[%s763_s1 + $0x20] sm:$0xff]   ;;  %v586_v22 = vld [vmem:[%s763_s1 + $0x28] sm:$0xff]  }
   0x8   :  { %511 = vmatpush3.bf16.msra.mxu0 %v570_v6  ;;  %v579_v15 = vld [vmem:[%s763_s1 + $0x98] sm:$0xff]   ;;  %v583_v19 = vld [vmem:[%s763_s1 + $0xa0] sm:$0xff]   ;;  %v587_v23 = vld [vmem:[%s763_s1 + $0xa8] sm:$0xff]  }
   0x9   :  { %539 = vmatpush3.bf16.msra.mxu1 %v571_v7  ;;  %512 = vmatprep.subr.bf16.mxu0 %v572_v8  ;;  %v588_v24 = vld [vmem:[%s763_s1 + $0x70] sm:$0xff]   ;;  %v592_v28 = vld [vmem:[%s763_s1 + $0x78] sm:$0xff]   ;;  %v507_v49 = vld [vmem:[%s765_s2] ss:$0 sm:$0xff] }
   0xa   :  { %540 = vmatprep.subr.bf16.mxu1 %v573_v9  ;;  %v589_v25 = vld [vmem:[%s763_s1 + $0xf0] sm:$0xff]   ;;  %v593_v29 = vld [vmem:[%s763_s1 + $0xf8] sm:$0xff]  }
   0xb   :  { %v590_v26 = vld [vmem:[%s763_s1 + $0x30] sm:$0xff]   ;;  %v594_v30 = vld [vmem:[%s763_s1 + $0x38] sm:$0xff]  }
   0xc   :  { %513 = vmatpush3.bf16.msra.mxu0 %v574_v10  ;;  %v591_v27 = vld [vmem:[%s763_s1 + $0xb0] sm:$0xff]   ;;  %v595_v31 = vld [vmem:[%s763_s1 + $0xb8] sm:$0xff]  }
   0xd   :  { %541 = vmatpush3.bf16.msra.mxu1 %v575_v11  ;;  %514 = vmatprep.subr.bf16.mxu0 %v576_v12  ;;  %v596_v32 = vld [vmem:[%s764_s0] ss:$16 sps:$4 sm:$0xff]   ;;  %v598_v33 = vld [vmem:[%s764_s0 + $0x4] ss:$16 sps:$4 sm:$0xff]   ;;  %v599_v34 = vld [vmem:[%s764_s0 + $0x8] ss:$16 sps:$4 sm:$0xff]  }
   0xe   :  { %542 = vmatprep.subr.bf16.mxu1 %v577_v13  ;;  %v601_v35 = vld [vmem:[%s764_s0 + $0xc] ss:$16 sps:$4 sm:$0xff]   ;;  %363 = vmatprep.mubr.bf16.mxu0 %v598_v33  ;;  %v602_v36 = vld [vmem:[%s764_s0 + $0x24] ss:$16 sps:$4 sm:$0xff]   ;;  %v606_v38 = vld [vmem:[%s764_s0 + $0x20] ss:$16 sps:$4 sm:$0xff]  }
   0xf   :  { %412 = vmatprep.mubr.bf16.mxu1 %v601_v35  ;;  %v604_v37 = vld [vmem:[%s764_s0 + $0x2c] ss:$16 sps:$4 sm:$0xff]   ;;  %v607_v39 = vld [vmem:[%s764_s0 + $0x28] ss:$16 sps:$4 sm:$0xff]  }
  0x10   :  { %515 = vmatpush3.bf16.msra.mxu0 %v578_v14 }
  0x11   :  { %543 = vmatpush3.bf16.msra.mxu1 %v579_v15  ;;  %516 = vmatprep.subr.bf16.mxu0 %v580_v16 }
  0x12   :  { %544 = vmatprep.subr.bf16.mxu1 %v581_v17 }
  0x14   :  { %517 = vmatpush3.bf16.msra.mxu0 %v582_v18 }
  0x15   :  { %545 = vmatpush3.bf16.msra.mxu1 %v583_v19  ;;  %518 = vmatprep.subr.bf16.mxu0 %v584_v20 }
  0x16   :  { %546 = vmatprep.subr.bf16.mxu1 %v585_v21 }
  0x18   :  { %519 = vmatpush3.bf16.msra.mxu0 %v586_v22 }
  0x19   :  { %547 = vmatpush3.bf16.msra.mxu1 %v587_v23  ;;  %520 = vmatprep.subr.bf16.mxu0 %v588_v24 }
  0x1a   :  { %548 = vmatprep.subr.bf16.mxu1 %v589_v25 }
  0x1c   :  { %521 = vmatpush3.bf16.msra.mxu0 %v590_v26 }
  0x1d   :  { %549 = vmatpush3.bf16.msra.mxu1 %v591_v27  ;;  %522 = vmatprep.subr.bf16.mxu0 %v592_v28 }
  0x1e   :  { %550 = vmatprep.subr.bf16.mxu1 %v593_v29 }
  0x20   :  { %523 = vmatpush3.bf16.msra.mxu0 %v594_v30 }
  0x21   :  { %551 = vmatpush3.bf16.msra.mxu1 %v595_v31 }
  0x23   :  { %364 = vmatmul.mubr.bf16.vlgmr.msra.gmra.mrb[0].mxu0 %v596_v32 }
  0x24   :  { %413 = vmatmul.mubr.bf16.vlgmr.msra.gmra.mrb[0].mxu1 %v599_v34  ;;  %371 = vmatprep.mubr.bf16.mxu0 %v602_v36 }
  0x25   :  { %420 = vmatprep.mubr.bf16.mxu1 %v604_v37 }
  0x2b   :  { %372 = vmatmul.mubr.bf16.gmra.mrb[4].mxu0 %v606_v38 }
  0x2c   :  { %421 = vmatmul.mubr.bf16.gmra.mrb[4].mxu1 %v607_v39 }
  0xf6   :  { %v524_v40 = vpop.f32.mrb[0].mxu0 }
  0xf7   :  { %v552_v41 = vpop.f32.mrb[0].mxu1  ;;  %v525_v42 = vpop.f32.mrb[1].mxu0 }
  0xf8   :  { %v526_v43 = vadd.f32 %v525_v42, %v524_v40  ;;  %v553_v44 = vpop.f32.mrb[1].mxu1  ;;  %v527_v45 = vpop.f32.mrb[2].mxu0 }
  0xf9   :  { %v554_v46 = vadd.f32 %v553_v44, %v552_v41  ;;  %v555_v47 = vpop.f32.mrb[2].mxu1  ;;  %v528_v48 = vpop.f32.mrb[3].mxu0 }
  0xfa   :  { %v529_v50 = vadd.f32 %v528_v48, %v527_v45  ;;  %v556_v51 = vpop.f32.mrb[3].mxu1 }
  0xfb   :  { %v415_v52 = vadd.f32 %v554_v46, %v526_v43  ;;  %v557_v53 = vadd.f32 %v556_v51, %v555_v47 }
  0xfd   :  { %v451_v54 = vadd.f32 %v507_v49, %v415_v52  ;;  %v418_v55 = vadd.f32 %v557_v53, %v529_v50 }
  0xfe   :  { %v530_v56 = vpop.f32.mrb[4].mxu0 }
  0xff   :  { %v455_v57 = vmax.f32 %v451_v54, 0.0  ;;  %v452_v58 = vadd.f32 %v507_v49, %v418_v55  ;;  %v558_v59 = vpop.f32.mrb[4].mxu1  ;;  %v531_v60 = vpop.f32.mrb[5].mxu0 }
 0x100   :  { %v532_v61 = vadd.f32 %v531_v60, %v530_v56  ;;  %v559_v62 = vpop.f32.mrb[5].mxu1  ;;  %v533_v63 = vpop.f32.mrb[6].mxu0 }
 0x101   :  { %459 = vst [vmem:[%s766_s3] sm:$0xff] %v455_v57  ;;  %v456_v0 = vmax.f32 %v452_v58, 0.0  ;;  %v560_v1 = vadd.f32 %v559_v62, %v558_v59  ;;  %v561_v2 = vpop.f32.mrb[6].mxu1  ;;  %v534_v3 = vpop.f32.mrb[7].mxu0 }
 0x102   :  { %v535_v4 = vadd.f32 %v534_v3, %v533_v63  ;;  %v562_v5 = vpop.f32.mrb[7].mxu1 }
 0x103   :  { %460 = vst [vmem:[%s766_s3 + $0x8] sm:$0xff] %v456_v0  ;;  %v423_v6 = vadd.f32 %v560_v1, %v532_v61  ;;  %v563_v7 = vadd.f32 %v562_v5, %v561_v2 }
 0x105   :  { %v453_v8 = vadd.f32 %v507_v49, %v423_v6  ;;  %v426_v9 = vadd.f32 %v563_v7, %v535_v4 }
 0x107   :  { %v457_v10 = vmax.f32 %v453_v8, 0.0  ;;  %v454_v11 = vadd.f32 %v507_v49, %v426_v9 }
 0x109   :  { %461 = vst [vmem:[%s766_s3 + $0x10] sm:$0xff] %v457_v10  ;;  %v458_v12 = vmax.f32 %v454_v11, 0.0 }
 0x10b   :  { %462 = vst [vmem:[%s766_s3 + $0x18] sm:$0xff] %v458_v12 }

// kernel: feature_vectors_forward.71
= control target key start
LH: loop header
LB: loop body
LE: loop exit
PB: predicated region body
PF: predicated region fallthrough
CT: control target
= control target key end

     0   :  { %s1090_s1 = inlined_call_operand.vmem [shape: bf16[1,512,256], index: 1, kind: input, shape index: {}]   ;;  %s1091_s0 = inlined_call_operand.vmem [shape: bf16[1,32,512], index: 0, kind: input, shape index: {}]   ;;  %s1092_s2 = inlined_call_operand.vmem [shape: f32[1,256], index: 2, kind: input, shape index: {}]   ;;  %s1093_s3 = inlined_call_operand.vmem [shape: f32[32,256], index: 3, kind: output, shape index: {}]  }
   0x1   :  { %v719_v0 = vld [vmem:[%s1090_s1 + $0x4] ss:$8 sps:$4 sm:$0xff]   ;;  %v723_v2 = vld [vmem:[%s1090_s1] ss:$8 sps:$4 sm:$0xff]   ;;  %v725_v4 = vld [vmem:[%s1090_s1 + $0x14] ss:$8 sps:$4 sm:$0xff]  }
   0x2   :  { %v721_v1 = vld [vmem:[%s1090_s1 + $0x104] ss:$8 sps:$4 sm:$0xff]   ;;  %466 = vmatprep.subr.bf16.mxu1 %v719_v0  ;;  %v724_v3 = vld [vmem:[%s1090_s1 + $0x100] ss:$8 sps:$4 sm:$0xff]   ;;  %v727_v5 = vld [vmem:[%s1090_s1 + $0x114] ss:$8 sps:$4 sm:$0xff]  }
   0x3   :  { %519 = vmatprep.subr.bf16.mxu0 %v721_v1  ;;  %467 = vmatpush1.bf16.msra.mxu1 %v723_v2  ;;  %v729_v6 = vld [vmem:[%s1090_s1 + $0x10] ss:$8 sps:$4 sm:$0xff]   ;;  %v731_v8 = vld [vmem:[%s1090_s1 + $0x24] ss:$8 sps:$4 sm:$0xff]   ;;  %v735_v10 = vld [vmem:[%s1090_s1 + $0x20] ss:$8 sps:$4 sm:$0xff]  }
   0x4   :  { %520 = vmatpush1.bf16.msra.mxu0 %v724_v3  ;;  %468 = vmatprep.subr.bf16.mxu1 %v725_v4  ;;  %v730_v7 = vld [vmem:[%s1090_s1 + $0x110] ss:$8 sps:$4 sm:$0xff]   ;;  %v733_v9 = vld [vmem:[%s1090_s1 + $0x124] ss:$8 sps:$4 sm:$0xff]   ;;  %v736_v11 = vld [vmem:[%s1090_s1 + $0x120] ss:$8 sps:$4 sm:$0xff]  }
   0x5   :  { %521 = vmatprep.subr.bf16.mxu0 %v727_v5  ;;  %v737_v12 = vld [vmem:[%s1090_s1 + $0x34] ss:$8 sps:$4 sm:$0xff]   ;;  %v741_v14 = vld [vmem:[%s1090_s1 + $0x30] ss:$8 sps:$4 sm:$0xff]   ;;  %v743_v16 = vld [vmem:[%s1090_s1 + $0x44] ss:$8 sps:$4 sm:$0xff]  }
   0x6   :  { %v739_v13 = vld [vmem:[%s1090_s1 + $0x134] ss:$8 sps:$4 sm:$0xff]   ;;  %v742_v15 = vld [vmem:[%s1090_s1 + $0x130] ss:$8 sps:$4 sm:$0xff]   ;;  %v745_v17 = vld [vmem:[%s1090_s1 + $0x144] ss:$8 sps:$4 sm:$0xff]  }
   0x7   :  { %469 = vmatpush1.bf16.msra.mxu1 %v729_v6  ;;  %v747_v18 = vld [vmem:[%s1090_s1 + $0x40] ss:$8 sps:$4 sm:$0xff]   ;;  %v749_v20 = vld [vmem:[%s1090_s1 + $0x54] ss:$8 sps:$4 sm:$0xff]   ;;  %v753_v22 = vld [vmem:[%s1090_s1 + $0x50] ss:$8 sps:$4 sm:$0xff]  }
   0x8   :  { %522 = vmatpush1.bf16.msra.mxu0 %v730_v7  ;;  %470 = vmatprep.subr.bf16.mxu1 %v731_v8  ;;  %v748_v19 = vld [vmem:[%s1090_s1 + $0x140] ss:$8 sps:$4 sm:$0xff]   ;;  %v751_v21 = vld [vmem:[%s1090_s1 + $0x154] ss:$8 sps:$4 sm:$0xff]   ;;  %v754_v23 = vld [vmem:[%s1090_s1 + $0x150] ss:$8 sps:$4 sm:$0xff]   ;;  %v601_v8 = vlaneseq }
   0x9   :  { %523 = vmatprep.subr.bf16.mxu0 %v733_v9  ;;  %v755_v24 = vld [vmem:[%s1090_s1 + $0x64] ss:$8 sps:$4 sm:$0xff]   ;;  %v759_v26 = vld [vmem:[%s1090_s1 + $0x60] ss:$8 sps:$4 sm:$0xff]   ;;  %v761_v28 = vld [vmem:[%s1090_s1 + $0x74] ss:$8 sps:$4 sm:$0xff]  }
   0xa   :  { %v757_v25 = vld [vmem:[%s1090_s1 + $0x164] ss:$8 sps:$4 sm:$0xff]   ;;  %v760_v27 = vld [vmem:[%s1090_s1 + $0x160] ss:$8 sps:$4 sm:$0xff]   ;;  %v763_v29 = vld [vmem:[%s1090_s1 + $0x174] ss:$8 sps:$4 sm:$0xff]  }
   0xb   :  { %471 = vmatpush1.bf16.msra.mxu1 %v735_v10  ;;  %v765_v30 = vld [vmem:[%s1090_s1 + $0x70] ss:$8 sps:$4 sm:$0xff]   ;;  %v767_v32 = vld [vmem:[%s1090_s1 + $0x84] ss:$8 sps:$4 sm:$0xff]   ;;  %v771_v34 = vld [vmem:[%s1090_s1 + $0x80] ss:$8 sps:$4 sm:$0xff]  }
   0xc   :  { %524 = vmatpush1.bf16.msra.mxu0 %v736_v11  ;;  %472 = vmatprep.subr.bf16.mxu1 %v737_v12  ;;  %v766_v31 = vld [vmem:[%s1090_s1 + $0x170] ss:$8 sps:$4 sm:$0xff]   ;;  %v769_v33 = vld [vmem:[%s1090_s1 + $0x184] ss:$8 sps:$4 sm:$0xff]   ;;  %v772_v35 = vld [vmem:[%s1090_s1 + $0x180] ss:$8 sps:$4 sm:$0xff]  }
   0xd   :  { %525 = vmatprep.subr.bf16.mxu0 %v739_v13  ;;  %v773_v36 = vld [vmem:[%s1090_s1 + $0x94] ss:$8 sps:$4 sm:$0xff]   ;;  %v777_v38 = vld [vmem:[%s1090_s1 + $0x90] ss:$8 sps:$4 sm:$0xff]   ;;  %v779_v40 = vld [vmem:[%s1090_s1 + $0xa4] ss:$8 sps:$4 sm:$0xff]  }
   0xe   :  { %v775_v37 = vld [vmem:[%s1090_s1 + $0x194] ss:$8 sps:$4 sm:$0xff]   ;;  %v778_v39 = vld [vmem:[%s1090_s1 + $0x190] ss:$8 sps:$4 sm:$0xff]   ;;  %v781_v41 = vld [vmem:[%s1090_s1 + $0x1a4] ss:$8 sps:$4 sm:$0xff]  }
   0xf   :  { %473 = vmatpush1.bf16.msra.mxu1 %v741_v14  ;;  %v783_v42 = vld [vmem:[%s1090_s1 + $0xa0] ss:$8 sps:$4 sm:$0xff]   ;;  %v785_v44 = vld [vmem:[%s1090_s1 + $0xb4] ss:$8 sps:$4 sm:$0xff]   ;;  %v789_v46 = vld [vmem:[%s1090_s1 + $0xb0] ss:$8 sps:$4 sm:$0xff]  }
  0x10   :  { %526 = vmatpush1.bf16.msra.mxu0 %v742_v15  ;;  %474 = vmatprep.subr.bf16.mxu1 %v743_v16  ;;  %v784_v43 = vld [vmem:[%s1090_s1 + $0x1a0] ss:$8 sps:$4 sm:$0xff]   ;;  %v787_v45 = vld [vmem:[%s1090_s1 + $0x1b4] ss:$8 sps:$4 sm:$0xff]   ;;  %v790_v47 = vld [vmem:[%s1090_s1 + $0x1b0] ss:$8 sps:$4 sm:$0xff]  }
  0x11   :  { %527 = vmatprep.subr.bf16.mxu0 %v745_v17  ;;  %v791_v48 = vld [vmem:[%s1090_s1 + $0xc4] ss:$8 sps:$4 sm:$0xff]   ;;  %v795_v52 = vld [vmem:[%s1090_s1 + $0xc0] ss:$8 sps:$4 sm:$0xff]   ;;  %v797_v54 = vld [vmem:[%s1090_s1 + $0xd4] ss:$8 sps:$4 sm:$0xff]  }
  0x12   :  { %v817_v49 = vld [vmem:[%s1091_s0 + $0x4] ss:$16 sps:$4 sm:$0xff]   ;;  %v820_v51 = vld [vmem:[%s1091_s0 + $0xc] ss:$16 sps:$4 sm:$0xff]   ;;  %v796_v53 = vld [vmem:[%s1090_s1 + $0x1c0] ss:$8 sps:$4 sm:$0xff]  }
  0x13   :  { %475 = vmatpush1.bf16.msra.mxu1 %v747_v18  ;;  %v793_v50 = vld [vmem:[%s1090_s1 + $0x1c4] ss:$8 sps:$4 sm:$0xff]   ;;  %498 = vmatprep.mubr.bf16.mxu1 %v817_v49  ;;  %v799_v55 = vld [vmem:[%s1090_s1 + $0x1d4] ss:$8 sps:$4 sm:$0xff]   ;;  %v801_v56 = vld [vmem:[%s1090_s1 + $0xd0] ss:$8 sps:$4 sm:$0xff]  }
  0x14   :  { %528 = vmatpush1.bf16.msra.mxu0 %v748_v19  ;;  %476 = vmatprep.subr.bf16.mxu1 %v749_v20  ;;  %v802_v57 = vld [vmem:[%s1090_s1 + $0x1d0] ss:$8 sps:$4 sm:$0xff]   ;;  %v803_v58 = vld [vmem:[%s1090_s1 + $0xe4] ss:$8 sps:$4 sm:$0xff]   ;;  %v807_v60 = vld [vmem:[%s1090_s1 + $0xe0] ss:$8 sps:$4 sm:$0xff]  }
  0x15   :  { %529 = vmatprep.subr.bf16.mxu0 %v751_v21  ;;  %551 = vmatprep.mubr.bf16.mxu0 %v820_v51  ;;  %v805_v59 = vld [vmem:[%s1090_s1 + $0x1e4] ss:$8 sps:$4 sm:$0xff]   ;;  %v808_v61 = vld [vmem:[%s1090_s1 + $0x1e0] ss:$8 sps:$4 sm:$0xff]   ;;  %v809_v62 = vld [vmem:[%s1090_s1 + $0xf4] ss:$8 sps:$4 sm:$0xff]  }
  0x16   :  { %v811_v63 = vld [vmem:[%s1090_s1 + $0x1f4] ss:$8 sps:$4 sm:$0xff]   ;;  %v813_v0 = vld [vmem:[%s1090_s1 + $0xf0] ss:$8 sps:$4 sm:$0xff]   ;;  %v602_v9 = vshrl.u32 %v601_v8, 7 }
  0x17   :  { %477 = vmatpush1.bf16.msra.mxu1 %v753_v22  ;;  %v814_v1 = vld [vmem:[%s1090_s1 + $0x1f0] ss:$8 sps:$4 sm:$0xff]   ;;  %v821_v4 = vld [vmem:[%s1091_s0 + $0x24] ss:$16 sps:$4 sm:$0xff]   ;;  %v823_v5 = vld [vmem:[%s1091_s0 + $0x2c] ss:$16 sps:$4 sm:$0xff]  }
  0x18   :  { %530 = vmatpush1.bf16.msra.mxu0 %v754_v23  ;;  %478 = vmatprep.subr.bf16.mxu1 %v755_v24  ;;  %v815_v2 = vld [vmem:[%s1091_s0] ss:$16 sps:$4 sm:$0xff]   ;;  %v818_v3 = vld [vmem:[%s1091_s0 + $0x8] ss:$16 sps:$4 sm:$0xff]   ;;  %v603_v10 = vsub.s32 0, %v602_v9  ;;  %v607_v12 = vsub.s32 1, %v602_v9 }
  0x19   :  { %531 = vmatprep.subr.bf16.mxu0 %v757_v25  ;;  %v825_v6 = vld [vmem:[%s1091_s0 + $0x20] ss:$16 sps:$4 sm:$0xff]   ;;  %v826_v7 = vld [vmem:[%s1091_s0 + $0x28] ss:$16 sps:$4 sm:$0xff]  }
  0x1a   :  { %v599_v11 = vld [vmem:[%s1092_s2] sm:$0x3] }
  0x1b   :  { %479 = vmatpush1.bf16.msra.mxu1 %v759_v26  ;;  %v604_v13 = vrot.slane %v599_v11, %v603_v10  ;;  %v608_v16 = vrot.slane %v599_v11, %v607_v12 }
  0x1c   :  { %532 = vmatpush1.bf16.msra.mxu0 %v760_v27  ;;  %480 = vmatprep.subr.bf16.mxu1 %v761_v28 }
  0x1d   :  { %533 = vmatprep.subr.bf16.mxu0 %v763_v29 }
  0x1f   :  { %481 = vmatpush1.bf16.msra.mxu1 %v765_v30 }
  0x20   :  { %534 = vmatpush1.bf16.msra.mxu0 %v766_v31  ;;  %482 = vmatprep.subr.bf16.mxu1 %v767_v32 }
  0x21   :  { %535 = vmatprep.subr.bf16.mxu0 %v769_v33 }
  0x23   :  { %483 = vmatpush1.bf16.msra.mxu1 %v771_v34 }
  0x24   :  { %536 = vmatpush1.bf16.msra.mxu0 %v772_v35  ;;  %484 = vmatprep.subr.bf16.mxu1 %v773_v36 }
  0x25   :  { %537 = vmatprep.subr.bf16.mxu0 %v775_v37 }
  0x27   :  { %485 = vmatpush1.bf16.msra.mxu1 %v777_v38 }
  0x28   :  { %538 = vmatpush1.bf16.msra.mxu0 %v778_v39  ;;  %486 = vmatprep.subr.bf16.mxu1 %v779_v40 }
  0x29   :  { %539 = vmatprep.subr.bf16.mxu0 %v781_v41 }
  0x2b   :  { %487 = vmatpush1.bf16.msra.mxu1 %v783_v42 }
  0x2c   :  { %540 = vmatpush1.bf16.msra.mxu0 %v784_v43  ;;  %488 = vmatprep.subr.bf16.mxu1 %v785_v44 }
  0x2d   :  { %541 = vmatprep.subr.bf16.mxu0 %v787_v45 }
  0x2f   :  { %489 = vmatpush1.bf16.msra.mxu1 %v789_v46 }
  0x30   :  { %542 = vmatpush1.bf16.msra.mxu0 %v790_v47  ;;  %490 = vmatprep.subr.bf16.mxu1 %v791_v48 }
  0x31   :  { %543 = vmatprep.subr.bf16.mxu0 %v793_v50 }
  0x33   :  { %491 = vmatpush1.bf16.msra.mxu1 %v795_v52 }
  0x34   :  { %544 = vmatpush1.bf16.msra.mxu0 %v796_v53  ;;  %492 = vmatprep.subr.bf16.mxu1 %v797_v54 }
  0x35   :  { %545 = vmatprep.subr.bf16.mxu0 %v799_v55 }
  0x37   :  { %493 = vmatpush1.bf16.msra.mxu1 %v801_v56 }
  0x38   :  { %546 = vmatpush1.bf16.msra.mxu0 %v802_v57  ;;  %494 = vmatprep.subr.bf16.mxu1 %v803_v58 }
  0x39   :  { %547 = vmatprep.subr.bf16.mxu0 %v805_v59 }
  0x3b   :  { %495 = vmatpush1.bf16.msra.mxu1 %v807_v60 }
  0x3c   :  { %548 = vmatpush1.bf16.msra.mxu0 %v808_v61  ;;  %496 = vmatprep.subr.bf16.mxu1 %v809_v62 }
  0x3d   :  { %549 = vmatprep.subr.bf16.mxu0 %v811_v63 }
  0x3f   :  { %497 = vmatpush1.bf16.msra.mxu1 %v813_v0 }
  0x40   :  { %550 = vmatpush1.bf16.msra.mxu0 %v814_v1 }
  0x42   :  { %499 = vmatmul.mubr.bf16.vlgmr.msra.gmra.mrb[0].mxu1 %v815_v2 }
  0x43   :  { %552 = vmatmul.mubr.bf16.vlgmr.msra.gmra.mrb[0].mxu0 %v818_v3  ;;  %508 = vmatprep.mubr.bf16.mxu1 %v821_v4 }
  0x44   :  { %561 = vmatprep.mubr.bf16.mxu0 %v823_v5 }
  0x4a   :  { %509 = vmatmul.mubr.bf16.gmra.mrb[4].mxu1 %v825_v6 }
  0x4b   :  { %562 = vmatmul.mubr.bf16.gmra.mrb[4].mxu0 %v826_v7 }
 0x115   :  { %v500_v14 = vpop.f32.mrb[0].mxu1 }
 0x116   :  { %v553_v15 = vpop.f32.mrb[0].mxu0  ;;  %v502_v18 = vpop.f32.mrb[1].mxu1 }
 0x117   :  { %v554_v17 = vadd.f32 %v553_v15, %v500_v14  ;;  %v555_v19 = vpop.f32.mrb[1].mxu0  ;;  %v504_v21 = vpop.f32.mrb[2].mxu1 }
 0x118   :  { %v556_v20 = vadd.f32 %v555_v19, %v502_v18  ;;  %v557_v22 = vpop.f32.mrb[2].mxu0  ;;  %v506_v25 = vpop.f32.mrb[3].mxu1 }
 0x119   :  { %v611_v23 = vadd.f32 %v604_v13, %v554_v17  ;;  %v558_v24 = vadd.f32 %v557_v22, %v504_v21  ;;  %v559_v26 = vpop.f32.mrb[3].mxu0 }
 0x11a   :  { %v612_v27 = vadd.f32 %v608_v16, %v556_v20  ;;  %v560_v28 = vadd.f32 %v559_v26, %v506_v25 }
 0x11b   :  { %v619_v29 = vmax.f32 %v611_v23, 0.0  ;;  %v613_v30 = vadd.f32 %v604_v13, %v558_v24 }
 0x11c   :  { %v620_v31 = vmax.f32 %v612_v27, 0.0  ;;  %v614_v32 = vadd.f32 %v608_v16, %v560_v28 }
 0x11d   :  { %627 = vst [vmem:[%s1093_s3] sm:$0xff] %v619_v29  ;;  %v621_v33 = vmax.f32 %v613_v30, 0.0  ;;  %v510_v35 = vpop.f32.mrb[4].mxu1 }
 0x11e   :  { %628 = vst [vmem:[%s1093_s3 + $0x8] sm:$0xff] %v620_v31  ;;  %v622_v34 = vmax.f32 %v614_v32, 0.0  ;;  %v563_v36 = vpop.f32.mrb[4].mxu0  ;;  %v512_v38 = vpop.f32.mrb[5].mxu1 }
 0x11f   :  { %629 = vst [vmem:[%s1093_s3 + $0x10] sm:$0xff] %v621_v33  ;;  %v564_v37 = vadd.f32 %v563_v36, %v510_v35  ;;  %v565_v39 = vpop.f32.mrb[5].mxu0  ;;  %v514_v41 = vpop.f32.mrb[6].mxu1 }
 0x120   :  { %630 = vst [vmem:[%s1093_s3 + $0x18] sm:$0xff] %v622_v34  ;;  %v566_v40 = vadd.f32 %v565_v39, %v512_v38  ;;  %v567_v42 = vpop.f32.mrb[6].mxu0  ;;  %v516_v45 = vpop.f32.mrb[7].mxu1 }
 0x121   :  { %v615_v43 = vadd.f32 %v604_v13, %v564_v37  ;;  %v568_v44 = vadd.f32 %v567_v42, %v514_v41  ;;  %v569_v46 = vpop.f32.mrb[7].mxu0 }
 0x122   :  { %v616_v47 = vadd.f32 %v608_v16, %v566_v40  ;;  %v570_v48 = vadd.f32 %v569_v46, %v516_v45 }
 0x123   :  { %v623_v49 = vmax.f32 %v615_v43, 0.0  ;;  %v617_v50 = vadd.f32 %v604_v13, %v568_v44 }
 0x124   :  { %v624_v51 = vmax.f32 %v616_v47, 0.0  ;;  %v618_v52 = vadd.f32 %v608_v16, %v570_v48 }
 0x125   :  { %631 = vst [vmem:[%s1093_s3 + $0x20] sm:$0xff] %v623_v49  ;;  %v625_v53 = vmax.f32 %v617_v50, 0.0 }
 0x126   :  { %632 = vst [vmem:[%s1093_s3 + $0x28] sm:$0xff] %v624_v51  ;;  %v626_v54 = vmax.f32 %v618_v52, 0.0 }
 0x127   :  { %633 = vst [vmem:[%s1093_s3 + $0x30] sm:$0xff] %v625_v53 }
 0x128   :  { %634 = vst [vmem:[%s1093_s3 + $0x38] sm:$0xff] %v626_v54 }

// kernel: feature_vectors_forward.72
= control target key start
LH: loop header
LB: loop body
LE: loop exit
PB: predicated region body
PF: predicated region fallthrough
CT: control target
= control target key end

     0   :  { %s838_s12 = smov 0   ;;  %s840_s13 = smov 0   ;;  %s923_s0 = inlined_call_operand.vmem [shape: bf16[9,8,256], index: 0, kind: input, shape index: {}]   ;;  %s924_s1 = inlined_call_operand.vmem [shape: bf16[9,256,256], index: 1, kind: input, shape index: {}]   ;;  %s925_s2 = inlined_call_operand.vmem [shape: f32[1,256], index: 2, kind: input, shape index: {}]   ;;  %s926_s3 = inlined_call_operand.vmem [shape: f32[8,256], index: 3, kind: output, shape index: {}]  }
   0x1   :  { %s842_s14 = smov 0  }
   0x2 LB: > { %s25_s15 = sadd.s32 1, %s811_s13  ;;  %p671_p0 = scmp.ge.s32.totalorder %s815_s14, 1  ;;  %s815_s14 = sphi %s842_s14, %s13_s14   ;;  %s811_s13 = sphi %s840_s13, %s928_s13   ;;  %s807_s12 = sphi %s838_s12, %s927_s12  }
   0x3   : > { %p26_p1 = scmp.ge.s32.totalorder %s25_s15, 9  ;;  %p191_p2 = scmp.lt.s32.totalorder %s815_s14, 10 }
   0x5   : > { %s930_s15 = smov (%p26_p1, %s25_s15), 0  ;;  %p192_p3 = pnand %p671_p0, %p191_p2 }
   0x6   : > { %p236_p4 = scmp.lt.s32.totalorder (!%p192_p3), %s807_s12, 8  ;;  %p676_p5 = scmp.ne.s32.totalorder (!%p192_p3), %s807_s12, 0 }
   0x7   : > { %195 = sbr.rel (%p192_p3) target bundleno = 315 (0x13b), region = 32 }
   0xe   : > { %s237_s16 = scalar_select %p236_p4, %s807_s12, 8 }
   0xf   : > { %273 = sbr.rel (%p676_p5) target bundleno = 22 (0x16), region = 36  ;;  %v817_v0 = vmov (!%p676_p5), 0.0  }
  0x10   : > { %s716_s17 = sshll.u32 %s237_s16, 3  ;;  %s717_s18 = sshll.u32 %s237_s16, 8  ;;  %274 = vst [vmem:[#allocation2] sm:$0xff] (!%p676_p5), %v817_v0  ;;  %275 = vst [vmem:[#allocation2 + $0x8] sm:$0xff] (!%p676_p5), %v817_v0 }
  0x11   : > { %s863_s21 = scalar_lea.vmem %s923_s0, %s716_s17  ;;  %s868_s24 = scalar_lea.vmem %s924_s1, %s717_s18 }
  0x16 PF: > { %v743_v1 = vld [vmem:[%s868_s24 + $0x4] ss:$8 sps:$4 sm:$0xff]   ;;  %v745_v2 = vld [vmem:[%s868_s24] ss:$8 sps:$4 sm:$0xff]   ;;  %v746_v3 = vld [vmem:[%s868_s24 + $0x14] ss:$8 sps:$4 sm:$0xff]  }
  0x17   : > { %478 = vmatprep.subr.bf16.mxu0 %v743_v1  ;;  %v748_v4 = vld [vmem:[%s868_s24 + $0x10] ss:$8 sps:$4 sm:$0xff]   ;;  %v749_v5 = vld [vmem:[%s868_s24 + $0x24] ss:$8 sps:$4 sm:$0xff]   ;;  %v751_v6 = vld [vmem:[%s868_s24 + $0x20] ss:$8 sps:$4 sm:$0xff]  }
  0x18   : > { %479 = vmatpush1.bf16.msra.mxu0 %v745_v2  ;;  %v752_v7 = vld [vmem:[%s868_s24 + $0x34] ss:$8 sps:$4 sm:$0xff]   ;;  %v754_v8 = vld [vmem:[%s868_s24 + $0x30] ss:$8 sps:$4 sm:$0xff]   ;;  %v755_v9 = vld [vmem:[%s868_s24 + $0x44] ss:$8 sps:$4 sm:$0xff]  }
  0x19   : > { %480 = vmatprep.subr.bf16.mxu0 %v746_v3  ;;  %v757_v10 = vld [vmem:[%s868_s24 + $0x40] ss:$8 sps:$4 sm:$0xff]   ;;  %v758_v11 = vld [vmem:[%s868_s24 + $0x54] ss:$8 sps:$4 sm:$0xff]   ;;  %v760_v12 = vld [vmem:[%s868_s24 + $0x50] ss:$8 sps:$4 sm:$0xff]  }
  0x1a   : > { %v761_v13 = vld [vmem:[%s868_s24 + $0x64] ss:$8 sps:$4 sm:$0xff]   ;;  %v763_v16 = vld [vmem:[%s868_s24 + $0x60] ss:$8 sps:$4 sm:$0xff]   ;;  %v764_v17 = vld [vmem:[%s868_s24 + $0x74] ss:$8 sps:$4 sm:$0xff]  }
  0x1b   : > { %v278_v14 = vld [vmem:[%s863_s21] sm:$0xff]  ;;  %v766_v18 = vld [vmem:[%s868_s24 + $0x70] ss:$8 sps:$4 sm:$0xff]   ;;  %v770_v21 = vld [vmem:[%s868_s24 + $0x94] ss:$8 sps:$4 sm:$0xff]   ;;  %p711_p6 = scmp.ne.s32.totalorder %s807_s12, 8 }
  0x1c   : > { %481 = vmatpush1.bf16.msra.mxu0 %v748_v4  ;;  %v678_v15 = vcombine.high %v278_v14, %v278_v14  ;;  %v767_v19 = vld [vmem:[%s868_s24 + $0x84] ss:$8 sps:$4 sm:$0xff]   ;;  %v769_v20 = vld [vmem:[%s868_s24 + $0x80] ss:$8 sps:$4 sm:$0xff]   ;;  %v772_v22 = vld [vmem:[%s868_s24 + $0x90] ss:$8 sps:$4 sm:$0xff]   ;;  %v677_v35 = vcombine.low %v278_v14, %v278_v14  ;;  %v531_v44 = vlaneseq (!%p711_p6) }
  0x1d   : > { %482 = vmatprep.subr.bf16.mxu0 %v749_v5  ;;  %v773_v23 = vld [vmem:[%s868_s24 + $0xa4] ss:$8 sps:$4 sm:$0xff]   ;;  %v775_v24 = vld [vmem:[%s868_s24 + $0xa0] ss:$8 sps:$4 sm:$0xff]   ;;  %v776_v25 = vld [vmem:[%s868_s24 + $0xb4] ss:$8 sps:$4 sm:$0xff]  }
  0x1e   : > { %510 = vmatprep.mubr.bf16.mxu0 %v678_v15  ;;  %v778_v26 = vld [vmem:[%s868_s24 + $0xb0] ss:$8 sps:$4 sm:$0xff]   ;;  %v779_v27 = vld [vmem:[%s868_s24 + $0xc4] ss:$8 sps:$4 sm:$0xff]   ;;  %v781_v28 = vld [vmem:[%s868_s24 + $0xc0] ss:$8 sps:$4 sm:$0xff]  }
  0x1f   : > { %v782_v29 = vld [vmem:[%s868_s24 + $0xd4] ss:$8 sps:$4 sm:$0xff]   ;;  %v784_v30 = vld [vmem:[%s868_s24 + $0xd0] ss:$8 sps:$4 sm:$0xff]   ;;  %v785_v31 = vld [vmem:[%s868_s24 + $0xe4] ss:$8 sps:$4 sm:$0xff]  }
  0x20   : > { %483 = vmatpush1.bf16.msra.mxu0 %v751_v6  ;;  %v787_v32 = vld [vmem:[%s868_s24 + $0xe0] ss:$8 sps:$4 sm:$0xff]   ;;  %v788_v33 = vld [vmem:[%s868_s24 + $0xf4] ss:$8 sps:$4 sm:$0xff]   ;;  %v790_v34 = vld [vmem:[%s868_s24 + $0xf0] ss:$8 sps:$4 sm:$0xff]  }
  0x21   : > { %484 = vmatprep.subr.bf16.mxu0 %v752_v7  ;;  %v276_v36 = vld [vmem:[#allocation2] sm:$0xff]  ;;  %v277_v37 = vld [vmem:[#allocation2 + $0x8] sm:$0xff]  ;;  %v532_v45 = vshrl.u32 (!%p711_p6), %v531_v44, 7 }
  0x22   : > { %v529_v46 = vld [vmem:[%s925_s2] sm:$0x3] (!%p711_p6) }
  0x23   : > { %v533_v47 = vsub.s32 (!%p711_p6), 0, %v532_v45  ;;  %v537_v48 = vsub.s32 (!%p711_p6), 1, %v532_v45 }
  0x24   : > { %485 = vmatpush1.bf16.msra.mxu0 %v754_v8 }
  0x25   : > { %486 = vmatprep.subr.bf16.mxu0 %v755_v9  ;;  %v534_v51 = vrot.slane (!%p711_p6), %v529_v46, %v533_v47  ;;  %v538_v52 = vrot.slane (!%p711_p6), %v529_v46, %v537_v48 }
  0x28   : > { %487 = vmatpush1.bf16.msra.mxu0 %v757_v10 }
  0x29   : > { %488 = vmatprep.subr.bf16.mxu0 %v758_v11 }
  0x2c   : > { %489 = vmatpush1.bf16.msra.mxu0 %v760_v12 }
  0x2d   : > { %490 = vmatprep.subr.bf16.mxu0 %v761_v13 }
  0x30   : > { %491 = vmatpush1.bf16.msra.mxu0 %v763_v16 }
  0x31   : > { %492 = vmatprep.subr.bf16.mxu0 %v764_v17 }
  0x34   : > { %493 = vmatpush1.bf16.msra.mxu0 %v766_v18 }
  0x35   : > { %494 = vmatprep.subr.bf16.mxu0 %v767_v19 }
  0x38   : > { %495 = vmatpush1.bf16.msra.mxu0 %v769_v20 }
  0x39   : > { %496 = vmatprep.subr.bf16.mxu0 %v770_v21 }
  0x3c   : > { %497 = vmatpush1.bf16.msra.mxu0 %v772_v22 }
  0x3d   : > { %498 = vmatprep.subr.bf16.mxu0 %v773_v23 }
  0x40   : > { %499 = vmatpush1.bf16.msra.mxu0 %v775_v24 }
  0x41   : > { %500 = vmatprep.subr.bf16.mxu0 %v776_v25 }
  0x44   : > { %501 = vmatpush1.bf16.msra.mxu0 %v778_v26 }
  0x45   : > { %502 = vmatprep.subr.bf16.mxu0 %v779_v27 }
  0x48   : > { %503 = vmatpush1.bf16.msra.mxu0 %v781_v28 }
  0x49   : > { %504 = vmatprep.subr.bf16.mxu0 %v782_v29 }
  0x4c   : > { %505 = vmatpush1.bf16.msra.mxu0 %v784_v30 }
  0x4d   : > { %506 = vmatprep.subr.bf16.mxu0 %v785_v31 }
  0x50   : > { %507 = vmatpush1.bf16.msra.mxu0 %v787_v32 }
  0x51   : > { %508 = vmatprep.subr.bf16.mxu0 %v788_v33 }
  0x54   : > { %509 = vmatpush1.bf16.msra.mxu0 %v790_v34 }
  0x57   : > { %511 = vmatmul.mubr.bf16.vlgmr.msra.gmra.mrb[0].mxu0 %v677_v35 }
 0x128   : > { %526 = sbr.rel (%p711_p6) target bundleno = 315 (0x13b), region = 40 }
 0x12a   : > { %v512_v38 = vpop.f32.mrb[0].mxu0 }
 0x12b   : > { %v519_v39 = vadd.f32 %v512_v38, %v276_v36  ;;  %v514_v40 = vpop.f32.mrb[1].mxu0 }
 0x12c   : > { %v520_v41 = vadd.f32 %v514_v40, %v277_v37  ;;  %v516_v42 = vpop.f32.mrb[2].mxu0 }
 0x12d   : > { %521 = vst [vmem:[#allocation2] sm:$0xff] %v519_v39  ;;  %v517_v43 = vpop.f32.mrb[3].mxu0 }
 0x12e   : > { %522 = vst [vmem:[#allocation2 + $0x8] sm:$0xff] %v520_v41 }
 0x134   : > { %v527_v49 = vld [vmem:[#allocation2] sm:$0xff] }
 0x135   : > { %v528_v50 = vld [vmem:[#allocation2 + $0x8] sm:$0xff]  ;;  %v541_v53 = vadd.f32 %v534_v51, %v527_v49 }
 0x136   : > { %v542_v54 = vadd.f32 %v538_v52, %v528_v50 }
 0x137   : > { %v543_v55 = vmax.f32 %v541_v53, 0.0 }
 0x138   : > { %v544_v56 = vmax.f32 %v542_v54, 0.0 }
 0x139   : > { %545 = vst [vmem:[%s926_s3] sm:$0xff] %v543_v55 }
 0x13a   : > { %546 = vst [vmem:[%s926_s3 + $0x8] sm:$0xff] %v544_v56 }
 0x13b PF: > { %s13_s14 = sadd.s32 1, %s815_s14   ;;  %s927_s12 = smov %s811_s13 }
 0x13c   : > { %p10_p7 = scmp.ge.s32.totalorder %s13_s14, 11   ;;  %s928_s13 = smov %s930_s15 }
 0x13e   :  { %12 = sbr.rel (!%p10_p7) target bundleno = 2 (0x2), region = 76 }

// kernel: feature_vectors_forward.73
= control target key start
LH: loop header
LB: loop body
LE: loop exit
PB: predicated region body
PF: predicated region fallthrough
CT: control target
= control target key end

     0   :  { %s1112_s15 = smov 0   ;;  %s1114_s16 = smov 0   ;;  %s1294_s0 = inlined_call_operand.vmem [shape: bf16[1,8,256], index: 0, kind: input, shape index: {}]   ;;  %s1295_s1 = inlined_call_operand.vmem [shape: bf16[1,256,1024], index: 1, kind: input, shape index: {}]   ;;  %s1296_s2 = inlined_call_operand.vmem [shape: f32[1,1024], index: 2, kind: input, shape index: {}]   ;;  %s1297_s3 = inlined_call_operand.vmem [shape: f32[8,1024], index: 3, kind: input, shape index: {}]   ;;  %s1298_s4 = inlined_call_operand.vmem [shape: f32[8,1024], index: 4, kind: output, shape index: {}]  }
   0x1   :  { %s1116_s17 = smov 0   ;;  %s1118_s18 = smov 0  }
   0x2   :  { %s1120_s19 = smov 0  }
   0x3 LB: > { %s29_s20 = sadd.s32 1, %s1081_s18  ;;  %p77_p1 = scmp.ne.s32.totalorder %s1073_s16, %s1069_s15  ;;  %s1085_s19 = sphi %s1120_s19, %s14_s19   ;;  %s1081_s18 = sphi %s1118_s18, %s1302_s18   ;;  %s1077_s17 = sphi %s1116_s17, %s1301_s17   ;;  %s1073_s16 = sphi %s1114_s16, %s1300_s16   ;;  %s1069_s15 = sphi %s1112_s15, %s1299_s15  }
   0x4   : > { %p31_p0 = scmp.ge.s32.totalorder %s29_s20, 4  ;;  %p78_p2 = scmp.eq.s32.totalorder %s1085_s19, 0 }
   0x5   : > { %s70_s22 = sadd.s32 1, %s1073_s16  ;;  %p909_p5 = scmp.ge.s32.totalorder %s1085_s19, 4 }
   0x6   : > { %s1304_s20 = smov (%p31_p0, %s29_s20), 0  ;;  %p79_p3 = por %p78_p2, %p77_p1 }
   0x7   : > { %s66_s21 = ssub.s32 %s1081_s18, %s1304_s20  ;;  %197 = sbr.rel (%p909_p5) target bundleno = 50 (0x32), region = 20 }
   0x8   : > { %p68_p4 = scmp.eq.s32.totalorder %s66_s21, 0 }
   0xa   : > { %s1147_s23 = scalar_select %p68_p4, %s1073_s16, %s70_s22  }
   0xe   : > { %200 = sbr.rel (!%p79_p3) target bundleno = 50 (0x32), region = 24  ;;  %s202_s24 = sand.u32 (%p79_p3), 1, %s1073_s16  }
   0xf   : > { %s956_s25 = sshll.u32 (%p79_p3), %s1081_s18, 3  ;;  %s910_s26 = sshll.u32 (%p79_p3), %s202_s24, 8 }
  0x10   : > { %s1155_s29 = scalar_lea.vmem (%p79_p3), %s1295_s1, %s956_s25  ;;  %s1160_s30 = scalar_lea.vmem (%p79_p3), [#allocation3], %s910_s26 }
  0x11   : > { %v299_v0 = vld [vmem:[%s1155_s29] sm:$0xff] (%p79_p3) }
  0x12   : > { %v301_v1 = vld [vmem:[%s1155_s29 + $0x20] sm:$0xff] (%p79_p3)  ;;  %300 = vst [vmem:[%s1160_s30] sm:$0xff] (%p79_p3), %v299_v0 }
  0x13   : > { %v303_v2 = vld [vmem:[%s1155_s29 + $0x40] sm:$0xff] (%p79_p3)  ;;  %302 = vst [vmem:[%s1160_s30 + $0x8] sm:$0xff] (%p79_p3), %v301_v1 }
  0x14   : > { %304 = vst [vmem:[%s1160_s30 + $0x10] sm:$0xff] (%p79_p3), %v303_v2  ;;  %v305_v3 = vld [vmem:[%s1155_s29 + $0x60] sm:$0xff] (%p79_p3) }
  0x15   : > { %v307_v4 = vld [vmem:[%s1155_s29 + $0x80] sm:$0xff]  ;;  %306 = vst [vmem:[%s1160_s30 + $0x18] sm:$0xff] %v305_v3 }
  0x16   : > { %v309_v5 = vld [vmem:[%s1155_s29 + $0xa0] sm:$0xff]  ;;  %308 = vst [vmem:[%s1160_s30 + $0x20] sm:$0xff] %v307_v4 }
  0x17   : > { %310 = vst [vmem:[%s1160_s30 + $0x28] sm:$0xff] %v309_v5  ;;  %v311_v6 = vld [vmem:[%s1155_s29 + $0xc0] sm:$0xff] }
  0x18   : > { %v313_v7 = vld [vmem:[%s1155_s29 + $0xe0] sm:$0xff]  ;;  %312 = vst [vmem:[%s1160_s30 + $0x30] sm:$0xff] %v311_v6 }
  0x19   : > { %v315_v8 = vld [vmem:[%s1155_s29 + $0x100] sm:$0xff]  ;;  %314 = vst [vmem:[%s1160_s30 + $0x38] sm:$0xff] %v313_v7 }
  0x1a   : > { %316 = vst [vmem:[%s1160_s30 + $0x40] sm:$0xff] %v315_v8  ;;  %v317_v9 = vld [vmem:[%s1155_s29 + $0x120] sm:$0xff] }
  0x1b   : > { %v319_v10 = vld [vmem:[%s1155_s29 + $0x140] sm:$0xff]  ;;  %318 = vst [vmem:[%s1160_s30 + $0x48] sm:$0xff] %v317_v9 }
  0x1c   : > { %v321_v11 = vld [vmem:[%s1155_s29 + $0x160] sm:$0xff]  ;;  %320 = vst [vmem:[%s1160_s30 + $0x50] sm:$0xff] %v319_v10 }
  0x1d   : > { %322 = vst [vmem:[%s1160_s30 + $0x58] sm:$0xff] %v321_v11  ;;  %v323_v12 = vld [vmem:[%s1155_s29 + $0x180] sm:$0xff] }
  0x1e   : > { %v325_v13 = vld [vmem:[%s1155_s29 + $0x1a0] sm:$0xff]  ;;  %324 = vst [vmem:[%s1160_s30 + $0x60] sm:$0xff] %v323_v12 }
  0x1f   : > { %v327_v14 = vld [vmem:[%s1155_s29 + $0x1c0] sm:$0xff]  ;;  %326 = vst [vmem:[%s1160_s30 + $0x68] sm:$0xff] %v325_v13 }
  0x20   : > { %328 = vst [vmem:[%s1160_s30 + $0x70] sm:$0xff] %v327_v14  ;;  %v329_v15 = vld [vmem:[%s1155_s29 + $0x1e0] sm:$0xff] }
  0x21   : > { %v331_v16 = vld [vmem:[%s1155_s29 + $0x200] sm:$0xff]  ;;  %330 = vst [vmem:[%s1160_s30 + $0x78] sm:$0xff] %v329_v15 }
  0x22   : > { %v333_v17 = vld [vmem:[%s1155_s29 + $0x220] sm:$0xff]  ;;  %332 = vst [vmem:[%s1160_s30 + $0x80] sm:$0xff] %v331_v16 }
  0x23   : > { %334 = vst [vmem:[%s1160_s30 + $0x88] sm:$0xff] %v333_v17  ;;  %v335_v18 = vld [vmem:[%s1155_s29 + $0x240] sm:$0xff] }
  0x24   : > { %v337_v19 = vld [vmem:[%s1155_s29 + $0x260] sm:$0xff]  ;;  %336 = vst [vmem:[%s1160_s30 + $0x90] sm:$0xff] %v335_v18 }
  0x25   : > { %v339_v20 = vld [vmem:[%s1155_s29 + $0x280] sm:$0xff]  ;;  %338 = vst [vmem:[%s1160_s30 + $0x98] sm:$0xff] %v337_v19 }
  0x26   : > { %340 = vst [vmem:[%s1160_s30 + $0xa0] sm:$0xff] %v339_v20  ;;  %v341_v21 = vld [vmem:[%s1155_s29 + $0x2a0] sm:$0xff] }
  0x27   : > { %v343_v22 = vld [vmem:[%s1155_s29 + $0x2c0] sm:$0xff]  ;;  %342 = vst [vmem:[%s1160_s30 + $0xa8] sm:$0xff] %v341_v21 }
  0x28   : > { %v345_v23 = vld [vmem:[%s1155_s29 + $0x2e0] sm:$0xff]  ;;  %344 = vst [vmem:[%s1160_s30 + $0xb0] sm:$0xff] %v343_v22 }
  0x29   : > { %346 = vst [vmem:[%s1160_s30 + $0xb8] sm:$0xff] %v345_v23  ;;  %v347_v24 = vld [vmem:[%s1155_s29 + $0x300] sm:$0xff] }
  0x2a   : > { %v349_v25 = vld [vmem:[%s1155_s29 + $0x320] sm:$0xff]  ;;  %348 = vst [vmem:[%s1160_s30 + $0xc0] sm:$0xff] %v347_v24 }
  0x2b   : > { %v351_v26 = vld [vmem:[%s1155_s29 + $0x340] sm:$0xff]  ;;  %350 = vst [vmem:[%s1160_s30 + $0xc8] sm:$0xff] %v349_v25 }
  0x2c   : > { %352 = vst [vmem:[%s1160_s30 + $0xd0] sm:$0xff] %v351_v26  ;;  %v353_v27 = vld [vmem:[%s1155_s29 + $0x360] sm:$0xff] }
  0x2d   : > { %v355_v28 = vld [vmem:[%s1155_s29 + $0x380] sm:$0xff]  ;;  %354 = vst [vmem:[%s1160_s30 + $0xd8] sm:$0xff] %v353_v27 }
  0x2e   : > { %v357_v29 = vld [vmem:[%s1155_s29 + $0x3a0] sm:$0xff]  ;;  %356 = vst [vmem:[%s1160_s30 + $0xe0] sm:$0xff] %v355_v28 }
  0x2f   : > { %358 = vst [vmem:[%s1160_s30 + $0xe8] sm:$0xff] %v357_v29  ;;  %v359_v30 = vld [vmem:[%s1155_s29 + $0x3c0] sm:$0xff] }
  0x30   : > { %v361_v31 = vld [vmem:[%s1155_s29 + $0x3e0] sm:$0xff]  ;;  %360 = vst [vmem:[%s1160_s30 + $0xf0] sm:$0xff] %v359_v30 }
  0x31   : > { %362 = vst [vmem:[%s1160_s30 + $0xf8] sm:$0xff] %v361_v31 }
  0x32 PF: > { %p913_p6 = scmp.ge.s32.totalorder %s1085_s19, 1  ;;  %p388_p7 = scmp.lt.s32.totalorder %s1085_s19, 5 }
  0x34   : > { %p389_p8 = pnand %p913_p6, %p388_p7 }
  0x35   : > { %s395_s5 = sand.u32 (!%p389_p8), 1, %s1069_s15   ;;  %v1229_v32 = vld [vmem:[%s1294_s0] sm:$0xff] (!%p389_p8)  ;;  %s915_s10 = sshll.u32 (!%p389_p8), %s1077_s17, 1  ;;  %v741_v3 = vlaneseq (!%p389_p8) }
  0x36   : > { %392 = sbr.rel (%p389_p8) target bundleno = 341 (0x155), region = 70  ;;  %s914_s8 = sshll.u32 (!%p389_p8), %s395_s5, 8  ;;  %v921_v33 = vcombine.high (!%p389_p8), %v1229_v32, %v1229_v32  ;;  %v920_v2 = vcombine.low (!%p389_p8), %v1229_v32, %v1229_v32 }
  0x37   : > { %s1233_s9 = scalar_lea.vmem (!%p389_p8), [#allocation3], %s914_s8  ;;  %p457_p9 = scmp.lt.s32.totalorder (!%p389_p8), %s915_s10, 7  ;;  %v742_v4 = vshrl.u32 (!%p389_p8), %v741_v3, 7 }
  0x38   : > { %v997_v34 = vld [vmem:[%s1233_s9 + $0x4] ss:$8 sps:$4 sm:$0xff] (!%p389_p8)   ;;  %721 = vmatprep.mubr.bf16.mxu0 (!%p389_p8), %v921_v33  ;;  %v999_v35 = vld [vmem:[%s1233_s9] ss:$8 sps:$4 sm:$0xff] (!%p389_p8)   ;;  %v1000_v36 = vld [vmem:[%s1233_s9 + $0x14] ss:$8 sps:$4 sm:$0xff] (!%p389_p8)  }
  0x39   : > { %689 = vmatprep.subr.bf16.mxu0 (!%p389_p8), %v997_v34  ;;  %v1002_v37 = vld [vmem:[%s1233_s9 + $0x10] ss:$8 sps:$4 sm:$0xff] (!%p389_p8)   ;;  %v1003_v38 = vld [vmem:[%s1233_s9 + $0x24] ss:$8 sps:$4 sm:$0xff] (!%p389_p8)   ;;  %v1005_v39 = vld [vmem:[%s1233_s9 + $0x20] ss:$8 sps:$4 sm:$0xff] (!%p389_p8)  }
  0x3a   : > { %690 = vmatpush1.bf16.msra.mxu0 (!%p389_p8), %v999_v35  ;;  %v1006_v40 = vld [vmem:[%s1233_s9 + $0x34] ss:$8 sps:$4 sm:$0xff] (!%p389_p8)   ;;  %v1008_v41 = vld [vmem:[%s1233_s9 + $0x30] ss:$8 sps:$4 sm:$0xff] (!%p389_p8)   ;;  %v1009_v42 = vld [vmem:[%s1233_s9 + $0x44] ss:$8 sps:$4 sm:$0xff] (!%p389_p8)  }
  0x3b   : > { %691 = vmatprep.subr.bf16.mxu0 (!%p389_p8), %v1000_v36  ;;  %v1011_v43 = vld [vmem:[%s1233_s9 + $0x40] ss:$8 sps:$4 sm:$0xff] (!%p389_p8)   ;;  %v1012_v44 = vld [vmem:[%s1233_s9 + $0x54] ss:$8 sps:$4 sm:$0xff] (!%p389_p8)   ;;  %v1014_v45 = vld [vmem:[%s1233_s9 + $0x50] ss:$8 sps:$4 sm:$0xff] (!%p389_p8)  }
  0x3c   : > { %v1015_v46 = vld [vmem:[%s1233_s9 + $0x64] ss:$8 sps:$4 sm:$0xff] (!%p389_p8)   ;;  %v1017_v47 = vld [vmem:[%s1233_s9 + $0x60] ss:$8 sps:$4 sm:$0xff] (!%p389_p8)   ;;  %v1018_v48 = vld [vmem:[%s1233_s9 + $0x74] ss:$8 sps:$4 sm:$0xff] (!%p389_p8)  }
  0x3d   : > { %v1020_v49 = vld [vmem:[%s1233_s9 + $0x70] ss:$8 sps:$4 sm:$0xff]   ;;  %v1021_v50 = vld [vmem:[%s1233_s9 + $0x84] ss:$8 sps:$4 sm:$0xff]   ;;  %v1023_v51 = vld [vmem:[%s1233_s9 + $0x80] ss:$8 sps:$4 sm:$0xff]  }
  0x3e   : > { %692 = vmatpush1.bf16.msra.mxu0 %v1002_v37  ;;  %v1024_v52 = vld [vmem:[%s1233_s9 + $0x94] ss:$8 sps:$4 sm:$0xff]   ;;  %v1026_v53 = vld [vmem:[%s1233_s9 + $0x90] ss:$8 sps:$4 sm:$0xff]   ;;  %v1027_v54 = vld [vmem:[%s1233_s9 + $0xa4] ss:$8 sps:$4 sm:$0xff]  }
  0x3f   : > { %693 = vmatprep.subr.bf16.mxu0 %v1003_v38  ;;  %v1029_v55 = vld [vmem:[%s1233_s9 + $0xa0] ss:$8 sps:$4 sm:$0xff]   ;;  %v1030_v56 = vld [vmem:[%s1233_s9 + $0xb4] ss:$8 sps:$4 sm:$0xff]   ;;  %v1032_v57 = vld [vmem:[%s1233_s9 + $0xb0] ss:$8 sps:$4 sm:$0xff]  }
  0x40   : > { %v1033_v58 = vld [vmem:[%s1233_s9 + $0xc4] ss:$8 sps:$4 sm:$0xff]   ;;  %v1035_v59 = vld [vmem:[%s1233_s9 + $0xc0] ss:$8 sps:$4 sm:$0xff]   ;;  %v1036_v60 = vld [vmem:[%s1233_s9 + $0xd4] ss:$8 sps:$4 sm:$0xff]  }
  0x41   : > { %v1038_v61 = vld [vmem:[%s1233_s9 + $0xd0] ss:$8 sps:$4 sm:$0xff]   ;;  %v1039_v62 = vld [vmem:[%s1233_s9 + $0xe4] ss:$8 sps:$4 sm:$0xff]   ;;  %v1041_v63 = vld [vmem:[%s1233_s9 + $0xe0] ss:$8 sps:$4 sm:$0xff]  }
  0x42   : > { %694 = vmatpush1.bf16.msra.mxu0 %v1005_v39  ;;  %v1042_v0 = vld [vmem:[%s1233_s9 + $0xf4] ss:$8 sps:$4 sm:$0xff]   ;;  %v1044_v1 = vld [vmem:[%s1233_s9 + $0xf0] ss:$8 sps:$4 sm:$0xff]   ;;  %s1306_s10 = smov (!%p457_p9, %s915_s10), 7  ;;  %v743_v5 = vsub.s32 0, %v742_v4 }
  0x43   : > { %695 = vmatprep.subr.bf16.mxu0 %v1006_v40  ;;  %s459_s13 = scalar_lea.vmem %s1296_s2, %s1306_s10  ;;  %s917_s14 = sshll.u32 %s1306_s10, 3  ;;  %v747_v7 = vsub.s32 1, %v742_v4 }
  0x44   : > { %v739_v6 = vld [vmem:[%s459_s13] sm:$0x3]  ;;  %s469_s22 = scalar_lea.vmem %s1297_s3, %s917_s14  ;;  %s479_s25 = scalar_lea.vmem %s1298_s4, %s917_s14 }
  0x45   : > { %v744_v8 = vrot.slane %v739_v6, %v743_v5  ;;  %v748_v9 = vrot.slane %v739_v6, %v747_v7  ;;  %v753_v11 = vld [vmem:[%s469_s22] sm:$0xff]  ;;  %v754_v14 = vld [vmem:[%s469_s22 + $0x8] sm:$0xff] }
  0x46   : > { %696 = vmatpush1.bf16.msra.mxu0 %v1008_v41 }
  0x47   : > { %697 = vmatprep.subr.bf16.mxu0 %v1009_v42 }
  0x4a   : > { %698 = vmatpush1.bf16.msra.mxu0 %v1011_v43 }
  0x4b   : > { %699 = vmatprep.subr.bf16.mxu0 %v1012_v44 }
  0x4e   : > { %700 = vmatpush1.bf16.msra.mxu0 %v1014_v45 }
  0x4f   : > { %701 = vmatprep.subr.bf16.mxu0 %v1015_v46 }
  0x52   : > { %702 = vmatpush1.bf16.msra.mxu0 %v1017_v47 }
  0x53   : > { %703 = vmatprep.subr.bf16.mxu0 %v1018_v48 }
  0x56   : > { %704 = vmatpush1.bf16.msra.mxu0 %v1020_v49 }
  0x57   : > { %705 = vmatprep.subr.bf16.mxu0 %v1021_v50 }
  0x5a   : > { %706 = vmatpush1.bf16.msra.mxu0 %v1023_v51 }
  0x5b   : > { %707 = vmatprep.subr.bf16.mxu0 %v1024_v52 }
  0x5e   : > { %708 = vmatpush1.bf16.msra.mxu0 %v1026_v53 }
  0x5f   : > { %709 = vmatprep.subr.bf16.mxu0 %v1027_v54 }
  0x62   : > { %710 = vmatpush1.bf16.msra.mxu0 %v1029_v55 }
  0x63   : > { %711 = vmatprep.subr.bf16.mxu0 %v1030_v56 }
  0x66   : > { %712 = vmatpush1.bf16.msra.mxu0 %v1032_v57 }
  0x67   : > { %713 = vmatprep.subr.bf16.mxu0 %v1033_v58 }
  0x6a   : > { %714 = vmatpush1.bf16.msra.mxu0 %v1035_v59 }
  0x6b   : > { %715 = vmatprep.subr.bf16.mxu0 %v1036_v60 }
  0x6e   : > { %716 = vmatpush1.bf16.msra.mxu0 %v1038_v61 }
  0x6f   : > { %717 = vmatprep.subr.bf16.mxu0 %v1039_v62 }
  0x72   : > { %718 = vmatpush1.bf16.msra.mxu0 %v1041_v63 }
  0x73   : > { %719 = vmatprep.subr.bf16.mxu0 %v1042_v0 }
  0x76   : > { %720 = vmatpush1.bf16.msra.mxu0 %v1044_v1 }
  0x79   : > { %722 = vmatmul.mubr.bf16.vlgmr.msra.gmra.mrb[0].mxu0 %v920_v2 }
 0x14c   : > { %v723_v10 = vpop.f32.mrb[0].mxu0 }
 0x14d   : > { %v751_v12 = vadd.f32 %v744_v8, %v723_v10  ;;  %v725_v13 = vpop.f32.mrb[1].mxu0 }
 0x14e   : > { %v752_v15 = vadd.f32 %v748_v9, %v725_v13  ;;  %v727_v16 = vpop.f32.mrb[2].mxu0 }
 0x14f   : > { %v755_v17 = vadd.f32 %v753_v11, %v751_v12  ;;  %v728_v18 = vpop.f32.mrb[3].mxu0 }
 0x150   : > { %v756_v19 = vadd.f32 %v754_v14, %v752_v15 }
 0x151   : > { %v757_v20 = vmax.f32 %v755_v17, 0.0 }
 0x152   : > { %v758_v21 = vmax.f32 %v756_v19, 0.0 }
 0x153   : > { %759 = vst [vmem:[%s479_s25] sm:$0xff] %v757_v20 }
 0x154   : > { %760 = vst [vmem:[%s479_s25 + $0x8] sm:$0xff] %v758_v21 }
 0x155 PF: > { %s14_s19 = sadd.s32 1, %s1085_s19   ;;  %s1299_s15 = smov %s1073_s16 }
 0x156   : > { %p11_p10 = scmp.ge.s32.totalorder %s14_s19, 6   ;;  %s1300_s16 = smov %s1147_s23 }
 0x157   : > { %s1301_s17 = smov %s1081_s18  ;;  %s1302_s18 = smov %s1304_s20 }
 0x158   :  { %13 = sbr.rel (!%p11_p10) target bundleno = 3 (0x3), region = 126 }

// kernel: feature_vectors_forward.70
= control target key start
LH: loop header
LB: loop body
LE: loop exit
PB: predicated region body
PF: predicated region fallthrough
CT: control target
= control target key end

     0   :  { %s1471_s12 = smov 0   ;;  %s1473_s13 = smov 0   ;;  %s1755_s0 = inlined_call_operand.vmem [shape: bf16[1,8,512], index: 0, kind: input, shape index: {}]   ;;  %s1756_s1 = inlined_call_operand.vmem [shape: bf16[1,512,1024], index: 1, kind: input, shape index: {}]   ;;  %s1757_s2 = inlined_call_operand.vmem [shape: f32[1,1024], index: 2, kind: input, shape index: {}]   ;;  %s1758_s3 = inlined_call_operand.vmem [shape: f32[8,1024], index: 3, kind: output, shape index: {}]  }
   0x1   :  { %s1475_s14 = smov 0   ;;  %s1477_s15 = smov 0  }
   0x2   :  { %s1479_s16 = smov 0  }
   0x3 LB: > { %s28_s17 = sadd.s32 1, %s1445_s15  ;;  %p76_p1 = scmp.ne.s32.totalorder %s1437_s13, %s1433_s12  ;;  %s1449_s16 = sphi %s1479_s16, %s13_s16   ;;  %s1445_s15 = sphi %s1477_s15, %s1762_s15   ;;  %s1441_s14 = sphi %s1475_s14, %s1761_s14   ;;  %s1437_s13 = sphi %s1473_s13, %s1760_s13   ;;  %s1433_s12 = sphi %s1471_s12, %s1759_s12  }
   0x4   : > { %p30_p0 = scmp.ge.s32.totalorder %s28_s17, 4  ;;  %p77_p2 = scmp.eq.s32.totalorder %s1449_s16, 0 }
   0x5   : > { %s69_s19 = sadd.s32 1, %s1437_s13  ;;  %p1191_p5 = scmp.ge.s32.totalorder %s1449_s16, 4 }
   0x6   : > { %s1764_s17 = smov (%p30_p0, %s28_s17), 0  ;;  %p78_p3 = por %p77_p2, %p76_p1 }
   0x7   : > { %s65_s18 = ssub.s32 %s1445_s15, %s1764_s17  ;;  %168 = sbr.rel (%p1191_p5) target bundleno = 82 (0x52), region = 20 }
   0x8   : > { %p67_p4 = scmp.eq.s32.totalorder %s65_s18, 0 }
   0xa   : > { %s1506_s20 = scalar_select %p67_p4, %s1437_s13, %s69_s19  }
   0xe   : > { %171 = sbr.rel (!%p78_p3) target bundleno = 82 (0x52), region = 24  ;;  %s173_s21 = sand.u32 (%p78_p3), 1, %s1437_s13  }
   0xf   : > { %s1270_s22 = sshll.u32 (%p78_p3), %s1445_s15, 3  ;;  %s1192_s23 = sshll.u32 (%p78_p3), %s173_s21, 9 }
  0x10   : > { %s1514_s26 = scalar_lea.vmem (%p78_p3), %s1756_s1, %s1270_s22  ;;  %s1519_s27 = scalar_lea.vmem (%p78_p3), [#allocation3], %s1192_s23 }
  0x11   : > { %v334_v0 = vld [vmem:[%s1514_s26] sm:$0xff] (%p78_p3) }
  0x12   : > { %v336_v1 = vld [vmem:[%s1514_s26 + $0x20] sm:$0xff] (%p78_p3)  ;;  %335 = vst [vmem:[%s1519_s27] sm:$0xff] (%p78_p3), %v334_v0 }
  0x13   : > { %v338_v2 = vld [vmem:[%s1514_s26 + $0x40] sm:$0xff] (%p78_p3)  ;;  %337 = vst [vmem:[%s1519_s27 + $0x8] sm:$0xff] (%p78_p3), %v336_v1 }
  0x14   : > { %339 = vst [vmem:[%s1519_s27 + $0x10] sm:$0xff] (%p78_p3), %v338_v2  ;;  %v340_v3 = vld [vmem:[%s1514_s26 + $0x60] sm:$0xff] (%p78_p3) }
  0x15   : > { %v342_v4 = vld [vmem:[%s1514_s26 + $0x80] sm:$0xff]  ;;  %341 = vst [vmem:[%s1519_s27 + $0x18] sm:$0xff] %v340_v3 }
  0x16   : > { %v344_v5 = vld [vmem:[%s1514_s26 + $0xa0] sm:$0xff]  ;;  %343 = vst [vmem:[%s1519_s27 + $0x20] sm:$0xff] %v342_v4 }
  0x17   : > { %345 = vst [vmem:[%s1519_s27 + $0x28] sm:$0xff] %v344_v5  ;;  %v346_v6 = vld [vmem:[%s1514_s26 + $0xc0] sm:$0xff] }
  0x18   : > { %v348_v7 = vld [vmem:[%s1514_s26 + $0xe0] sm:$0xff]  ;;  %347 = vst [vmem:[%s1519_s27 + $0x30] sm:$0xff] %v346_v6 }
  0x19   : > { %v350_v8 = vld [vmem:[%s1514_s26 + $0x100] sm:$0xff]  ;;  %349 = vst [vmem:[%s1519_s27 + $0x38] sm:$0xff] %v348_v7 }
  0x1a   : > { %351 = vst [vmem:[%s1519_s27 + $0x40] sm:$0xff] %v350_v8  ;;  %v352_v9 = vld [vmem:[%s1514_s26 + $0x120] sm:$0xff] }
  0x1b   : > { %v354_v10 = vld [vmem:[%s1514_s26 + $0x140] sm:$0xff]  ;;  %353 = vst [vmem:[%s1519_s27 + $0x48] sm:$0xff] %v352_v9 }
  0x1c   : > { %v356_v11 = vld [vmem:[%s1514_s26 + $0x160] sm:$0xff]  ;;  %355 = vst [vmem:[%s1519_s27 + $0x50] sm:$0xff] %v354_v10 }
  0x1d   : > { %357 = vst [vmem:[%s1519_s27 + $0x58] sm:$0xff] %v356_v11  ;;  %v358_v12 = vld [vmem:[%s1514_s26 + $0x180] sm:$0xff] }
  0x1e   : > { %v360_v13 = vld [vmem:[%s1514_s26 + $0x1a0] sm:$0xff]  ;;  %359 = vst [vmem:[%s1519_s27 + $0x60] sm:$0xff] %v358_v12 }
  0x1f   : > { %v362_v14 = vld [vmem:[%s1514_s26 + $0x1c0] sm:$0xff]  ;;  %361 = vst [vmem:[%s1519_s27 + $0x68] sm:$0xff] %v360_v13 }
  0x20   : > { %363 = vst [vmem:[%s1519_s27 + $0x70] sm:$0xff] %v362_v14  ;;  %v364_v15 = vld [vmem:[%s1514_s26 + $0x1e0] sm:$0xff] }
  0x21   : > { %v366_v16 = vld [vmem:[%s1514_s26 + $0x200] sm:$0xff]  ;;  %365 = vst [vmem:[%s1519_s27 + $0x78] sm:$0xff] %v364_v15 }
  0x22   : > { %v368_v17 = vld [vmem:[%s1514_s26 + $0x220] sm:$0xff]  ;;  %367 = vst [vmem:[%s1519_s27 + $0x80] sm:$0xff] %v366_v16 }
  0x23   : > { %369 = vst [vmem:[%s1519_s27 + $0x88] sm:$0xff] %v368_v17  ;;  %v370_v18 = vld [vmem:[%s1514_s26 + $0x240] sm:$0xff] }
  0x24   : > { %v372_v19 = vld [vmem:[%s1514_s26 + $0x260] sm:$0xff]  ;;  %371 = vst [vmem:[%s1519_s27 + $0x90] sm:$0xff] %v370_v18 }
  0x25   : > { %v374_v20 = vld [vmem:[%s1514_s26 + $0x280] sm:$0xff]  ;;  %373 = vst [vmem:[%s1519_s27 + $0x98] sm:$0xff] %v372_v19 }
  0x26   : > { %375 = vst [vmem:[%s1519_s27 + $0xa0] sm:$0xff] %v374_v20  ;;  %v376_v21 = vld [vmem:[%s1514_s26 + $0x2a0] sm:$0xff] }
  0x27   : > { %v378_v22 = vld [vmem:[%s1514_s26 + $0x2c0] sm:$0xff]  ;;  %377 = vst [vmem:[%s1519_s27 + $0xa8] sm:$0xff] %v376_v21 }
  0x28   : > { %v380_v23 = vld [vmem:[%s1514_s26 + $0x2e0] sm:$0xff]  ;;  %379 = vst [vmem:[%s1519_s27 + $0xb0] sm:$0xff] %v378_v22 }
  0x29   : > { %381 = vst [vmem:[%s1519_s27 + $0xb8] sm:$0xff] %v380_v23  ;;  %v382_v24 = vld [vmem:[%s1514_s26 + $0x300] sm:$0xff] }
  0x2a   : > { %v384_v25 = vld [vmem:[%s1514_s26 + $0x320] sm:$0xff]  ;;  %383 = vst [vmem:[%s1519_s27 + $0xc0] sm:$0xff] %v382_v24 }
  0x2b   : > { %v386_v26 = vld [vmem:[%s1514_s26 + $0x340] sm:$0xff]  ;;  %385 = vst [vmem:[%s1519_s27 + $0xc8] sm:$0xff] %v384_v25 }
  0x2c   : > { %387 = vst [vmem:[%s1519_s27 + $0xd0] sm:$0xff] %v386_v26  ;;  %v388_v27 = vld [vmem:[%s1514_s26 + $0x360] sm:$0xff] }
  0x2d   : > { %v390_v28 = vld [vmem:[%s1514_s26 + $0x380] sm:$0xff]  ;;  %389 = vst [vmem:[%s1519_s27 + $0xd8] sm:$0xff] %v388_v27 }
  0x2e   : > { %v392_v29 = vld [vmem:[%s1514_s26 + $0x3a0] sm:$0xff]  ;;  %391 = vst [vmem:[%s1519_s27 + $0xe0] sm:$0xff] %v390_v28 }
  0x2f   : > { %393 = vst [vmem:[%s1519_s27 + $0xe8] sm:$0xff] %v392_v29  ;;  %v394_v30 = vld [vmem:[%s1514_s26 + $0x3c0] sm:$0xff] }
  0x30   : > { %v396_v31 = vld [vmem:[%s1514_s26 + $0x3e0] sm:$0xff]  ;;  %395 = vst [vmem:[%s1519_s27 + $0xf0] sm:$0xff] %v394_v30 }
  0x31   : > { %v398_v32 = vld [vmem:[%s1514_s26 + $0x400] sm:$0xff]  ;;  %397 = vst [vmem:[%s1519_s27 + $0xf8] sm:$0xff] %v396_v31 }
  0x32   : > { %399 = vst [vmem:[%s1519_s27 + $0x100] sm:$0xff] %v398_v32  ;;  %v400_v33 = vld [vmem:[%s1514_s26 + $0x420] sm:$0xff] }
  0x33   : > { %v402_v34 = vld [vmem:[%s1514_s26 + $0x440] sm:$0xff]  ;;  %401 = vst [vmem:[%s1519_s27 + $0x108] sm:$0xff] %v400_v33 }
  0x34   : > { %v404_v35 = vld [vmem:[%s1514_s26 + $0x460] sm:$0xff]  ;;  %403 = vst [vmem:[%s1519_s27 + $0x110] sm:$0xff] %v402_v34 }
  0x35   : > { %405 = vst [vmem:[%s1519_s27 + $0x118] sm:$0xff] %v404_v35  ;;  %v406_v36 = vld [vmem:[%s1514_s26 + $0x480] sm:$0xff] }
  0x36   : > { %v408_v37 = vld [vmem:[%s1514_s26 + $0x4a0] sm:$0xff]  ;;  %407 = vst [vmem:[%s1519_s27 + $0x120] sm:$0xff] %v406_v36 }
  0x37   : > { %v410_v38 = vld [vmem:[%s1514_s26 + $0x4c0] sm:$0xff]  ;;  %409 = vst [vmem:[%s1519_s27 + $0x128] sm:$0xff] %v408_v37 }
  0x38   : > { %411 = vst [vmem:[%s1519_s27 + $0x130] sm:$0xff] %v410_v38  ;;  %v412_v39 = vld [vmem:[%s1514_s26 + $0x4e0] sm:$0xff] }
  0x39   : > { %v414_v40 = vld [vmem:[%s1514_s26 + $0x500] sm:$0xff]  ;;  %413 = vst [vmem:[%s1519_s27 + $0x138] sm:$0xff] %v412_v39 }
  0x3a   : > { %v416_v41 = vld [vmem:[%s1514_s26 + $0x520] sm:$0xff]  ;;  %415 = vst [vmem:[%s1519_s27 + $0x140] sm:$0xff] %v414_v40 }
  0x3b   : > { %417 = vst [vmem:[%s1519_s27 + $0x148] sm:$0xff] %v416_v41  ;;  %v418_v42 = vld [vmem:[%s1514_s26 + $0x540] sm:$0xff] }
  0x3c   : > { %v420_v43 = vld [vmem:[%s1514_s26 + $0x560] sm:$0xff]  ;;  %419 = vst [vmem:[%s1519_s27 + $0x150] sm:$0xff] %v418_v42 }
  0x3d   : > { %v422_v44 = vld [vmem:[%s1514_s26 + $0x580] sm:$0xff]  ;;  %421 = vst [vmem:[%s1519_s27 + $0x158] sm:$0xff] %v420_v43 }
  0x3e   : > { %423 = vst [vmem:[%s1519_s27 + $0x160] sm:$0xff] %v422_v44  ;;  %v424_v45 = vld [vmem:[%s1514_s26 + $0x5a0] sm:$0xff] }
  0x3f   : > { %v426_v46 = vld [vmem:[%s1514_s26 + $0x5c0] sm:$0xff]  ;;  %425 = vst [vmem:[%s1519_s27 + $0x168] sm:$0xff] %v424_v45 }
  0x40   : > { %v428_v47 = vld [vmem:[%s1514_s26 + $0x5e0] sm:$0xff]  ;;  %427 = vst [vmem:[%s1519_s27 + $0x170] sm:$0xff] %v426_v46 }
  0x41   : > { %429 = vst [vmem:[%s1519_s27 + $0x178] sm:$0xff] %v428_v47  ;;  %v430_v48 = vld [vmem:[%s1514_s26 + $0x600] sm:$0xff] }
  0x42   : > { %v432_v49 = vld [vmem:[%s1514_s26 + $0x620] sm:$0xff]  ;;  %431 = vst [vmem:[%s1519_s27 + $0x180] sm:$0xff] %v430_v48 }
  0x43   : > { %v434_v50 = vld [vmem:[%s1514_s26 + $0x640] sm:$0xff]  ;;  %433 = vst [vmem:[%s1519_s27 + $0x188] sm:$0xff] %v432_v49 }
  0x44   : > { %435 = vst [vmem:[%s1519_s27 + $0x190] sm:$0xff] %v434_v50  ;;  %v436_v51 = vld [vmem:[%s1514_s26 + $0x660] sm:$0xff] }
  0x45   : > { %v438_v52 = vld [vmem:[%s1514_s26 + $0x680] sm:$0xff]  ;;  %437 = vst [vmem:[%s1519_s27 + $0x198] sm:$0xff] %v436_v51 }
  0x46   : > { %v440_v53 = vld [vmem:[%s1514_s26 + $0x6a0] sm:$0xff]  ;;  %439 = vst [vmem:[%s1519_s27 + $0x1a0] sm:$0xff] %v438_v52 }
  0x47   : > { %441 = vst [vmem:[%s1519_s27 + $0x1a8] sm:$0xff] %v440_v53  ;;  %v442_v54 = vld [vmem:[%s1514_s26 + $0x6c0] sm:$0xff] }
  0x48   : > { %v444_v55 = vld [vmem:[%s1514_s26 + $0x6e0] sm:$0xff]  ;;  %443 = vst [vmem:[%s1519_s27 + $0x1b0] sm:$0xff] %v442_v54 }
  0x49   : > { %v446_v56 = vld [vmem:[%s1514_s26 + $0x700] sm:$0xff]  ;;  %445 = vst [vmem:[%s1519_s27 + $0x1b8] sm:$0xff] %v444_v55 }
  0x4a   : > { %447 = vst [vmem:[%s1519_s27 + $0x1c0] sm:$0xff] %v446_v56  ;;  %v448_v57 = vld [vmem:[%s1514_s26 + $0x720] sm:$0xff] }
  0x4b   : > { %v450_v58 = vld [vmem:[%s1514_s26 + $0x740] sm:$0xff]  ;;  %449 = vst [vmem:[%s1519_s27 + $0x1c8] sm:$0xff] %v448_v57 }
  0x4c   : > { %v452_v59 = vld [vmem:[%s1514_s26 + $0x760] sm:$0xff]  ;;  %451 = vst [vmem:[%s1519_s27 + $0x1d0] sm:$0xff] %v450_v58 }
  0x4d   : > { %453 = vst [vmem:[%s1519_s27 + $0x1d8] sm:$0xff] %v452_v59  ;;  %v454_v60 = vld [vmem:[%s1514_s26 + $0x780] sm:$0xff] }
  0x4e   : > { %v456_v61 = vld [vmem:[%s1514_s26 + $0x7a0] sm:$0xff]  ;;  %455 = vst [vmem:[%s1519_s27 + $0x1e0] sm:$0xff] %v454_v60 }
  0x4f   : > { %v458_v62 = vld [vmem:[%s1514_s26 + $0x7c0] sm:$0xff]  ;;  %457 = vst [vmem:[%s1519_s27 + $0x1e8] sm:$0xff] %v456_v61 }
  0x50   : > { %459 = vst [vmem:[%s1519_s27 + $0x1f0] sm:$0xff] %v458_v62  ;;  %v460_v63 = vld [vmem:[%s1514_s26 + $0x7e0] sm:$0xff] }
  0x51   : > { %461 = vst [vmem:[%s1519_s27 + $0x1f8] sm:$0xff] %v460_v63 }
  0x52 PF: > { %p1195_p6 = scmp.ge.s32.totalorder %s1449_s16, 1  ;;  %p474_p7 = scmp.lt.s32.totalorder %s1449_s16, 5 }
  0x54   : > { %p475_p8 = pnand %p1195_p6, %p474_p7 }
  0x55   : > { %s481_s28 = sand.u32 (!%p475_p8), 1, %s1433_s12   ;;  %v1652_v0 = vld [vmem:[%s1755_s0] sm:$0xff] (!%p475_p8)  ;;  %v1657_v1 = vld [vmem:[%s1755_s0 + $0x8] sm:$0xff] (!%p475_p8)  ;;  %s1197_s8 = sshll.u32 (!%p475_p8), %s1441_s14, 1 }
  0x56   : > { %478 = sbr.rel (%p475_p8) target bundleno = 372 (0x174), region = 66  ;;  %s1196_s6 = sshll.u32 (!%p475_p8), %s481_s28, 9  ;;  %v1201_v2 = vcombine.high (!%p475_p8), %v1652_v0, %v1652_v0  ;;  %v1203_v3 = vcombine.high (!%p475_p8), %v1657_v1, %v1657_v1 }
  0x57   : > { %s1663_s7 = scalar_lea.vmem (!%p475_p8), [#allocation3], %s1196_s6  ;;  %p532_p9 = scmp.lt.s32.totalorder (!%p475_p8), %s1197_s8, 7 }
  0x58   : > { %v1311_v4 = vld [vmem:[%s1663_s7 + $0x4] ss:$8 sps:$4 sm:$0xff] (!%p475_p8)   ;;  %986 = vmatprep.mubr.bf16.mxu0 (!%p475_p8), %v1201_v2  ;;  %1027 = vmatprep.mubr.bf16.mxu1 (!%p475_p8), %v1203_v3  ;;  %v1315_v6 = vld [vmem:[%s1663_s7] ss:$8 sps:$4 sm:$0xff] (!%p475_p8)   ;;  %v1317_v8 = vld [vmem:[%s1663_s7 + $0x14] ss:$8 sps:$4 sm:$0xff] (!%p475_p8)  }
  0x59   : > { %v1313_v5 = vld [vmem:[%s1663_s7 + $0x104] ss:$8 sps:$4 sm:$0xff] (!%p475_p8)   ;;  %954 = vmatprep.subr.bf16.mxu0 (!%p475_p8), %v1311_v4  ;;  %v1316_v7 = vld [vmem:[%s1663_s7 + $0x100] ss:$8 sps:$4 sm:$0xff] (!%p475_p8)   ;;  %v1319_v9 = vld [vmem:[%s1663_s7 + $0x114] ss:$8 sps:$4 sm:$0xff] (!%p475_p8)  }
  0x5a   : > { %995 = vmatprep.subr.bf16.mxu1 (!%p475_p8), %v1313_v5  ;;  %955 = vmatpush1.bf16.msra.mxu0 (!%p475_p8), %v1315_v6  ;;  %v1321_v10 = vld [vmem:[%s1663_s7 + $0x10] ss:$8 sps:$4 sm:$0xff] (!%p475_p8)   ;;  %v1323_v12 = vld [vmem:[%s1663_s7 + $0x24] ss:$8 sps:$4 sm:$0xff] (!%p475_p8)   ;;  %v1327_v14 = vld [vmem:[%s1663_s7 + $0x20] ss:$8 sps:$4 sm:$0xff] (!%p475_p8)   ;;  %v1200_v6 = vcombine.low (!%p475_p8), %v1652_v0, %v1652_v0 }
  0x5b   : > { %996 = vmatpush1.bf16.msra.mxu1 (!%p475_p8), %v1316_v7  ;;  %956 = vmatprep.subr.bf16.mxu0 (!%p475_p8), %v1317_v8  ;;  %v1322_v11 = vld [vmem:[%s1663_s7 + $0x110] ss:$8 sps:$4 sm:$0xff] (!%p475_p8)   ;;  %v1325_v13 = vld [vmem:[%s1663_s7 + $0x124] ss:$8 sps:$4 sm:$0xff] (!%p475_p8)   ;;  %v1328_v15 = vld [vmem:[%s1663_s7 + $0x120] ss:$8 sps:$4 sm:$0xff] (!%p475_p8)   ;;  %v1202_v7 = vcombine.low (!%p475_p8), %v1657_v1, %v1657_v1  ;;  %v1047_v8 = vlaneseq (!%p475_p8) }
  0x5c   : > { %997 = vmatprep.subr.bf16.mxu1 (!%p475_p8), %v1319_v9  ;;  %v1329_v16 = vld [vmem:[%s1663_s7 + $0x34] ss:$8 sps:$4 sm:$0xff] (!%p475_p8)   ;;  %v1333_v18 = vld [vmem:[%s1663_s7 + $0x30] ss:$8 sps:$4 sm:$0xff] (!%p475_p8)   ;;  %v1335_v20 = vld [vmem:[%s1663_s7 + $0x44] ss:$8 sps:$4 sm:$0xff] (!%p475_p8)  }
  0x5d   : > { %v1331_v17 = vld [vmem:[%s1663_s7 + $0x134] ss:$8 sps:$4 sm:$0xff]   ;;  %v1334_v19 = vld [vmem:[%s1663_s7 + $0x130] ss:$8 sps:$4 sm:$0xff]   ;;  %v1337_v21 = vld [vmem:[%s1663_s7 + $0x144] ss:$8 sps:$4 sm:$0xff]  }
  0x5e   : > { %957 = vmatpush1.bf16.msra.mxu0 %v1321_v10  ;;  %v1339_v22 = vld [vmem:[%s1663_s7 + $0x40] ss:$8 sps:$4 sm:$0xff]   ;;  %v1341_v24 = vld [vmem:[%s1663_s7 + $0x54] ss:$8 sps:$4 sm:$0xff]   ;;  %v1345_v26 = vld [vmem:[%s1663_s7 + $0x50] ss:$8 sps:$4 sm:$0xff]  }
  0x5f   : > { %998 = vmatpush1.bf16.msra.mxu1 %v1322_v11  ;;  %958 = vmatprep.subr.bf16.mxu0 %v1323_v12  ;;  %v1340_v23 = vld [vmem:[%s1663_s7 + $0x140] ss:$8 sps:$4 sm:$0xff]   ;;  %v1343_v25 = vld [vmem:[%s1663_s7 + $0x154] ss:$8 sps:$4 sm:$0xff]   ;;  %v1346_v27 = vld [vmem:[%s1663_s7 + $0x150] ss:$8 sps:$4 sm:$0xff]  }
  0x60   : > { %999 = vmatprep.subr.bf16.mxu1 %v1325_v13  ;;  %v1347_v28 = vld [vmem:[%s1663_s7 + $0x64] ss:$8 sps:$4 sm:$0xff]   ;;  %v1351_v30 = vld [vmem:[%s1663_s7 + $0x60] ss:$8 sps:$4 sm:$0xff]   ;;  %v1353_v32 = vld [vmem:[%s1663_s7 + $0x74] ss:$8 sps:$4 sm:$0xff]  }
  0x61   : > { %v1349_v29 = vld [vmem:[%s1663_s7 + $0x164] ss:$8 sps:$4 sm:$0xff]   ;;  %v1352_v31 = vld [vmem:[%s1663_s7 + $0x160] ss:$8 sps:$4 sm:$0xff]   ;;  %v1355_v33 = vld [vmem:[%s1663_s7 + $0x174] ss:$8 sps:$4 sm:$0xff]  }
  0x62   : > { %959 = vmatpush1.bf16.msra.mxu0 %v1327_v14  ;;  %v1357_v34 = vld [vmem:[%s1663_s7 + $0x70] ss:$8 sps:$4 sm:$0xff]   ;;  %v1359_v36 = vld [vmem:[%s1663_s7 + $0x84] ss:$8 sps:$4 sm:$0xff]   ;;  %v1363_v38 = vld [vmem:[%s1663_s7 + $0x80] ss:$8 sps:$4 sm:$0xff]  }
  0x63   : > { %1000 = vmatpush1.bf16.msra.mxu1 %v1328_v15  ;;  %960 = vmatprep.subr.bf16.mxu0 %v1329_v16  ;;  %v1358_v35 = vld [vmem:[%s1663_s7 + $0x170] ss:$8 sps:$4 sm:$0xff]   ;;  %v1361_v37 = vld [vmem:[%s1663_s7 + $0x184] ss:$8 sps:$4 sm:$0xff]   ;;  %v1364_v39 = vld [vmem:[%s1663_s7 + $0x180] ss:$8 sps:$4 sm:$0xff]  }
  0x64   : > { %1001 = vmatprep.subr.bf16.mxu1 %v1331_v17  ;;  %v1365_v40 = vld [vmem:[%s1663_s7 + $0x94] ss:$8 sps:$4 sm:$0xff]   ;;  %v1369_v42 = vld [vmem:[%s1663_s7 + $0x90] ss:$8 sps:$4 sm:$0xff]   ;;  %v1371_v44 = vld [vmem:[%s1663_s7 + $0xa4] ss:$8 sps:$4 sm:$0xff]  }
  0x65   : > { %v1367_v41 = vld [vmem:[%s1663_s7 + $0x194] ss:$8 sps:$4 sm:$0xff]   ;;  %v1370_v43 = vld [vmem:[%s1663_s7 + $0x190] ss:$8 sps:$4 sm:$0xff]   ;;  %v1373_v45 = vld [vmem:[%s1663_s7 + $0x1a4] ss:$8 sps:$4 sm:$0xff]  }
  0x66   : > { %961 = vmatpush1.bf16.msra.mxu0 %v1333_v18  ;;  %v1375_v46 = vld [vmem:[%s1663_s7 + $0xa0] ss:$8 sps:$4 sm:$0xff]   ;;  %v1377_v48 = vld [vmem:[%s1663_s7 + $0xb4] ss:$8 sps:$4 sm:$0xff]   ;;  %v1381_v50 = vld [vmem:[%s1663_s7 + $0xb0] ss:$8 sps:$4 sm:$0xff]  }
  0x67   : > { %1002 = vmatpush1.bf16.msra.mxu1 %v1334_v19  ;;  %962 = vmatprep.subr.bf16.mxu0 %v1335_v20  ;;  %v1376_v47 = vld [vmem:[%s1663_s7 + $0x1a0] ss:$8 sps:$4 sm:$0xff]   ;;  %v1379_v49 = vld [vmem:[%s1663_s7 + $0x1b4] ss:$8 sps:$4 sm:$0xff]   ;;  %v1382_v51 = vld [vmem:[%s1663_s7 + $0x1b0] ss:$8 sps:$4 sm:$0xff]  }
  0x68   : > { %1003 = vmatprep.subr.bf16.mxu1 %v1337_v21  ;;  %v1383_v52 = vld [vmem:[%s1663_s7 + $0xc4] ss:$8 sps:$4 sm:$0xff]   ;;  %v1387_v54 = vld [vmem:[%s1663_s7 + $0xc0] ss:$8 sps:$4 sm:$0xff]   ;;  %v1389_v56 = vld [vmem:[%s1663_s7 + $0xd4] ss:$8 sps:$4 sm:$0xff]  }
  0x69   : > { %v1385_v53 = vld [vmem:[%s1663_s7 + $0x1c4] ss:$8 sps:$4 sm:$0xff]   ;;  %v1388_v55 = vld [vmem:[%s1663_s7 + $0x1c0] ss:$8 sps:$4 sm:$0xff]   ;;  %v1391_v57 = vld [vmem:[%s1663_s7 + $0x1d4] ss:$8 sps:$4 sm:$0xff]  }
  0x6a   : > { %963 = vmatpush1.bf16.msra.mxu0 %v1339_v22  ;;  %v1393_v58 = vld [vmem:[%s1663_s7 + $0xd0] ss:$8 sps:$4 sm:$0xff]   ;;  %v1395_v60 = vld [vmem:[%s1663_s7 + $0xe4] ss:$8 sps:$4 sm:$0xff]   ;;  %v1399_v62 = vld [vmem:[%s1663_s7 + $0xe0] ss:$8 sps:$4 sm:$0xff]  }
  0x6b   : > { %1004 = vmatpush1.bf16.msra.mxu1 %v1340_v23  ;;  %964 = vmatprep.subr.bf16.mxu0 %v1341_v24  ;;  %v1394_v59 = vld [vmem:[%s1663_s7 + $0x1d0] ss:$8 sps:$4 sm:$0xff]   ;;  %v1397_v61 = vld [vmem:[%s1663_s7 + $0x1e4] ss:$8 sps:$4 sm:$0xff]   ;;  %v1400_v63 = vld [vmem:[%s1663_s7 + $0x1e0] ss:$8 sps:$4 sm:$0xff]  }
  0x6c   : > { %1005 = vmatprep.subr.bf16.mxu1 %v1343_v25  ;;  %v1401_v2 = vld [vmem:[%s1663_s7 + $0xf4] ss:$8 sps:$4 sm:$0xff]   ;;  %v1405_v4 = vld [vmem:[%s1663_s7 + $0xf0] ss:$8 sps:$4 sm:$0xff]   ;;  %s1766_s8 = smov (!%p532_p9, %s1197_s8), 7  ;;  %v1048_v9 = vshrl.u32 %v1047_v8, 7 }
  0x6d   : > { %v1403_v3 = vld [vmem:[%s1663_s7 + $0x1f4] ss:$8 sps:$4 sm:$0xff]   ;;  %v1406_v5 = vld [vmem:[%s1663_s7 + $0x1f0] ss:$8 sps:$4 sm:$0xff]   ;;  %s534_s11 = scalar_lea.vmem %s1757_s2, %s1766_s8  ;;  %s1199_s12 = sshll.u32 %s1766_s8, 3 }
  0x6e   : > { %965 = vmatpush1.bf16.msra.mxu0 %v1345_v26  ;;  %v1049_v10 = vsub.s32 0, %v1048_v9  ;;  %v1045_v11 = vld [vmem:[%s534_s11] sm:$0x3]  ;;  %v1053_v12 = vsub.s32 1, %v1048_v9  ;;  %s544_s19 = scalar_lea.vmem %s1758_s3, %s1199_s12 }
  0x6f   : > { %1006 = vmatpush1.bf16.msra.mxu1 %v1346_v27  ;;  %966 = vmatprep.subr.bf16.mxu0 %v1347_v28 }
  0x70   : > { %1007 = vmatprep.subr.bf16.mxu1 %v1349_v29  ;;  %v1050_v0 = vrot.slane %v1045_v11, %v1049_v10  ;;  %v1054_v14 = vrot.slane %v1045_v11, %v1053_v12 }
  0x72   : > { %967 = vmatpush1.bf16.msra.mxu0 %v1351_v30 }
  0x73   : > { %1008 = vmatpush1.bf16.msra.mxu1 %v1352_v31  ;;  %968 = vmatprep.subr.bf16.mxu0 %v1353_v32 }
  0x74   : > { %1009 = vmatprep.subr.bf16.mxu1 %v1355_v33 }
  0x76   : > { %969 = vmatpush1.bf16.msra.mxu0 %v1357_v34 }
  0x77   : > { %1010 = vmatpush1.bf16.msra.mxu1 %v1358_v35  ;;  %970 = vmatprep.subr.bf16.mxu0 %v1359_v36 }
  0x78   : > { %1011 = vmatprep.subr.bf16.mxu1 %v1361_v37 }
  0x7a   : > { %971 = vmatpush1.bf16.msra.mxu0 %v1363_v38 }
  0x7b   : > { %1012 = vmatpush1.bf16.msra.mxu1 %v1364_v39  ;;  %972 = vmatprep.subr.bf16.mxu0 %v1365_v40 }
  0x7c   : > { %1013 = vmatprep.subr.bf16.mxu1 %v1367_v41 }
  0x7e   : > { %973 = vmatpush1.bf16.msra.mxu0 %v1369_v42 }
  0x7f   : > { %1014 = vmatpush1.bf16.msra.mxu1 %v1370_v43  ;;  %974 = vmatprep.subr.bf16.mxu0 %v1371_v44 }
  0x80   : > { %1015 = vmatprep.subr.bf16.mxu1 %v1373_v45 }
  0x82   : > { %975 = vmatpush1.bf16.msra.mxu0 %v1375_v46 }
  0x83   : > { %1016 = vmatpush1.bf16.msra.mxu1 %v1376_v47  ;;  %976 = vmatprep.subr.bf16.mxu0 %v1377_v48 }
  0x84   : > { %1017 = vmatprep.subr.bf16.mxu1 %v1379_v49 }
  0x86   : > { %977 = vmatpush1.bf16.msra.mxu0 %v1381_v50 }
  0x87   : > { %1018 = vmatpush1.bf16.msra.mxu1 %v1382_v51  ;;  %978 = vmatprep.subr.bf16.mxu0 %v1383_v52 }
  0x88   : > { %1019 = vmatprep.subr.bf16.mxu1 %v1385_v53 }
  0x8a   : > { %979 = vmatpush1.bf16.msra.mxu0 %v1387_v54 }
  0x8b   : > { %1020 = vmatpush1.bf16.msra.mxu1 %v1388_v55  ;;  %980 = vmatprep.subr.bf16.mxu0 %v1389_v56 }
  0x8c   : > { %1021 = vmatprep.subr.bf16.mxu1 %v1391_v57 }
  0x8e   : > { %981 = vmatpush1.bf16.msra.mxu0 %v1393_v58 }
  0x8f   : > { %1022 = vmatpush1.bf16.msra.mxu1 %v1394_v59  ;;  %982 = vmatprep.subr.bf16.mxu0 %v1395_v60 }
  0x90   : > { %1023 = vmatprep.subr.bf16.mxu1 %v1397_v61 }
  0x92   : > { %983 = vmatpush1.bf16.msra.mxu0 %v1399_v62 }
  0x93   : > { %1024 = vmatpush1.bf16.msra.mxu1 %v1400_v63  ;;  %984 = vmatprep.subr.bf16.mxu0 %v1401_v2 }
  0x94   : > { %1025 = vmatprep.subr.bf16.mxu1 %v1403_v3 }
  0x96   : > { %985 = vmatpush1.bf16.msra.mxu0 %v1405_v4 }
  0x97   : > { %1026 = vmatpush1.bf16.msra.mxu1 %v1406_v5 }
  0x99   : > { %987 = vmatmul.mubr.bf16.vlgmr.msra.gmra.mrb[0].mxu0 %v1200_v6 }
  0x9a   : > { %1028 = vmatmul.mubr.bf16.vlgmr.msra.gmra.mrb[0].mxu1 %v1202_v7 }
 0x16c   : > { %v988_v13 = vpop.f32.mrb[0].mxu0 }
 0x16d   : > { %v1029_v1 = vpop.f32.mrb[0].mxu1  ;;  %v990_v16 = vpop.f32.mrb[1].mxu0 }
 0x16e   : > { %v1030_v15 = vadd.f32 %v1029_v1, %v988_v13  ;;  %v1031_v17 = vpop.f32.mrb[1].mxu1  ;;  %v992_v19 = vpop.f32.mrb[2].mxu0 }
 0x16f   : > { %v1032_v18 = vadd.f32 %v1031_v17, %v990_v16  ;;  %v1033_v20 = vpop.f32.mrb[2].mxu1  ;;  %v993_v22 = vpop.f32.mrb[3].mxu0 }
 0x170   : > { %v1057_v21 = vadd.f32 %v1050_v0, %v1030_v15  ;;  %v1034_v23 = vpop.f32.mrb[3].mxu1 }
 0x171   : > { %v1058_v24 = vadd.f32 %v1054_v14, %v1032_v18 }
 0x172   : > { %1059 = vst [vmem:[%s544_s19] sm:$0xff] %v1057_v21 }
 0x173   : > { %1060 = vst [vmem:[%s544_s19 + $0x8] sm:$0xff] %v1058_v24 }
 0x174 PF: > { %s13_s16 = sadd.s32 1, %s1449_s16   ;;  %s1759_s12 = smov %s1437_s13 }
 0x175   : > { %p10_p10 = scmp.ge.s32.totalorder %s13_s16, 6   ;;  %s1760_s13 = smov %s1506_s20 }
 0x176   : > { %s1761_s14 = smov %s1445_s15  ;;  %s1762_s15 = smov %s1764_s17 }
 0x177   :  { %12 = sbr.rel (!%p10_p10) target bundleno = 3 (0x3), region = 119 }

// kernel: feature_vectors_forward.74
= control target key start
LH: loop header
LB: loop body
LE: loop exit
PB: predicated region body
PF: predicated region fallthrough
CT: control target
= control target key end

     0   :  { %s1790_s1 = inlined_call_operand.vmem [shape: bf16[1,1024,256], index: 1, kind: input, shape index: {}]   ;;  %s1791_s0 = inlined_call_operand.vmem [shape: bf16[1,8,1024], index: 0, kind: input, shape index: {}]   ;;  %s1792_s2 = inlined_call_operand.vmem [shape: f32[1,256], index: 2, kind: input, shape index: {}]   ;;  %s1793_s3 = inlined_call_operand.vmem [shape: f32[8,256], index: 3, kind: output, shape index: {}]  }
   0x1   :  { %v1153_v0 = vld [vmem:[%s1790_s1 + $0x4] ss:$8 sps:$4 sm:$0xff]   ;;  %v1157_v2 = vld [vmem:[%s1790_s1] ss:$8 sps:$4 sm:$0xff]   ;;  %v1159_v4 = vld [vmem:[%s1790_s1 + $0x14] ss:$8 sps:$4 sm:$0xff]  }
   0x2   :  { %v1155_v1 = vld [vmem:[%s1790_s1 + $0x104] ss:$8 sps:$4 sm:$0xff]   ;;  %822 = vmatprep.subr.bf16.mxu0 %v1153_v0  ;;  %v1158_v3 = vld [vmem:[%s1790_s1 + $0x100] ss:$8 sps:$4 sm:$0xff]   ;;  %v1161_v5 = vld [vmem:[%s1790_s1 + $0x114] ss:$8 sps:$4 sm:$0xff]  }
   0x3   :  { %863 = vmatprep.subr.bf16.mxu1 %v1155_v1  ;;  %823 = vmatpush1.bf16.msra.mxu0 %v1157_v2  ;;  %v1163_v6 = vld [vmem:[%s1790_s1 + $0x10] ss:$8 sps:$4 sm:$0xff]   ;;  %v1165_v8 = vld [vmem:[%s1790_s1 + $0x24] ss:$8 sps:$4 sm:$0xff]   ;;  %v1169_v10 = vld [vmem:[%s1790_s1 + $0x20] ss:$8 sps:$4 sm:$0xff]  }
   0x4   :  { %864 = vmatpush1.bf16.msra.mxu1 %v1158_v3  ;;  %824 = vmatprep.subr.bf16.mxu0 %v1159_v4  ;;  %v1164_v7 = vld [vmem:[%s1790_s1 + $0x110] ss:$8 sps:$4 sm:$0xff]   ;;  %v1167_v9 = vld [vmem:[%s1790_s1 + $0x124] ss:$8 sps:$4 sm:$0xff]   ;;  %v1170_v11 = vld [vmem:[%s1790_s1 + $0x120] ss:$8 sps:$4 sm:$0xff]  }
   0x5   :  { %865 = vmatprep.subr.bf16.mxu1 %v1161_v5  ;;  %v1171_v12 = vld [vmem:[%s1790_s1 + $0x34] ss:$8 sps:$4 sm:$0xff]   ;;  %v1175_v14 = vld [vmem:[%s1790_s1 + $0x30] ss:$8 sps:$4 sm:$0xff]   ;;  %v1177_v16 = vld [vmem:[%s1790_s1 + $0x44] ss:$8 sps:$4 sm:$0xff]  }
   0x6   :  { %v1173_v13 = vld [vmem:[%s1790_s1 + $0x134] ss:$8 sps:$4 sm:$0xff]   ;;  %v1176_v15 = vld [vmem:[%s1790_s1 + $0x130] ss:$8 sps:$4 sm:$0xff]   ;;  %v1179_v17 = vld [vmem:[%s1790_s1 + $0x144] ss:$8 sps:$4 sm:$0xff]  }
   0x7   :  { %825 = vmatpush1.bf16.msra.mxu0 %v1163_v6  ;;  %v1181_v18 = vld [vmem:[%s1790_s1 + $0x40] ss:$8 sps:$4 sm:$0xff]   ;;  %v1183_v20 = vld [vmem:[%s1790_s1 + $0x54] ss:$8 sps:$4 sm:$0xff]   ;;  %v1187_v22 = vld [vmem:[%s1790_s1 + $0x50] ss:$8 sps:$4 sm:$0xff]  }
   0x8   :  { %866 = vmatpush1.bf16.msra.mxu1 %v1164_v7  ;;  %826 = vmatprep.subr.bf16.mxu0 %v1165_v8  ;;  %v1182_v19 = vld [vmem:[%s1790_s1 + $0x140] ss:$8 sps:$4 sm:$0xff]   ;;  %v1185_v21 = vld [vmem:[%s1790_s1 + $0x154] ss:$8 sps:$4 sm:$0xff]   ;;  %v1188_v23 = vld [vmem:[%s1790_s1 + $0x150] ss:$8 sps:$4 sm:$0xff]  }
   0x9   :  { %867 = vmatprep.subr.bf16.mxu1 %v1167_v9  ;;  %v1189_v24 = vld [vmem:[%s1790_s1 + $0x64] ss:$8 sps:$4 sm:$0xff]   ;;  %v1193_v26 = vld [vmem:[%s1790_s1 + $0x60] ss:$8 sps:$4 sm:$0xff]   ;;  %v1195_v28 = vld [vmem:[%s1790_s1 + $0x74] ss:$8 sps:$4 sm:$0xff]  }
   0xa   :  { %v1191_v25 = vld [vmem:[%s1790_s1 + $0x164] ss:$8 sps:$4 sm:$0xff]   ;;  %v1194_v27 = vld [vmem:[%s1790_s1 + $0x160] ss:$8 sps:$4 sm:$0xff]   ;;  %v1197_v29 = vld [vmem:[%s1790_s1 + $0x174] ss:$8 sps:$4 sm:$0xff]  }
   0xb   :  { %827 = vmatpush1.bf16.msra.mxu0 %v1169_v10  ;;  %v1199_v30 = vld [vmem:[%s1790_s1 + $0x70] ss:$8 sps:$4 sm:$0xff]   ;;  %v1201_v32 = vld [vmem:[%s1790_s1 + $0x84] ss:$8 sps:$4 sm:$0xff]   ;;  %v1205_v34 = vld [vmem:[%s1790_s1 + $0x80] ss:$8 sps:$4 sm:$0xff]  }
   0xc   :  { %868 = vmatpush1.bf16.msra.mxu1 %v1170_v11  ;;  %828 = vmatprep.subr.bf16.mxu0 %v1171_v12  ;;  %v1200_v31 = vld [vmem:[%s1790_s1 + $0x170] ss:$8 sps:$4 sm:$0xff]   ;;  %v1203_v33 = vld [vmem:[%s1790_s1 + $0x184] ss:$8 sps:$4 sm:$0xff]   ;;  %v1206_v35 = vld [vmem:[%s1790_s1 + $0x180] ss:$8 sps:$4 sm:$0xff]  }
   0xd   :  { %869 = vmatprep.subr.bf16.mxu1 %v1173_v13  ;;  %v1207_v36 = vld [vmem:[%s1790_s1 + $0x94] ss:$8 sps:$4 sm:$0xff]   ;;  %v1211_v38 = vld [vmem:[%s1790_s1 + $0x90] ss:$8 sps:$4 sm:$0xff]   ;;  %v1213_v40 = vld [vmem:[%s1790_s1 + $0xa4] ss:$8 sps:$4 sm:$0xff]  }
   0xe   :  { %v1209_v37 = vld [vmem:[%s1790_s1 + $0x194] ss:$8 sps:$4 sm:$0xff]   ;;  %v1212_v39 = vld [vmem:[%s1790_s1 + $0x190] ss:$8 sps:$4 sm:$0xff]   ;;  %v1215_v41 = vld [vmem:[%s1790_s1 + $0x1a4] ss:$8 sps:$4 sm:$0xff]  }
   0xf   :  { %829 = vmatpush1.bf16.msra.mxu0 %v1175_v14  ;;  %v1217_v42 = vld [vmem:[%s1790_s1 + $0xa0] ss:$8 sps:$4 sm:$0xff]   ;;  %v1219_v44 = vld [vmem:[%s1790_s1 + $0xb4] ss:$8 sps:$4 sm:$0xff]   ;;  %v1223_v49 = vld [vmem:[%s1790_s1 + $0xb0] ss:$8 sps:$4 sm:$0xff]  }
  0x10   :  { %870 = vmatpush1.bf16.msra.mxu1 %v1176_v15  ;;  %830 = vmatprep.subr.bf16.mxu0 %v1177_v16  ;;  %v1218_v43 = vld [vmem:[%s1790_s1 + $0x1a0] ss:$8 sps:$4 sm:$0xff]   ;;  %v1221_v45 = vld [vmem:[%s1790_s1 + $0x1b4] ss:$8 sps:$4 sm:$0xff]   ;;  %v1224_v50 = vld [vmem:[%s1790_s1 + $0x1b0] ss:$8 sps:$4 sm:$0xff]  }
  0x11   :  { %871 = vmatprep.subr.bf16.mxu1 %v1179_v17  ;;  %v22_v46 = vld [vmem:[%s1791_s0] sm:$0xff]  ;;  %v23_v48 = vld [vmem:[%s1791_s0 + $0x8] sm:$0xff]  ;;  %v1231_v56 = vld [vmem:[%s1790_s1 + $0xd4] ss:$8 sps:$4 sm:$0xff]  }
  0x12   :  { %v1018_v47 = vcombine.high %v22_v46, %v22_v46  ;;  %v1020_v51 = vcombine.high %v23_v48, %v23_v48  ;;  %v1225_v52 = vld [vmem:[%s1790_s1 + $0xc4] ss:$8 sps:$4 sm:$0xff]   ;;  %v1229_v54 = vld [vmem:[%s1790_s1 + $0xc0] ss:$8 sps:$4 sm:$0xff]   ;;  %v1233_v57 = vld [vmem:[%s1790_s1 + $0x1d4] ss:$8 sps:$4 sm:$0xff]   ;;  %v1017_v6 = vcombine.low %v22_v46, %v22_v46  ;;  %v1019_v7 = vcombine.low %v23_v48, %v23_v48 }
  0x13   :  { %831 = vmatpush1.bf16.msra.mxu0 %v1181_v18  ;;  %v1227_v53 = vld [vmem:[%s1790_s1 + $0x1c4] ss:$8 sps:$4 sm:$0xff]   ;;  %v1230_v55 = vld [vmem:[%s1790_s1 + $0x1c0] ss:$8 sps:$4 sm:$0xff]   ;;  %v1235_v58 = vld [vmem:[%s1790_s1 + $0xd0] ss:$8 sps:$4 sm:$0xff]  }
  0x14   :  { %872 = vmatpush1.bf16.msra.mxu1 %v1182_v19  ;;  %832 = vmatprep.subr.bf16.mxu0 %v1183_v20  ;;  %v1236_v59 = vld [vmem:[%s1790_s1 + $0x1d0] ss:$8 sps:$4 sm:$0xff]   ;;  %v1237_v60 = vld [vmem:[%s1790_s1 + $0xe4] ss:$8 sps:$4 sm:$0xff]   ;;  %v1241_v62 = vld [vmem:[%s1790_s1 + $0xe0] ss:$8 sps:$4 sm:$0xff]  }
  0x15   :  { %873 = vmatprep.subr.bf16.mxu1 %v1185_v21  ;;  %854 = vmatprep.mubr.bf16.mxu0 %v1018_v47  ;;  %v1239_v61 = vld [vmem:[%s1790_s1 + $0x1e4] ss:$8 sps:$4 sm:$0xff]   ;;  %v1242_v63 = vld [vmem:[%s1790_s1 + $0x1e0] ss:$8 sps:$4 sm:$0xff]   ;;  %v1243_v0 = vld [vmem:[%s1790_s1 + $0xf4] ss:$8 sps:$4 sm:$0xff]  }
  0x16   :  { %895 = vmatprep.mubr.bf16.mxu1 %v1020_v51  ;;  %v1245_v1 = vld [vmem:[%s1790_s1 + $0x1f4] ss:$8 sps:$4 sm:$0xff]   ;;  %v1247_v2 = vld [vmem:[%s1790_s1 + $0xf0] ss:$8 sps:$4 sm:$0xff]   ;;  %v1255_v4 = vld [vmem:[%s1790_s1 + $0x204] ss:$8 sps:$4 sm:$0xff]  }
  0x17   :  { %833 = vmatpush1.bf16.msra.mxu0 %v1187_v22  ;;  %v1248_v3 = vld [vmem:[%s1790_s1 + $0x1f0] ss:$8 sps:$4 sm:$0xff]   ;;  %v1258_v5 = vld [vmem:[%s1790_s1 + $0x304] ss:$8 sps:$4 sm:$0xff]   ;;  %v1253_v8 = vld [vmem:[%s1790_s1 + $0x200] ss:$8 sps:$4 sm:$0xff]  }
  0x18   :  { %874 = vmatpush1.bf16.msra.mxu1 %v1188_v23  ;;  %834 = vmatprep.subr.bf16.mxu0 %v1189_v24  ;;  %v1256_v9 = vld [vmem:[%s1790_s1 + $0x300] ss:$8 sps:$4 sm:$0xff]   ;;  %v1261_v10 = vld [vmem:[%s1790_s1 + $0x214] ss:$8 sps:$4 sm:$0xff]   ;;  %v1259_v12 = vld [vmem:[%s1790_s1 + $0x210] ss:$8 sps:$4 sm:$0xff]  }
  0x19   :  { %875 = vmatprep.subr.bf16.mxu1 %v1191_v25  ;;  %v1264_v11 = vld [vmem:[%s1790_s1 + $0x314] ss:$8 sps:$4 sm:$0xff]   ;;  %v1262_v13 = vld [vmem:[%s1790_s1 + $0x310] ss:$8 sps:$4 sm:$0xff]   ;;  %v1267_v14 = vld [vmem:[%s1790_s1 + $0x224] ss:$8 sps:$4 sm:$0xff]  }
  0x1a   :  { %v1270_v15 = vld [vmem:[%s1790_s1 + $0x324] ss:$8 sps:$4 sm:$0xff]   ;;  %v1265_v16 = vld [vmem:[%s1790_s1 + $0x220] ss:$8 sps:$4 sm:$0xff]   ;;  %v1273_v18 = vld [vmem:[%s1790_s1 + $0x234] ss:$8 sps:$4 sm:$0xff]  }
  0x1b   :  { %835 = vmatpush1.bf16.msra.mxu0 %v1193_v26  ;;  %v1268_v17 = vld [vmem:[%s1790_s1 + $0x320] ss:$8 sps:$4 sm:$0xff]   ;;  %v1276_v19 = vld [vmem:[%s1790_s1 + $0x334] ss:$8 sps:$4 sm:$0xff]   ;;  %v1271_v20 = vld [vmem:[%s1790_s1 + $0x230] ss:$8 sps:$4 sm:$0xff]  }
  0x1c   :  { %876 = vmatpush1.bf16.msra.mxu1 %v1194_v27  ;;  %836 = vmatprep.subr.bf16.mxu0 %v1195_v28  ;;  %v1274_v21 = vld [vmem:[%s1790_s1 + $0x330] ss:$8 sps:$4 sm:$0xff]   ;;  %v1279_v22 = vld [vmem:[%s1790_s1 + $0x244] ss:$8 sps:$4 sm:$0xff]   ;;  %v1277_v24 = vld [vmem:[%s1790_s1 + $0x240] ss:$8 sps:$4 sm:$0xff]  }
  0x1d   :  { %877 = vmatprep.subr.bf16.mxu1 %v1197_v29  ;;  %v1282_v23 = vld [vmem:[%s1790_s1 + $0x344] ss:$8 sps:$4 sm:$0xff]   ;;  %v1280_v25 = vld [vmem:[%s1790_s1 + $0x340] ss:$8 sps:$4 sm:$0xff]   ;;  %v1285_v26 = vld [vmem:[%s1790_s1 + $0x254] ss:$8 sps:$4 sm:$0xff]  }
  0x1e   :  { %v1288_v27 = vld [vmem:[%s1790_s1 + $0x354] ss:$8 sps:$4 sm:$0xff]   ;;  %v1283_v28 = vld [vmem:[%s1790_s1 + $0x250] ss:$8 sps:$4 sm:$0xff]   ;;  %v1318_v51 = vld [vmem:[%s1790_s1 + $0x3a4] ss:$8 sps:$4 sm:$0xff]  }
  0x1f   :  { %837 = vmatpush1.bf16.msra.mxu0 %v1199_v30  ;;  %v1286_v29 = vld [vmem:[%s1790_s1 + $0x350] ss:$8 sps:$4 sm:$0xff]   ;;  %v1291_v30 = vld [vmem:[%s1790_s1 + $0x264] ss:$8 sps:$4 sm:$0xff]   ;;  %v1309_v46 = vld [vmem:[%s1790_s1 + $0x294] ss:$8 sps:$4 sm:$0xff]  }
  0x20   :  { %878 = vmatpush1.bf16.msra.mxu1 %v1200_v31  ;;  %838 = vmatprep.subr.bf16.mxu0 %v1201_v32  ;;  %v1294_v31 = vld [vmem:[%s1790_s1 + $0x364] ss:$8 sps:$4 sm:$0xff]   ;;  %v1652_v32 = vld [vmem:[%s1791_s0 + $0x10] sm:$0xff] }
  0x21   :  { %879 = vmatprep.subr.bf16.mxu1 %v1203_v33  ;;  %v1657_v33 = vld [vmem:[%s1791_s0 + $0x18] sm:$0xff] }
  0x22   :  { %v1312_v47 = vld [vmem:[%s1790_s1 + $0x394] ss:$8 sps:$4 sm:$0xff]   ;;  %v1307_v48 = vld [vmem:[%s1790_s1 + $0x290] ss:$8 sps:$4 sm:$0xff]  }
  0x23   :  { %839 = vmatpush1.bf16.msra.mxu0 %v1205_v34  ;;  %v1022_v34 = vcombine.high %v1652_v32, %v1652_v32 }
  0x24   :  { %880 = vmatpush1.bf16.msra.mxu1 %v1206_v35  ;;  %840 = vmatprep.subr.bf16.mxu0 %v1207_v36  ;;  %v1024_v35 = vcombine.high %v1657_v33, %v1657_v33  ;;  %v1289_v36 = vld [vmem:[%s1790_s1 + $0x260] ss:$8 sps:$4 sm:$0xff]  }
  0x25   :  { %881 = vmatprep.subr.bf16.mxu1 %v1209_v37  ;;  %v1292_v37 = vld [vmem:[%s1790_s1 + $0x360] ss:$8 sps:$4 sm:$0xff]  }
  0x27   :  { %841 = vmatpush1.bf16.msra.mxu0 %v1211_v38  ;;  %v1297_v38 = vld [vmem:[%s1790_s1 + $0x274] ss:$8 sps:$4 sm:$0xff]  }
  0x28   :  { %882 = vmatpush1.bf16.msra.mxu1 %v1212_v39  ;;  %842 = vmatprep.subr.bf16.mxu0 %v1213_v40  ;;  %v1300_v39 = vld [vmem:[%s1790_s1 + $0x374] ss:$8 sps:$4 sm:$0xff]   ;;  %v1295_v40 = vld [vmem:[%s1790_s1 + $0x270] ss:$8 sps:$4 sm:$0xff]  }
  0x29   :  { %883 = vmatprep.subr.bf16.mxu1 %v1215_v41  ;;  %v1298_v41 = vld [vmem:[%s1790_s1 + $0x370] ss:$8 sps:$4 sm:$0xff]  }
  0x2b   :  { %843 = vmatpush1.bf16.msra.mxu0 %v1217_v42  ;;  %v1303_v42 = vld [vmem:[%s1790_s1 + $0x284] ss:$8 sps:$4 sm:$0xff]  }
  0x2c   :  { %884 = vmatpush1.bf16.msra.mxu1 %v1218_v43  ;;  %844 = vmatprep.subr.bf16.mxu0 %v1219_v44  ;;  %v1306_v43 = vld [vmem:[%s1790_s1 + $0x384] ss:$8 sps:$4 sm:$0xff]   ;;  %v1301_v44 = vld [vmem:[%s1790_s1 + $0x280] ss:$8 sps:$4 sm:$0xff]  }
  0x2d   :  { %885 = vmatprep.subr.bf16.mxu1 %v1221_v45  ;;  %v1304_v45 = vld [vmem:[%s1790_s1 + $0x380] ss:$8 sps:$4 sm:$0xff]  }
  0x2f   :  { %845 = vmatpush1.bf16.msra.mxu0 %v1223_v49  ;;  %v1310_v49 = vld [vmem:[%s1790_s1 + $0x390] ss:$8 sps:$4 sm:$0xff]  }
  0x30   :  { %886 = vmatpush1.bf16.msra.mxu1 %v1224_v50  ;;  %846 = vmatprep.subr.bf16.mxu0 %v1225_v52  ;;  %v1315_v50 = vld [vmem:[%s1790_s1 + $0x2a4] ss:$8 sps:$4 sm:$0xff]   ;;  %v1313_v52 = vld [vmem:[%s1790_s1 + $0x2a0] ss:$8 sps:$4 sm:$0xff]  }
  0x31   :  { %887 = vmatprep.subr.bf16.mxu1 %v1227_v53  ;;  %v1316_v53 = vld [vmem:[%s1790_s1 + $0x3a0] ss:$8 sps:$4 sm:$0xff]  }
  0x33   :  { %847 = vmatpush1.bf16.msra.mxu0 %v1229_v54  ;;  %v1321_v54 = vld [vmem:[%s1790_s1 + $0x2b4] ss:$8 sps:$4 sm:$0xff]  }
  0x34   :  { %888 = vmatpush1.bf16.msra.mxu1 %v1230_v55  ;;  %848 = vmatprep.subr.bf16.mxu0 %v1231_v56  ;;  %v1324_v55 = vld [vmem:[%s1790_s1 + $0x3b4] ss:$8 sps:$4 sm:$0xff]   ;;  %v1319_v56 = vld [vmem:[%s1790_s1 + $0x2b0] ss:$8 sps:$4 sm:$0xff]  }
  0x35   :  { %889 = vmatprep.subr.bf16.mxu1 %v1233_v57  ;;  %v1322_v57 = vld [vmem:[%s1790_s1 + $0x3b0] ss:$8 sps:$4 sm:$0xff]  }
  0x37   :  { %849 = vmatpush1.bf16.msra.mxu0 %v1235_v58  ;;  %v1327_v58 = vld [vmem:[%s1790_s1 + $0x2c4] ss:$8 sps:$4 sm:$0xff]  }
  0x38   :  { %890 = vmatpush1.bf16.msra.mxu1 %v1236_v59  ;;  %850 = vmatprep.subr.bf16.mxu0 %v1237_v60  ;;  %v1330_v59 = vld [vmem:[%s1790_s1 + $0x3c4] ss:$8 sps:$4 sm:$0xff]   ;;  %v1325_v60 = vld [vmem:[%s1790_s1 + $0x2c0] ss:$8 sps:$4 sm:$0xff]  }
  0x39   :  { %891 = vmatprep.subr.bf16.mxu1 %v1239_v61  ;;  %v1328_v61 = vld [vmem:[%s1790_s1 + $0x3c0] ss:$8 sps:$4 sm:$0xff]  }
  0x3b   :  { %851 = vmatpush1.bf16.msra.mxu0 %v1241_v62  ;;  %v1333_v62 = vld [vmem:[%s1790_s1 + $0x2d4] ss:$8 sps:$4 sm:$0xff]  }
  0x3c   :  { %892 = vmatpush1.bf16.msra.mxu1 %v1242_v63  ;;  %852 = vmatprep.subr.bf16.mxu0 %v1243_v0  ;;  %v1336_v63 = vld [vmem:[%s1790_s1 + $0x3d4] ss:$8 sps:$4 sm:$0xff]   ;;  %v1331_v0 = vld [vmem:[%s1790_s1 + $0x2d0] ss:$8 sps:$4 sm:$0xff]  }
  0x3d   :  { %893 = vmatprep.subr.bf16.mxu1 %v1245_v1  ;;  %v1334_v1 = vld [vmem:[%s1790_s1 + $0x3d0] ss:$8 sps:$4 sm:$0xff]  }
  0x3f   :  { %853 = vmatpush1.bf16.msra.mxu0 %v1247_v2  ;;  %v1339_v2 = vld [vmem:[%s1790_s1 + $0x2e4] ss:$8 sps:$4 sm:$0xff]  }
  0x40   :  { %894 = vmatpush1.bf16.msra.mxu1 %v1248_v3  ;;  %904 = vmatprep.subr.bf16.mxu0 %v1255_v4  ;;  %v1342_v3 = vld [vmem:[%s1790_s1 + $0x3e4] ss:$8 sps:$4 sm:$0xff]   ;;  %v1337_v4 = vld [vmem:[%s1790_s1 + $0x2e0] ss:$8 sps:$4 sm:$0xff]  }
  0x41   :  { %945 = vmatprep.subr.bf16.mxu1 %v1258_v5  ;;  %v1340_v5 = vld [vmem:[%s1790_s1 + $0x3e0] ss:$8 sps:$4 sm:$0xff]  }
  0x42   :  { %855 = vmatmul.mubr.bf16.vlgmr.msra.gmra.mrb[0].mxu0 %v1017_v6  ;;  %v1345_v6 = vld [vmem:[%s1790_s1 + $0x2f4] ss:$8 sps:$4 sm:$0xff]  }
  0x43   :  { %896 = vmatmul.mubr.bf16.vlgmr.msra.gmra.mrb[0].mxu1 %v1019_v7  ;;  %905 = vmatpush1.bf16.msra.mxu0 %v1253_v8  ;;  %v1348_v7 = vld [vmem:[%s1790_s1 + $0x3f4] ss:$8 sps:$4 sm:$0xff]   ;;  %v1343_v8 = vld [vmem:[%s1790_s1 + $0x2f0] ss:$8 sps:$4 sm:$0xff]  }
  0x44   :  { %946 = vmatpush1.bf16.msra.mxu1 %v1256_v9  ;;  %906 = vmatprep.subr.bf16.mxu0 %v1261_v10  ;;  %v1346_v9 = vld [vmem:[%s1790_s1 + $0x3f0] ss:$8 sps:$4 sm:$0xff]   ;;  %v1021_v10 = vcombine.low %v1652_v32, %v1652_v32 }
  0x45   :  { %947 = vmatprep.subr.bf16.mxu1 %v1264_v11  ;;  %936 = vmatprep.mubr.bf16.mxu0 %v1022_v34  ;;  %v1023_v11 = vcombine.low %v1657_v33, %v1657_v33 }
  0x46   :  { %977 = vmatprep.mubr.bf16.mxu1 %v1024_v35 }
  0x47   :  { %907 = vmatpush1.bf16.msra.mxu0 %v1259_v12 }
  0x48   :  { %948 = vmatpush1.bf16.msra.mxu1 %v1262_v13  ;;  %908 = vmatprep.subr.bf16.mxu0 %v1267_v14 }
  0x49   :  { %949 = vmatprep.subr.bf16.mxu1 %v1270_v15 }
  0x4b   :  { %909 = vmatpush1.bf16.msra.mxu0 %v1265_v16 }
  0x4c   :  { %950 = vmatpush1.bf16.msra.mxu1 %v1268_v17  ;;  %910 = vmatprep.subr.bf16.mxu0 %v1273_v18 }
  0x4d   :  { %951 = vmatprep.subr.bf16.mxu1 %v1276_v19 }
  0x4f   :  { %911 = vmatpush1.bf16.msra.mxu0 %v1271_v20 }
  0x50   :  { %952 = vmatpush1.bf16.msra.mxu1 %v1274_v21  ;;  %912 = vmatprep.subr.bf16.mxu0 %v1279_v22  ;;  %v997_v22 = vlaneseq }
  0x51   :  { %953 = vmatprep.subr.bf16.mxu1 %v1282_v23 }
  0x52   :  { %v998_v23 = vshrl.u32 %v997_v22, 7 }
  0x53   :  { %913 = vmatpush1.bf16.msra.mxu0 %v1277_v24 }
  0x54   :  { %954 = vmatpush1.bf16.msra.mxu1 %v1280_v25  ;;  %914 = vmatprep.subr.bf16.mxu0 %v1285_v26  ;;  %v999_v24 = vsub.s32 0, %v998_v23  ;;  %v995_v25 = vld [vmem:[%s1792_s2] sm:$0x3]  ;;  %v1003_v26 = vsub.s32 1, %v998_v23 }
  0x55   :  { %955 = vmatprep.subr.bf16.mxu1 %v1288_v27 }
  0x56   :  { %v1004_v34 = vrot.slane %v995_v25, %v1003_v26 }
  0x57   :  { %915 = vmatpush1.bf16.msra.mxu0 %v1283_v28 }
  0x58   :  { %956 = vmatpush1.bf16.msra.mxu1 %v1286_v29  ;;  %916 = vmatprep.subr.bf16.mxu0 %v1291_v30  ;;  %v1000_v30 = vrot.slane %v995_v25, %v999_v24 }
  0x59   :  { %957 = vmatprep.subr.bf16.mxu1 %v1294_v31 }
  0x5b   :  { %917 = vmatpush1.bf16.msra.mxu0 %v1289_v36 }
  0x5c   :  { %958 = vmatpush1.bf16.msra.mxu1 %v1292_v37  ;;  %918 = vmatprep.subr.bf16.mxu0 %v1297_v38 }
  0x5d   :  { %959 = vmatprep.subr.bf16.mxu1 %v1300_v39 }
  0x5f   :  { %919 = vmatpush1.bf16.msra.mxu0 %v1295_v40 }
  0x60   :  { %960 = vmatpush1.bf16.msra.mxu1 %v1298_v41  ;;  %920 = vmatprep.subr.bf16.mxu0 %v1303_v42 }
  0x61   :  { %961 = vmatprep.subr.bf16.mxu1 %v1306_v43 }
  0x63   :  { %921 = vmatpush1.bf16.msra.mxu0 %v1301_v44 }
  0x64   :  { %962 = vmatpush1.bf16.msra.mxu1 %v1304_v45  ;;  %922 = vmatprep.subr.bf16.mxu0 %v1309_v46 }
  0x65   :  { %963 = vmatprep.subr.bf16.mxu1 %v1312_v47 }
  0x67   :  { %923 = vmatpush1.bf16.msra.mxu0 %v1307_v48 }
  0x68   :  { %964 = vmatpush1.bf16.msra.mxu1 %v1310_v49  ;;  %924 = vmatprep.subr.bf16.mxu0 %v1315_v50 }
  0x69   :  { %965 = vmatprep.subr.bf16.mxu1 %v1318_v51 }
  0x6b   :  { %925 = vmatpush1.bf16.msra.mxu0 %v1313_v52 }
  0x6c   :  { %966 = vmatpush1.bf16.msra.mxu1 %v1316_v53  ;;  %926 = vmatprep.subr.bf16.mxu0 %v1321_v54 }
  0x6d   :  { %967 = vmatprep.subr.bf16.mxu1 %v1324_v55 }
  0x6f   :  { %927 = vmatpush1.bf16.msra.mxu0 %v1319_v56 }
  0x70   :  { %968 = vmatpush1.bf16.msra.mxu1 %v1322_v57  ;;  %928 = vmatprep.subr.bf16.mxu0 %v1327_v58 }
  0x71   :  { %969 = vmatprep.subr.bf16.mxu1 %v1330_v59 }
  0x73   :  { %929 = vmatpush1.bf16.msra.mxu0 %v1325_v60 }
  0x74   :  { %970 = vmatpush1.bf16.msra.mxu1 %v1328_v61  ;;  %930 = vmatprep.subr.bf16.mxu0 %v1333_v62 }
  0x75   :  { %971 = vmatprep.subr.bf16.mxu1 %v1336_v63 }
  0x77   :  { %931 = vmatpush1.bf16.msra.mxu0 %v1331_v0 }
  0x78   :  { %972 = vmatpush1.bf16.msra.mxu1 %v1334_v1  ;;  %932 = vmatprep.subr.bf16.mxu0 %v1339_v2 }
  0x79   :  { %973 = vmatprep.subr.bf16.mxu1 %v1342_v3 }
  0x7b   :  { %933 = vmatpush1.bf16.msra.mxu0 %v1337_v4 }
  0x7c   :  { %974 = vmatpush1.bf16.msra.mxu1 %v1340_v5  ;;  %934 = vmatprep.subr.bf16.mxu0 %v1345_v6 }
  0x7d   :  { %975 = vmatprep.subr.bf16.mxu1 %v1348_v7 }
  0x7f   :  { %935 = vmatpush1.bf16.msra.mxu0 %v1343_v8 }
  0x80   :  { %976 = vmatpush1.bf16.msra.mxu1 %v1346_v9 }
  0x82   :  { %937 = vmatmul.mubr.bf16.vlgmr.msra.gmra.mrb[4].mxu0 %v1021_v10 }
  0x83   :  { %978 = vmatmul.mubr.bf16.vlgmr.msra.gmra.mrb[4].mxu1 %v1023_v11 }
 0x115   :  { %v856_v12 = vpop.f32.mrb[0].mxu0 }
 0x116   :  { %v897_v13 = vpop.f32.mrb[0].mxu1  ;;  %v858_v15 = vpop.f32.mrb[1].mxu0 }
 0x117   :  { %v898_v14 = vadd.f32 %v897_v13, %v856_v12  ;;  %v899_v16 = vpop.f32.mrb[1].mxu1  ;;  %v860_v18 = vpop.f32.mrb[2].mxu0 }
 0x118   :  { %v900_v17 = vadd.f32 %v899_v16, %v858_v15  ;;  %v901_v19 = vpop.f32.mrb[2].mxu1  ;;  %v861_v20 = vpop.f32.mrb[3].mxu0 }
 0x119   :  { %v902_v21 = vpop.f32.mrb[3].mxu1 }
 0x155   :  { %v938_v27 = vpop.f32.mrb[4].mxu0 }
 0x156   :  { %v979_v28 = vpop.f32.mrb[4].mxu1  ;;  %v939_v29 = vadd.f32 %v938_v27, %v898_v14  ;;  %v940_v31 = vpop.f32.mrb[5].mxu0 }
 0x157   :  { %v981_v32 = vpop.f32.mrb[5].mxu1  ;;  %v941_v33 = vadd.f32 %v940_v31, %v900_v17  ;;  %v942_v35 = vpop.f32.mrb[6].mxu0 }
 0x158   :  { %v983_v36 = vpop.f32.mrb[6].mxu1  ;;  %v980_v37 = vadd.f32 %v979_v28, %v939_v29  ;;  %v943_v38 = vpop.f32.mrb[7].mxu0 }
 0x159   :  { %v984_v39 = vpop.f32.mrb[7].mxu1  ;;  %v982_v40 = vadd.f32 %v981_v32, %v941_v33 }
 0x15a   :  { %v1007_v41 = vadd.f32 %v1000_v30, %v980_v37 }
 0x15b   :  { %v1008_v42 = vadd.f32 %v1004_v34, %v982_v40 }
 0x15c   :  { %v1009_v43 = vmax.f32 %v1007_v41, 0.0 }
 0x15d   :  { %v1010_v44 = vmax.f32 %v1008_v42, 0.0 }
 0x15e   :  { %1011 = vst [vmem:[%s1793_s3] sm:$0xff] %v1009_v43 }
 0x15f   :  { %1012 = vst [vmem:[%s1793_s3 + $0x8] sm:$0xff] %v1010_v44 }

// kernel: feature_vectors_forward.89
= control target key start
LH: loop header
LB: loop body
LE: loop exit
PB: predicated region body
PF: predicated region fallthrough
CT: control target
= control target key end

     0   :  { %vm41_vm0 = vcmask 1043456   ;;  %v192_v3 = vlaneseq  ;;  %s410_s0 = inlined_call_operand.vmem [shape: f32[2,4,1024], index: 0, kind: input, shape index: {}]   ;;  %s411_s1 = inlined_call_operand.hbm [shape: f32[2,1024], index: 1, kind: output, shape index: {}]  }
   0x1   :  { %v9_v0 = vld [vmem:[%s410_s0] sm:$0xff]  ;;  %v10_v1 = vld [vmem:[%s410_s0 + $0x8] sm:$0xff] }
   0x2   :  { %v13_v2 = vld [vmem:[%s410_s0 + $0x20] sm:$0xff]  ;;  %v14_v4 = vld [vmem:[%s410_s0 + $0x28] sm:$0xff]  ;;  %v25_v5 = vcombine.high %v9_v0, %v9_v0  ;;  %v26_v6 = vcombine.high %v10_v1, %v10_v1  ;;  %v42_v8 = vsel %vm41_vm0, %v9_v0, 0.0  ;;  %v56_v11 = vsel %vm41_vm0, %v10_v1, 0.0 }
   0x3   :  { %v29_v7 = vcombine.high %v13_v2, %v13_v2  ;;  %v30_v9 = vcombine.high %v14_v4, %v14_v4  ;;  %v43_v10 = vrot.slane %v42_v8, 4  ;;  %v98_v12 = vsel %vm41_vm0, %v13_v2, 0.0 }
   0x4   :  { %v49_v13 = vsel %vm41_vm0, %v25_v5, 0.0  ;;  %v57_v14 = vrot.slane %v56_v11, 4  ;;  %v63_v15 = vsel %vm41_vm0, %v26_v6, 0.0  ;;  %v99_v16 = vrot.slane %v98_v12, 4 }
   0x5   :  { %6 = vsyncpa [#allocation3], 0  ;;  %v44_v17 = vadd.f32 %v43_v10, %v42_v8  ;;  %v50_v18 = vrot.slane %v49_v13, 4  ;;  %v64_v19 = vrot.slane %v63_v15, 4  ;;  %v105_v20 = vsel %vm41_vm0, %v29_v7, 0.0  ;;  %v11_v10 = vld [vmem:[%s410_s0 + $0x10] sm:$0xff] }
   0x6   :  { %v58_v21 = vadd.f32 %v57_v14, %v56_v11  ;;  %v100_v22 = vadd.f32 %v99_v16, %v98_v12  ;;  %v106_v23 = vrot.slane %v105_v20, 4  ;;  %v112_v24 = vsel %vm41_vm0, %v14_v4, 0.0  ;;  %v12_v11 = vld [vmem:[%s410_s0 + $0x18] sm:$0xff] }
   0x7   :  { %v45_v25 = vrot.slane %v44_v17, 2  ;;  %v51_v26 = vadd.f32 %v50_v18, %v49_v13  ;;  %v65_v27 = vadd.f32 %v64_v19, %v63_v15  ;;  %v113_v28 = vrot.slane %v112_v24, 4  ;;  %v15_v15 = vld [vmem:[%s410_s0 + $0x30] sm:$0xff] }
   0x8   :  { %v59_v29 = vrot.slane %v58_v21, 2  ;;  %v101_v30 = vrot.slane %v100_v22, 2  ;;  %v107_v31 = vadd.f32 %v106_v23, %v105_v20  ;;  %v119_v32 = vsel %vm41_vm0, %v30_v9, 0.0 }
   0x9   :  { %v46_v33 = vadd.f32 %v45_v25, %v44_v17  ;;  %v52_v34 = vrot.slane %v51_v26, 2  ;;  %v66_v35 = vrot.slane %v65_v27, 2  ;;  %v114_v36 = vadd.f32 %v113_v28, %v112_v24 }
   0xa   :  { %v60_v37 = vadd.f32 %v59_v29, %v58_v21  ;;  %v102_v38 = vadd.f32 %v101_v30, %v100_v22  ;;  %v108_v39 = vrot.slane %v107_v31, 2  ;;  %v120_v40 = vrot.slane %v119_v32, 4 }
   0xb   :  { %v47_v41 = vrot.slane %v46_v33, 1  ;;  %v53_v42 = vadd.f32 %v52_v34, %v51_v26  ;;  %v67_v43 = vadd.f32 %v66_v35, %v65_v27  ;;  %v115_v44 = vrot.slane %v114_v36, 2 }
   0xc   :  { %v61_v45 = vrot.slane %v60_v37, 1  ;;  %v103_v46 = vrot.slane %v102_v38, 1  ;;  %v109_v47 = vadd.f32 %v108_v39, %v107_v31  ;;  %v121_v48 = vadd.f32 %v120_v40, %v119_v32  ;;  %v16_v40 = vld [vmem:[%s410_s0 + $0x38] sm:$0xff]  ;;  %s328_s0 = smov [#allocation2]  }
   0xd   :  { %v48_v49 = vadd.f32 %v47_v41, %v46_v33  ;;  %v54_v50 = vrot.slane %v53_v42, 1  ;;  %v68_v51 = vrot.slane %v67_v43, 1  ;;  %v116_v52 = vadd.f32 %v115_v44, %v114_v36  ;;  %s285_s22 = sshll.u32 %s328_s0, 4  ;;  %s286_s22 = int_to_ptr.vmem [resolvable:$true] %s285_s22 }
   0xe   :  { %v62_v53 = vadd.f32 %v61_v45, %v60_v37  ;;  %v104_v54 = vadd.f32 %v103_v46, %v102_v38  ;;  %v110_v55 = vrot.slane %v109_v47, 1  ;;  %v122_v56 = vrot.slane %v121_v48, 2  ;;  %s303_s23 = scalar_lea.vmem %s286_s22, 256  ;;  %p308_p1 = scmp.lt.s32.totalorder %s286_s22, %s286_s22 }
   0xf   :  { %v55_v57 = vadd.f32 %v54_v50, %v53_v42  ;;  %v69_v58 = vadd.f32 %v68_v51, %v67_v43  ;;  %v117_v59 = vrot.slane %v116_v52, 1  ;;  %v155_v60 = vmul.f32 0.25, %v48_v49  ;;  %p304_p0 = scmp.ne.s32.totalorder %s286_s22, %s303_s23  ;;  %p309_p2 = scmp.lt.s32.totalorder %s303_s23, %s303_s23 }
  0x10   :  { %v111_v61 = vadd.f32 %v110_v55, %v109_v47  ;;  %v123_v62 = vadd.f32 %v122_v56, %v121_v48  ;;  %v157_v63 = vmul.f32 0.25, %v62_v53  ;;  %v163_v0 = vmul.f32 0.25, %v104_v54 }
  0x11   :  { %v118_v1 = vadd.f32 %v117_v59, %v116_v52  ;;  %v156_v2 = vmul.f32 0.25, %v55_v57  ;;  %v158_v4 = vmul.f32 0.25, %v69_v58  ;;  %v327_v5 = vmov 1983009808   ;;  %p310_p3 = por %p309_p2, %p308_p1 }
  0x12   :  { %v190_v6 = vunpack.c.l.s4 %v327_v5  ;;  %v124_v7 = vrot.slane %v123_v62, 1  ;;  %v164_v8 = vmul.f32 0.25, %v111_v61  ;;  %v193_v9 = vshrl.u32 %v192_v3, 7 }
  0x13   :  { %v187_v12 = vcombine.low %v155_v60, %v156_v2  ;;  %v188_v13 = vcombine.low %v157_v63, %v158_v4  ;;  %v165_v17 = vmul.f32 0.25, %v118_v1  ;;  %vm260_vm1 = vcmask 1041409   ;;  %p311_p4 = pnand %p310_p3, %p304_p0 }
  0x14   :  { %v191_v14 = vunpack.c.0.s8 %v190_v6  ;;  %v125_v16 = vadd.f32 %v124_v7, %v123_v62  ;;  %v221_v18 = vcombine.low %v163_v0, %v164_v8  ;;  %v27_v3 = vcombine.high %v11_v10, %v11_v10 }
  0x15   :  { %v28_v20 = vcombine.high %v12_v11, %v12_v11  ;;  %vm262_vm2 = vcmask 1043459   ;;  %v31_v22 = vcombine.high %v15_v15, %v15_v15  ;;  %v70_v23 = vsel %vm41_vm0, %v11_v10, 0.0 }
  0x16   :  { %v369_v19 = vsub.s32 %v191_v14, %v193_v9  ;;  %v166_v21 = vmul.f32 0.25, %v125_v16  ;;  %vm264_vm3 = vcmask 1045509   ;;  %v71_v27 = vrot.slane %v70_v23, 4 }
  0x17   :  { %vm266_vm4 = vcmask 1047559   ;;  %v77_v29 = vsel %vm41_vm0, %v27_v3, 0.0  ;;  %v84_v30 = vsel %vm41_vm0, %v12_v11, 0.0  ;;  %v91_v31 = vsel %vm41_vm0, %v28_v20, 0.0 }
  0x18   :  { %v195_v24 = vrot.slane %v187_v12, %v369_v19  ;;  %v202_v25 = vrot.slane %v188_v13, %v369_v19  ;;  %v229_v26 = vrot.slane %v221_v18, %v369_v19  ;;  %v222_v28 = vcombine.low %v165_v17, %v166_v21 }
  0x19   :  { %v72_v33 = vadd.f32 %v71_v27, %v70_v23  ;;  %v78_v34 = vrot.slane %v77_v29, 4  ;;  %v85_v35 = vrot.slane %v84_v30, 4  ;;  %v92_v37 = vrot.slane %v91_v31, 4 }
  0x1a   :  { %v203_v32 = vcombine.low %v195_v24, %v202_v25  ;;  %v236_v36 = vrot.slane %v222_v28, %v369_v19  ;;  %v126_v38 = vsel %vm41_vm0, %v15_v15, 0.0  ;;  %v133_v39 = vsel %vm41_vm0, %v31_v22, 0.0 }
  0x1b   :  { %v73_v41 = vrot.slane %v72_v33, 2  ;;  %v79_v42 = vadd.f32 %v78_v34, %v77_v29  ;;  %v86_v43 = vadd.f32 %v85_v35, %v84_v30  ;;  %v127_v44 = vrot.slane %v126_v38, 4 }
  0x1c   :  { %v237_v45 = vcombine.low %v229_v26, %v236_v36  ;;  %v93_v46 = vadd.f32 %v92_v37, %v91_v31  ;;  %v134_v47 = vrot.slane %v133_v39, 4  ;;  %v140_v48 = vsel %vm41_vm0, %v16_v40, 0.0 }
  0x1d   :  { %v74_v49 = vadd.f32 %v73_v41, %v72_v33  ;;  %v80_v50 = vrot.slane %v79_v42, 2  ;;  %v87_v51 = vrot.slane %v86_v43, 2  ;;  %v128_v52 = vadd.f32 %v127_v44, %v126_v38 }
  0x1e   :  { %v259_v53 = vrot.slane %v237_v45, 7  ;;  %v94_v54 = vrot.slane %v93_v46, 2  ;;  %v135_v55 = vadd.f32 %v134_v47, %v133_v39  ;;  %v141_v56 = vrot.slane %v140_v48, 4 }
  0x1f   :  { %v32_v57 = vcombine.high %v16_v40, %v16_v40  ;;  %v81_v58 = vadd.f32 %v80_v50, %v79_v42  ;;  %v88_v59 = vadd.f32 %v87_v51, %v86_v43  ;;  %v129_v60 = vrot.slane %v128_v52, 2 }
  0x20   :  { %v261_v61 = vsel %vm260_vm1, %v259_v53, %v203_v32  ;;  %v95_v62 = vadd.f32 %v94_v54, %v93_v46  ;;  %v136_v63 = vrot.slane %v135_v55, 2  ;;  %v142_v0 = vadd.f32 %v141_v56, %v140_v48 }
  0x21   :  { %v263_v1 = vsel %vm262_vm2, %v259_v53, %v261_v61  ;;  %v75_v2 = vrot.slane %v74_v49, 1  ;;  %v82_v4 = vrot.slane %v81_v58, 1  ;;  %v89_v5 = vrot.slane %v88_v59, 1 }
  0x22   :  { %v265_v6 = vsel %vm264_vm3, %v259_v53, %v263_v1  ;;  %v96_v7 = vrot.slane %v95_v62, 1  ;;  %v130_v8 = vadd.f32 %v129_v60, %v128_v52  ;;  %v137_v9 = vadd.f32 %v136_v63, %v135_v55 }
  0x23   :  { %v267_v10 = vsel %vm266_vm4, %v259_v53, %v265_v6  ;;  %v143_v11 = vrot.slane %v142_v0, 2  ;;  %v147_v14 = vsel %vm41_vm0, %v32_v57, 0.0  ;;  %v76_v17 = vadd.f32 %v75_v2, %v74_v49 }
  0x24   :  { %277 = vst [vmem:[#allocation2] sm:$0xff] %v267_v10  ;;  %v131_v12 = vrot.slane %v130_v8, 1  ;;  %v138_v13 = vrot.slane %v137_v9, 1  ;;  %v148_v16 = vrot.slane %v147_v14, 4  ;;  %v83_v18 = vadd.f32 %v82_v4, %v81_v58 }
  0x25   :  { %v144_v15 = vadd.f32 %v143_v11, %v142_v0  ;;  %v90_v3 = vadd.f32 %v89_v5, %v88_v59  ;;  %v97_v20 = vadd.f32 %v96_v7, %v95_v62  ;;  %v159_v26 = vmul.f32 0.25, %v76_v17 }
  0x26   :  { %v132_v21 = vadd.f32 %v131_v12, %v130_v8  ;;  %v139_v22 = vadd.f32 %v138_v13, %v137_v9  ;;  %v149_v24 = vadd.f32 %v148_v16, %v147_v14  ;;  %v160_v27 = vmul.f32 0.25, %v83_v18 }
  0x27   :  { %v145_v23 = vrot.slane %v144_v15, 1  ;;  %v161_v28 = vmul.f32 0.25, %v90_v3  ;;  %v162_v29 = vmul.f32 0.25, %v97_v20 }
  0x28   :  { %v150_v25 = vrot.slane %v149_v24, 2  ;;  %v167_v32 = vmul.f32 0.25, %v132_v21  ;;  %v168_v33 = vmul.f32 0.25, %v139_v22  ;;  %v204_v35 = vcombine.low %v159_v26, %v160_v27 }
  0x29   :  { %v146_v30 = vadd.f32 %v145_v23, %v144_v15  ;;  %v205_v38 = vcombine.low %v161_v28, %v162_v29 }
  0x2a   :  { %v151_v31 = vadd.f32 %v150_v25, %v149_v24  ;;  %v238_v39 = vcombine.low %v167_v32, %v168_v33  ;;  %v212_v41 = vrot.slane %v204_v35, %v369_v19 }
  0x2b   :  { %v169_v37 = vmul.f32 0.25, %v146_v30  ;;  %v219_v42 = vrot.slane %v205_v38, %v369_v19 }
  0x2c   :  { %v152_v34 = vrot.slane %v151_v31, 1  ;;  %v246_v44 = vrot.slane %v238_v39, %v369_v19 }
  0x2d   :  { %v220_v46 = vcombine.low %v212_v41, %v219_v42 }
  0x2e   :  { %v153_v36 = vadd.f32 %v152_v34, %v151_v31 }
  0x30   :  { %v170_v40 = vmul.f32 0.25, %v153_v36 }
  0x32   :  { %v239_v43 = vcombine.low %v169_v37, %v170_v40 }
  0x34   :  { %v253_v45 = vrot.slane %v239_v43, %v369_v19 }
  0x36   :  { %v254_v47 = vcombine.low %v246_v44, %v253_v45 }
  0x38   :  { %v270_v48 = vrot.slane %v254_v47, 7 }
  0x3a   :  { %v271_v49 = vsel %vm260_vm1, %v270_v48, %v220_v46 }
  0x3b   :  { %v272_v50 = vsel %vm262_vm2, %v270_v48, %v271_v49 }
  0x3c   :  { %v273_v51 = vsel %vm264_vm3, %v270_v48, %v272_v50 }
  0x3d   :  { %v274_v52 = vsel %vm266_vm4, %v270_v48, %v273_v51 }
  0x3e   :  { %278 = vst [vmem:[#allocation2 + $0x8] sm:$0xff] %v274_v52 }
  0x3f   :  { %314 = shalt.err (!%p311_p4)
}
  0x40   :  { %s315_s26 = scalar_lea.hbm %s411_s1, 256 }
  0x41   :  { %p316_p5 = scmp.ne.s32.totalorder %s411_s1, %s315_s26  ;;  %p319_p6 = scmp.lt.u32.totalorder %s315_s26, %s411_s1 }
  0x43   :  { %p321_p7 = pnand %p319_p6, %p316_p5 }
  0x45   :  { %324 = shalt.err (!%p321_p7)
}
  0x46   :  { %288 = dma.vmem_to_hbm [thread:$0]  %s286_s22, 256, %s411_s1, [#allocation3]  }
  0x47   :  { %325 = dma.done.wait [#allocation3], 256  }
  0x48   :  { %326 = vsyncadd [#allocation3], 4294967040 }
  0x49   :  { %292 = vsyncpa [#allocation3], 1 }

</bundles_post_ra>
